<compile_context>
chip_gen: v5e
topology: v5e:2x2
jax: 0.10.0
libtpu: 0.0.40
codegen_flags: <defaults>
</compile_context>

<pallas_src>
import functools
import numpy as np

import jax
import jax.numpy as jnp
from jax import lax
from jax.experimental import pallas as pl
from jax.experimental.pallas import tpu as pltpu

BN_EPS = 1e-5
CARDINALITY = 32   # BottleneckX.cardinality
EXPANSION = 2      # BottleneckX.expansion (unused in forward)


# ----------------------------------------------------------------------------
# Pallas kernel: one full BottleneckX block, B images per grid step.
# ----------------------------------------------------------------------------
def _bottleneckx_kernel(H, W, d,
                        x_ref, w1_ref, s1_ref, b1_ref,
                        w2_ref, s2_ref, b2_ref,
                        w3_ref, s3_ref, b3_ref,
                        out_ref, pad_ref, stage_ref):
    B, HW, Cin = x_ref.shape
    Cb = w1_ref.shape[1]
    Cp = w3_ref.shape[1]
    Hp, Wp = H + 2 * d, W + 2 * d

    xb = x_ref[...].reshape(B * HW, Cin)            # bf16, reused for residual

    # conv1 (1x1, no bias) + bn1 + relu  == one bf16 MXU matmul, f32 accumulate
    h1 = jnp.dot(xb, w1_ref[...], preferred_element_type=jnp.float32)
    h1 = jnp.maximum(h1 * s1_ref[...] + b1_ref[...], 0.0)

    # conv2: 3x3 grouped conv, stride=1, padding=dilation, dilation=d.
    # Write h1 into a zero-framed (B, Hp, Wp, Cb) scratch; no masks needed.
    # Only the frame is zeroed (the body is fully overwritten every step).
    # The frame is re-zeroed each step so results are correct even when the
    # grid is sharded across TensorCores (program_id==0 may not run on a core).
    zrow = jnp.zeros((B, d, Wp, Cb), pad_ref.dtype)
    pad_ref[:, 0:d, :, :] = zrow
    pad_ref[:, d + H:Hp, :, :] = zrow
    zcol = jnp.zeros((B, H, d, Cb), pad_ref.dtype)
    pad_ref[:, d:d + H, 0:d, :] = zcol
    pad_ref[:, d:d + H, d + W:Wp, :] = zcol
    pad_ref[:, d:d + H, d:d + W, :] = h1.astype(pad_ref.dtype).reshape(B, H, W, Cb)

    # Stack the 9 shifted taps along the contraction axis -> one big-K matmul
    # (K = 9*Cb) instead of nine tiny K=Cb matmuls.
    for ky in range(3):
        for kx in range(3):
            t = ky * 3 + kx
            tap = pad_ref[:, ky * d:ky * d + H, kx * d:kx * d + W, :]
            stage_ref[:, t * Cb:(t + 1) * Cb] = tap.reshape(B * HW, Cb)

    h2 = jnp.dot(stage_ref[...], w2_ref[...], preferred_element_type=jnp.float32)
    h2 = jnp.maximum(h2 * s2_ref[...] + b2_ref[...], 0.0)

    # conv3 (1x1) + bn3 + residual add + relu  (elementwise math stays f32)
    h3 = jnp.dot(h2.astype(jnp.bfloat16), w3_ref[...],
                 preferred_element_type=jnp.float32)
    h3 = h3 * s3_ref[...] + b3_ref[...]
    out = jnp.maximum(h3 + xb.astype(jnp.float32), 0.0)
    out_ref[...] = out.reshape(B, HW, Cp).astype(out_ref.dtype)


# ----------------------------------------------------------------------------
# Host-side glue
# ----------------------------------------------------------------------------
def _fold_bn(bn):
    gamma, beta, mean, var = bn
    scale = gamma / jnp.sqrt(var + BN_EPS)
    bias = beta - mean * scale
    return (scale.reshape(1, -1).astype(jnp.float32),
            bias.reshape(1, -1).astype(jnp.float32))


def _expand_grouped_weight(w2g, groups):
    # w2g: (Cout=Cb, Cin_per_group, 3, 3) -> (9*Cb_in, Cb_out) block diagonal,
    # rows ordered tap-major to match the staging buffer's column layout.
    w = np.asarray(w2g, np.float32)
    cout, gs, _, _ = w.shape
    full = np.zeros((9, cout, cout), np.float32)   # [tap, cin, cout]
    for co in range(cout):
        g = co // (cout // groups)
        for ci_local in range(gs):
            ci = g * gs + ci_local
            full[:, ci, co] = w[co, ci_local].reshape(9)
    return jnp.asarray(full.reshape(9 * cout, cout), dtype=jnp.bfloat16)


def _pick_batch_block(n, max_block=8):
    for b in range(min(n, max_block), 0, -1):
        if n % b == 0:
            return b
    return 1


def bottleneckx_forward(x_nchw, params, stride=1, dilation=1, batch_block=8):
    """Pallas implementation of BottleneckX.forward(x, residual=None)."""
    # TODO(synk): stride > 1 (spatial subsampling in conv2) and an external
    # `residual` argument (used by real DLA trees) are not implemented.
    assert stride == 1, "only stride=1 supported"
    N, Cin, H, W = x_nchw.shape
    Cb = params["w1"].shape[0]
    Cp = params["w3"].shape[0]
    assert Cin == Cp, "residual add requires inplanes == planes"
    HW = H * W
    d = dilation
    B = _pick_batch_block(N, batch_block)

    # Fold params into kernel-friendly layouts (bf16 matmul operands).
    w1_k = jnp.transpose(params["w1"][:, :, 0, 0]).astype(jnp.bfloat16)   # (Cin, Cb)
    w3_k = jnp.transpose(params["w3"][:, :, 0, 0]).astype(jnp.bfloat16)   # (Cb, Cp)
    w2_k = _expand_grouped_weight(params["w2g"], CARDINALITY)             # (9*Cb, Cb)
    s1, b1 = _fold_bn(params["bn1"])
    s2, b2 = _fold_bn(params["bn2"])
    s3, b3 = _fold_bn(params["bn3"])

    # NCHW -> (N, H*W, C), bf16 (halves activation DMA; residual upcast in-kernel)
    x_flat = jnp.transpose(x_nchw, (0, 2, 3, 1)).reshape(N, HW, Cin).astype(jnp.bfloat16)

    kernel = functools.partial(_bottleneckx_kernel, H, W, d)
    full = lambda shape: pl.BlockSpec(shape, lambda n: (0,) * len(shape))

    flops = 2 * N * HW * (Cin * Cb + 9 * Cb * Cb + Cb * Cp)
    bytes_accessed = int(
        x_flat.size * 2 + N * HW * Cp * 4 +
        (w1_k.size + w2_k.size + w3_k.size) * 2 +
        (s1.size + b1.size + s2.size + b2.size + s3.size + b3.size) * 4)

    out_flat = pl.pallas_call(
        kernel,
        out_shape=jax.ShapeDtypeStruct((N, HW, Cp), jnp.float32),
        grid_spec=pltpu.PrefetchScalarGridSpec(
            num_scalar_prefetch=0,
            grid=(N // B,),
            in_specs=[
                pl.BlockSpec((B, HW, Cin), lambda n: (n, 0, 0)),   # x
                full((Cin, Cb)),                                   # w1
                full((1, Cb)), full((1, Cb)),                      # s1, b1
                full((9 * Cb, Cb)),                                # w2 (expanded)
                full((1, Cb)), full((1, Cb)),                      # s2, b2
                full((Cb, Cp)),                                    # w3
                full((1, Cp)), full((1, Cp)),                      # s3, b3
            ],
            out_specs=pl.BlockSpec((B, HW, Cp), lambda n: (n, 0, 0)),
            scratch_shapes=[
                pltpu.VMEM((B, H + 2 * d, W + 2 * d, Cb), jnp.bfloat16),  # padded h1
                pltpu.VMEM((B * HW, 9 * Cb), jnp.bfloat16),               # stacked taps
            ]),
        compiler_params=pltpu.CompilerParams(
            dimension_semantics=("parallel",),
            vmem_limit_bytes=64 * 1024 * 1024),
        cost_estimate=pl.CostEstimate(flops=flops, transcendentals=0,
                                      bytes_accessed=bytes_accessed),
    )(x_flat, w1_k, s1, b1, w2_k, s2, b2, w3_k, s3, b3)

    # (N, H*W, Cp) -> NCHW
    return jnp.transpose(out_flat.reshape(N, H, W, Cp), (0, 3, 1, 2))


# ----------------------------------------------------------------------------
# Deterministic parameter init (shapes from BottleneckX.__init__)
# ----------------------------------------------------------------------------
def init_params(key, inplanes, planes):
    bottle = planes * CARDINALITY // 32
    gs = bottle // CARDINALITY
    ks = jax.random.split(key, 6)

    def bn_init(k, c):
        k1, k2, k3, k4 = jax.random.split(k, 4)
        gamma = 1.0 + 0.1 * jax.random.normal(k1, (c,), jnp.float32)
        beta = 0.1 * jax.random.normal(k2, (c,), jnp.float32)
        mean = 0.1 * jax.random.normal(k3, (c,), jnp.float32)
        var = jnp.abs(1.0 + 0.1 * jax.random.normal(k4, (c,), jnp.float32))
        return gamma, beta, mean, var

    return dict(
        w1=0.1 * jax.random.normal(ks[0], (bottle, inplanes, 1, 1), jnp.float32),
        w2g=0.1 * jax.random.normal(ks[1], (bottle, gs, 3, 3), jnp.float32),
        w3=0.1 * jax.random.normal(ks[2], (planes, bottle, 1, 1), jnp.float32),
        bn1=bn_init(ks[3], bottle),
        bn2=bn_init(ks[4], bottle),
        bn3=bn_init(ks[5], planes),
    )


# ----------------------------------------------------------------------------
# Pure-JAX reference (lax convolutions, f32) for correctness check
# ----------------------------------------------------------------------------
def ref_forward(x, p, dilation=1):
    def bn(y, bnp):
        gamma, beta, mean, var = bnp
        s = gamma / jnp.sqrt(var + BN_EPS)
        return y * s[None, :, None, None] + (beta - mean * s)[None, :, None, None]

    dn = ("NCHW", "OIHW", "NCHW")
    d = dilation
    o = lax.conv_general_dilated(x, p["w1"], (1, 1), "VALID", dimension_numbers=dn)
    o = jax.nn.relu(bn(o, p["bn1"]))
    o = lax.conv_general_dilated(o, p["w2g"], (1, 1), ((d, d), (d, d)),
                                 rhs_dilation=(d, d), dimension_numbers=dn,
                                 feature_group_count=CARDINALITY)
    o = jax.nn.relu(bn(o, p["bn2"]))
    o = lax.conv_general_dilated(o, p["w3"], (1, 1), "VALID", dimension_numbers=dn)
    o = bn(o, p["bn3"])
    return jax.nn.relu(o + x)


if __name__ == "__main__":
    # Grouped conv (groups=32) needs bottle_planes % 32 == 0, and the residual
    # add needs inplanes == planes, so use 32 channels.
    N, C, H, W = 2, 32, 16, 16
    inplanes = planes = C
    stride, dilation = 1, 1

    key = jax.random.PRNGKey(0)
    kx, kp = jax.random.split(key)
    x = jax.random.normal(kx, (N, C, H, W), jnp.float32)
    params = init_params(kp, inplanes, planes)

    out = bottleneckx_forward(x, params, stride=stride, dilation=dilation)
    out = jax.block_until_ready(out)

    expected = jax.block_until_ready(ref_forward(x, params, dilation=dilation))
    # bf16 matmul operands (incl. bf16 x feeding the residual) vs. f32 reference.
    np.testing.assert_allclose(np.asarray(out), np.asarray(expected),
                               rtol=2e-2, atol=2e-2)
    print("KERNEL_OK")
</pallas_src>

<mosaic_0001>
module attributes {stable_mosaic.version = 11 : i64} {
  func.func @_bottleneckx_kernel(%arg0: i32, %arg1: memref<2x256x32xbf16, #tpu.memory_space<vmem>>, %arg2: memref<32x32xbf16, #tpu.memory_space<vmem>>, %arg3: memref<1x32xf32, #tpu.memory_space<vmem>>, %arg4: memref<1x32xf32, #tpu.memory_space<vmem>>, %arg5: memref<288x32xbf16, #tpu.memory_space<vmem>>, %arg6: memref<1x32xf32, #tpu.memory_space<vmem>>, %arg7: memref<1x32xf32, #tpu.memory_space<vmem>>, %arg8: memref<32x32xbf16, #tpu.memory_space<vmem>>, %arg9: memref<1x32xf32, #tpu.memory_space<vmem>>, %arg10: memref<1x32xf32, #tpu.memory_space<vmem>>, %arg11: memref<2x256x32xf32, #tpu.memory_space<vmem>>, %arg12: memref<2x18x18x32xbf16, #tpu.memory_space<vmem>>, %arg13: memref<512x288xbf16, #tpu.memory_space<vmem>>) attributes {dimension_semantics = [#tpu.dimension_semantics<parallel>], iteration_bounds = array<i64: 1>, scalar_prefetch = 0 : i64, scratch_operands = 2 : i64, tpu.core_type = #tpu.core_type<tc>, window_params = [{transform_indices = @transform_0, window_bounds = array<i64: 2, 256, 32>}, {pipeline_mode = #tpu.pipeline_mode<synchronous>, transform_indices = @transform_1, window_bounds = array<i64: 32, 32>}, {pipeline_mode = #tpu.pipeline_mode<synchronous>, transform_indices = @transform_2, window_bounds = array<i64: 1, 32>}, {pipeline_mode = #tpu.pipeline_mode<synchronous>, transform_indices = @transform_3, window_bounds = array<i64: 1, 32>}, {pipeline_mode = #tpu.pipeline_mode<synchronous>, transform_indices = @transform_4, window_bounds = array<i64: 288, 32>}, {pipeline_mode = #tpu.pipeline_mode<synchronous>, transform_indices = @transform_5, window_bounds = array<i64: 1, 32>}, {pipeline_mode = #tpu.pipeline_mode<synchronous>, transform_indices = @transform_6, window_bounds = array<i64: 1, 32>}, {pipeline_mode = #tpu.pipeline_mode<synchronous>, transform_indices = @transform_7, window_bounds = array<i64: 32, 32>}, {pipeline_mode = #tpu.pipeline_mode<synchronous>, transform_indices = @transform_8, window_bounds = array<i64: 1, 32>}, {pipeline_mode = #tpu.pipeline_mode<synchronous>, transform_indices = @transform_9, window_bounds = array<i64: 1, 32>}, {transform_indices = @transform_10, window_bounds = array<i64: 2, 256, 32>}]} {
    %c0 = arith.constant 0 : index
    %c0_0 = arith.constant 0 : index
    %c0_1 = arith.constant 0 : index
    %0 = vector.load %arg1[%c0, %c0_0, %c0_1] : memref<2x256x32xbf16, #tpu.memory_space<vmem>>, vector<2x256x32xbf16>
    %1 = vector.shape_cast %0 : vector<2x256x32xbf16> to vector<512x32xbf16>
    %c0_2 = arith.constant 0 : index
    %c0_3 = arith.constant 0 : index
    %2 = vector.load %arg2[%c0_2, %c0_3] : memref<32x32xbf16, #tpu.memory_space<vmem>>, vector<32x32xbf16>
    %cst = arith.constant dense<0.000000e+00> : vector<512x32xf32>
    %3 = tpu.matmul %1, %2, %cst {dimension_numbers = #tpu.dot_dimension_numbers<[1], [0], [0], [1], [0, 0, 1, 1], [], []>} : vector<512x32xbf16>, vector<32x32xbf16>, vector<512x32xf32> -> vector<512x32xf32>
    %c0_4 = arith.constant 0 : index
    %c0_5 = arith.constant 0 : index
    %4 = vector.load %arg3[%c0_4, %c0_5] : memref<1x32xf32, #tpu.memory_space<vmem>>, vector<1x32xf32>
    %5 = vector.broadcast %4 : vector<1x32xf32> to vector<512x32xf32>
    %6 = arith.mulf %3, %5 : vector<512x32xf32>
    %c0_6 = arith.constant 0 : index
    %c0_7 = arith.constant 0 : index
    %7 = vector.load %arg4[%c0_6, %c0_7] : memref<1x32xf32, #tpu.memory_space<vmem>>, vector<1x32xf32>
    %8 = vector.broadcast %7 : vector<1x32xf32> to vector<512x32xf32>
    %9 = arith.addf %6, %8 : vector<512x32xf32>
    %cst_8 = arith.constant 0.000000e+00 : f32
    %10 = vector.broadcast %cst_8 : f32 to vector<512x32xf32>
    %11 = arith.maximumf %9, %10 : vector<512x32xf32>
    %cst_9 = arith.constant 0.000000e+00 : bf16
    %12 = vector.broadcast %cst_9 : bf16 to vector<2x1x18x32xbf16>
    %c0_10 = arith.constant 0 : index
    %c0_11 = arith.constant 0 : index
    %c0_12 = arith.constant 0 : index
    %c0_13 = arith.constant 0 : index
    %13 = vector.load %arg12[%c0_10, %c0_11, %c0_12, %c0_13] : memref<2x18x18x32xbf16, #tpu.memory_space<vmem>>, vector<2x1x18x32xbf16>
    tpu.vector_store %arg12[%c0_10, %c0_11, %c0_12, %c0_13], %12 {strides = array<i32>} : memref<2x18x18x32xbf16, #tpu.memory_space<vmem>>, vector<2x1x18x32xbf16>,
    %c0_14 = arith.constant 0 : index
    %c17 = arith.constant 17 : index
    %c0_15 = arith.constant 0 : index
    %c0_16 = arith.constant 0 : index
    %14 = vector.load %arg12[%c0_14, %c17, %c0_15, %c0_16] : memref<2x18x18x32xbf16, #tpu.memory_space<vmem>>, vector<2x1x18x32xbf16>
    tpu.vector_store %arg12[%c0_14, %c17, %c0_15, %c0_16], %12 {strides = array<i32>} : memref<2x18x18x32xbf16, #tpu.memory_space<vmem>>, vector<2x1x18x32xbf16>,
    %cst_17 = arith.constant 0.000000e+00 : bf16
    %15 = vector.broadcast %cst_17 : bf16 to vector<2x16x1x32xbf16>
    %c0_18 = arith.constant 0 : index
    %c1 = arith.constant 1 : index
    %c0_19 = arith.constant 0 : index
    %c0_20 = arith.constant 0 : index
    %16 = vector.load %arg12[%c0_18, %c1, %c0_19, %c0_20] : memref<2x18x18x32xbf16, #tpu.memory_space<vmem>>, vector<2x16x1x32xbf16>
    tpu.vector_store %arg12[%c0_18, %c1, %c0_19, %c0_20], %15 {strides = array<i32>} : memref<2x18x18x32xbf16, #tpu.memory_space<vmem>>, vector<2x16x1x32xbf16>,
    %c0_21 = arith.constant 0 : index
    %c1_22 = arith.constant 1 : index
    %c17_23 = arith.constant 17 : index
    %c0_24 = arith.constant 0 : index
    %17 = vector.load %arg12[%c0_21, %c1_22, %c17_23, %c0_24] : memref<2x18x18x32xbf16, #tpu.memory_space<vmem>>, vector<2x16x1x32xbf16>
    tpu.vector_store %arg12[%c0_21, %c1_22, %c17_23, %c0_24], %15 {strides = array<i32>} : memref<2x18x18x32xbf16, #tpu.memory_space<vmem>>, vector<2x16x1x32xbf16>,
    %18 = arith.truncf %11 : vector<512x32xf32> to vector<512x32xbf16>
    %19 = vector.shape_cast %18 : vector<512x32xbf16> to vector<2x16x16x32xbf16>
    %c0_25 = arith.constant 0 : index
    %c1_26 = arith.constant 1 : index
    %c1_27 = arith.constant 1 : index
    %c0_28 = arith.constant 0 : index
    %20 = vector.load %arg12[%c0_25, %c1_26, %c1_27, %c0_28] : memref<2x18x18x32xbf16, #tpu.memory_space<vmem>>, vector<2x16x16x32xbf16>
    tpu.vector_store %arg12[%c0_25, %c1_26, %c1_27, %c0_28], %19 {strides = array<i32>} : memref<2x18x18x32xbf16, #tpu.memory_space<vmem>>, vector<2x16x16x32xbf16>,
    %c0_29 = arith.constant 0 : index
    %c0_30 = arith.constant 0 : index
    %c0_31 = arith.constant 0 : index
    %c0_32 = arith.constant 0 : index
    %21 = vector.load %arg12[%c0_29, %c0_30, %c0_31, %c0_32] : memref<2x18x18x32xbf16, #tpu.memory_space<vmem>>, vector<2x16x16x32xbf16>
    %22 = vector.shape_cast %21 : vector<2x16x16x32xbf16> to vector<512x32xbf16>
    %c0_33 = arith.constant 0 : index
    %c0_34 = arith.constant 0 : index
    %23 = vector.load %arg13[%c0_33, %c0_34] : memref<512x288xbf16, #tpu.memory_space<vmem>>, vector<512x32xbf16>
    tpu.vector_store %arg13[%c0_33, %c0_34], %22 {strides = array<i32>} : memref<512x288xbf16, #tpu.memory_space<vmem>>, vector<512x32xbf16>,
    %c0_35 = arith.constant 0 : index
    %c0_36 = arith.constant 0 : index
    %c1_37 = arith.constant 1 : index
    %c0_38 = arith.constant 0 : index
    %24 = vector.load %arg12[%c0_35, %c0_36, %c1_37, %c0_38] : memref<2x18x18x32xbf16, #tpu.memory_space<vmem>>, vector<2x16x16x32xbf16>
    %25 = vector.shape_cast %24 : vector<2x16x16x32xbf16> to vector<512x32xbf16>
    %c0_39 = arith.constant 0 : index
    %c32 = arith.constant 32 : index
    %26 = vector.load %arg13[%c0_39, %c32] : memref<512x288xbf16, #tpu.memory_space<vmem>>, vector<512x32xbf16>
    tpu.vector_store %arg13[%c0_39, %c32], %25 {strides = array<i32>} : memref<512x288xbf16, #tpu.memory_space<vmem>>, vector<512x32xbf16>,
    %c0_40 = arith.constant 0 : index
    %c0_41 = arith.constant 0 : index
    %c2 = arith.constant 2 : index
    %c0_42 = arith.constant 0 : index
    %27 = vector.load %arg12[%c0_40, %c0_41, %c2, %c0_42] : memref<2x18x18x32xbf16, #tpu.memory_space<vmem>>, vector<2x16x16x32xbf16>
    %28 = vector.shape_cast %27 : vector<2x16x16x32xbf16> to vector<512x32xbf16>
    %c0_43 = arith.constant 0 : index
    %c64 = arith.constant 64 : index
    %29 = vector.load %arg13[%c0_43, %c64] : memref<512x288xbf16, #tpu.memory_space<vmem>>, vector<512x32xbf16>
    tpu.vector_store %arg13[%c0_43, %c64], %28 {strides = array<i32>} : memref<512x288xbf16, #tpu.memory_space<vmem>>, vector<512x32xbf16>,
    %c0_44 = arith.constant 0 : index
    %c1_45 = arith.constant 1 : index
    %c0_46 = arith.constant 0 : index
    %c0_47 = arith.constant 0 : index
    %30 = vector.load %arg12[%c0_44, %c1_45, %c0_46, %c0_47] : memref<2x18x18x32xbf16, #tpu.memory_space<vmem>>, vector<2x16x16x32xbf16>
    %31 = vector.shape_cast %30 : vector<2x16x16x32xbf16> to vector<512x32xbf16>
    %c0_48 = arith.constant 0 : index
    %c96 = arith.constant 96 : index
    %32 = vector.load %arg13[%c0_48, %c96] : memref<512x288xbf16, #tpu.memory_space<vmem>>, vector<512x32xbf16>
    tpu.vector_store %arg13[%c0_48, %c96], %31 {strides = array<i32>} : memref<512x288xbf16, #tpu.memory_space<vmem>>, vector<512x32xbf16>,
    %c0_49 = arith.constant 0 : index
    %c1_50 = arith.constant 1 : index
    %c1_51 = arith.constant 1 : index
    %c0_52 = arith.constant 0 : index
    %33 = vector.load %arg12[%c0_49, %c1_50, %c1_51, %c0_52] : memref<2x18x18x32xbf16, #tpu.memory_space<vmem>>, vector<2x16x16x32xbf16>
    %34 = vector.shape_cast %33 : vector<2x16x16x32xbf16> to vector<512x32xbf16>
    %c0_53 = arith.constant 0 : index
    %c128 = arith.constant 128 : index
    %35 = vector.load %arg13[%c0_53, %c128] : memref<512x288xbf16, #tpu.memory_space<vmem>>, vector<512x32xbf16>
    tpu.vector_store %arg13[%c0_53, %c128], %34 {strides = array<i32>} : memref<512x288xbf16, #tpu.memory_space<vmem>>, vector<512x32xbf16>,
    %c0_54 = arith.constant 0 : index
    %c1_55 = arith.constant 1 : index
    %c2_56 = arith.constant 2 : index
    %c0_57 = arith.constant 0 : index
    %36 = vector.load %arg12[%c0_54, %c1_55, %c2_56, %c0_57] : memref<2x18x18x32xbf16, #tpu.memory_space<vmem>>, vector<2x16x16x32xbf16>
    %37 = vector.shape_cast %36 : vector<2x16x16x32xbf16> to vector<512x32xbf16>
    %c0_58 = arith.constant 0 : index
    %c160 = arith.constant 160 : index
    %38 = vector.load %arg13[%c0_58, %c160] : memref<512x288xbf16, #tpu.memory_space<vmem>>, vector<512x32xbf16>
    tpu.vector_store %arg13[%c0_58, %c160], %37 {strides = array<i32>} : memref<512x288xbf16, #tpu.memory_space<vmem>>, vector<512x32xbf16>,
    %c0_59 = arith.constant 0 : index
    %c2_60 = arith.constant 2 : index
    %c0_61 = arith.constant 0 : index
    %c0_62 = arith.constant 0 : index
    %39 = vector.load %arg12[%c0_59, %c2_60, %c0_61, %c0_62] : memref<2x18x18x32xbf16, #tpu.memory_space<vmem>>, vector<2x16x16x32xbf16>
    %40 = vector.shape_cast %39 : vector<2x16x16x32xbf16> to vector<512x32xbf16>
    %c0_63 = arith.constant 0 : index
    %c192 = arith.constant 192 : index
    %41 = vector.load %arg13[%c0_63, %c192] : memref<512x288xbf16, #tpu.memory_space<vmem>>, vector<512x32xbf16>
    tpu.vector_store %arg13[%c0_63, %c192], %40 {strides = array<i32>} : memref<512x288xbf16, #tpu.memory_space<vmem>>, vector<512x32xbf16>,
    %c0_64 = arith.constant 0 : index
    %c2_65 = arith.constant 2 : index
    %c1_66 = arith.constant 1 : index
    %c0_67 = arith.constant 0 : index
    %42 = vector.load %arg12[%c0_64, %c2_65, %c1_66, %c0_67] : memref<2x18x18x32xbf16, #tpu.memory_space<vmem>>, vector<2x16x16x32xbf16>
    %43 = vector.shape_cast %42 : vector<2x16x16x32xbf16> to vector<512x32xbf16>
    %c0_68 = arith.constant 0 : index
    %c224 = arith.constant 224 : index
    %44 = vector.load %arg13[%c0_68, %c224] : memref<512x288xbf16, #tpu.memory_space<vmem>>, vector<512x32xbf16>
    tpu.vector_store %arg13[%c0_68, %c224], %43 {strides = array<i32>} : memref<512x288xbf16, #tpu.memory_space<vmem>>, vector<512x32xbf16>,
    %c0_69 = arith.constant 0 : index
    %c2_70 = arith.constant 2 : index
    %c2_71 = arith.constant 2 : index
    %c0_72 = arith.constant 0 : index
    %45 = vector.load %arg12[%c0_69, %c2_70, %c2_71, %c0_72] : memref<2x18x18x32xbf16, #tpu.memory_space<vmem>>, vector<2x16x16x32xbf16>
    %46 = vector.shape_cast %45 : vector<2x16x16x32xbf16> to vector<512x32xbf16>
    %c0_73 = arith.constant 0 : index
    %c256 = arith.constant 256 : index
    %47 = vector.load %arg13[%c0_73, %c256] : memref<512x288xbf16, #tpu.memory_space<vmem>>, vector<512x32xbf16>
    tpu.vector_store %arg13[%c0_73, %c256], %46 {strides = array<i32>} : memref<512x288xbf16, #tpu.memory_space<vmem>>, vector<512x32xbf16>,
    %c0_74 = arith.constant 0 : index
    %c0_75 = arith.constant 0 : index
    %48 = vector.load %arg13[%c0_74, %c0_75] : memref<512x288xbf16, #tpu.memory_space<vmem>>, vector<512x288xbf16>
    %c0_76 = arith.constant 0 : index
    %c0_77 = arith.constant 0 : index
    %49 = vector.load %arg5[%c0_76, %c0_77] : memref<288x32xbf16, #tpu.memory_space<vmem>>, vector<288x32xbf16>
    %cst_78 = arith.constant dense<0.000000e+00> : vector<512x32xf32>
    %50 = tpu.matmul %48, %49, %cst_78 {dimension_numbers = #tpu.dot_dimension_numbers<[1], [0], [0], [1], [0, 0, 1, 1], [], []>} : vector<512x288xbf16>, vector<288x32xbf16>, vector<512x32xf32> -> vector<512x32xf32>
    %c0_79 = arith.constant 0 : index
    %c0_80 = arith.constant 0 : index
    %51 = vector.load %arg6[%c0_79, %c0_80] : memref<1x32xf32, #tpu.memory_space<vmem>>, vector<1x32xf32>
    %52 = vector.broadcast %51 : vector<1x32xf32> to vector<512x32xf32>
    %53 = arith.mulf %50, %52 : vector<512x32xf32>
    %c0_81 = arith.constant 0 : index
    %c0_82 = arith.constant 0 : index
    %54 = vector.load %arg7[%c0_81, %c0_82] : memref<1x32xf32, #tpu.memory_space<vmem>>, vector<1x32xf32>
    %55 = vector.broadcast %54 : vector<1x32xf32> to vector<512x32xf32>
    %56 = arith.addf %53, %55 : vector<512x32xf32>
    %cst_83 = arith.constant 0.000000e+00 : f32
    %57 = vector.broadcast %cst_83 : f32 to vector<512x32xf32>
    %58 = arith.maximumf %56, %57 : vector<512x32xf32>
    %59 = arith.truncf %58 : vector<512x32xf32> to vector<512x32xbf16>
    %c0_84 = arith.constant 0 : index
    %c0_85 = arith.constant 0 : index
    %60 = vector.load %arg8[%c0_84, %c0_85] : memref<32x32xbf16, #tpu.memory_space<vmem>>, vector<32x32xbf16>
    %cst_86 = arith.constant dense<0.000000e+00> : vector<512x32xf32>
    %61 = tpu.matmul %59, %60, %cst_86 {dimension_numbers = #tpu.dot_dimension_numbers<[1], [0], [0], [1], [0, 0, 1, 1], [], []>} : vector<512x32xbf16>, vector<32x32xbf16>, vector<512x32xf32> -> vector<512x32xf32>
    %c0_87 = arith.constant 0 : index
    %c0_88 = arith.constant 0 : index
    %62 = vector.load %arg9[%c0_87, %c0_88] : memref<1x32xf32, #tpu.memory_space<vmem>>, vector<1x32xf32>
    %63 = vector.broadcast %62 : vector<1x32xf32> to vector<512x32xf32>
    %64 = arith.mulf %61, %63 : vector<512x32xf32>
    %c0_89 = arith.constant 0 : index
    %c0_90 = arith.constant 0 : index
    %65 = vector.load %arg10[%c0_89, %c0_90] : memref<1x32xf32, #tpu.memory_space<vmem>>, vector<1x32xf32>
    %66 = vector.broadcast %65 : vector<1x32xf32> to vector<512x32xf32>
    %67 = arith.addf %64, %66 : vector<512x32xf32>
    %68 = arith.extf %1 : vector<512x32xbf16> to vector<512x32xf32>
    %69 = arith.addf %67, %68 : vector<512x32xf32>
    %cst_91 = arith.constant 0.000000e+00 : f32
    %70 = vector.broadcast %cst_91 : f32 to vector<512x32xf32>
    %71 = arith.maximumf %69, %70 : vector<512x32xf32>
    %72 = vector.shape_cast %71 : vector<512x32xf32> to vector<2x256x32xf32>
    %c0_92 = arith.constant 0 : index
    %c0_93 = arith.constant 0 : index
    %c0_94 = arith.constant 0 : index
    %73 = vector.load %arg11[%c0_92, %c0_93, %c0_94] : memref<2x256x32xf32, #tpu.memory_space<vmem>>, vector<2x256x32xf32>
    tpu.vector_store %arg11[%c0_92, %c0_93, %c0_94], %72 {strides = array<i32>} : memref<2x256x32xf32, #tpu.memory_space<vmem>>, vector<2x256x32xf32>,
    return
  }
  func.func @transform_0(%arg0: i32) -> (i32, i32, i32) {
    %c0_i32 = arith.constant 0 : i32
    %c0_i32_0 = arith.constant 0 : i32
    %c0_i32_1 = arith.constant 0 : i32
    return %arg0, %c0_i32, %c0_i32_0 : i32, i32, i32
  }
  func.func @transform_1(%arg0: i32) -> (i32, i32) {
    %c0_i32 = arith.constant 0 : i32
    %c0_i32_0 = arith.constant 0 : i32
    %c0_i32_1 = arith.constant 0 : i32
    return %c0_i32, %c0_i32_0 : i32, i32
  }
  func.func @transform_2(%arg0: i32) -> (i32, i32) {
    %c0_i32 = arith.constant 0 : i32
    %c0_i32_0 = arith.constant 0 : i32
    %c0_i32_1 = arith.constant 0 : i32
    return %c0_i32, %c0_i32_0 : i32, i32
  }
  func.func @transform_3(%arg0: i32) -> (i32, i32) {
    %c0_i32 = arith.constant 0 : i32
    %c0_i32_0 = arith.constant 0 : i32
    %c0_i32_1 = arith.constant 0 : i32
    return %c0_i32, %c0_i32_0 : i32, i32
  }
  func.func @transform_4(%arg0: i32) -> (i32, i32) {
    %c0_i32 = arith.constant 0 : i32
    %c0_i32_0 = arith.constant 0 : i32
    %c0_i32_1 = arith.constant 0 : i32
    return %c0_i32, %c0_i32_0 : i32, i32
  }
  func.func @transform_5(%arg0: i32) -> (i32, i32) {
    %c0_i32 = arith.constant 0 : i32
    %c0_i32_0 = arith.constant 0 : i32
    %c0_i32_1 = arith.constant 0 : i32
    return %c0_i32, %c0_i32_0 : i32, i32
  }
  func.func @transform_6(%arg0: i32) -> (i32, i32) {
    %c0_i32 = arith.constant 0 : i32
    %c0_i32_0 = arith.constant 0 : i32
    %c0_i32_1 = arith.constant 0 : i32
    return %c0_i32, %c0_i32_0 : i32, i32
  }
  func.func @transform_7(%arg0: i32) -> (i32, i32) {
    %c0_i32 = arith.constant 0 : i32
    %c0_i32_0 = arith.constant 0 : i32
    %c0_i32_1 = arith.constant 0 : i32
    return %c0_i32, %c0_i32_0 : i32, i32
  }
  func.func @transform_8(%arg0: i32) -> (i32, i32) {
    %c0_i32 = arith.constant 0 : i32
    %c0_i32_0 = arith.constant 0 : i32
    %c0_i32_1 = arith.constant 0 : i32
    return %c0_i32, %c0_i32_0 : i32, i32
  }
  func.func @transform_9(%arg0: i32) -> (i32, i32) {
    %c0_i32 = arith.constant 0 : i32
    %c0_i32_0 = arith.constant 0 : i32
    %c0_i32_1 = arith.constant 0 : i32
    return %c0_i32, %c0_i32_0 : i32, i32
  }
  func.func @transform_10(%arg0: i32) -> (i32, i32, i32) {
    %c0_i32 = arith.constant 0 : i32
    %c0_i32_0 = arith.constant 0 : i32
    %c0_i32_1 = arith.constant 0 : i32
    return %arg0, %c0_i32, %c0_i32_0 : i32, i32, i32
  }
}

</mosaic_0001>

<bundles_post_ra>
// kernel: tpu_custom_call.1
= control target key start
LH: loop header
LB: loop body
LE: loop exit
PB: predicated region body
PF: predicated region fallthrough
CT: control target
= control target key end

     0   :  { %vm276_vm0 = vcmask 261120   ;;  %vm745_vm1 = vcmask 253952   ;;  %vm759_vm2 = vsmask.f32 256  ;;  %v761_v16 = vld [vmem:[#allocation2 + $0xc] sm:$0x1]  ;;  %s15937_s1 = inlined_call_operand.vmem [shape: bf16[32,32], index: 1, kind: input, shape index: {}]   ;;  %s15938_s2 = inlined_call_operand.vmem [shape: f32[1,32], index: 2, kind: input, shape index: {}]   ;;  %s15939_s3 = inlined_call_operand.vmem [shape: f32[1,32], index: 3, kind: input, shape index: {}]   ;;  %s15940_s0 = inlined_call_operand.vmem [shape: bf16[2,256,32], index: 0, kind: input, shape index: {}]   ;;  %s15941_s4 = inlined_call_operand.vmem [shape: bf16[288,32], index: 4, kind: input, shape index: {}]   ;;  %s15942_s7 = inlined_call_operand.vmem [shape: bf16[32,32], index: 7, kind: input, shape index: {}]   ;;  %s15943_s5 = inlined_call_operand.vmem [shape: f32[1,32], index: 5, kind: input, shape index: {}]   ;;  %s15944_s6 = inlined_call_operand.vmem [shape: f32[1,32], index: 6, kind: input, shape index: {}]   ;;  %s15945_s8 = inlined_call_operand.vmem [shape: f32[1,32], index: 8, kind: input, shape index: {}]   ;;  %s15946_s9 = inlined_call_operand.vmem [shape: f32[1,32], index: 9, kind: input, shape index: {}]   ;;  %s15947_s10 = inlined_call_operand.vmem [shape: f32[2,256,32], index: 10, kind: output, shape index: {}]  }
   0x1   :  { %v11002_v0 = vld [vmem:[%s15937_s1 + $0x8] sm:$0xff]  ;;  %v11001_v1 = vld [vmem:[%s15937_s1] sm:$0xff]  ;;  %v10992_v5 = vld [vmem:[%s15940_s0 + $0xb8] sm:$0xff]  ;;  %vm857_vm4 = vsmask.f32 7938  ;;  %vm742_vm6 = vcmask 257024  }
   0x2   :  { %379 = vmatpush.bf16.msra.mxu0 %v11002_v0  ;;  %11119 = vmatpush.bf16.msra.mxu1 %v11002_v0  ;;  %v10969_v2 = vld [vmem:[%s15940_s0] sm:$0xff]  ;;  %v10978_v3 = vld [vmem:[%s15940_s0 + $0x48] sm:$0xff]  ;;  %v10971_v6 = vld [vmem:[%s15940_s0 + $0x10] sm:$0xff]  ;;  %vm1019_vm8 = vsmask.f32 4368  ;;  %s11159_s1 = smov 64  }
   0x3   :  { %11121 = vmatpush.bf16.msra.mxu3 %v11002_v0  ;;  %11120 = vmatpush.bf16.msra.mxu2 %v11002_v0  ;;  %v10970_v4 = vld [vmem:[%s15940_s0 + $0x8] sm:$0xff]  ;;  %v10993_v7 = vld [vmem:[%s15940_s0 + $0xc0] sm:$0xff]  ;;  %v10972_v8 = vld [vmem:[%s15940_s0 + $0x18] sm:$0xff]  ;;  %vm3331_vm10 = vcmask 1042432   ;;  %vm3332_vm11 = vcmask 1046532   ;;  %s11160_s25 = smov 96  }
   0x4   :  { %v10994_v9 = vld [vmem:[%s15940_s0 + $0xc8] sm:$0xff]  ;;  %v10973_v10 = vld [vmem:[%s15940_s0 + $0x20] sm:$0xff]  ;;  %v10995_v11 = vld [vmem:[%s15940_s0 + $0xd0] sm:$0xff]  ;;  %vm2111_vm12 = vsmask.f32 3328  ;;  %s11161_s26 = smov 32  }
   0x5   :  { %v10974_v12 = vld [vmem:[%s15940_s0 + $0x28] sm:$0xff]  ;;  %v10996_v13 = vld [vmem:[%s15940_s0 + $0xd8] sm:$0xff]  ;;  %v10975_v14 = vld [vmem:[%s15940_s0 + $0x30] sm:$0xff]  ;;  %vm2112_vm13 = vsmask.f32 7440 }
   0x6   :  { %380 = vmatpush.bf16.msra.mxu0 %v11001_v1  ;;  %11122 = vmatpush.bf16.msra.mxu1 %v11001_v1  ;;  %vm11278_vm3 = vmand %vm745_vm1, %vm759_vm2  ;;  %v788_v18 = vld [vmem:[#allocation2 + $0x78] sm:$0x1]  ;;  %v859_v21 = vld [vmem:[#allocation2 + $0x14] sm:$0x1] }
   0x7   :  { %11124 = vmatpush.bf16.msra.mxu3 %v11001_v1  ;;  %11123 = vmatpush.bf16.msra.mxu2 %v11001_v1  ;;  %v762_v17 = vsel %vm11278_vm3, 0, %v761_v16  ;;  %v789_v19 = vsel %vm11278_vm3, 0, %v788_v18  ;;  %vm11288_vm5 = vmand %vm745_vm1, %vm857_vm4  ;;  %v10976_v22 = vld [vmem:[%s15940_s0 + $0x38] sm:$0xff]  ;;  %v886_v24 = vld [vmem:[#allocation2 + $0x80] sm:$0x1] }
   0x8   :  { %763 = vst [vmem:[#allocation2 + $0xc] sm:$0x1] %v762_v17  ;;  %v860_v23 = vsel %vm11288_vm5, 0, %v859_v21  ;;  %v887_v25 = vsel %vm11288_vm5, 0, %v886_v24  ;;  %v10979_v26 = vld [vmem:[%s15940_s0 + $0x50] sm:$0xff]  ;;  %v10997_v27 = vld [vmem:[%s15940_s0 + $0xe0] sm:$0xff]  ;;  %vm11344_vm7 = vmand %vm742_vm6, %vm857_vm4 }
   0x9   :  { %10313 = vmatmul.msk.bf16.vlgmr.msra.gmra.mxu0 %vm276_vm0, %v10969_v2  ;;  %10322 = vmatmul.msk.bf16.vlgmr.msra.gmra.mxu1 %vm276_vm0, %v10978_v3  ;;  %790 = vst [vmem:[#allocation2 + $0x78] sm:$0x1] %v789_v19  ;;  %v764_v28 = vld [vmem:[#allocation2 + $0x18] sm:$0x1]  ;;  %v11313_v30 = vld [vmem:[%s15938_s2] ss:$0 sm:$0xff]  ;;  %vm11367_vm9 = vmor %vm759_vm2, %vm1019_vm8 }
   0xa   :  { %10336 = vmatmul.msk.bf16.vlgmr.msra.gmra.mxu3 %vm276_vm0, %v10992_v5  ;;  %861 = vst [vmem:[#allocation2 + $0x14] sm:$0x1] %v860_v23  ;;  %v765_v29 = vsel %vm11278_vm3, 0, %v764_v28  ;;  %v11318_v31 = vld [vmem:[%s15939_s3] ss:$0 sm:$0xff]  ;;  %v10980_v38 = vld [vmem:[%s15940_s0 + $0x58] sm:$0xff]  ;;  %vm11407_vm14 = vmor %vm2111_vm12, %vm2112_vm13 }
   0xb   :  { %888 = vst [vmem:[#allocation2 + $0x80] sm:$0x1] %v887_v25  ;;  %v10977_v32 = vld [vmem:[%s15940_s0 + $0x40] sm:$0xff]  ;;  %v10998_v39 = vld [vmem:[%s15940_s0 + $0xe8] sm:$0xff]  ;;  %vm11416_vm15 = vmor %vm3331_vm10, %vm3332_vm11  ;;  %vm3074_vm2 = vcmask 519424   ;;  %vm3750_vm4 = vcmask 781824  }
   0xc   :  { %766 = vst [vmem:[#allocation2 + $0x18] sm:$0x1] %v765_v29  ;;  %v862_v37 = vld [vmem:[#allocation2 + $0x20] sm:$0x1]  ;;  %v767_v51 = vld [vmem:[#allocation2 + $0x24] sm:$0x1] }
   0xd   :  { %v863_v40 = vsel %vm11288_vm5, 0, %v862_v37  ;;  %v768_v54 = vsel %vm11278_vm3, 0, %v767_v51  ;;  %vm4135_vm8 = vcmask 1044224  }
   0xe   :  { %864 = vst [vmem:[#allocation2 + $0x20] sm:$0x1] %v863_v40 }
   0xf   :  { %769 = vst [vmem:[#allocation2 + $0x24] sm:$0x1] %v768_v54  ;;  %v1663_v60 = vld [vmem:[#allocation2 + $0xc] sm:$0xf] }
  0x10   :  { %v1726_v61 = vld [vmem:[#allocation2 + $0x78] sm:$0xf] }
  0x19   :  { %10314 = vmatmul.msk.bf16.gmra.mxu0 %vm276_vm0, %v10970_v4  ;;  %10323 = vmatmul.msk.bf16.gmra.mxu1 %vm276_vm0, %v10979_v26  ;;  %v1667_v26 = vld [vmem:[#allocation2 + $0x14] sm:$0x1] }
  0x1a   :  { %10337 = vmatmul.msk.bf16.gmra.mxu3 %vm276_vm0, %v10993_v7 }
  0x29   :  { %10315 = vmatmul.msk.bf16.gmra.mxu0 %vm276_vm0, %v10971_v6  ;;  %10324 = vmatmul.msk.bf16.gmra.mxu1 %vm276_vm0, %v10980_v38 }
  0x2a   :  { %10338 = vmatmul.msk.bf16.gmra.mxu3 %vm276_vm0, %v10994_v9 }
  0x39   :  { %10316 = vmatmul.msk.bf16.gmra.mxu0 %vm276_vm0, %v10972_v8 }
  0x3a   :  { %10339 = vmatmul.msk.bf16.gmra.mxu3 %vm276_vm0, %v10995_v11  ;;  %v10981_v11 = vld [vmem:[%s15940_s0 + $0x60] sm:$0xff] }
  0x3b   :  { %10325 = vmatmul.msk.bf16.gmra.mxu1 %vm276_vm0, %v10981_v11 }
  0x49   :  { %10317 = vmatmul.msk.bf16.gmra.mxu0 %vm276_vm0, %v10973_v10  ;;  %v865_v10 = vld [vmem:[#allocation2 + $0x2c] sm:$0x1] }
  0x4a   :  { %10340 = vmatmul.msk.bf16.gmra.mxu3 %vm276_vm0, %v10996_v13  ;;  %v866_v17 = vsel %vm11288_vm5, 0, %v865_v10 }
  0x4b   :  { %867 = vst [vmem:[#allocation2 + $0x2c] sm:$0x1] %v866_v17 }
  0x59   :  { %10318 = vmatmul.msk.bf16.gmra.mxu0 %vm276_vm0, %v10974_v12  ;;  %v10999_v12 = vld [vmem:[%s15940_s0 + $0xf0] sm:$0xff] }
  0x5a   :  { %10341 = vmatmul.msk.bf16.gmra.mxu3 %vm276_vm0, %v10997_v27 }
  0x69   :  { %10319 = vmatmul.msk.bf16.gmra.mxu0 %vm276_vm0, %v10975_v14 }
  0x6a   :  { %10342 = vmatmul.msk.bf16.gmra.mxu3 %vm276_vm0, %v10998_v39 }
  0x79   :  { %10320 = vmatmul.msk.bf16.gmra.mxu0 %vm276_vm0, %v10976_v22 }
  0x7a   :  { %10343 = vmatmul.msk.bf16.gmra.mxu3 %vm276_vm0, %v10999_v12 }
  0x86   :  { %v382_v33 = vpop.f32.mrf.mxu0  ;;  %v427_v34 = vpop.f32.mrf.mxu1 }
  0x87   :  { %v546_v35 = vmul.f32 %v11313_v30, %v382_v33  ;;  %v564_v36 = vmul.f32 %v11313_v30, %v427_v34  ;;  %v1730_v34 = vld [vmem:[#allocation2 + $0x80] sm:$0x1] }
  0x89   :  { %v614_v41 = vadd.f32 %v11318_v31, %v546_v35  ;;  %v632_v42 = vadd.f32 %v11318_v31, %v564_v36  ;;  %10321 = vmatmul.msk.bf16.gmra.mxu0 %vm276_vm0, %v10977_v32 }
  0x8b   :  { %v678_v43 = vmax.f32 %v614_v41, 0.0  ;;  %v696_v44 = vmax.f32 %v632_v42, 0.0 }
  0x8d   :  { %v955_v45 = vpack.c.bf16 %v678_v43, %v678_v43  ;;  %v973_v46 = vpack.c.bf16 %v696_v44, %v696_v44 }
  0x8e   :  { %v384_v47 = vpop.f32.mrf.mxu0  ;;  %v429_v48 = vpop.f32.mrf.mxu1 }
  0x8f   :  { %v1022_v49 = vshrl.u32 %v955_v45, 16  ;;  %v1175_v50 = vshrl.u32 %v973_v46, 16  ;;  %v547_v52 = vmul.f32 %v11313_v30, %v384_v47  ;;  %v565_v53 = vmul.f32 %v11313_v30, %v429_v48  ;;  %v1670_v47 = vld [vmem:[#allocation2 + $0x18] sm:$0xf] }
  0x90   :  { %v1025_v56 = vshll.u32 %v955_v45, 16  ;;  %v1178_v58 = vshll.u32 %v973_v46, 16 }
  0x91   :  { %v1024_v55 = vrot.slane %v1022_v49, 7  ;;  %v1177_v57 = vrot.slane %v1175_v50, 7  ;;  %v615_v62 = vadd.f32 %v11318_v31, %v547_v52  ;;  %v633_v63 = vadd.f32 %v11318_v31, %v565_v53  ;;  %v770_v49 = vld [vmem:[#allocation2 + $0x30] sm:$0x1] }
  0x93   :  { %v1027_v0 = vor.u32 %v1025_v56, %v1024_v55  ;;  %v1180_v1 = vor.u32 %v1178_v58, %v1177_v57  ;;  %v679_v2 = vmax.f32 %v615_v62, 0.0  ;;  %v697_v3 = vmax.f32 %v633_v63, 0.0 }
  0x94   :  { %v1028_v23 = vrot.slane %v1024_v55, 4  ;;  %v1181_v24 = vrot.slane %v1177_v57, 4  ;;  %v771_v55 = vsel %vm11278_vm3, 0, %v770_v49 }
  0x95   :  { %v1664_v4 = vsel %vm11344_vm7, %v1027_v0, %v1663_v60  ;;  %v1727_v5 = vsel %vm11344_vm7, %v1180_v1, %v1726_v61  ;;  %v956_v6 = vpack.c.bf16 %v679_v2, %v679_v2  ;;  %v974_v7 = vpack.c.bf16 %v697_v3, %v697_v3  ;;  %772 = vst [vmem:[#allocation2 + $0x30] sm:$0x1] %v771_v55 }
  0x96   :  { %1665 = vst [vmem:[#allocation2 + $0xc] sm:$0xf] %v1664_v4  ;;  %v387_v8 = vpop.f32.mrf.mxu0 }
  0x97   :  { %1728 = vst [vmem:[#allocation2 + $0x78] sm:$0xf] %v1727_v5  ;;  %v548_v9 = vmul.f32 %v11313_v30, %v387_v8  ;;  %v1030_v13 = vshrl.u32 %v956_v6, 16  ;;  %v1183_v14 = vshrl.u32 %v974_v7, 16  ;;  %v1033_v19 = vshll.u32 %v956_v6, 16  ;;  %v10982_v8 = vld [vmem:[%s15940_s0 + $0x68] sm:$0xff] }
  0x98   :  { %v1186_v22 = vshll.u32 %v974_v7, 16  ;;  %10326 = vmatmul.msk.bf16.gmra.mxu1 %vm276_vm0, %v10982_v8  ;;  %v11116_v8 = vld [vmem:[%s15941_s4 + $0x88] sm:$0xff] }
  0x99   :  { %v616_v16 = vadd.f32 %v11318_v31, %v548_v9  ;;  %v1032_v18 = vrot.slane %v1030_v13, 7  ;;  %v1185_v21 = vrot.slane %v1183_v14, 7  ;;  %v11000_v13 = vld [vmem:[%s15940_s0 + $0xf8] sm:$0xff]  ;;  %11125 = vmatpush.bf16.msrb.mxu3 %v11116_v8 }
  0x9a   :  { %10344 = vmatmul.msk.bf16.gmra.mxu3 %vm276_vm0, %v11000_v13 }
  0x9b   :  { %v680_v27 = vmax.f32 %v616_v16, 0.0  ;;  %v1035_v28 = vor.u32 %v1033_v19, %v1032_v18  ;;  %v1037_v29 = vrot.slane %v1032_v18, 4  ;;  %v1188_v32 = vor.u32 %v1186_v22, %v1185_v21  ;;  %v868_v19 = vld [vmem:[#allocation2 + $0x38] sm:$0x1] }
  0x9c   :  { %v1190_v33 = vrot.slane %v1185_v21, 4  ;;  %v1674_v21 = vld [vmem:[#allocation2 + $0x20] sm:$0x1] }
  0x9d   :  { %v957_v35 = vpack.c.bf16 %v680_v27, %v680_v27  ;;  %v1036_v36 = vsel %vm11367_vm9, %v1028_v23, %v1035_v28  ;;  %v1668_v37 = vsel %vm11278_vm3, %v1037_v29, %v1667_v26  ;;  %v1189_v38 = vsel %vm11367_vm9, %v1181_v24, %v1188_v32  ;;  %v4200_v46 = vld [vmem:[#allocation2 + $0xc] sm:$0xf] }
  0x9e   :  { %v5881_v39 = vld [vmem:[#allocation2 + $0x78] sm:$0xf]  ;;  %v389_v40 = vpop.f32.mrf.mxu0  ;;  %1666 = vst.msk [vmem:[#allocation2 + $0x10] sm:$0xf] %vm742_vm6, %v1036_v36  ;;  %v1731_v42 = vsel %vm11278_vm3, %v1190_v33, %v1730_v34  ;;  %v4297_v56 = vshrl.u32 %v4200_v46, 16  ;;  %v4300_v57 = vshll.u32 %v4200_v46, 16 }
  0x9f   :  { %v6273_v41 = vld [vmem:[#allocation2 + $0x78] sm:$0xf]  ;;  %v1039_v43 = vshrl.u32 %v957_v35, 16  ;;  %6025 = vrot.lane.b32.xlu2 %v5881_v39, %s11159_s1  ;;  %v549_v44 = vmul.f32 %v11313_v30, %v389_v40  ;;  %1669 = vst [vmem:[#allocation2 + $0x14] sm:$0x1] %v1668_v37  ;;  %v1042_v51 = vshll.u32 %v957_v35, 16 }
  0xa0   :  { %v6538_v45 = vshrl.u32 %v6273_v41, 16  ;;  %v6541_v48 = vshll.u32 %v6273_v41, 16  ;;  %1729 = vst.msk [vmem:[#allocation2 + $0x7c] sm:$0xf] %vm742_vm6, %v1189_v38  ;;  %v4299_v2 = vrot.slane %v4297_v56, 4  ;;  %v4302_v3 = vrot.slane %v4300_v57, 5 }
  0xa1   :  { %v1041_v50 = vrot.slane %v1039_v43, 7  ;;  %v617_v52 = vadd.f32 %v11318_v31, %v549_v44  ;;  %1732 = vst [vmem:[#allocation2 + $0x80] sm:$0x1] %v1731_v42  ;;  %v5192_v6 = vld [vmem:[#allocation2 + $0xc] sm:$0xe]  ;;  %v869_v26 = vsel %vm11288_vm5, 0, %v868_v19 }
  0xa2   :  { %v6540_v53 = vrot.slane %v6538_v45, 4  ;;  %v6543_v54 = vrot.slane %v6541_v48, 5  ;;  %v11392_v9 = vld [vmem:[#allocation2 + $0x78] sm:$0xe]  ;;  %v4303_v27 = vor.u32 %v4302_v3, %v4299_v2  ;;  %870 = vst [vmem:[#allocation2 + $0x38] sm:$0x1] %v869_v26 }
  0xa3   :  { %v1044_v58 = vor.u32 %v1042_v51, %v1041_v50  ;;  %v681_v60 = vmax.f32 %v617_v52, 0.0  ;;  %v1045_v63 = vrot.slane %v1041_v50, 4  ;;  %v10377_v36 = vrot.slane %v5192_v6, 9  ;;  %v773_v57 = vld [vmem:[#allocation2 + $0x3c] sm:$0x1] }
  0xa4   :  { %v6544_v1 = vor.u32 %v6543_v54, %v6540_v53  ;;  %v10386_v39 = vrot.slane %v11392_v9, 9  ;;  %v4304_v53 = vrot.slane %v4303_v27, 4 }
  0xa5   :  { %v1671_v61 = vsel %vm11344_vm7, %v1044_v58, %v1670_v47  ;;  %v958_v62 = vpack.c.bf16 %v681_v60, %v681_v60  ;;  %v5193_v7 = vld [vmem:[#allocation2 + $0x10] sm:$0xf]  ;;  %v497_v58 = vpop.f32.mrf.mxu3 }
  0xa6   :  { %1672 = vst [vmem:[#allocation2 + $0x18] sm:$0xf] %v1671_v61  ;;  %v392_v0 = vpop.f32.mrf.mxu0  ;;  %v11402_v18 = vld [vmem:[#allocation2 + $0x14] sm:$0x1]  ;;  %v6545_v23 = vrot.slane %v6544_v1, 4  ;;  %v5386_v24 = vrot.slane %v5193_v7, 5 }
  0xa7   :  { %v1047_v4 = vshrl.u32 %v958_v62, 16  ;;  %v550_v5 = vmul.f32 %v11313_v30, %v392_v0  ;;  %v1050_v10 = vshll.u32 %v958_v62, 16  ;;  %v5882_v11 = vld [vmem:[#allocation2 + $0x7c] sm:$0xf]  ;;  %v5389_v37 = vrot.slane %v11402_v18, 5 }
  0xa8   :  { %v11394_v12 = vld [vmem:[#allocation2 + $0x7c] sm:$0xf]  ;;  %6027 = vrot.lane.b32.xlu0 %v5882_v11, %s11159_s1  ;;  %v4201_v38 = vld [vmem:[#allocation2 + $0x10] sm:$0xf]  ;;  %v5387_v45 = vsel %vm11416_vm15, %v10377_v36, %v5386_v24  ;;  %v5388_v52 = vrot.slane %v5386_v24, 4  ;;  %v774_v0 = vsel %vm11278_vm3, 0, %v773_v57 }
  0xa9   :  { %v1049_v14 = vrot.slane %v1047_v4, 7  ;;  %v618_v16 = vadd.f32 %v11318_v31, %v550_v5  ;;  %v6547_v17 = vshll.u32 %v11394_v12, 16  ;;  %v6551_v35 = vshrl.u32 %v11394_v12, 16  ;;  %v1677_v62 = vld [vmem:[#allocation2 + $0x24] sm:$0xf] }
  0xaa   :  { %v4306_v49 = vshll.u32 %v4201_v38, 16  ;;  %v4310_v1 = vshrl.u32 %v4201_v38, 16  ;;  %775 = vst [vmem:[#allocation2 + $0x3c] sm:$0x1] %v774_v0  ;;  %v4202_v4 = vld [vmem:[#allocation2 + $0x14] sm:$0x1]  ;;  %v5390_v12 = vsel %vm11416_vm15, %v5388_v52, %v5389_v37 }
  0xab   :  { %v1052_v28 = vor.u32 %v1050_v10, %v1049_v14  ;;  %v1054_v29 = vrot.slane %v1049_v14, 4  ;;  %v682_v33 = vmax.f32 %v618_v16, 0.0  ;;  %v11420_v34 = vrot.slane %v6547_v17, 5  ;;  %v11461_v16 = vld [vmem:[#allocation2 + $0x7c] sm:$0xf] }
  0xac   :  { %v11437_v60 = vrot.slane %v4306_v49, 5  ;;  %v11449_v6 = vrot.slane %v6551_v35, 4  ;;  %v11455_v10 = vrot.slane %v4310_v1, 4 }
  0xad   :  { %v1053_v40 = vsel %vm11367_vm9, %v1045_v63, %v1052_v28  ;;  %v1675_v41 = vsel %vm11278_vm3, %v1054_v29, %v1674_v21  ;;  %v959_v42 = vpack.c.bf16 %v682_v33, %v682_v33  ;;  %v6550_v43 = vsel %vm11407_vm14, %v6545_v23, %v11420_v34  ;;  %v6249_v44 = vld [vmem:[#allocation2 + $0x18] sm:$0xf]  ;;  %v499_v57 = vpop.f32.mrf.mxu3 }
  0xae   :  { %1673 = vst.msk [vmem:[#allocation2 + $0x1c] sm:$0xf] %vm742_vm6, %v1053_v40  ;;  %7145 = vrot.lane.b32.xlu1 %v6550_v43, %s11160_s25  ;;  %v394_v46 = vpop.f32.mrf.mxu0  ;;  %v6346_v47 = vshrl.u32 %v6249_v44, 16  ;;  %v6349_v48 = vshll.u32 %v6249_v44, 16  ;;  %v7369_v2 = vld [vmem:[#allocation2 + $0x18] sm:$0xe]  ;;  %v4309_v3 = vsel %vm11407_vm14, %v4304_v53, %v11437_v60  ;;  %v4313_v24 = vor.u32 %v11455_v10, %v11437_v60 }
  0xaf   :  { %1676 = vst [vmem:[#allocation2 + $0x20] sm:$0x1] %v1675_v41  ;;  %v1056_v50 = vshrl.u32 %v959_v42, 16  ;;  %v551_v51 = vmul.f32 %v11313_v30, %v394_v46  ;;  %v1059_v54 = vshll.u32 %v959_v42, 16  ;;  %v5865_v11 = vld [vmem:[#allocation2 + $0x18] sm:$0xf]  ;;  %v592_v29 = vmul.f32 %v11313_v30, %v497_v58 }
  0xb0   :  { %v6348_v55 = vrot.slane %v6346_v47, 4  ;;  %v6351_v56 = vrot.slane %v6349_v48, 5  ;;  %5608 = vrot.lane.b32.xlu0 %v5387_v45, %s11161_s26  ;;  %5128 = vst.msk [vmem:[#allocation3 + $0x4] sm:$0xf] %vm742_vm6, %v4309_v3  ;;  %v11459_v14 = vld [vmem:[#allocation2 + $0x18] sm:$0xe] }
  0xb1   :  { %v11439_v61 = vrot.slane %v1056_v50, 7  ;;  %v619_v63 = vadd.f32 %v11318_v31, %v551_v51  ;;  %v10409_v17 = vrot.slane %v7369_v2, 9  ;;  %v4316_v33 = vshll.u32 %v4202_v4, 16  ;;  %v11115_v40 = vld [vmem:[%s15941_s4 + $0x80] sm:$0xff]  ;;  %v1681_v43 = vld [vmem:[#allocation2 + $0x2c] sm:$0x1] }
  0xb2   :  { %v6352_v13 = vor.u32 %v6351_v56, %v6348_v55  ;;  %v10378_v38 = vrot.slane %v11459_v14, 9  ;;  %v5449_v41 = vrot.slane %v11461_v16, 5  ;;  %11126 = vmatpush.bf16.msrb.mxu3 %v11115_v40  ;;  %v830_v55 = vld [vmem:[#allocation2 + $0x138] sm:$0x1]  ;;  %v871_v14 = vld [vmem:[#allocation2 + $0x44] sm:$0x1] }
  0xb3   :  { %v1061_v5 = vor.u32 %v1059_v54, %v11439_v61  ;;  %v683_v7 = vmax.f32 %v619_v63, 0.0  ;;  %v1062_v52 = vrot.slane %v11439_v61, 4  ;;  %v660_v54 = vadd.f32 %v11318_v31, %v592_v29  ;;  %v10983_v61 = vld [vmem:[%s15940_s0 + $0x70] sm:$0xff] }
  0xb4   :  { %v6353_v44 = vrot.slane %v6352_v13, 4  ;;  %v11489_v58 = vrot.slane %v4316_v33, 5  ;;  %10327 = vmatmul.msk.bf16.gmra.mxu1 %vm276_vm0, %v10983_v61  ;;  %v1684_v40 = vld [vmem:[#allocation2 + $0x30] sm:$0xf] }
  0xb5   :  { %v11463_v18 = vld [vmem:[#allocation2 + $0x1c] sm:$0xf]  ;;  %v1678_v19 = vsel %vm11344_vm7, %v1061_v5, %v1677_v62  ;;  %v960_v21 = vpack.c.bf16 %v683_v7, %v683_v7  ;;  %v724_v4 = vmax.f32 %v660_v54, 0.0  ;;  %v831_v5 = vsel %vm11278_vm3, 0, %v830_v55 }
  0xb6   :  { %v6250_v23 = vld [vmem:[#allocation2 + $0x1c] sm:$0xf]  ;;  %v15948_v26 = vrot.slane %v11463_v18, 5  ;;  %1679 = vst [vmem:[#allocation2 + $0x24] sm:$0xf] %v1678_v19  ;;  %5993 = vrot.lane.b32.xlu1 %v5865_v11, %s11159_s1  ;;  %v397_v27 = vpop.f32.mrf.mxu0  ;;  %v872_v54 = vsel %vm11288_vm5, 0, %v871_v14 }
  0xb7   :  { %v6355_v28 = vshll.u32 %v6250_v23, 16  ;;  %v1064_v35 = vshrl.u32 %v960_v21, 16  ;;  %v552_v36 = vmul.f32 %v11313_v30, %v397_v27  ;;  %v5196_v37 = vld [vmem:[#allocation2 + $0x1c] sm:$0xf]  ;;  %v6359_v46 = vshrl.u32 %v6250_v23, 16 }
  0xb8   :  { %v7564_v42 = vsel %vm11416_vm15, %v10409_v17, %v15948_v26  ;;  %v5197_v47 = vld [vmem:[#allocation2 + $0x20] sm:$0x1]  ;;  %v1067_v49 = vshll.u32 %v960_v21, 16  ;;  %5610 = vrot.lane.b32.xlu0 %v5390_v12, %s11161_s26  ;;  %v5393_v51 = vrot.slane %v5196_v37, 5  ;;  %v5866_v2 = vld [vmem:[#allocation2 + $0x1c] sm:$0xf]  ;;  %v1001_v21 = vpack.c.bf16 %v724_v4, %v724_v4  ;;  %v502_v4 = vpop.f32.mrf.mxu3 }
  0xb9   :  { %v6357_v45 = vrot.slane %v6355_v28, 5  ;;  %7849 = vst.msk [vmem:[#allocation3 + $0x8] sm:$0xf] %vm742_vm6, %v7564_v42  ;;  %v1066_v48 = vrot.slane %v1064_v35, 7  ;;  %v620_v50 = vadd.f32 %v11318_v31, %v552_v36  ;;  %v6251_v56 = vld [vmem:[#allocation2 + $0x20] sm:$0x1] }
  0xba   :  { %v5396_v1 = vrot.slane %v5197_v47, 5  ;;  %v5395_v3 = vrot.slane %v5393_v51, 4  ;;  %v6361_v7 = vrot.slane %v6359_v46, 4  ;;  %832 = vst [vmem:[#allocation2 + $0x138] sm:$0x1] %v831_v5  ;;  %v6365_v13 = vshll.u32 %v6251_v56, 16 }
  0xbb   :  { %v6358_v53 = vsel %vm11407_vm14, %v6353_v44, %v6357_v45  ;;  %v1069_v62 = vor.u32 %v1067_v49, %v1066_v48  ;;  %v1071_v63 = vrot.slane %v1066_v48, 4  ;;  %v684_v0 = vmax.f32 %v620_v50, 0.0  ;;  %v10986_v37 = vld [vmem:[%s15940_s0 + $0x88] sm:$0xff]  ;;  %v928_v49 = vld [vmem:[#allocation2 + $0x140] sm:$0x1] }
  0xbc   :  { %7113 = vrot.lane.b32.xlu2 %v6358_v53, %s11160_s25  ;;  %v5394_v17 = vsel %vm11416_vm15, %v10378_v38, %v5393_v51  ;;  %v6362_v23 = vor.u32 %v6361_v7, %v6357_v45  ;;  %v5397_v36 = vsel %vm11416_vm15, %v5395_v3, %v5396_v1  ;;  %v1413_v42 = vshrl.u32 %v1001_v21, 16  ;;  %10330 = vmatmul.msk.bf16.vlgmr.msra.gmra.mxu2 %vm276_vm0, %v10986_v37  ;;  %v1688_v37 = vld [vmem:[#allocation2 + $0x38] sm:$0x1] }
  0xbd   :  { %v1070_v8 = vsel %vm11367_vm9, %v1062_v52, %v1069_v62  ;;  %v1682_v11 = vsel %vm11278_vm3, %v1071_v63, %v1681_v43  ;;  %v961_v12 = vpack.c.bf16 %v684_v0, %v684_v0  ;;  %v6252_v27 = vld [vmem:[#allocation2 + $0x24] sm:$0xf]  ;;  %v1416_v38 = vshll.u32 %v1001_v21, 16  ;;  %873 = vst [vmem:[#allocation2 + $0x44] sm:$0x1] %v872_v54 }
  0xbe   :  { %1680 = vst.msk [vmem:[#allocation2 + $0x28] sm:$0xf] %vm742_vm6, %v1070_v8  ;;  %5995 = vrot.lane.b32.xlu1 %v5866_v2, %s11159_s1  ;;  %v399_v19 = vpop.f32.mrf.mxu0  ;;  %v5198_v28 = vld [vmem:[#allocation2 + $0x24] sm:$0xe]  ;;  %v11512_v43 = vrot.slane %v6365_v13, 5  ;;  %v6370_v44 = vshrl.u32 %v6252_v27, 16  ;;  %v593_v2 = vmul.f32 %v11313_v30, %v499_v57 }
  0xbf   :  { %1683 = vst [vmem:[#allocation2 + $0x2c] sm:$0x1] %v1682_v11  ;;  %v1073_v29 = vshrl.u32 %v961_v12, 16  ;;  %v1076_v33 = vshll.u32 %v961_v12, 16  ;;  %v553_v35 = vmul.f32 %v11313_v30, %v399_v19  ;;  %v11518_v47 = vrot.slane %v6362_v23, 4 }
  0xc0   :  { %5612 = vrot.lane.b32.xlu0 %v5394_v17, %s11161_s26  ;;  %v6373_v48 = vshll.u32 %v6252_v27, 16  ;;  %v5867_v50 = vld [vmem:[#allocation2 + $0x24] sm:$0xf]  ;;  %v11521_v51 = vrot.slane %v1413_v42, 7  ;;  %v6372_v52 = vrot.slane %v6370_v44, 4  ;;  %v10379_v53 = vrot.slane %v5198_v28, 9 }
  0xc1   :  { %v11514_v45 = vrot.slane %v1073_v29, 7  ;;  %v621_v46 = vadd.f32 %v11318_v31, %v553_v35  ;;  %v1824_v61 = vld [vmem:[#allocation2 + $0x138] sm:$0xf]  ;;  %v929_v3 = vsel %vm11288_vm5, 0, %v928_v49  ;;  %v6368_v11 = vsel %vm11407_vm14, %v11518_v47, %v11512_v43  ;;  %v7372_v17 = vld [vmem:[#allocation2 + $0x24] sm:$0xe] }
  0xc2   :  { %v6375_v63 = vrot.slane %v6373_v48, 5  ;;  %v1418_v0 = vor.u32 %v1416_v38, %v11521_v51  ;;  %v1419_v1 = vrot.slane %v11521_v51, 4  ;;  %v661_v42 = vadd.f32 %v11318_v31, %v593_v2  ;;  %930 = vst [vmem:[#allocation2 + $0x140] sm:$0x1] %v929_v3 }
  0xc3   :  { %v1078_v55 = vor.u32 %v1076_v33, %v11514_v45  ;;  %v1079_v56 = vrot.slane %v11514_v45, 4  ;;  %v685_v62 = vmax.f32 %v621_v46, 0.0  ;;  %v594_v49 = vmul.f32 %v11313_v30, %v502_v4 }
  0xc4   :  { %5997 = vrot.lane.b32.xlu2 %v5867_v50, %s11159_s1  ;;  %v6376_v13 = vor.u32 %v6375_v63, %v6372_v52  ;;  %v1825_v19 = vsel %vm11344_vm7, %v1418_v0, %v1824_v61  ;;  %v725_v52 = vmax.f32 %v661_v42, 0.0 }
  0xc5   :  { %v1685_v5 = vsel %vm11344_vm7, %v1078_v55, %v1684_v40  ;;  %v962_v7 = vpack.c.bf16 %v685_v62, %v685_v62  ;;  %v5868_v8 = vld [vmem:[#allocation2 + $0x28] sm:$0xf]  ;;  %1826 = vst [vmem:[#allocation2 + $0x138] sm:$0xf] %v1825_v19 }
  0xc6   :  { %v11539_v12 = vld [vmem:[#allocation2 + $0x28] sm:$0xf]  ;;  %1686 = vst [vmem:[#allocation2 + $0x30] sm:$0xf] %v1685_v5  ;;  %5614 = vrot.lane.b32.xlu1 %v5397_v36, %s11161_s26  ;;  %v402_v57 = vpop.f32.mrf.mxu0  ;;  %v6377_v35 = vrot.slane %v6376_v13, 4  ;;  %v1002_v2 = vpack.c.bf16 %v725_v52, %v725_v52  ;;  %v11114_v52 = vld [vmem:[%s15941_s4 + $0x78] sm:$0xff] }
  0xc7   :  { %v5199_v14 = vld [vmem:[#allocation2 + $0x28] sm:$0xf]  ;;  %v6379_v21 = vshll.u32 %v11539_v12, 16  ;;  %v6383_v23 = vshrl.u32 %v11539_v12, 16  ;;  %v1081_v28 = vshrl.u32 %v962_v7, 16  ;;  %v1084_v29 = vshll.u32 %v962_v7, 16  ;;  %8930 = vmatpush.bf16.msrb.mxu2 %v11114_v52 }
  0xc8   :  { %v5400_v27 = vrot.slane %v5199_v14, 5  ;;  %v554_v33 = vmul.f32 %v11313_v30, %v402_v57  ;;  %v5200_v38 = vld [vmem:[#allocation2 + $0x2c] sm:$0x1]  ;;  %5999 = vrot.lane.b32.xlu0 %v5868_v8, %s11159_s1  ;;  %v7373_v47 = vld [vmem:[#allocation2 + $0x28] sm:$0xf]  ;;  %v1421_v19 = vshrl.u32 %v1002_v2, 16 }
  0xc9   :  { %v11547_v40 = vrot.slane %v6379_v21, 5  ;;  %v1083_v44 = vrot.slane %v1081_v28, 7  ;;  %v5403_v46 = vrot.slane %v5200_v38, 5  ;;  %v7374_v48 = vld [vmem:[#allocation2 + $0x2c] sm:$0x1]  ;;  %v7570_v54 = vrot.slane %v7373_v47, 5 }
  0xca   :  { %v5401_v36 = vsel %vm11416_vm15, %v10379_v53, %v5400_v27  ;;  %v5402_v43 = vrot.slane %v5400_v27, 4  ;;  %v622_v45 = vadd.f32 %v11318_v31, %v554_v33  ;;  %v10410_v53 = vrot.slane %v7372_v17, 9  ;;  %v776_v55 = vld [vmem:[#allocation2 + $0x48] sm:$0x1]  ;;  %v833_v7 = vld [vmem:[#allocation2 + $0x144] sm:$0x1]  ;;  %v504_v17 = vpop.f32.mrf.mxu3 }
  0xcb   :  { %v6382_v50 = vsel %vm11407_vm14, %v6377_v35, %v11547_v40  ;;  %v1086_v62 = vor.u32 %v1084_v29, %v1083_v44  ;;  %v1088_v63 = vrot.slane %v1083_v44, 4  ;;  %v7572_v4 = vrot.slane %v7570_v54, 4  ;;  %v6254_v14 = vld [vmem:[#allocation2 + $0x2c] sm:$0x1]  ;;  %v1691_v38 = vld [vmem:[#allocation2 + $0x3c] sm:$0xf] }
  0xcc   :  { %v686_v0 = vmax.f32 %v622_v45, 0.0  ;;  %7115 = vrot.lane.b32.xlu2 %v6368_v11, %s11160_s25  ;;  %v11561_v61 = vsel %vm11416_vm15, %v5402_v43, %v5403_v46  ;;  %v7571_v3 = vsel %vm11416_vm15, %v10410_v53, %v7570_v54  ;;  %v7573_v5 = vrot.slane %v7374_v48, 5 }
  0xcd   :  { %v1087_v8 = vsel %vm11367_vm9, %v1079_v56, %v1086_v62  ;;  %v1689_v12 = vsel %vm11278_vm3, %v1088_v63, %v1688_v37  ;;  %7851 = vst.msk [vmem:[#allocation3 + $0x20] sm:$0xf] %vm742_vm6, %v7571_v3  ;;  %v777_v11 = vsel %vm11278_vm3, 0, %v776_v55  ;;  %v1424_v21 = vshll.u32 %v1002_v2, 16  ;;  %v11577_v28 = vld [vmem:[#allocation2 + $0x30] sm:$0xf] }
  0xce   :  { %v963_v13 = vpack.c.bf16 %v686_v0, %v686_v0  ;;  %1687 = vst.msk [vmem:[#allocation2 + $0x34] sm:$0xf] %vm742_vm6, %v1087_v8  ;;  %7117 = vrot.lane.b32.xlu1 %v6382_v50, %s11160_s25  ;;  %v404_v57 = vpop.f32.mrf.mxu0  ;;  %v7574_v56 = vsel %vm11416_vm15, %v7572_v4, %v7573_v5  ;;  %v662_v27 = vadd.f32 %v11318_v31, %v594_v49  ;;  %v1828_v37 = vld [vmem:[#allocation2 + $0x140] sm:$0x1]  ;;  %v1423_v43 = vrot.slane %v1421_v19, 7  ;;  %v10987_v4 = vld [vmem:[%s15940_s0 + $0x90] sm:$0xff] }
  0xcf   :  { %1690 = vst [vmem:[#allocation2 + $0x38] sm:$0x1] %v1689_v12  ;;  %v555_v35 = vmul.f32 %v11313_v30, %v404_v57  ;;  %v595_v42 = vmul.f32 %v11313_v30, %v504_v17  ;;  %v834_v45 = vsel %vm11278_vm3, 0, %v833_v7  ;;  %v6385_v46 = vrot.slane %v6383_v23, 4  ;;  %v5869_v55 = vld [vmem:[#allocation2 + $0x30] sm:$0xf]  ;;  %10331 = vmatmul.msk.bf16.gmra.mxu2 %vm276_vm0, %v10987_v4 }
  0xd0   :  { %v1090_v29 = vshrl.u32 %v963_v13, 16  ;;  %v1093_v33 = vshll.u32 %v963_v13, 16  ;;  %7852 = vst.msk [vmem:[#allocation3 + $0x2c] sm:$0xf] %vm742_vm6, %v7574_v56  ;;  %v726_v44 = vmax.f32 %v662_v27, 0.0  ;;  %5616 = vrot.lane.b32.xlu0 %v5401_v36, %s11161_s26  ;;  %v6389_v49 = vshll.u32 %v6254_v14, 16 }
  0xd1   :  { %v623_v48 = vadd.f32 %v11318_v31, %v555_v35  ;;  %778 = vst [vmem:[#allocation2 + $0x48] sm:$0x1] %v777_v11  ;;  %v6394_v50 = vshrl.u32 %v11577_v28, 16  ;;  %v1426_v53 = vor.u32 %v1424_v21, %v1423_v43  ;;  %v1428_v54 = vrot.slane %v1423_v43, 4  ;;  %v10984_v36 = vld [vmem:[%s15940_s0 + $0x78] sm:$0xff] }
  0xd2   :  { %v11584_v47 = vrot.slane %v1090_v29, 7  ;;  %835 = vst [vmem:[#allocation2 + $0x144] sm:$0x1] %v834_v45  ;;  %v1003_v62 = vpack.c.bf16 %v726_v44, %v726_v44  ;;  %v6386_v23 = vor.u32 %v6385_v46, %v11547_v40  ;;  %v6391_v3 = vrot.slane %v6389_v49, 5  ;;  %10328 = vmatmul.msk.bf16.gmra.mxu1 %vm276_vm0, %v10984_v36  ;;  %v874_v35 = vld [vmem:[#allocation2 + $0x50] sm:$0x1] }
  0xd3   :  { %v687_v2 = vmax.f32 %v623_v48, 0.0  ;;  %v1427_v40 = vsel %vm11367_vm9, %v1419_v1, %v1426_v53  ;;  %v1829_v5 = vsel %vm11278_vm3, %v1428_v54, %v1828_v37  ;;  %v6396_v51 = vrot.slane %v6394_v50, 4  ;;  %v1695_v43 = vld [vmem:[#allocation2 + $0x44] sm:$0x1]  ;;  %v11113_v54 = vld [vmem:[%s15941_s4 + $0x70] sm:$0xff] }
  0xd4   :  { %v1095_v63 = vor.u32 %v1093_v33, %v11584_v47  ;;  %v1096_v0 = vrot.slane %v11584_v47, 4  ;;  %6001 = vrot.lane.b32.xlu2 %v5869_v55, %s11159_s1  ;;  %v1430_v7 = vshrl.u32 %v1003_v62, 16  ;;  %v1433_v8 = vshll.u32 %v1003_v62, 16  ;;  %1827 = vst.msk [vmem:[#allocation2 + $0x13c] sm:$0xf] %vm742_vm6, %v1427_v40  ;;  %8931 = vmatpush.bf16.msrb.mxu2 %v11113_v54 }
  0xd5   :  { %v964_v13 = vpack.c.bf16 %v687_v2, %v687_v2  ;;  %v10463_v11 = vld [vmem:[#allocation3 + $0x20] sm:$0xf]  ;;  %v5870_v14 = vld [vmem:[#allocation2 + $0x34] sm:$0xf]  ;;  %v6387_v17 = vrot.slane %v6386_v23, 4  ;;  %v6397_v21 = vshll.u32 %v11577_v28, 16  ;;  %v663_v37 = vadd.f32 %v11318_v31, %v595_v42 }
  0xd6   :  { %v1692_v12 = vsel %vm11344_vm7, %v1095_v63, %v1691_v38  ;;  %5618 = vrot.lane.b32.xlu1 %v11561_v61, %s11161_s26  ;;  %v407_v1 = vpop.f32.mrf.mxu0  ;;  %v11615_v57 = vrot.slane %v1430_v7, 7  ;;  %v11617_v19 = vld [vmem:[#allocation2 + $0x34] sm:$0xf]  ;;  %1830 = vst [vmem:[#allocation2 + $0x140] sm:$0x1] %v1829_v5  ;;  %v11622_v38 = vpop.f32.mrf.mxu3 }
  0xd7   :  { %1693 = vst [vmem:[#allocation2 + $0x3c] sm:$0xf] %v1692_v12  ;;  %v1098_v56 = vshrl.u32 %v964_v13, 16  ;;  %v1101_v27 = vshll.u32 %v964_v13, 16  ;;  %v11008_v29 = vld [vmem:[#allocation3 + $0x28] sm:$0xf0]  ;;  %v556_v33 = vmul.f32 %v11313_v30, %v407_v1  ;;  %v6392_v45 = vsel %vm11407_vm14, %v6387_v17, %v6391_v3 }
  0xd8   :  { %v10464_v61 = vor.u32 %v11008_v29, %v10463_v11  ;;  %v1435_v44 = vor.u32 %v1433_v8, %v11615_v57  ;;  %v6399_v46 = vrot.slane %v6397_v21, 5  ;;  %v5201_v28 = vld [vmem:[#allocation2 + $0x30] sm:$0xe]  ;;  %v5202_v48 = vld [vmem:[#allocation2 + $0x34] sm:$0xf]  ;;  %6003 = vrot.lane.b32.xlu0 %v5870_v14, %s11159_s1  ;;  %v1436_v52 = vrot.slane %v11615_v57, 4 }
  0xd9   :  { %v1100_v49 = vrot.slane %v1098_v56, 7  ;;  %v624_v50 = vadd.f32 %v11318_v31, %v556_v33  ;;  %v1831_v42 = vld [vmem:[#allocation2 + $0x144] sm:$0xf]  ;;  %v6403_v53 = vshll.u32 %v11617_v19, 16  ;;  %v6407_v23 = vshrl.u32 %v11617_v19, 16  ;;  %v11112_v57 = vld [vmem:[%s15941_s4 + $0x68] sm:$0xff] }
  0xda   :  { %10898 = vmatmul.msk.bf16.vlgmr.msrb.gmra.mxu3 %vm276_vm0, %v10464_v61  ;;  %v1832_v55 = vsel %vm11344_vm7, %v1435_v44, %v1831_v42  ;;  %v6400_v62 = vor.u32 %v6399_v46, %v6396_v51  ;;  %v5407_v36 = vrot.slane %v5202_v48, 5  ;;  %v931_v63 = vld [vmem:[#allocation2 + $0x14c] sm:$0x1]  ;;  %v11638_v2 = vld [vmem:[#allocation2 + $0x38] sm:$0x1]  ;;  %v10380_v12 = vrot.slane %v5201_v28, 9  ;;  %8932 = vmatpush.bf16.msrb.mxu2 %v11112_v57 }
  0xdb   :  { %v1103_v3 = vor.u32 %v1101_v27, %v1100_v49  ;;  %v1105_v4 = vrot.slane %v1100_v49, 4  ;;  %v688_v40 = vmax.f32 %v624_v50, 0.0  ;;  %1833 = vst [vmem:[#allocation2 + $0x144] sm:$0xf] %v1832_v55  ;;  %v11641_v5 = vrot.slane %v6403_v53, 5 }
  0xdc   :  { %7119 = vrot.lane.b32.xlu2 %v6392_v45, %s11160_s25  ;;  %v7375_v7 = vld [vmem:[#allocation2 + $0x30] sm:$0xe]  ;;  %v6401_v8 = vrot.slane %v6400_v62, 4  ;;  %v875_v13 = vsel %vm11288_vm5, 0, %v874_v35  ;;  %v727_v11 = vmax.f32 %v663_v37, 0.0  ;;  %v932_v21 = vsel %vm11288_vm5, 0, %v931_v63 }
  0xdd   :  { %v7376_v14 = vld [vmem:[#allocation2 + $0x34] sm:$0xf]  ;;  %v1104_v17 = vsel %vm11367_vm9, %v1096_v0, %v1103_v3  ;;  %v1696_v51 = vsel %vm11278_vm3, %v1105_v4, %v1695_v43  ;;  %v965_v1 = vpack.c.bf16 %v688_v40, %v688_v40  ;;  %876 = vst [vmem:[#allocation2 + $0x50] sm:$0x1] %v875_v13  ;;  %v7377_v56 = vld [vmem:[#allocation2 + $0x38] sm:$0x1]  ;;  %v5408_v47 = vsel %vm11416_vm15, %v10380_v12, %v5407_v36 }
  0xde   :  { %1694 = vst.msk [vmem:[#allocation2 + $0x40] sm:$0xf] %vm742_vm6, %v1104_v17  ;;  %v6406_v27 = vsel %vm11407_vm14, %v6401_v8, %v11641_v5  ;;  %v409_v29 = vpop.f32.mrf.mxu0  ;;  %v1004_v0 = vpack.c.bf16 %v727_v11, %v727_v11  ;;  %v5409_v33 = vrot.slane %v5407_v36, 4  ;;  %v779_v35 = vld [vmem:[#allocation2 + $0x54] sm:$0x1]  ;;  %v5410_v44 = vrot.slane %v11638_v2, 5  ;;  %v509_v36 = vpop.f32.mrf.mxu3 }
  0xdf   :  { %1697 = vst [vmem:[#allocation2 + $0x44] sm:$0x1] %v1696_v51  ;;  %v1107_v37 = vshrl.u32 %v965_v1, 16  ;;  %v1110_v43 = vshll.u32 %v965_v1, 16  ;;  %7121 = vrot.lane.b32.xlu1 %v6406_v27, %s11160_s25  ;;  %v557_v61 = vmul.f32 %v11313_v30, %v409_v29  ;;  %v1698_v45 = vld [vmem:[#allocation2 + $0x48] sm:$0xf]  ;;  %v596_v4 = vmul.f32 %v11313_v30, %v11622_v38 }
  0xe0   :  { %933 = vst [vmem:[#allocation2 + $0x14c] sm:$0x1] %v932_v21  ;;  %v1438_v46 = vshrl.u32 %v1004_v0, 16  ;;  %v1441_v28 = vshll.u32 %v1004_v0, 16  ;;  %v5871_v48 = vld [vmem:[#allocation2 + $0x3c] sm:$0xf]  ;;  %5620 = vrot.lane.b32.xlu0 %v5408_v47, %s11161_s26  ;;  %v5411_v47 = vsel %vm11416_vm15, %v5409_v33, %v5410_v44 }
  0xe1   :  { %v10411_v49 = vrot.slane %v7375_v7, 9  ;;  %v7577_v50 = vrot.slane %v7376_v14, 5  ;;  %v11662_v42 = vrot.slane %v1107_v37, 7  ;;  %v625_v53 = vadd.f32 %v11318_v31, %v557_v61  ;;  %v836_v62 = vld [vmem:[#allocation2 + $0x150] sm:$0x1]  ;;  %v10988_v11 = vld [vmem:[%s15940_s0 + $0x98] sm:$0xff] }
  0xe2   :  { %v7580_v54 = vrot.slane %v7377_v56, 5  ;;  %v780_v55 = vsel %vm11278_vm3, 0, %v779_v35  ;;  %v1440_v63 = vrot.slane %v1438_v46, 7  ;;  %v6257_v40 = vld [vmem:[#allocation2 + $0x38] sm:$0x1]  ;;  %v837_v13 = vsel %vm11278_vm3, 0, %v836_v62  ;;  %10332 = vmatmul.msk.bf16.gmra.mxu2 %vm276_vm0, %v10988_v11 }
  0xe3   :  { %v7578_v2 = vsel %vm11416_vm15, %v10411_v49, %v7577_v50  ;;  %v7579_v3 = vrot.slane %v7577_v50, 4  ;;  %781 = vst [vmem:[#allocation2 + $0x54] sm:$0x1] %v780_v55  ;;  %v1112_v7 = vor.u32 %v1110_v43, %v11662_v42  ;;  %v1113_v8 = vrot.slane %v11662_v42, 4  ;;  %v6258_v35 = vld [vmem:[#allocation2 + $0x3c] sm:$0xf] }
  0xe4   :  { %v689_v12 = vmax.f32 %v625_v53, 0.0  ;;  %6005 = vrot.lane.b32.xlu2 %v5871_v48, %s11159_s1  ;;  %7853 = vst.msk [vmem:[#allocation3 + $0x38] sm:$0xf] %vm742_vm6, %v7578_v2  ;;  %v1443_v14 = vor.u32 %v1441_v28, %v1440_v63  ;;  %v1445_v17 = vrot.slane %v1440_v63, 4  ;;  %v664_v38 = vadd.f32 %v11318_v31, %v596_v4  ;;  %v11699_v19 = vld [vmem:[%s15938_s2] ss:$0 sm:$0xff] }
  0xe5   :  { %v7581_v30 = vsel %vm11416_vm15, %v7579_v3, %v7580_v54  ;;  %838 = vst [vmem:[#allocation2 + $0x150] sm:$0x1] %v837_v13  ;;  %v1699_v51 = vsel %vm11344_vm7, %v1112_v7, %v1698_v45  ;;  %v5872_v21 = vld [vmem:[#allocation2 + $0x40] sm:$0xf]  ;;  %v6409_v56 = vrot.slane %v6407_v23, 4  ;;  %v6413_v27 = vshll.u32 %v6257_v40, 16 }
  0xe6   :  { %v966_v1 = vpack.c.bf16 %v689_v12, %v689_v12  ;;  %7854 = vst.msk [vmem:[#allocation3 + $0x44] sm:$0xf] %vm742_vm6, %v7581_v30  ;;  %v1444_v31 = vsel %vm11367_vm9, %v1436_v52, %v1443_v14  ;;  %v412_v29 = vpop.f32.mrf.mxu0  ;;  %v728_v0 = vmax.f32 %v664_v38, 0.0  ;;  %v597_v23 = vmul.f32 %v11699_v19, %v509_v36  ;;  %v1702_v44 = vld [vmem:[#allocation2 + $0x50] sm:$0x1]  ;;  %v11722_v11 = vpop.f32.mrf.mxu3 }
  0xe7   :  { %1700 = vst [vmem:[#allocation2 + $0x48] sm:$0xf] %v1699_v51  ;;  %v1835_v52 = vld [vmem:[#allocation2 + $0x14c] sm:$0x1]  ;;  %5622 = vrot.lane.b32.xlu1 %v5411_v47, %s11161_s26  ;;  %v558_v33 = vmul.f32 %v11699_v19, %v412_v29  ;;  %v6410_v61 = vor.u32 %v6409_v56, %v11641_v5  ;;  %v6415_v28 = vrot.slane %v6413_v27, 5  ;;  %v6418_v48 = vshrl.u32 %v6258_v35, 16 }
  0xe8   :  { %v1115_v37 = vshrl.u32 %v966_v1, 16  ;;  %v1118_v43 = vshll.u32 %v966_v1, 16  ;;  %1834 = vst.msk [vmem:[#allocation2 + $0x148] sm:$0xf] %vm742_vm6, %v1444_v31  ;;  %v1836_v45 = vsel %vm11278_vm3, %v1445_v17, %v1835_v52  ;;  %v1005_v46 = vpack.c.bf16 %v728_v0, %v728_v0  ;;  %6007 = vrot.lane.b32.xlu0 %v5872_v21, %s11159_s1  ;;  %v11715_v50 = vld [vmem:[%s15939_s3] ss:$0 sm:$0xff] }
  0xe9   :  { %1837 = vst [vmem:[#allocation2 + $0x14c] sm:$0x1] %v1836_v45  ;;  %v626_v53 = vadd.f32 %v11715_v50, %v558_v33  ;;  %v6411_v5 = vrot.slane %v6410_v61, 4  ;;  %v11718_v54 = vld [vmem:[#allocation2 + $0x40] sm:$0xf]  ;;  %v6420_v36 = vrot.slane %v6418_v48, 4  ;;  %v665_v51 = vadd.f32 %v11715_v50, %v597_v23 }
  0xea   :  { %v1117_v49 = vrot.slane %v1115_v37, 7  ;;  %v1447_v55 = vshrl.u32 %v1005_v46, 16  ;;  %v1450_v62 = vshll.u32 %v1005_v46, 16  ;;  %v6421_v63 = vshll.u32 %v6258_v35, 16  ;;  %v5204_v2 = vld [vmem:[#allocation2 + $0x3c] sm:$0xe] }
  0xeb   :  { %v10475_v40 = vld [vmem:[#allocation3 + $0x38] sm:$0xf]  ;;  %v690_v7 = vmax.f32 %v626_v53, 0.0  ;;  %v6416_v12 = vsel %vm11407_vm14, %v6411_v5, %v6415_v28  ;;  %v5205_v13 = vld [vmem:[#allocation2 + $0x40] sm:$0xf]  ;;  %v6427_v38 = vshll.u32 %v11718_v54, 16 }
  0xec   :  { %v1120_v3 = vor.u32 %v1118_v43, %v1117_v49  ;;  %v1122_v4 = vrot.slane %v1117_v49, 4  ;;  %v11724_v17 = vrot.slane %v1447_v55, 7  ;;  %7123 = vrot.lane.b32.xlu2 %v6416_v12, %s11160_s25  ;;  %v6423_v30 = vrot.slane %v6421_v63, 5  ;;  %v1838_v31 = vld [vmem:[#allocation2 + $0x150] sm:$0xf] }
  0xed   :  { %v11011_v14 = vld [vmem:[#allocation3 + $0x40] sm:$0xf0]  ;;  %v967_v27 = vpack.c.bf16 %v690_v7, %v690_v7  ;;  %v877_v47 = vld [vmem:[#allocation2 + $0x5c] sm:$0x1]  ;;  %v934_v29 = vld [vmem:[#allocation2 + $0x158] sm:$0x1] }
  0xee   :  { %v1121_v1 = vsel %vm11367_vm9, %v1113_v8, %v1120_v3  ;;  %v1703_v21 = vsel %vm11278_vm3, %v1122_v4, %v1702_v44  ;;  %v10476_v56 = vor.u32 %v11011_v14, %v10475_v40  ;;  %v1452_v0 = vor.u32 %v1450_v62, %v11724_v17  ;;  %v414_v23 = vpop.f32.mrf.mxu0  ;;  %v11740_v37 = vld [vmem:[#allocation2 + $0x44] sm:$0x1]  ;;  %v1705_v61 = vld [vmem:[#allocation2 + $0x54] sm:$0xf]  ;;  %v7378_v48 = vld [vmem:[#allocation2 + $0x3c] sm:$0xe] }
  0xef   :  { %1701 = vst.msk [vmem:[#allocation2 + $0x4c] sm:$0xf] %vm742_vm6, %v1121_v1  ;;  %v6424_v35 = vor.u32 %v6423_v30, %v6420_v36  ;;  %v11737_v57 = vrot.slane %v6427_v38, 5  ;;  %v6431_v42 = vshrl.u32 %v11718_v54, 16  ;;  %v1124_v8 = vshrl.u32 %v967_v27, 16  ;;  %v10985_v36 = vld [vmem:[%s15940_s0 + $0x80] sm:$0xff] }
  0xf0   :  { %1704 = vst [vmem:[#allocation2 + $0x50] sm:$0x1] %v1703_v21  ;;  %10899 = vmatmul.msk.bf16.gmra.mxu3 %vm276_vm0, %v10476_v56  ;;  %v1127_v43 = vshll.u32 %v967_v27, 16  ;;  %v10381_v52 = vrot.slane %v5204_v2, 9  ;;  %v5414_v33 = vrot.slane %v5205_v13, 5  ;;  %v1839_v44 = vsel %vm11344_vm7, %v1452_v0, %v1838_v31  ;;  %10329 = vmatmul.msk.bf16.gmra.mxu1 %vm276_vm0, %v10985_v36  ;;  %v11111_v36 = vld [vmem:[%s15941_s4 + $0x60] sm:$0xff] }
  0xf1   :  { %v6425_v45 = vrot.slane %v6424_v35, 4  ;;  %v559_v46 = vmul.f32 %v11699_v19, %v414_v23  ;;  %v878_v28 = vsel %vm11288_vm5, 0, %v877_v47  ;;  %v7379_v49 = vld [vmem:[#allocation2 + $0x40] sm:$0xf]  ;;  %v11748_v53 = vrot.slane %v1124_v8, 7  ;;  %8933 = vmatpush.bf16.msrb.mxu2 %v11111_v36 }
  0xf2   :  { %1840 = vst [vmem:[#allocation2 + $0x150] sm:$0xf] %v1839_v44  ;;  %v5415_v5 = vsel %vm11416_vm15, %v10381_v52, %v5414_v33  ;;  %v729_v54 = vmax.f32 %v665_v51, 0.0  ;;  %v935_v55 = vsel %vm11288_vm5, 0, %v934_v29  ;;  %v5873_v62 = vld [vmem:[#allocation2 + $0x48] sm:$0xf]  ;;  %v514_v29 = vpop.f32.mrf.mxu3 }
  0xf3   :  { %v1453_v63 = vrot.slane %v11724_v17, 4  ;;  %v6430_v2 = vsel %vm11407_vm14, %v6425_v45, %v11737_v57  ;;  %5624 = vrot.lane.b32.xlu0 %v5415_v5, %s11161_s26  ;;  %v627_v3 = vadd.f32 %v11715_v50, %v559_v46  ;;  %879 = vst [vmem:[#allocation2 + $0x5c] sm:$0x1] %v878_v28  ;;  %v5416_v4 = vrot.slane %v5414_v33, 4  ;;  %v7380_v40 = vld [vmem:[#allocation2 + $0x44] sm:$0x1] }
  0xf4   :  { %v1129_v7 = vor.u32 %v1127_v43, %v11748_v53  ;;  %v1130_v12 = vrot.slane %v11748_v53, 4  ;;  %7125 = vrot.lane.b32.xlu1 %v6430_v2, %s11160_s25  ;;  %936 = vst [vmem:[#allocation2 + $0x158] sm:$0x1] %v935_v55  ;;  %v1006_v13 = vpack.c.bf16 %v729_v54, %v729_v54  ;;  %v5417_v14 = vrot.slane %v11740_v37, 5  ;;  %v782_v17 = vld [vmem:[#allocation2 + $0x60] sm:$0x1]  ;;  %6009 = vrot.lane.b32.xlu2 %v5873_v62, %s11159_s1 }
  0xf5   :  { %v691_v30 = vmax.f32 %v627_v3, 0.0  ;;  %v10412_v38 = vrot.slane %v7378_v48, 9  ;;  %v7584_v51 = vrot.slane %v7379_v49, 5  ;;  %v7587_v1 = vrot.slane %v7380_v40, 5  ;;  %v839_v21 = vld [vmem:[#allocation2 + $0x15c] sm:$0x1] }
  0xf6   :  { %v1706_v56 = vsel %vm11344_vm7, %v1129_v7, %v1705_v61  ;;  %v1455_v27 = vshrl.u32 %v1006_v13, 16  ;;  %v1458_v31 = vshll.u32 %v1006_v13, 16  ;;  %v783_v47 = vsel %vm11278_vm3, 0, %v782_v17  ;;  %v5874_v37 = vld [vmem:[#allocation2 + $0x4c] sm:$0xf]  ;;  %v417_v8 = vpop.f32.mrf.mxu0  ;;  %v10989_v45 = vld [vmem:[%s15940_s0 + $0xa0] sm:$0xff] }
  0xf7   :  { %1707 = vst [vmem:[#allocation2 + $0x54] sm:$0xf] %v1706_v56  ;;  %v968_v0 = vpack.c.bf16 %v691_v30, %v691_v30  ;;  %v7585_v35 = vsel %vm11416_vm15, %v10412_v38, %v7584_v51  ;;  %v7586_v23 = vrot.slane %v7584_v51, 4  ;;  %v598_v43 = vmul.f32 %v11699_v19, %v11722_v11  ;;  %v6260_v49 = vld [vmem:[#allocation2 + $0x44] sm:$0x1]  ;;  %10333 = vmatmul.msk.bf16.gmra.mxu2 %vm276_vm0, %v10989_v45 }
  0xf8   :  { %v1457_v52 = vrot.slane %v1455_v27, 7  ;;  %7855 = vst.msk [vmem:[#allocation3 + $0x50] sm:$0xf] %vm742_vm6, %v7585_v35  ;;  %v560_v33 = vmul.f32 %v11699_v19, %v417_v8  ;;  %v840_v61 = vsel %vm11278_vm3, 0, %v839_v21  ;;  %v6433_v44 = vrot.slane %v6431_v42, 4 }
  0xf9   :  { %v1132_v46 = vshrl.u32 %v968_v0, 16  ;;  %v1135_v28 = vshll.u32 %v968_v0, 16  ;;  %v7588_v48 = vsel %vm11416_vm15, %v7586_v23, %v7587_v1  ;;  %784 = vst [vmem:[#allocation2 + $0x60] sm:$0x1] %v783_v47  ;;  %v666_v11 = vadd.f32 %v11715_v50, %v598_v43  ;;  %v6261_v62 = vld [vmem:[#allocation2 + $0x48] sm:$0xf] }
  0xfa   :  { %v1460_v5 = vor.u32 %v1458_v31, %v1457_v52  ;;  %v1462_v54 = vrot.slane %v1457_v52, 4  ;;  %7856 = vst.msk [vmem:[#allocation3 + $0x5c] sm:$0xf] %vm742_vm6, %v7588_v48  ;;  %v628_v55 = vadd.f32 %v11715_v50, %v560_v33  ;;  %v6434_v42 = vor.u32 %v6433_v44, %v11737_v57  ;;  %v1709_v17 = vld [vmem:[#allocation2 + $0x5c] sm:$0x1]  ;;  %v517_v45 = vpop.f32.mrf.mxu3 }
  0xfb   :  { %v1134_v2 = vrot.slane %v1132_v46, 7  ;;  %v1842_v3 = vld [vmem:[#allocation2 + $0x158] sm:$0x1]  ;;  %v5418_v40 = vsel %vm11416_vm15, %v5416_v4, %v5417_v14  ;;  %6011 = vrot.lane.b32.xlu0 %v5874_v37, %s11159_s1  ;;  %v730_v7 = vmax.f32 %v666_v11, 0.0  ;;  %841 = vst [vmem:[#allocation2 + $0x15c] sm:$0x1] %v840_v61  ;;  %v599_v13 = vmul.f32 %v11699_v19, %v514_v29 }
  0xfc   :  { %v1461_v57 = vsel %vm11367_vm9, %v1453_v63, %v1460_v5  ;;  %v1843_v30 = vsel %vm11278_vm3, %v1462_v54, %v1842_v3  ;;  %5626 = vrot.lane.b32.xlu1 %v5418_v40, %s11161_s26  ;;  %v692_v38 = vmax.f32 %v628_v55, 0.0  ;;  %v6435_v51 = vrot.slane %v6434_v42, 4  ;;  %v11803_v1 = vld [vmem:[#allocation2 + $0x4c] sm:$0xf]  ;;  %v5207_v33 = vld [vmem:[#allocation2 + $0x48] sm:$0xe] }
  0xfd   :  { %v1137_v4 = vor.u32 %v1135_v28, %v1134_v2  ;;  %v1139_v14 = vrot.slane %v1134_v2, 4  ;;  %1841 = vst.msk [vmem:[#allocation2 + $0x154] sm:$0xf] %vm742_vm6, %v1461_v57  ;;  %v1007_v21 = vpack.c.bf16 %v730_v7, %v730_v7  ;;  %v6437_v56 = vshll.u32 %v6260_v49, 16  ;;  %v5208_v61 = vld [vmem:[#allocation2 + $0x4c] sm:$0xf] }
  0xfe   :  { %1844 = vst [vmem:[#allocation2 + $0x158] sm:$0x1] %v1843_v30  ;;  %v969_v27 = vpack.c.bf16 %v692_v38, %v692_v38  ;;  %v6442_v31 = vshrl.u32 %v6261_v62, 16  ;;  %v6445_v63 = vshll.u32 %v6261_v62, 16  ;;  %v6451_v47 = vshll.u32 %v11803_v1, 16  ;;  %v419_v37 = vpop.f32.mrf.mxu0 }
  0xff   :  { %v1138_v29 = vsel %vm11367_vm9, %v1130_v12, %v1137_v4  ;;  %v1710_v0 = vsel %vm11278_vm3, %v1139_v14, %v1709_v17  ;;  %v1464_v35 = vshrl.u32 %v1007_v21, 16  ;;  %v1467_v23 = vshll.u32 %v1007_v21, 16  ;;  %v10487_v8 = vld [vmem:[#allocation3 + $0x50] sm:$0xf]  ;;  %v880_v28 = vld [vmem:[#allocation2 + $0x68] sm:$0x1] }
 0x100   :  { %1708 = vst.msk [vmem:[#allocation2 + $0x58] sm:$0xf] %vm742_vm6, %v1138_v29  ;;  %v1141_v43 = vshrl.u32 %v969_v27, 16  ;;  %v1144_v52 = vshll.u32 %v969_v27, 16  ;;  %v561_v44 = vmul.f32 %v11699_v19, %v419_v37  ;;  %v6439_v12 = vrot.slane %v6437_v56, 5 }
 0x101   :  { %1711 = vst [vmem:[#allocation2 + $0x5c] sm:$0x1] %v1710_v0  ;;  %v11014_v53 = vld [vmem:[#allocation3 + $0x58] sm:$0xf0]  ;;  %v11815_v46 = vrot.slane %v1464_v35, 7  ;;  %v667_v48 = vadd.f32 %v11715_v50, %v599_v13  ;;  %v11819_v11 = vmul.f32 %v11699_v19, %v517_v45  ;;  %v6444_v55 = vrot.slane %v6442_v31, 4 }
 0x102   :  { %v10488_v49 = vor.u32 %v11014_v53, %v10487_v8  ;;  %v11821_v5 = vrot.slane %v1141_v43, 7  ;;  %v1845_v54 = vld [vmem:[#allocation2 + $0x15c] sm:$0xf]  ;;  %v6447_v42 = vrot.slane %v6445_v63, 5  ;;  %v1712_v62 = vld [vmem:[#allocation2 + $0x60] sm:$0xf]  ;;  %v6440_v3 = vsel %vm11407_vm14, %v6435_v51, %v6439_v12 }
 0x103   :  { %v1469_v36 = vor.u32 %v1467_v23, %v11815_v46  ;;  %v1470_v2 = vrot.slane %v11815_v46, 4  ;;  %v11827_v40 = vrot.slane %v6451_v47, 5  ;;  %v937_v7 = vld [vmem:[#allocation2 + $0x164] sm:$0x1]  ;;  %7127 = vrot.lane.b32.xlu2 %v6440_v3, %s11160_s25  ;;  %v6455_v30 = vshrl.u32 %v11803_v1, 16  ;;  %v11110_v43 = vld [vmem:[%s15941_s4 + $0x58] sm:$0xff] }
 0x104   :  { %10900 = vmatmul.msk.bf16.gmra.mxu3 %vm276_vm0, %v10488_v49  ;;  %v1146_v13 = vor.u32 %v1144_v52, %v11821_v5  ;;  %v1147_v17 = vrot.slane %v11821_v5, 4  ;;  %v6448_v57 = vor.u32 %v6447_v42, %v6444_v55  ;;  %v5209_v38 = vld [vmem:[#allocation2 + $0x50] sm:$0x1]  ;;  %v7381_v4 = vld [vmem:[#allocation2 + $0x48] sm:$0xe]  ;;  %v10382_v51 = vrot.slane %v5207_v33, 9  ;;  %8934 = vmatpush.bf16.msrb.mxu2 %v11110_v43 }
 0x105   :  { %v1846_v14 = vsel %vm11344_vm7, %v1469_v36, %v1845_v54  ;;  %v5421_v21 = vrot.slane %v5208_v61, 5  ;;  %v629_v56 = vadd.f32 %v11715_v50, %v561_v44  ;;  %v7382_v27 = vld [vmem:[#allocation2 + $0x4c] sm:$0xf]  ;;  %v7383_v31 = vld [vmem:[#allocation2 + $0x50] sm:$0x1]  ;;  %v881_v29 = vsel %vm11288_vm5, 0, %v880_v28 }
 0x106   :  { %v1713_v63 = vsel %vm11344_vm7, %v1146_v13, %v1712_v62  ;;  %1847 = vst [vmem:[#allocation2 + $0x15c] sm:$0xf] %v1846_v14  ;;  %v6449_v47 = vrot.slane %v6448_v57, 4  ;;  %v731_v1 = vmax.f32 %v667_v48, 0.0  ;;  %v938_v23 = vsel %vm11288_vm5, 0, %v937_v7  ;;  %v422_v8 = vpop.f32.mrf.mxu0 }
 0x107   :  { %1714 = vst [vmem:[#allocation2 + $0x60] sm:$0xf] %v1713_v63  ;;  %v5422_v0 = vsel %vm11416_vm15, %v10382_v51, %v5421_v21  ;;  %v693_v35 = vmax.f32 %v629_v56, 0.0  ;;  %v5423_v37 = vrot.slane %v5421_v21, 4  ;;  %v5424_v61 = vrot.slane %v5209_v38, 5 }
 0x108   :  { %v6454_v52 = vsel %vm11407_vm14, %v6449_v47, %v11827_v40  ;;  %5628 = vrot.lane.b32.xlu0 %v5422_v0, %s11161_s26  ;;  %882 = vst [vmem:[#allocation2 + $0x68] sm:$0x1] %v881_v29  ;;  %v1008_v33 = vpack.c.bf16 %v731_v1, %v731_v1  ;;  %v10413_v44 = vrot.slane %v7381_v4, 9  ;;  %v5875_v53 = vld [vmem:[#allocation2 + $0x54] sm:$0xf]  ;;  %v7591_v12 = vrot.slane %v7382_v27, 5  ;;  %v519_v27 = vpop.f32.mrf.mxu3 }
 0x109   :  { %7129 = vrot.lane.b32.xlu1 %v6454_v52, %s11160_s25  ;;  %v970_v45 = vpack.c.bf16 %v693_v35, %v693_v35  ;;  %939 = vst [vmem:[#allocation2 + $0x164] sm:$0x1] %v938_v23  ;;  %v7594_v28 = vrot.slane %v7383_v31, 5  ;;  %v562_v48 = vmul.f32 %v11699_v19, %v422_v8  ;;  %v785_v49 = vld [vmem:[#allocation2 + $0x6c] sm:$0x1]  ;;  %v5425_v42 = vsel %vm11416_vm15, %v5423_v37, %v5424_v61 }
 0x10a   :  { %v1472_v54 = vshrl.u32 %v1008_v33, 16  ;;  %v1475_v55 = vshll.u32 %v1008_v33, 16  ;;  %v786_v62 = vsel %vm11278_vm3, 0, %v785_v49  ;;  %v842_v36 = vld [vmem:[#allocation2 + $0x168] sm:$0x1]  ;;  %v7592_v13 = vsel %vm11416_vm15, %v10413_v44, %v7591_v12 }
 0x10b   :  { %v1149_v3 = vshrl.u32 %v970_v45, 16  ;;  %v1152_v7 = vshll.u32 %v970_v45, 16  ;;  %v7593_v57 = vrot.slane %v7591_v12, 4  ;;  %v5876_v38 = vld [vmem:[#allocation2 + $0x58] sm:$0xf]  ;;  %6013 = vrot.lane.b32.xlu2 %v5875_v53, %s11159_s1  ;;  %v630_v14 = vadd.f32 %v11715_v50, %v562_v48 }
 0x10c   :  { %787 = vst [vmem:[#allocation2 + $0x6c] sm:$0x1] %v786_v62  ;;  %v1474_v4 = vrot.slane %v1472_v54, 7  ;;  %v668_v51 = vadd.f32 %v11715_v50, %v11819_v11  ;;  %v843_v21 = vsel %vm11278_vm3, 0, %v842_v36  ;;  %v6263_v56 = vld [vmem:[#allocation2 + $0x50] sm:$0x1]  ;;  %v432_v62 = vpop.f32.mrf.mxu1 }
 0x10d   :  { %7857 = vst.msk [vmem:[#allocation3 + $0x68] sm:$0xf] %vm742_vm6, %v7592_v13  ;;  %v1151_v31 = vrot.slane %v1149_v3, 7  ;;  %v7595_v63 = vsel %vm11416_vm15, %v7593_v57, %v7594_v28  ;;  %v6457_v47 = vrot.slane %v6455_v30, 4  ;;  %v6461_v29 = vshll.u32 %v6263_v56, 16 }
 0x10e   :  { %844 = vst [vmem:[#allocation2 + $0x168] sm:$0x1] %v843_v21  ;;  %v1477_v1 = vor.u32 %v1475_v55, %v1474_v4  ;;  %v1479_v0 = vrot.slane %v1474_v4, 4  ;;  %v694_v35 = vmax.f32 %v630_v14, 0.0  ;;  %v732_v23 = vmax.f32 %v668_v51, 0.0  ;;  %v424_v61 = vpop.f32.mrf.mxu0 }
 0x10f   :  { %7858 = vst.msk [vmem:[#allocation3 + $0x74] sm:$0xf] %vm742_vm6, %v7595_v63  ;;  %v1154_v37 = vor.u32 %v1152_v7, %v1151_v31  ;;  %v1156_v11 = vrot.slane %v1151_v31, 4  ;;  %v1716_v8 = vld [vmem:[#allocation2 + $0x68] sm:$0x1]  ;;  %v6458_v43 = vor.u32 %v6457_v47, %v11827_v40  ;;  %v6463_v52 = vrot.slane %v6461_v29, 5 }
 0x110   :  { %v6264_v33 = vld [vmem:[#allocation2 + $0x54] sm:$0xf]  ;;  %v1478_v30 = vsel %vm11367_vm9, %v1470_v2, %v1477_v1  ;;  %v1849_v44 = vld [vmem:[#allocation2 + $0x164] sm:$0x1]  ;;  %6015 = vrot.lane.b32.xlu0 %v5876_v38, %s11159_s1  ;;  %v971_v45 = vpack.c.bf16 %v694_v35, %v694_v35  ;;  %v1009_v53 = vpack.c.bf16 %v732_v23, %v732_v23  ;;  %v11886_v48 = vld [vmem:[#allocation2 + $0x58] sm:$0xf]  ;;  %v601_v55 = vmul.f32 %v11699_v19, %v519_v27 }
 0x111   :  { %v6466_v12 = vshrl.u32 %v6264_v33, 16  ;;  %v1155_v28 = vsel %vm11367_vm9, %v1147_v17, %v1154_v37  ;;  %v1717_v40 = vsel %vm11278_vm3, %v1156_v11, %v1716_v8  ;;  %1848 = vst.msk [vmem:[#allocation2 + $0x160] sm:$0xf] %vm742_vm6, %v1478_v30  ;;  %v1850_v46 = vsel %vm11278_vm3, %v1479_v0, %v1849_v44  ;;  %5630 = vrot.lane.b32.xlu1 %v5425_v42, %s11161_s26  ;;  %v5210_v54 = vld [vmem:[#allocation2 + $0x54] sm:$0xe]  ;;  %v522_v11 = vpop.f32.mrf.mxu3  ;;  %v10990_v30 = vld [vmem:[%s15940_s0 + $0xa8] sm:$0xff] }
 0x112   :  { %v6459_v2 = vrot.slane %v6458_v43, 4  ;;  %1715 = vst.msk [vmem:[#allocation2 + $0x64] sm:$0xf] %vm742_vm6, %v1155_v28  ;;  %v1158_v49 = vshrl.u32 %v971_v45, 16  ;;  %v1161_v5 = vshll.u32 %v971_v45, 16  ;;  %v563_v17 = vmul.f32 %v11699_v19, %v424_v61  ;;  %10334 = vmatmul.msk.bf16.gmra.mxu2 %vm276_vm0, %v10990_v30 }
 0x113   :  { %1718 = vst [vmem:[#allocation2 + $0x68] sm:$0x1] %v1717_v40  ;;  %v1719_v3 = vld [vmem:[#allocation2 + $0x6c] sm:$0xf]  ;;  %v1481_v7 = vshrl.u32 %v1009_v53, 16  ;;  %v1484_v13 = vshll.u32 %v1009_v53, 16  ;;  %v566_v57 = vmul.f32 %v11699_v19, %v432_v62  ;;  %v669_v21 = vadd.f32 %v11715_v50, %v601_v55 }
 0x114   :  { %v10499_v36 = vld [vmem:[#allocation3 + $0x68] sm:$0xf]  ;;  %v6464_v42 = vsel %vm11407_vm14, %v6459_v2, %v6463_v52  ;;  %1851 = vst [vmem:[#allocation2 + $0x164] sm:$0x1] %v1850_v46  ;;  %v11894_v38 = vrot.slane %v1158_v49, 7  ;;  %v6468_v14 = vrot.slane %v6466_v12, 4  ;;  %v631_v51 = vadd.f32 %v11715_v50, %v563_v17 }
 0x115   :  { %v1852_v4 = vld [vmem:[#allocation2 + $0x168] sm:$0xf]  ;;  %7131 = vrot.lane.b32.xlu2 %v6464_v42, %s11160_s25  ;;  %v11899_v27 = vrot.slane %v1481_v7, 7  ;;  %v6469_v31 = vshll.u32 %v6264_v33, 16  ;;  %v6475_v63 = vshll.u32 %v11886_v48, 16  ;;  %v6479_v47 = vshrl.u32 %v11886_v48, 16 }
 0x116   :  { %v11017_v56 = vld [vmem:[#allocation3 + $0x70] sm:$0xf0]  ;;  %v1163_v1 = vor.u32 %v1161_v5, %v11894_v38  ;;  %v1164_v0 = vrot.slane %v11894_v38, 4  ;;  %v5211_v35 = vld [vmem:[#allocation2 + $0x58] sm:$0xf]  ;;  %v10383_v23 = vrot.slane %v5210_v54, 9  ;;  %v634_v62 = vadd.f32 %v11715_v50, %v566_v57 }
 0x117   :  { %v10500_v29 = vor.u32 %v11017_v56, %v10499_v36  ;;  %v883_v37 = vld [vmem:[#allocation2 + $0x74] sm:$0x1]  ;;  %v1486_v8 = vor.u32 %v1484_v13, %v11899_v27  ;;  %v1487_v43 = vrot.slane %v11899_v27, 4  ;;  %v6471_v52 = vrot.slane %v6469_v31, 5  ;;  %v940_v33 = vld [vmem:[#allocation2 + $0x170] sm:$0x1]  ;;  %v434_v56 = vpop.f32.mrf.mxu1 }
 0x118   :  { %v11907_v61 = vrot.slane %v6475_v63, 5  ;;  %v1720_v44 = vsel %vm11344_vm7, %v1163_v1, %v1719_v3  ;;  %v5428_v45 = vrot.slane %v5211_v35, 5  ;;  %v695_v53 = vmax.f32 %v631_v51, 0.0  ;;  %v791_v28 = vld [vmem:[#allocation2 + $0x84] sm:$0x1]  ;;  %v11109_v40 = vld [vmem:[%s15941_s4 + $0x50] sm:$0xff] }
 0x119   :  { %10901 = vmatmul.msk.bf16.gmra.mxu3 %vm276_vm0, %v10500_v29  ;;  %v884_v12 = vsel %vm11288_vm5, 0, %v883_v37  ;;  %1721 = vst [vmem:[#allocation2 + $0x6c] sm:$0xf] %v1720_v44  ;;  %v1853_v46 = vsel %vm11344_vm7, %v1486_v8, %v1852_v4  ;;  %v6472_v2 = vor.u32 %v6471_v52, %v6468_v14  ;;  %v733_v49 = vmax.f32 %v669_v21, 0.0  ;;  %v5212_v54 = vld [vmem:[#allocation2 + $0x5c] sm:$0x1]  ;;  %8935 = vmatpush.bf16.msrb.mxu2 %v11109_v40 }
 0x11a   :  { %v941_v5 = vsel %vm11288_vm5, 0, %v940_v33  ;;  %1854 = vst [vmem:[#allocation2 + $0x168] sm:$0xf] %v1853_v46  ;;  %v5429_v17 = vsel %vm11416_vm15, %v10383_v23, %v5428_v45  ;;  %v972_v55 = vpack.c.bf16 %v695_v53, %v695_v53  ;;  %v792_v36 = vsel %vm11278_vm3, 0, %v791_v28  ;;  %v5877_v3 = vld [vmem:[#allocation2 + $0x60] sm:$0xf] }
 0x11b   :  { %v6473_v7 = vrot.slane %v6472_v2, 4  ;;  %5632 = vrot.lane.b32.xlu0 %v5429_v17, %s11161_s26  ;;  %885 = vst [vmem:[#allocation2 + $0x74] sm:$0x1] %v884_v12  ;;  %v1010_v13 = vpack.c.bf16 %v733_v49, %v733_v49  ;;  %v5430_v42 = vrot.slane %v5428_v45, 4  ;;  %v5431_v4 = vrot.slane %v5212_v54, 5  ;;  %v524_v54 = vpop.f32.mrf.mxu3 }
 0x11c   :  { %v1166_v14 = vshrl.u32 %v972_v55, 16  ;;  %v1169_v51 = vshll.u32 %v972_v55, 16  ;;  %942 = vst [vmem:[#allocation2 + $0x170] sm:$0x1] %v941_v5  ;;  %v698_v21 = vmax.f32 %v634_v62, 0.0  ;;  %v602_v57 = vmul.f32 %v11699_v19, %v522_v11  ;;  %v11941_v5 = vpop.permute.xlu0 %6027 }
 0x11d   :  { %6017 = vrot.lane.b32.xlu2 %v5877_v3, %s11159_s1  ;;  %v6478_v31 = vsel %vm11407_vm14, %v6473_v7, %v11907_v61  ;;  %v1489_v63 = vshrl.u32 %v1010_v13, 16  ;;  %v1492_v29 = vshll.u32 %v1010_v13, 16  ;;  %793 = vst [vmem:[#allocation2 + $0x84] sm:$0x1] %v792_v36  ;;  %v5432_v1 = vsel %vm11416_vm15, %v5430_v42, %v5431_v4  ;;  %v7384_v35 = vld [vmem:[#allocation2 + $0x54] sm:$0xe] }
 0x11e   :  { %7133 = vrot.lane.b32.xlu1 %v6478_v31, %s11160_s25  ;;  %v1168_v23 = vrot.slane %v1166_v14, 7  ;;  %v975_v37 = vpack.c.bf16 %v698_v21, %v698_v21  ;;  %v7385_v8 = vld [vmem:[#allocation2 + $0x58] sm:$0xf]  ;;  %v7386_v52 = vld [vmem:[#allocation2 + $0x5c] sm:$0x1]  ;;  %v10414_v33 = vrot.slane %v7384_v35, 9  ;;  %v670_v11 = vadd.f32 %v11715_v50, %v602_v57  ;;  %v11965_v31 = vpop.permute.xlu2 %6025 }
 0x11f   :  { %v1491_v30 = vrot.slane %v1489_v63, 7  ;;  %v7598_v44 = vrot.slane %v7385_v8, 5  ;;  %v7601_v45 = vrot.slane %v7386_v52, 5  ;;  %v5878_v53 = vld [vmem:[#allocation2 + $0x64] sm:$0xf]  ;;  %v567_v12 = vmul.f32 %v11699_v19, %v434_v56 }
 0x120   :  { %v1171_v28 = vor.u32 %v1169_v51, %v1168_v23  ;;  %v1173_v40 = vrot.slane %v1168_v23, 4  ;;  %v1192_v46 = vshrl.u32 %v975_v37, 16  ;;  %v1195_v2 = vshll.u32 %v975_v37, 16  ;;  %v845_v49 = vld [vmem:[#allocation2 + $0x174] sm:$0x1] }
 0x121   :  { %v1494_v17 = vor.u32 %v1492_v29, %v1491_v30  ;;  %v1496_v55 = vrot.slane %v1491_v30, 4  ;;  %v7599_v62 = vsel %vm11416_vm15, %v10414_v33, %v7598_v44  ;;  %v7600_v36 = vrot.slane %v7598_v44, 4  ;;  %v889_v3 = vld [vmem:[#allocation2 + $0x8c] sm:$0x1]  ;;  %v6266_v7 = vld [vmem:[#allocation2 + $0x5c] sm:$0x1] }
 0x122   :  { %v1172_v13 = vsel %vm11367_vm9, %v1164_v0, %v1171_v28  ;;  %v1723_v42 = vld [vmem:[#allocation2 + $0x74] sm:$0x1]  ;;  %v11949_v4 = vrot.slane %v1192_v46, 7  ;;  %7859 = vst.msk [vmem:[#allocation3 + $0x80] sm:$0xf] %vm742_vm6, %v7599_v62  ;;  %v734_v14 = vmax.f32 %v670_v11, 0.0  ;;  %v635_v51 = vadd.f32 %v11715_v50, %v567_v12  ;;  %v437_v46 = vpop.f32.mrf.mxu1 }
 0x123   :  { %1722 = vst.msk [vmem:[#allocation2 + $0x70] sm:$0xf] %vm742_vm6, %v1172_v13  ;;  %v1724_v21 = vsel %vm11278_vm3, %v1173_v40, %v1723_v42  ;;  %v1495_v38 = vsel %vm11367_vm9, %v1487_v43, %v1494_v17  ;;  %v1856_v57 = vld [vmem:[#allocation2 + $0x170] sm:$0x1]  ;;  %v7602_v0 = vsel %vm11416_vm15, %v7600_v36, %v7601_v45  ;;  %6019 = vrot.lane.b32.xlu0 %v5878_v53, %s11159_s1  ;;  %v846_v56 = vsel %vm11278_vm3, 0, %v845_v49 }
 0x124   :  { %1725 = vst [vmem:[#allocation2 + $0x74] sm:$0x1] %v1724_v21  ;;  %v1857_v63 = vsel %vm11278_vm3, %v1496_v55, %v1856_v57  ;;  %v1197_v27 = vor.u32 %v1195_v2, %v11949_v4  ;;  %v1198_v29 = vrot.slane %v11949_v4, 4  ;;  %v1733_v43 = vld [vmem:[#allocation2 + $0x84] sm:$0xf]  ;;  %v1011_v35 = vpack.c.bf16 %v734_v14, %v734_v14  ;;  %v5609_v42 = vpop.permute.xlu0 %5608  ;;  %v10991_v14 = vld [vmem:[%s15940_s0 + $0xb0] sm:$0xff] }
 0x125   :  { %1855 = vst.msk [vmem:[#allocation2 + $0x16c] sm:$0xf] %vm742_vm6, %v1495_v38  ;;  %v699_v23 = vmax.f32 %v635_v51, 0.0  ;;  %v890_v37 = vsel %vm11288_vm5, 0, %v889_v3  ;;  %v6481_v8 = vrot.slane %v6479_v47, 4  ;;  %v6485_v52 = vshll.u32 %v6266_v7, 16  ;;  %v11983_v47 = vpop.permute.xlu1 %7145  ;;  %v527_v51 = vpop.f32.mrf.mxu3  ;;  %10335 = vmatmul.msk.bf16.gmra.mxu2 %vm276_vm0, %v10991_v14 }
 0x126   :  { %1858 = vst [vmem:[#allocation2 + $0x170] sm:$0x1] %v1857_v63  ;;  %v1734_v33 = vsel %vm11344_vm7, %v1197_v27, %v1733_v43  ;;  %5634 = vrot.lane.b32.xlu1 %v5432_v1, %s11161_s26  ;;  %v1498_v11 = vshrl.u32 %v1011_v35, 16  ;;  %v1501_v30 = vshll.u32 %v1011_v35, 16  ;;  %v6267_v44 = vld [vmem:[#allocation2 + $0x60] sm:$0xf]  ;;  %v603_v45 = vmul.f32 %v11699_v19, %v524_v54  ;;  %v11999_v63 = vpop.permute.xlu2 %7113 }
 0x127   :  { %1735 = vst [vmem:[#allocation2 + $0x84] sm:$0xf] %v1734_v33  ;;  %v976_v53 = vpack.c.bf16 %v699_v23, %v699_v23  ;;  %v6482_v12 = vor.u32 %v6481_v8, %v11907_v61  ;;  %v6487_v28 = vrot.slane %v6485_v52, 5  ;;  %v11981_v40 = vld [vmem:[#allocation2 + $0x64] sm:$0xf]  ;;  %v6490_v48 = vshrl.u32 %v6267_v44, 16 }
 0x128   :  { %7860 = vst.msk [vmem:[#allocation3 + $0x8c] sm:$0xf] %vm742_vm6, %v7602_v0  ;;  %v11986_v2 = vrot.slane %v1498_v11, 7  ;;  %v6493_v1 = vshll.u32 %v6267_v44, 16  ;;  %v6499_v49 = vshll.u32 %v11981_v40, 16  ;;  %v6503_v54 = vshrl.u32 %v11981_v40, 16 }
 0x129   :  { %847 = vst [vmem:[#allocation2 + $0x174] sm:$0x1] %v846_v56  ;;  %v1200_v17 = vshrl.u32 %v976_v53, 16  ;;  %v1203_v55 = vshll.u32 %v976_v53, 16  ;;  %v671_v61 = vadd.f32 %v11715_v50, %v603_v45  ;;  %v568_v62 = vmul.f32 %v11699_v19, %v437_v46  ;;  %v5213_v0 = vld [vmem:[#allocation2 + $0x60] sm:$0xe] }
 0x12a   :  { %v1503_v36 = vor.u32 %v1501_v30, %v11986_v2  ;;  %v1504_v3 = vrot.slane %v11986_v2, 4  ;;  %891 = vst [vmem:[#allocation2 + $0x8c] sm:$0x1] %v890_v37  ;;  %v6483_v7 = vrot.slane %v6482_v12, 4  ;;  %v6492_v13 = vrot.slane %v6490_v48, 4  ;;  %v11108_v46 = vld [vmem:[%s15941_s4 + $0x48] sm:$0xff] }
 0x12b   :  { %v1202_v21 = vrot.slane %v1200_v17, 7  ;;  %v6495_v38 = vrot.slane %v6493_v1, 5  ;;  %v11997_v57 = vrot.slane %v6499_v49, 5  ;;  %v735_v56 = vmax.f32 %v671_v61, 0.0  ;;  %v5214_v43 = vld [vmem:[#allocation2 + $0x64] sm:$0xf]  ;;  %8936 = vmatpush.bf16.msrb.mxu2 %v11108_v46 }
 0x12c   :  { %v6488_v27 = vsel %vm11407_vm14, %v6483_v7, %v6487_v28  ;;  %v10384_v35 = vrot.slane %v5213_v0, 9  ;;  %v943_v23 = vld [vmem:[#allocation2 + $0x17c] sm:$0x1]  ;;  %v636_v37 = vadd.f32 %v11715_v50, %v568_v62  ;;  %v10511_v8 = vld [vmem:[#allocation3 + $0x80] sm:$0xf]  ;;  %v5435_v30 = vrot.slane %v5214_v43, 5 }
 0x12d   :  { %v1205_v52 = vor.u32 %v1203_v55, %v1202_v21  ;;  %v1207_v33 = vrot.slane %v1202_v21, 4  ;;  %7135 = vrot.lane.b32.xlu2 %v6488_v27, %s11160_s25  ;;  %v6496_v11 = vor.u32 %v6495_v38, %v6492_v13  ;;  %5800 = vst.msk [vmem:[#allocation3 + $0x4] sm:$0xf] %vm3074_vm2, %v5609_v42  ;;  %v794_v44 = vld [vmem:[#allocation2 + $0x90] sm:$0x1]  ;;  %v944_v45 = vsel %vm11288_vm5, 0, %v943_v23  ;;  %v5994_v0 = vpop.permute.xlu1 %5993 }
 0x12e   :  { %v1012_v53 = vpack.c.bf16 %v735_v56, %v735_v56  ;;  %v700_v12 = vmax.f32 %v636_v37, 0.0  ;;  %v795_v28 = vsel %vm11278_vm3, 0, %v794_v44  ;;  %v5215_v48 = vld [vmem:[#allocation2 + $0x68] sm:$0x1]  ;;  %v5436_v55 = vsel %vm11416_vm15, %v10384_v35, %v5435_v30  ;;  %945 = vst [vmem:[#allocation2 + $0x17c] sm:$0x1] %v944_v45  ;;  %v439_v56 = vpop.f32.mrf.mxu1 }
 0x12f   :  { %v11020_v1 = vld [vmem:[#allocation3 + $0x88] sm:$0xf0]  ;;  %v1206_v49 = vsel %vm11367_vm9, %v1198_v29, %v1205_v52  ;;  %v6497_v17 = vrot.slane %v6496_v11, 4  ;;  %v5437_v61 = vrot.slane %v5435_v30, 4  ;;  %5636 = vrot.lane.b32.xlu0 %v5436_v55, %s11161_s26  ;;  %796 = vst [vmem:[#allocation2 + $0x90] sm:$0x1] %v795_v28  ;;  %v5450_v37 = vsel %vm11416_vm15, %v10386_v39, %v5449_v41 }
 0x130   :  { %v10512_v62 = vor.u32 %v11020_v1, %v10511_v8  ;;  %v1859_v7 = vld [vmem:[#allocation2 + $0x174] sm:$0xf]  ;;  %1736 = vst.msk [vmem:[#allocation2 + $0x88] sm:$0xf] %vm742_vm6, %v1206_v49  ;;  %v1506_v13 = vshrl.u32 %v1012_v53, 16  ;;  %v1509_v42 = vshll.u32 %v1012_v53, 16  ;;  %v977_v14 = vpack.c.bf16 %v700_v12, %v700_v12  ;;  %v529_v53 = vpop.f32.mrf.mxu3 }
 0x131   :  { %v1860_v4 = vsel %vm11344_vm7, %v1503_v36, %v1859_v7  ;;  %v1737_v29 = vld [vmem:[#allocation2 + $0x8c] sm:$0x1]  ;;  %v6502_v21 = vsel %vm11407_vm14, %v6497_v17, %v11997_v57  ;;  %v5438_v38 = vrot.slane %v5215_v48, 5  ;;  %v604_v8 = vmul.f32 %v11699_v19, %v527_v51  ;;  %6185 = vst.msk [vmem:[#allocation3 + $0x4] sm:$0xf] %vm3750_vm4, %v5994_v0  ;;  %v12052_v51 = vpop.permute.xlu2 %5997 }
 0x132   :  { %10902 = vmatmul.msk.bf16.gmra.mxu3 %vm276_vm0, %v10512_v62  ;;  %1861 = vst [vmem:[#allocation2 + $0x174] sm:$0xf] %v1860_v4  ;;  %v1738_v27 = vsel %vm11278_vm3, %v1207_v33, %v1737_v29  ;;  %7137 = vrot.lane.b32.xlu1 %v6502_v21, %s11160_s25  ;;  %v1508_v43 = vrot.slane %v1506_v13, 7  ;;  %v1209_v36 = vshrl.u32 %v977_v14, 16  ;;  %v1212_v35 = vshll.u32 %v977_v14, 16 }
 0x133   :  { %1739 = vst [vmem:[#allocation2 + $0x8c] sm:$0x1] %v1738_v27  ;;  %v5879_v23 = vld [vmem:[#allocation2 + $0x6c] sm:$0xf]  ;;  %v4314_v52 = vrot.slane %v4313_v24, 4  ;;  %v569_v45 = vmul.f32 %v11699_v19, %v439_v56  ;;  %v5439_v9 = vsel %vm11416_vm15, %v5437_v61, %v5438_v38  ;;  %v672_v10 = vadd.f32 %v11715_v50, %v604_v8  ;;  %v5611_v27 = vpop.permute.xlu0 %5610 }
 0x134   :  { %v1511_v33 = vor.u32 %v1509_v42, %v1508_v43  ;;  %v1513_v11 = vrot.slane %v1508_v43, 4  ;;  %v12041_v30 = vrot.slane %v1209_v36, 7  ;;  %v7387_v44 = vld [vmem:[#allocation2 + $0x60] sm:$0xe]  ;;  %7305 = vst.msk [vmem:[#allocation3 + $0x4] sm:$0xf] %vm4135_vm8, %v11999_v63  ;;  %v605_v24 = vmul.f32 %v11699_v19, %v529_v53 }
 0x135   :  { %6021 = vrot.lane.b32.xlu2 %v5879_v23, %s11159_s1  ;;  %v7388_v39 = vld [vmem:[#allocation2 + $0x64] sm:$0xf]  ;;  %v7389_v60 = vld [vmem:[#allocation2 + $0x68] sm:$0x1]  ;;  %v1863_v28 = vld [vmem:[#allocation2 + $0x17c] sm:$0x1]  ;;  %v637_v61 = vadd.f32 %v11715_v50, %v569_v45  ;;  %v4319_v16 = vsel %vm11407_vm14, %v4314_v52, %v11489_v58 }
 0x136   :  { %v1512_v12 = vsel %vm11367_vm9, %v1504_v3, %v1511_v33  ;;  %v1214_v48 = vor.u32 %v1212_v35, %v12041_v30  ;;  %v1215_v46 = vrot.slane %v12041_v30, 4  ;;  %v10415_v1 = vrot.slane %v7387_v44, 9  ;;  %v848_v63 = vld [vmem:[#allocation2 + $0x180] sm:$0x1]  ;;  %v1740_v2 = vld [vmem:[#allocation2 + $0x90] sm:$0xf]  ;;  %v442_v36 = vpop.f32.mrf.mxu1  ;;  %v5996_v44 = vpop.permute.xlu1 %5995 }
 0x137   :  { %1862 = vst.msk [vmem:[#allocation2 + $0x178] sm:$0xf] %vm742_vm6, %v1512_v12  ;;  %v1864_v49 = vsel %vm11278_vm3, %v1513_v11, %v1863_v28  ;;  %v7605_v19 = vrot.slane %v7388_v39, 5  ;;  %v7608_v17 = vrot.slane %v7389_v60, 5  ;;  %v736_v55 = vmax.f32 %v672_v10, 0.0  ;;  %5644 = vrot.lane.b32.xlu0 %v5450_v37, %s11161_s26 }
 0x138   :  { %1865 = vst [vmem:[#allocation2 + $0x17c] sm:$0x1] %v1864_v49  ;;  %v849_v3 = vsel %vm11278_vm3, 0, %v848_v63  ;;  %v5451_v62 = vrot.slane %v5449_v41, 4  ;;  %v673_v7 = vadd.f32 %v11715_v50, %v605_v24  ;;  %v1741_v13 = vsel %vm11344_vm7, %v1214_v48, %v1740_v2  ;;  %v892_v29 = vld [vmem:[#allocation2 + $0x98] sm:$0x1] }
 0x139   :  { %v7606_v42 = vsel %vm11416_vm15, %v10415_v1, %v7605_v19  ;;  %v7607_v14 = vrot.slane %v7605_v19, 4  ;;  %850 = vst [vmem:[#allocation2 + $0x180] sm:$0x1] %v849_v3  ;;  %v1013_v4 = vpack.c.bf16 %v736_v55, %v736_v55  ;;  %v701_v41 = vmax.f32 %v637_v61, 0.0  ;;  %v5221_v21 = vld [vmem:[#allocation2 + $0x80] sm:$0x1]  ;;  %v7116_v28 = vpop.permute.xlu2 %7115 }
 0x13a   :  { %1742 = vst [vmem:[#allocation2 + $0x90] sm:$0xf] %v1741_v13  ;;  %5638 = vrot.lane.b32.xlu1 %v5439_v9, %s11161_s26  ;;  %v893_v50 = vsel %vm11288_vm5, 0, %v892_v29  ;;  %v5452_v43 = vrot.slane %v5221_v21, 5  ;;  %v6269_v23 = vld [vmem:[#allocation2 + $0x68] sm:$0x1] }
 0x13b   :  { %v7609_v38 = vsel %vm11416_vm15, %v7607_v14, %v7608_v17  ;;  %7861 = vst.msk [vmem:[#allocation3 + $0x98] sm:$0xf] %vm742_vm6, %v7606_v42  ;;  %v1515_v0 = vshrl.u32 %v1013_v4, 16  ;;  %v1518_v56 = vshll.u32 %v1013_v4, 16  ;;  %v978_v35 = vpack.c.bf16 %v701_v41, %v701_v41  ;;  %v12089_v8 = vld [vmem:[%s15938_s2] ss:$0 sm:$0xff]  ;;  %v532_v41 = vpop.f32.mrf.mxu3 }
 0x13c   :  { %7862 = vst.msk [vmem:[#allocation3 + $0xa4] sm:$0xf] %vm742_vm6, %v7609_v38  ;;  %v6505_v58 = vrot.slane %v6503_v54, 4  ;;  %v737_v37 = vmax.f32 %v673_v7, 0.0  ;;  %v570_v52 = vmul.f32 %v12089_v8, %v442_v36  ;;  %v6509_v11 = vshll.u32 %v6269_v23, 16 }
 0x13d   :  { %v12092_v33 = vrot.slane %v1515_v0, 7  ;;  %5129 = vst.msk [vmem:[#allocation3 + $0x10] sm:$0xf] %vm742_vm6, %v4319_v16  ;;  %v5880_v45 = vld [vmem:[#allocation2 + $0x70] sm:$0xf]  ;;  %v1217_v53 = vshrl.u32 %v978_v35, 16  ;;  %v5453_v17 = vsel %vm11416_vm15, %v5451_v62, %v5452_v43  ;;  %v6554_v16 = vor.u32 %v11449_v6, %v11420_v34 }
 0x13e   :  { %5801 = vst.msk [vmem:[#allocation3 + $0x10] sm:$0xf] %vm3074_vm2, %v5611_v27  ;;  %v1220_v40 = vshll.u32 %v978_v35, 16  ;;  %v6506_v54 = vor.u32 %v6505_v58, %v11997_v57  ;;  %v946_v9 = vld [vmem:[#allocation2 + $0x188] sm:$0x1]  ;;  %v1014_v39 = vpack.c.bf16 %v737_v37, %v737_v37  ;;  %v6511_v24 = vrot.slane %v6509_v11, 5 }
 0x13f   :  { %v1520_v60 = vor.u32 %v1518_v56, %v12092_v33  ;;  %v1521_v10 = vrot.slane %v12092_v33, 4  ;;  %894 = vst [vmem:[#allocation2 + $0x98] sm:$0x1] %v893_v50  ;;  %v947_v12 = vsel %vm11288_vm5, 0, %v946_v9  ;;  %v1219_v1 = vrot.slane %v1217_v53, 7  ;;  %6023 = vrot.lane.b32.xlu0 %v5880_v45, %s11159_s1  ;;  %v11107_v34 = vld [vmem:[%s15941_s4 + $0x40] sm:$0xff] }
 0x140   :  { %v1866_v48 = vld [vmem:[#allocation2 + $0x180] sm:$0xf]  ;;  %v6507_v63 = vrot.slane %v6506_v54, 4  ;;  %6186 = vst.msk [vmem:[#allocation3 + $0x10] sm:$0xf] %vm3750_vm4, %v5996_v44  ;;  %v1523_v55 = vshrl.u32 %v1014_v39, 16  ;;  %8937 = vmatpush.bf16.msrb.mxu2 %v11107_v34 }
 0x141   :  { %v12106_v57 = vld [vmem:[%s15939_s3] ss:$0 sm:$0xff]  ;;  %v1867_v19 = vsel %vm11344_vm7, %v1520_v60, %v1866_v48  ;;  %7306 = vst.msk [vmem:[#allocation3 + $0x10] sm:$0xf] %vm4135_vm8, %v7116_v28  ;;  %v1526_v2 = vshll.u32 %v1014_v39, 16  ;;  %v1222_v7 = vor.u32 %v1220_v40, %v1219_v1  ;;  %v1224_v13 = vrot.slane %v1219_v1, 4  ;;  %v444_v39 = vpop.f32.mrf.mxu1  ;;  %v5613_v1 = vpop.permute.xlu0 %5612 }
 0x142   :  { %v638_v49 = vadd.f32 %v12106_v57, %v570_v52  ;;  %v4203_v3 = vld [vmem:[#allocation2 + $0x18] sm:$0xf]  ;;  %v10523_v61 = vld [vmem:[#allocation3 + $0x98] sm:$0xf]  ;;  %1868 = vst [vmem:[#allocation2 + $0x180] sm:$0xf] %v1867_v19  ;;  %5646 = vrot.lane.b32.xlu1 %v5453_v17, %s11161_s26  ;;  %v6512_v42 = vsel %vm11407_vm14, %v6507_v63, %v6511_v24  ;;  %v606_v28 = vmul.f32 %v12089_v8, %v532_v41 }
 0x143   :  { %v4321_v14 = vshrl.u32 %v4203_v3, 16  ;;  %v11023_v4 = vld [vmem:[#allocation3 + $0xa0] sm:$0xf0]  ;;  %7139 = vrot.lane.b32.xlu2 %v6512_v42, %s11160_s25  ;;  %948 = vst [vmem:[#allocation2 + $0x188] sm:$0x1] %v947_v12  ;;  %v1525_v62 = vrot.slane %v1523_v55, 7  ;;  %v1223_v21 = vsel %vm11367_vm9, %v1215_v46, %v1222_v7  ;;  %v12153_v42 = vpop.permute.xlu2 %6001 }
 0x144   :  { %v4324_v29 = vshll.u32 %v4203_v3, 16  ;;  %v10524_v50 = vor.u32 %v11023_v4, %v10523_v61  ;;  %v4204_v0 = vld [vmem:[#allocation2 + $0x1c] sm:$0xf]  ;;  %v702_v56 = vmax.f32 %v638_v49, 0.0  ;;  %1743 = vst.msk [vmem:[#allocation2 + $0x94] sm:$0xf] %vm742_vm6, %v1223_v21 }
 0x145   :  { %v4323_v38 = vrot.slane %v4321_v14, 4  ;;  %v797_v27 = vld [vmem:[#allocation2 + $0x9c] sm:$0x1]  ;;  %v1528_v43 = vor.u32 %v1526_v2, %v1525_v62  ;;  %v1530_v36 = vrot.slane %v1525_v62, 4  ;;  %v4330_v23 = vshll.u32 %v4204_v0, 16  ;;  %v11143_v60 = vld [vmem:[%s15941_s4 + $0x88] sm:$0xff] }
 0x146   :  { %v4326_v35 = vrot.slane %v4324_v29, 5  ;;  %10903 = vmatmul.msk.bf16.gmra.mxu3 %vm276_vm0, %v10524_v50  ;;  %v1744_v6 = vld [vmem:[#allocation2 + $0x98] sm:$0x1]  ;;  %v4334_v30 = vshrl.u32 %v4204_v0, 16  ;;  %v798_v46 = vsel %vm11278_vm3, 0, %v797_v27  ;;  %v979_v58 = vpack.c.bf16 %v702_v56, %v702_v56  ;;  %9105 = vmatpush.bf16.msra.mxu2 %v11143_v60  ;;  %v11144_v41 = vld [vmem:[%s15941_s4 + $0x80] sm:$0xff]  ;;  %v534_v27 = vpop.f32.mrf.mxu3 }
 0x147   :  { %v6275_v37 = vld [vmem:[#allocation2 + $0x80] sm:$0x1]  ;;  %v1745_v52 = vsel %vm11278_vm3, %v1224_v13, %v1744_v6  ;;  %v1529_v33 = vsel %vm11367_vm9, %v1521_v10, %v1528_v43  ;;  %v12135_v44 = vrot.slane %v4330_v23, 5  ;;  %799 = vst [vmem:[#allocation2 + $0x9c] sm:$0x1] %v798_v46  ;;  %v6555_v54 = vrot.slane %v6554_v16, 4 }
 0x148   :  { %v4327_v11 = vor.u32 %v4326_v35, %v4323_v38  ;;  %v6270_v45 = vld [vmem:[#allocation2 + $0x6c] sm:$0xf]  ;;  %1746 = vst [vmem:[#allocation2 + $0x98] sm:$0x1] %v1745_v52  ;;  %v1226_v53 = vshrl.u32 %v979_v58, 16  ;;  %v1229_v40 = vshll.u32 %v979_v58, 16  ;;  %v571_v13 = vmul.f32 %v12089_v8, %v444_v39  ;;  %v5615_v38 = vpop.permute.xlu1 %5614 }
 0x149   :  { %v6557_v9 = vshll.u32 %v6275_v37, 16  ;;  %1869 = vst.msk [vmem:[#allocation2 + $0x184] sm:$0xf] %vm742_vm6, %v1529_v33  ;;  %v12141_v24 = vld [vmem:[#allocation2 + $0x70] sm:$0xf]  ;;  %v6514_v12 = vshrl.u32 %v6270_v45, 16  ;;  %v674_v23 = vadd.f32 %v12106_v57, %v606_v28  ;;  %v607_v34 = vmul.f32 %v12089_v8, %v534_v27 }
 0x14a   :  { %v4328_v10 = vrot.slane %v4327_v11, 4  ;;  %v1870_v48 = vld [vmem:[#allocation2 + $0x188] sm:$0x1]  ;;  %v12144_v63 = vrot.slane %v1226_v53, 7  ;;  %v6517_v19 = vshll.u32 %v6270_v45, 16  ;;  %v6523_v17 = vshll.u32 %v12141_v24, 16  ;;  %9106 = vmatpush.bf16.msra.mxu2 %v11144_v41 }
 0x14b   :  { %v6559_v49 = vrot.slane %v6557_v9, 5  ;;  %v1871_v55 = vsel %vm11278_vm3, %v1530_v36, %v1870_v48  ;;  %v6516_v3 = vrot.slane %v6514_v12, 4  ;;  %v4205_v61 = vld [vmem:[#allocation2 + $0x20] sm:$0x1]  ;;  %v7390_v7 = vld [vmem:[#allocation2 + $0x6c] sm:$0xe]  ;;  %v639_v45 = vadd.f32 %v12106_v57, %v571_v13 }
 0x14c   :  { %v4333_v2 = vsel %vm11407_vm14, %v4328_v10, %v12135_v44  ;;  %1872 = vst [vmem:[#allocation2 + $0x188] sm:$0x1] %v1871_v55  ;;  %v1231_v14 = vor.u32 %v1229_v40, %v12144_v63  ;;  %v6519_v62 = vrot.slane %v6517_v19, 5  ;;  %v6527_v29 = vshrl.u32 %v12141_v24, 16  ;;  %v7391_v16 = vld [vmem:[#allocation2 + $0x70] sm:$0xf] }
 0x14d   :  { %v6560_v4 = vsel %vm11407_vm14, %v6555_v54, %v6559_v49  ;;  %5130 = vst.msk [vmem:[#allocation3 + $0x1c] sm:$0xf] %vm742_vm6, %v4333_v2  ;;  %v12164_v50 = vrot.slane %v6523_v17, 5  ;;  %v4340_v21 = vshll.u32 %v4205_v61, 16  ;;  %v4336_v0 = vrot.slane %v4334_v30, 4  ;;  %v6000_v17 = vpop.permute.xlu0 %5999  ;;  %v447_v61 = vpop.f32.mrf.mxu1 }
 0x14e   :  { %7147 = vrot.lane.b32.xlu2 %v6560_v4, %s11160_s25  ;;  %v10416_v56 = vrot.slane %v7390_v7, 9  ;;  %5802 = vst.msk [vmem:[#allocation3 + $0x1c] sm:$0xf] %vm3074_vm2, %v5613_v1  ;;  %v1747_v43 = vld [vmem:[#allocation2 + $0x9c] sm:$0xf]  ;;  %v6520_v36 = vor.u32 %v6519_v62, %v6516_v3  ;;  %v7612_v58 = vrot.slane %v7391_v16, 5  ;;  %v675_v1 = vadd.f32 %v12106_v57, %v607_v34 }
 0x14f   :  { %v7392_v35 = vld [vmem:[#allocation2 + $0x74] sm:$0x1]  ;;  %6187 = vst.msk [vmem:[#allocation3 + $0x1c] sm:$0xf] %vm3750_vm4, %v12052_v51  ;;  %v1748_v6 = vsel %vm11344_vm7, %v1231_v14, %v1747_v43  ;;  %v4342_v46 = vrot.slane %v4340_v21, 5  ;;  %v4337_v30 = vor.u32 %v4336_v0, %v12135_v44  ;;  %v738_v60 = vmax.f32 %v674_v23, 0.0  ;;  %v7120_v0 = vpop.permute.xlu2 %7119 }
 0x150   :  { %v5216_v37 = vld [vmem:[#allocation2 + $0x6c] sm:$0xe]  ;;  %1749 = vst [vmem:[#allocation2 + $0x9c] sm:$0xf] %v1748_v6  ;;  %v6521_v52 = vrot.slane %v6520_v36, 4  ;;  %v7615_v33 = vrot.slane %v7392_v35, 5  ;;  %v7613_v40 = vsel %vm11416_vm15, %v10416_v56, %v7612_v58  ;;  %v572_v4 = vmul.f32 %v12089_v8, %v447_v61  ;;  %v7118_v43 = vpop.permute.xlu1 %7117 }
 0x151   :  { %v5217_v11 = vld [vmem:[#allocation2 + $0x70] sm:$0xf]  ;;  %v4338_v53 = vrot.slane %v4337_v30, 4  ;;  %v7614_v54 = vrot.slane %v7612_v58, 4  ;;  %v10385_v51 = vrot.slane %v5216_v37, 9  ;;  %v1015_v19 = vpack.c.bf16 %v738_v60, %v738_v60 }
 0x152   :  { %v851_v9 = vld [vmem:[#allocation2 + $0x18c] sm:$0x1]  ;;  %v6526_v39 = vsel %vm11407_vm14, %v6521_v52, %v12164_v50  ;;  %7863 = vst.msk [vmem:[#allocation3 + $0xb0] sm:$0xf] %vm742_vm6, %v7613_v40  ;;  %v5442_v44 = vrot.slane %v5217_v11, 5  ;;  %v703_v2 = vmax.f32 %v639_v45, 0.0  ;;  %v640_v11 = vadd.f32 %v12106_v57, %v572_v4 }
 0x153   :  { %v852_v10 = vsel %vm11278_vm3, 0, %v851_v9  ;;  %7141 = vrot.lane.b32.xlu1 %v6526_v39, %s11160_s25  ;;  %v4343_v24 = vsel %vm11407_vm14, %v4338_v53, %v4342_v46  ;;  %v7616_v12 = vsel %vm11416_vm15, %v7614_v54, %v7615_v33  ;;  %v11003_v28 = vld [vmem:[#allocation3 + $0x4] sm:$0xf]  ;;  %v10445_v48 = vld [vmem:[#allocation3 + $0xc] sm:$0xf0]  ;;  %v6529_v14 = vrot.slane %v6527_v29, 4 }
 0x154   :  { %853 = vst [vmem:[#allocation2 + $0x18c] sm:$0x1] %v852_v10  ;;  %v5443_v49 = vsel %vm11416_vm15, %v10385_v51, %v5442_v44  ;;  %v10448_v55 = vor.u32 %v11003_v28, %v10445_v48  ;;  %v895_v3 = vld [vmem:[#allocation2 + $0xa4] sm:$0x1]  ;;  %v6272_v13 = vld [vmem:[#allocation2 + $0x74] sm:$0x1]  ;;  %v980_v41 = vpack.c.bf16 %v703_v2, %v703_v2 }
 0x155   :  { %5131 = vst.msk [vmem:[#allocation3 + $0x28] sm:$0xf] %vm742_vm6, %v4343_v24  ;;  %5640 = vrot.lane.b32.xlu0 %v5443_v49, %s11161_s26  ;;  %v896_v7 = vsel %vm11288_vm5, 0, %v895_v3  ;;  %v1532_v62 = vshrl.u32 %v1015_v19, 16  ;;  %v1535_v16 = vshll.u32 %v1015_v19, 16  ;;  %v6533_v21 = vshll.u32 %v6272_v13, 16 }
 0x156   :  { %5803 = vst.msk [vmem:[#allocation3 + $0x28] sm:$0xf] %vm3074_vm2, %v5615_v38  ;;  %8938 = vmatmul.bf16.vlgmr.msrb.gmra.mxu2 %v10448_v55  ;;  %v6530_v38 = vor.u32 %v6529_v14, %v12164_v50  ;;  %v5218_v56 = vld [vmem:[#allocation2 + $0x74] sm:$0x1]  ;;  %v5444_v27 = vrot.slane %v5442_v44, 4  ;;  %v739_v36 = vmax.f32 %v675_v1, 0.0  ;;  %v537_v14 = vpop.f32.mrf.mxu3 }
 0x157   :  { %7864 = vst.msk [vmem:[#allocation3 + $0xbc] sm:$0xf] %vm742_vm6, %v7616_v12  ;;  %v1232_v29 = vrot.slane %v12144_v63, 4  ;;  %v1534_v35 = vrot.slane %v1532_v62, 7  ;;  %v1234_v23 = vshrl.u32 %v980_v41, 16  ;;  %v1237_v34 = vshll.u32 %v980_v41, 16 }
 0x158   :  { %6188 = vst.msk [vmem:[#allocation3 + $0x28] sm:$0xf] %vm3750_vm4, %v6000_v17  ;;  %v6531_v6 = vrot.slane %v6530_v38, 4  ;;  %v6535_v46 = vrot.slane %v6533_v21, 5  ;;  %v5445_v30 = vrot.slane %v5218_v56, 5  ;;  %v1016_v58 = vpack.c.bf16 %v739_v36, %v739_v36 }
 0x159   :  { %7308 = vst.msk [vmem:[#allocation3 + $0x28] sm:$0xf] %vm4135_vm8, %v7120_v0  ;;  %v1537_v37 = vor.u32 %v1535_v16, %v1534_v35  ;;  %v1538_v52 = vrot.slane %v1534_v35, 4  ;;  %v1236_v50 = vrot.slane %v1234_v23, 7  ;;  %v10535_v45 = vld [vmem:[#allocation3 + $0xb0] sm:$0xf]  ;;  %v449_v0 = vpop.f32.mrf.mxu1  ;;  %v608_v36 = vmul.f32 %v12089_v8, %v537_v14 }
 0x15a   :  { %897 = vst [vmem:[#allocation2 + $0xa4] sm:$0x1] %v896_v7  ;;  %v6536_v63 = vsel %vm11407_vm14, %v6531_v6, %v6535_v46  ;;  %v5446_v53 = vsel %vm11416_vm15, %v5444_v27, %v5445_v30  ;;  %v5884_v40 = vld [vmem:[#allocation2 + $0x88] sm:$0xf]  ;;  %v949_v54 = vld [vmem:[#allocation2 + $0x194] sm:$0x1] }
 0x15b   :  { %v1873_v33 = vld [vmem:[#allocation2 + $0x18c] sm:$0xf]  ;;  %7307 = vst.msk [vmem:[#allocation3 + $0x1c] sm:$0xf] %vm4135_vm8, %v7118_v43  ;;  %v1540_v51 = vshrl.u32 %v1016_v58, 16  ;;  %v1543_v9 = vshll.u32 %v1016_v58, 16  ;;  %v1239_v44 = vor.u32 %v1237_v34, %v1236_v50  ;;  %7143 = vrot.lane.b32.xlu2 %v6536_v63, %s11160_s25  ;;  %5642 = vrot.lane.b32.xlu1 %v5446_v53, %s11161_s26  ;;  %v573_v58 = vmul.f32 %v12089_v8, %v449_v0 }
 0x15c   :  { %v1874_v39 = vsel %vm11344_vm7, %v1537_v37, %v1873_v33  ;;  %v1241_v60 = vrot.slane %v1236_v50, 4  ;;  %v950_v10 = vsel %vm11288_vm5, 0, %v949_v54  ;;  %v4206_v24 = vld [vmem:[#allocation2 + $0x24] sm:$0xf]  ;;  %v4207_v12 = vld [vmem:[#allocation2 + $0x28] sm:$0xf] }
 0x15d   :  { %1875 = vst [vmem:[#allocation2 + $0x18c] sm:$0xf] %v1874_v39  ;;  %6031 = vrot.lane.b32.xlu0 %v5884_v40, %s11159_s1  ;;  %v1542_v48 = vrot.slane %v1540_v51, 7  ;;  %v4345_v1 = vshrl.u32 %v4206_v24, 16  ;;  %v1240_v19 = vsel %vm11367_vm9, %v1232_v29, %v1239_v44  ;;  %v4348_v17 = vshll.u32 %v4206_v24, 16 }
 0x15e   :  { %v11026_v28 = vld [vmem:[#allocation3 + $0xb8] sm:$0xf0]  ;;  %951 = vst [vmem:[#allocation2 + $0x194] sm:$0x1] %v950_v10  ;;  %v4354_v55 = vshll.u32 %v4207_v12, 16  ;;  %v4358_v13 = vshrl.u32 %v4207_v12, 16  ;;  %v676_v51 = vadd.f32 %v12106_v57, %v608_v36  ;;  %v12240_v12 = vpop.permute.xlu2 %6005 }
 0x15f   :  { %v10536_v49 = vor.u32 %v11026_v28, %v10535_v45  ;;  %v800_v2 = vld [vmem:[#allocation2 + $0xa8] sm:$0x1]  ;;  %1750 = vst.msk [vmem:[#allocation2 + $0xa0] sm:$0xf] %vm742_vm6, %v1240_v19  ;;  %v1545_v3 = vor.u32 %v1543_v9, %v1542_v48  ;;  %v1547_v61 = vrot.slane %v1542_v48, 4  ;;  %v4347_v7 = vrot.slane %v4345_v1, 4  ;;  %v5619_v1 = vpop.permute.xlu1 %5618 }
 0x160   :  { %v4350_v62 = vrot.slane %v4348_v17, 5  ;;  %v4356_v16 = vrot.slane %v4354_v55, 5  ;;  %v704_v41 = vmax.f32 %v640_v11, 0.0  ;;  %v801_v21 = vsel %vm11278_vm3, 0, %v800_v2  ;;  %v5883_v27 = vld [vmem:[#allocation2 + $0x84] sm:$0xf] }
 0x161   :  { %10904 = vmatmul.msk.bf16.gmra.mxu3 %vm276_vm0, %v10536_v49  ;;  %v1751_v4 = vld [vmem:[#allocation2 + $0xa4] sm:$0x1]  ;;  %v1546_v56 = vsel %vm11367_vm9, %v1538_v52, %v1545_v3  ;;  %802 = vst [vmem:[#allocation2 + $0xa8] sm:$0x1] %v801_v21  ;;  %v12226_v23 = vld [vmem:[#allocation2 + $0x88] sm:$0xf]  ;;  %v5617_v52 = vpop.permute.xlu0 %5616 }
 0x162   :  { %v1752_v38 = vsel %vm11278_vm3, %v1241_v60, %v1751_v4  ;;  %v6276_v43 = vld [vmem:[#allocation2 + $0x84] sm:$0xf]  ;;  %v4351_v29 = vor.u32 %v4350_v62, %v4347_v7  ;;  %v981_v35 = vpack.c.bf16 %v704_v41, %v704_v41  ;;  %1876 = vst.msk [vmem:[#allocation2 + $0x190] sm:$0xf] %vm742_vm6, %v1546_v56  ;;  %v6571_v46 = vshll.u32 %v12226_v23, 16  ;;  %v539_v41 = vpop.f32.mrf.mxu3 }
 0x163   :  { %1753 = vst [vmem:[#allocation2 + $0xa4] sm:$0x1] %v1752_v38  ;;  %v6562_v34 = vshrl.u32 %v6276_v43, 16  ;;  %v6565_v6 = vshll.u32 %v6276_v43, 16  ;;  %v4208_v30 = vld [vmem:[#allocation2 + $0x2c] sm:$0x1]  ;;  %6029 = vrot.lane.b32.xlu2 %v5883_v27, %s11159_s1  ;;  %v641_v7 = vadd.f32 %v12106_v57, %v573_v58  ;;  %v609_v56 = vmul.f32 %v12089_v8, %v539_v41 }
 0x164   :  { %v4352_v37 = vrot.slane %v4351_v29, 4  ;;  %v1243_v33 = vshrl.u32 %v981_v35, 16  ;;  %v1246_v50 = vshll.u32 %v981_v35, 16  ;;  %v7393_v45 = vld [vmem:[#allocation2 + $0x78] sm:$0xe]  ;;  %v4364_v40 = vshll.u32 %v4208_v30, 16 }
 0x165   :  { %v6564_v11 = vrot.slane %v6562_v34, 4  ;;  %v1877_v63 = vld [vmem:[#allocation2 + $0x194] sm:$0x1]  ;;  %v6567_v53 = vrot.slane %v6565_v6, 5  ;;  %v4360_v54 = vrot.slane %v4358_v13, 4  ;;  %v6575_v60 = vshrl.u32 %v12226_v23, 16 }
 0x166   :  { %v1878_v9 = vsel %vm11278_vm3, %v1547_v61, %v1877_v63  ;;  %v4357_v39 = vsel %vm11407_vm14, %v4352_v37, %v4356_v16  ;;  %v12237_v44 = vrot.slane %v1243_v33, 7  ;;  %v7394_v10 = vld [vmem:[#allocation2 + $0x7c] sm:$0xf]  ;;  %v7395_v24 = vld [vmem:[#allocation2 + $0x80] sm:$0x1]  ;;  %v12242_v48 = vrot.slane %v6571_v46, 5  ;;  %v452_v63 = vpop.f32.mrf.mxu1 }
 0x167   :  { %1879 = vst [vmem:[#allocation2 + $0x194] sm:$0x1] %v1878_v9  ;;  %v6568_v28 = vor.u32 %v6567_v53, %v6564_v11  ;;  %v4361_v49 = vor.u32 %v4360_v54, %v4356_v16  ;;  %v7619_v19 = vrot.slane %v7394_v10, 5  ;;  %v5222_v17 = vld [vmem:[#allocation2 + $0x84] sm:$0xe]  ;;  %v4366_v3 = vrot.slane %v4364_v40, 5 }
 0x168   :  { %5132 = vst.msk [vmem:[#allocation3 + $0x34] sm:$0xf] %vm742_vm6, %v4357_v39  ;;  %v1248_v55 = vor.u32 %v1246_v50, %v12237_v44  ;;  %v1754_v2 = vld [vmem:[#allocation2 + $0xa8] sm:$0xf]  ;;  %v10417_v61 = vrot.slane %v7393_v45, 9  ;;  %v7622_v62 = vrot.slane %v7395_v24, 5  ;;  %v677_v9 = vadd.f32 %v12106_v57, %v609_v56 }
 0x169   :  { %5804 = vst.msk [vmem:[#allocation3 + $0x34] sm:$0xf] %vm3074_vm2, %v5617_v52  ;;  %v6569_v13 = vrot.slane %v6568_v28, 4  ;;  %v4362_v14 = vrot.slane %v4361_v49, 4  ;;  %v7621_v4 = vrot.slane %v7619_v19, 4  ;;  %v10387_v0 = vrot.slane %v5222_v17, 9  ;;  %v6004_v50 = vpop.permute.xlu0 %6003 }
 0x16a   :  { %6189 = vst.msk [vmem:[#allocation3 + $0x34] sm:$0xf] %vm3750_vm4, %v12153_v42  ;;  %v1755_v16 = vsel %vm11344_vm7, %v1248_v55, %v1754_v2  ;;  %v5223_v21 = vld [vmem:[#allocation2 + $0x88] sm:$0xf]  ;;  %v740_v38 = vmax.f32 %v676_v51, 0.0  ;;  %v7620_v36 = vsel %vm11416_vm15, %v10417_v61, %v7619_v19  ;;  %v705_v46 = vmax.f32 %v641_v7, 0.0 }
 0x16b   :  { %1756 = vst [vmem:[#allocation2 + $0xa8] sm:$0xf] %v1755_v16  ;;  %v6574_v27 = vsel %vm11407_vm14, %v6569_v13, %v12242_v48  ;;  %v4367_v43 = vsel %vm11407_vm14, %v4362_v14, %v4366_v3  ;;  %v5456_v42 = vrot.slane %v5223_v21, 5  ;;  %v854_v29 = vld [vmem:[#allocation2 + $0x198] sm:$0x1]  ;;  %v7623_v35 = vsel %vm11416_vm15, %v7621_v4, %v7622_v62 }
 0x16c   :  { %7149 = vrot.lane.b32.xlu1 %v6574_v27, %s11160_s25  ;;  %5133 = vst.msk [vmem:[#allocation3 + $0x40] sm:$0xf] %vm742_vm6, %v4367_v43  ;;  %v855_v23 = vsel %vm11278_vm3, 0, %v854_v29  ;;  %v1017_v34 = vpack.c.bf16 %v740_v38, %v740_v38  ;;  %v11006_v6 = vld [vmem:[#allocation3 + $0x1c] sm:$0xf]  ;;  %v982_v53 = vpack.c.bf16 %v705_v46, %v705_v46  ;;  %v6577_v54 = vrot.slane %v6575_v60, 4  ;;  %v7122_v60 = vpop.permute.xlu1 %7121 }
 0x16d   :  { %5805 = vst.msk [vmem:[#allocation3 + $0x40] sm:$0xf] %vm3074_vm2, %v5619_v1  ;;  %v5457_v30 = vsel %vm11416_vm15, %v10387_v0, %v5456_v42  ;;  %v10457_v58 = vld [vmem:[#allocation3 + $0x24] sm:$0xf0]  ;;  %v898_v37 = vld [vmem:[#allocation2 + $0xb0] sm:$0x1]  ;;  %v574_v28 = vmul.f32 %v12089_v8, %v452_v63  ;;  %v7124_v1 = vpop.permute.xlu2 %7123 }
 0x16e   :  { %7865 = vst.msk [vmem:[#allocation3 + $0xc8] sm:$0xf] %vm742_vm6, %v7620_v36  ;;  %5648 = vrot.lane.b32.xlu0 %v5457_v30, %s11161_s26  ;;  %v1549_v52 = vshrl.u32 %v1017_v34, 16  ;;  %v1552_v33 = vshll.u32 %v1017_v34, 16  ;;  %v10460_v11 = vor.u32 %v11006_v6, %v10457_v58  ;;  %v899_v45 = vsel %vm11288_vm5, 0, %v898_v37  ;;  %v467_v36 = vpop.f32.mrf.mxu2  ;;  %v454_v63 = vpop.f32.mrf.mxu1 }
 0x16f   :  { %7866 = vst.msk [vmem:[#allocation3 + $0xd4] sm:$0xf] %vm742_vm6, %v7623_v35  ;;  %v6278_v40 = vld [vmem:[#allocation2 + $0x8c] sm:$0x1]  ;;  %v5458_v51 = vrot.slane %v5456_v42, 4  ;;  %v1251_v49 = vshrl.u32 %v982_v53, 16  ;;  %v6578_v17 = vor.u32 %v6577_v54, %v12242_v48  ;;  %v642_v16 = vadd.f32 %v12106_v57, %v574_v28 }
 0x170   :  { %856 = vst [vmem:[#allocation2 + $0x198] sm:$0x1] %v855_v23  ;;  %v12275_v39 = vrot.slane %v1549_v52, 7  ;;  %8943 = vmatmul.bf16.gmra.mxu2 %v10460_v11  ;;  %v6581_v10 = vshll.u32 %v6278_v40, 16  ;;  %v5224_v24 = vld [vmem:[#allocation2 + $0x8c] sm:$0x1]  ;;  %v580_v34 = vmul.f32 %v12089_v8, %v467_v36 }
 0x171   :  { %6190 = vst.msk [vmem:[#allocation3 + $0x40] sm:$0xf] %vm3750_vm4, %v6004_v50  ;;  %v1254_v19 = vshll.u32 %v982_v53, 16  ;;  %v5459_v55 = vrot.slane %v5224_v24, 5  ;;  %v1249_v2 = vrot.slane %v12237_v44, 4  ;;  %v1253_v7 = vrot.slane %v1251_v49, 7 }
 0x172   :  { %v1555_v3 = vrot.slane %v12275_v39, 4  ;;  %7310 = vst.msk [vmem:[#allocation3 + $0x40] sm:$0xf] %vm4135_vm8, %v7124_v1  ;;  %v6583_v61 = vrot.slane %v6581_v10, 5  ;;  %v6579_v13 = vrot.slane %v6578_v17, 4  ;;  %v741_v62 = vmax.f32 %v677_v9, 0.0 }
 0x173   :  { %900 = vst [vmem:[#allocation2 + $0xb0] sm:$0x1] %v899_v45  ;;  %v5460_v14 = vsel %vm11416_vm15, %v5458_v51, %v5459_v55  ;;  %v5886_v4 = vld [vmem:[#allocation2 + $0x94] sm:$0xf]  ;;  %v1554_v41 = vor.u32 %v1552_v33, %v12275_v39  ;;  %v952_v44 = vld [vmem:[#allocation2 + $0x1a0] sm:$0x1]  ;;  %v1256_v0 = vor.u32 %v1254_v19, %v1253_v7  ;;  %v648_v28 = vadd.f32 %v12106_v57, %v580_v34 }
 0x174   :  { %5650 = vrot.lane.b32.xlu1 %v5460_v14, %s11161_s26  ;;  %7309 = vst.msk [vmem:[#allocation3 + $0x34] sm:$0xf] %vm4135_vm8, %v7122_v60  ;;  %v4209_v48 = vld [vmem:[#allocation2 + $0x30] sm:$0xf]  ;;  %v1258_v38 = vrot.slane %v1253_v7, 4  ;;  %v6584_v56 = vsel %vm11407_vm14, %v6579_v13, %v6583_v61  ;;  %v953_v27 = vsel %vm11288_vm5, 0, %v952_v44  ;;  %v1018_v29 = vpack.c.bf16 %v741_v62, %v741_v62  ;;  %v5621_v13 = vpop.permute.xlu0 %5620 }
 0x175   :  { %v10547_v21 = vld [vmem:[#allocation3 + $0xc8] sm:$0xf]  ;;  %v4210_v43 = vld [vmem:[#allocation2 + $0x34] sm:$0xf]  ;;  %7151 = vrot.lane.b32.xlu2 %v6584_v56, %s11160_s25  ;;  %954 = vst [vmem:[#allocation2 + $0x1a0] sm:$0x1] %v953_v27  ;;  %v1257_v30 = vsel %vm11367_vm9, %v1249_v2, %v1256_v0  ;;  %v575_v2 = vmul.f32 %v12089_v8, %v454_v63  ;;  %v12315_v36 = vpop.permute.xlu2 %6009 }
 0x176   :  { %v11029_v42 = vld [vmem:[#allocation3 + $0xd0] sm:$0xf0]  ;;  %6035 = vrot.lane.b32.xlu0 %v5886_v4, %s11159_s1  ;;  %v4369_v35 = vshrl.u32 %v4209_v48, 16  ;;  %v4372_v23 = vshll.u32 %v4209_v48, 16  ;;  %v4378_v58 = vshll.u32 %v4210_v43, 16  ;;  %v4382_v37 = vshrl.u32 %v4210_v43, 16 }
 0x177   :  { %v10548_v6 = vor.u32 %v11029_v42, %v10547_v21  ;;  %v1880_v46 = vld [vmem:[#allocation2 + $0x198] sm:$0xf]  ;;  %v803_v52 = vld [vmem:[#allocation2 + $0xb4] sm:$0x1]  ;;  %1757 = vst.msk [vmem:[#allocation2 + $0xac] sm:$0xf] %vm742_vm6, %v1257_v30 }
 0x178   :  { %v1881_v33 = vsel %vm11344_vm7, %v1554_v41, %v1880_v46  ;;  %v1557_v50 = vshrl.u32 %v1018_v29, 16  ;;  %v1560_v11 = vshll.u32 %v1018_v29, 16  ;;  %v4371_v45 = vrot.slane %v4369_v35, 4  ;;  %v5885_v17 = vld [vmem:[#allocation2 + $0x90] sm:$0xf] }
 0x179   :  { %10905 = vmatmul.msk.bf16.gmra.mxu3 %vm276_vm0, %v10548_v6  ;;  %1882 = vst [vmem:[#allocation2 + $0x198] sm:$0xf] %v1881_v33  ;;  %v4374_v53 = vrot.slane %v4372_v23, 5  ;;  %v4380_v40 = vrot.slane %v4378_v58, 5  ;;  %v706_v54 = vmax.f32 %v642_v16, 0.0  ;;  %v804_v51 = vsel %vm11278_vm3, 0, %v803_v52  ;;  %v5623_v23 = vpop.permute.xlu1 %5622 }
 0x17a   :  { %v1758_v9 = vld [vmem:[#allocation2 + $0xb0] sm:$0x1]  ;;  %v1559_v10 = vrot.slane %v1557_v50, 7  ;;  %805 = vst [vmem:[#allocation2 + $0xb4] sm:$0x1] %v804_v51  ;;  %v4384_v24 = vrot.slane %v4382_v37, 4  ;;  %v643_v33 = vadd.f32 %v12106_v57, %v575_v2 }
 0x17b   :  { %v1759_v1 = vsel %vm11278_vm3, %v1258_v38, %v1758_v9  ;;  %v4375_v49 = vor.u32 %v4374_v53, %v4371_v45  ;;  %v983_v19 = vpack.c.bf16 %v706_v54, %v706_v54  ;;  %v6279_v55 = vld [vmem:[#allocation2 + $0x90] sm:$0xf]  ;;  %v6280_v60 = vld [vmem:[#allocation2 + $0x94] sm:$0xf]  ;;  %v4211_v27 = vld [vmem:[#allocation2 + $0x38] sm:$0x1]  ;;  %v469_v53 = vpop.f32.mrf.mxu2 }
 0x17c   :  { %1760 = vst [vmem:[#allocation2 + $0xb0] sm:$0x1] %v1759_v1  ;;  %v1562_v61 = vor.u32 %v1560_v11, %v1559_v10  ;;  %v1564_v7 = vrot.slane %v1559_v10, 4  ;;  %v6586_v14 = vshrl.u32 %v6279_v55, 16  ;;  %v6589_v4 = vshll.u32 %v6279_v55, 16 }
 0x17d   :  { %v1884_v62 = vld [vmem:[#allocation2 + $0x1a0] sm:$0x1]  ;;  %v4376_v41 = vrot.slane %v4375_v49, 4  ;;  %v1260_v44 = vshrl.u32 %v983_v19, 16  ;;  %v1263_v48 = vshll.u32 %v983_v19, 16  ;;  %v6595_v16 = vshll.u32 %v6280_v60, 16  ;;  %6033 = vrot.lane.b32.xlu2 %v5885_v17, %s11159_s1 }
 0x17e   :  { %v1563_v21 = vsel %vm11367_vm9, %v1555_v3, %v1562_v61  ;;  %v1885_v0 = vsel %vm11278_vm3, %v1564_v7, %v1884_v62  ;;  %v6588_v38 = vrot.slane %v6586_v14, 4  ;;  %v6591_v56 = vrot.slane %v6589_v4, 5  ;;  %v7396_v43 = vld [vmem:[#allocation2 + $0x84] sm:$0xe]  ;;  %v7397_v6 = vld [vmem:[#allocation2 + $0x88] sm:$0xf]  ;;  %v457_v61 = vpop.f32.mrf.mxu1  ;;  %v6008_v14 = vpop.permute.xlu0 %6007 }
 0x17f   :  { %1883 = vst.msk [vmem:[#allocation2 + $0x19c] sm:$0xf] %vm742_vm6, %v1563_v21  ;;  %v4381_v42 = vsel %vm11407_vm14, %v4376_v41, %v4380_v40  ;;  %v12320_v39 = vrot.slane %v1260_v44, 7  ;;  %v12322_v29 = vrot.slane %v6595_v16, 5  ;;  %v4388_v35 = vshll.u32 %v4211_v27, 16  ;;  %v7128_v27 = vpop.permute.xlu2 %7127 }
 0x180   :  { %1886 = vst [vmem:[#allocation2 + $0x1a0] sm:$0x1] %v1885_v0  ;;  %v6592_v3 = vor.u32 %v6591_v56, %v6588_v38  ;;  %v4385_v34 = vor.u32 %v4384_v24, %v4380_v40  ;;  %v10418_v46 = vrot.slane %v7396_v43, 9  ;;  %v6599_v37 = vshrl.u32 %v6280_v60, 16  ;;  %v7398_v54 = vld [vmem:[#allocation2 + $0x8c] sm:$0x1] }
 0x181   :  { %5134 = vst.msk [vmem:[#allocation3 + $0x4c] sm:$0xf] %vm742_vm6, %v4381_v42  ;;  %v1265_v30 = vor.u32 %v1263_v48, %v12320_v39  ;;  %v1761_v58 = vld [vmem:[#allocation2 + $0xb4] sm:$0xf]  ;;  %v7626_v52 = vrot.slane %v7397_v6, 5  ;;  %v4390_v11 = vrot.slane %v4388_v35, 5  ;;  %v581_v2 = vmul.f32 %v12089_v8, %v469_v53 }
 0x182   :  { %5806 = vst.msk [vmem:[#allocation3 + $0x4c] sm:$0xf] %vm3074_vm2, %v5621_v13  ;;  %v6593_v50 = vrot.slane %v6592_v3, 4  ;;  %v4386_v45 = vrot.slane %v4385_v34, 4  ;;  %v712_v63 = vmax.f32 %v648_v28, 0.0  ;;  %v707_v10 = vmax.f32 %v643_v33, 0.0 }
 0x183   :  { %6191 = vst.msk [vmem:[#allocation3 + $0x4c] sm:$0xf] %vm3750_vm4, %v12240_v12  ;;  %v1762_v40 = vsel %vm11344_vm7, %v1265_v30, %v1761_v58  ;;  %v7627_v51 = vsel %vm11416_vm15, %v10418_v46, %v7626_v52  ;;  %v7628_v9 = vrot.slane %v7626_v52, 4  ;;  %v7629_v1 = vrot.slane %v7398_v54, 5  ;;  %v5225_v49 = vld [vmem:[#allocation2 + $0x90] sm:$0xe] }
 0x184   :  { %1763 = vst [vmem:[#allocation2 + $0xb4] sm:$0xf] %v1762_v40  ;;  %v6598_v24 = vsel %vm11407_vm14, %v6593_v50, %v12322_v29  ;;  %v4391_v28 = vsel %vm11407_vm14, %v4386_v45, %v4390_v11  ;;  %v989_v12 = vpack.c.bf16 %v712_v63, %v712_v63  ;;  %v5226_v19 = vld [vmem:[#allocation2 + $0x94] sm:$0xf]  ;;  %v10388_v17 = vrot.slane %v5225_v49, 9 }
 0x185   :  { %7153 = vrot.lane.b32.xlu1 %v6598_v24, %s11160_s25  ;;  %5135 = vst.msk [vmem:[#allocation3 + $0x58] sm:$0xf] %vm742_vm6, %v4391_v28  ;;  %v984_v55 = vpack.c.bf16 %v707_v10, %v707_v10  ;;  %v6601_v60 = vrot.slane %v6599_v37, 4  ;;  %v7630_v7 = vsel %vm11416_vm15, %v7628_v9, %v7629_v1  ;;  %v5463_v13 = vrot.slane %v5226_v19, 5  ;;  %v812_v4 = vld [vmem:[#allocation2 + $0xf0] sm:$0x1] }
 0x186   :  { %5807 = vst.msk [vmem:[#allocation3 + $0x58] sm:$0xf] %vm3074_vm2, %v5623_v23  ;;  %v1311_v62 = vshrl.u32 %v989_v12, 16  ;;  %v576_v41 = vmul.f32 %v12089_v8, %v457_v61  ;;  %v1266_v44 = vrot.slane %v12320_v39, 4  ;;  %v11009_v48 = vld [vmem:[#allocation3 + $0x34] sm:$0xf]  ;;  %v649_v3 = vadd.f32 %v12106_v57, %v581_v2  ;;  %v472_v61 = vpop.f32.mrf.mxu2 }
 0x187   :  { %7867 = vst.msk [vmem:[#allocation3 + $0xe0] sm:$0xf] %vm742_vm6, %v7627_v51  ;;  %v5464_v16 = vsel %vm11416_vm15, %v10388_v17, %v5463_v13  ;;  %v813_v21 = vsel %vm11278_vm3, 0, %v812_v4  ;;  %v10469_v0 = vld [vmem:[#allocation3 + $0x3c] sm:$0xf0]  ;;  %v1268_v38 = vshrl.u32 %v984_v55, 16  ;;  %v6602_v56 = vor.u32 %v6601_v60, %v12322_v29  ;;  %v7126_v29 = vpop.permute.xlu1 %7125 }
 0x188   :  { %7868 = vst.msk [vmem:[#allocation3 + $0xec] sm:$0xf] %vm742_vm6, %v7630_v7  ;;  %5652 = vrot.lane.b32.xlu0 %v5464_v16, %s11161_s26  ;;  %v1314_v8 = vshll.u32 %v989_v12, 16  ;;  %v10472_v43 = vor.u32 %v11009_v48, %v10469_v0  ;;  %v901_v42 = vld [vmem:[#allocation2 + $0xbc] sm:$0x1]  ;;  %v1271_v39 = vshll.u32 %v984_v55, 16  ;;  %v644_v6 = vadd.f32 %v12106_v57, %v576_v41 }
 0x189   :  { %6192 = vst.msk [vmem:[#allocation3 + $0x58] sm:$0xf] %vm3750_vm4, %v6008_v14  ;;  %v12358_v35 = vrot.slane %v1311_v62, 7  ;;  %v902_v23 = vsel %vm11288_vm5, 0, %v901_v42  ;;  %v1270_v34 = vrot.slane %v1268_v38, 7  ;;  %v6603_v37 = vrot.slane %v6602_v56, 4  ;;  %v5625_v56 = vpop.permute.xlu0 %5624  ;;  %v12385_v42 = vpop.permute.xlu2 %6013 }
 0x18a   :  { %7312 = vst.msk [vmem:[#allocation3 + $0x58] sm:$0xf] %vm4135_vm8, %v7128_v27  ;;  %8948 = vmatmul.bf16.gmra.mxu2 %v10472_v43  ;;  %v6281_v46 = vld [vmem:[#allocation2 + $0x98] sm:$0x1]  ;;  %v5465_v33 = vrot.slane %v5463_v13, 4  ;;  %v713_v45 = vmax.f32 %v649_v3, 0.0 }
 0x18b   :  { %814 = vst [vmem:[#allocation2 + $0xf0] sm:$0x1] %v813_v21  ;;  %v5227_v30 = vld [vmem:[#allocation2 + $0x98] sm:$0x1]  ;;  %v1273_v58 = vor.u32 %v1271_v39, %v1270_v34  ;;  %v6605_v52 = vshll.u32 %v6281_v46, 16  ;;  %v1275_v50 = vrot.slane %v1270_v34, 4  ;;  %v1316_v53 = vor.u32 %v1314_v8, %v12358_v35 }
 0x18c   :  { %903 = vst [vmem:[#allocation2 + $0xbc] sm:$0x1] %v902_v23  ;;  %v5466_v11 = vrot.slane %v5227_v30, 5  ;;  %v5888_v54 = vld [vmem:[#allocation2 + $0xa0] sm:$0xf]  ;;  %v708_v9 = vmax.f32 %v644_v6, 0.0  ;;  %v990_v49 = vpack.c.bf16 %v713_v45, %v713_v45  ;;  %v459_v23 = vpop.f32.mrf.mxu1 }
 0x18d   :  { %7311 = vst.msk [vmem:[#allocation3 + $0x4c] sm:$0xf] %vm4135_vm8, %v7126_v29  ;;  %v1274_v57 = vsel %vm11367_vm9, %v1266_v44, %v1273_v58  ;;  %v6607_v40 = vrot.slane %v6605_v52, 5  ;;  %v4212_v51 = vld [vmem:[#allocation2 + $0x3c] sm:$0xf]  ;;  %v1317_v7 = vrot.slane %v12358_v35, 4 }
 0x18e   :  { %v10559_v63 = vld [vmem:[#allocation3 + $0xe0] sm:$0xf]  ;;  %1764 = vst.msk [vmem:[#allocation2 + $0xb8] sm:$0xf] %vm742_vm6, %v1274_v57  ;;  %v5467_v24 = vsel %vm11416_vm15, %v5465_v33, %v5466_v11  ;;  %v4393_v28 = vshrl.u32 %v4212_v51, 16  ;;  %v4396_v1 = vshll.u32 %v4212_v51, 16  ;;  %v985_v2 = vpack.c.bf16 %v708_v9, %v708_v9 }
 0x18f   :  { %v11032_v10 = vld [vmem:[#allocation3 + $0xe8] sm:$0xf0]  ;;  %v6608_v19 = vsel %vm11407_vm14, %v6603_v37, %v6607_v40  ;;  %5654 = vrot.lane.b32.xlu1 %v5467_v24, %s11161_s26  ;;  %v4213_v17 = vld [vmem:[#allocation2 + $0x40] sm:$0xf]  ;;  %v910_v55 = vld [vmem:[#allocation2 + $0xf8] sm:$0x1] }
 0x190   :  { %v10560_v12 = vor.u32 %v11032_v10, %v10559_v63  ;;  %v806_v60 = vld [vmem:[#allocation2 + $0xc0] sm:$0x1]  ;;  %7155 = vrot.lane.b32.xlu2 %v6608_v19, %s11160_s25  ;;  %6039 = vrot.lane.b32.xlu0 %v5888_v54, %s11159_s1  ;;  %v4395_v13 = vrot.slane %v4393_v28, 4  ;;  %v4398_v14 = vrot.slane %v4396_v1, 5  ;;  %v4402_v4 = vshll.u32 %v4213_v17, 16 }
 0x191   :  { %v911_v41 = vsel %vm11288_vm5, 0, %v910_v55  ;;  %v1319_v44 = vshrl.u32 %v990_v49, 16  ;;  %v1322_v48 = vshll.u32 %v990_v49, 16  ;;  %v807_v16 = vsel %vm11278_vm3, 0, %v806_v60  ;;  %v6282_v35 = vld [vmem:[#allocation2 + $0x9c] sm:$0xf]  ;;  %v5627_v55 = vpop.permute.xlu1 %5626 }
 0x192   :  { %10906 = vmatmul.msk.bf16.gmra.mxu3 %vm276_vm0, %v10560_v12  ;;  %v1782_v62 = vld [vmem:[#allocation2 + $0xf0] sm:$0xf]  ;;  %v4399_v38 = vor.u32 %v4398_v14, %v4395_v13  ;;  %v4404_v27 = vrot.slane %v4402_v4, 5  ;;  %912 = vst [vmem:[#allocation2 + $0xf8] sm:$0x1] %v911_v41  ;;  %v1277_v8 = vshrl.u32 %v985_v2, 16 }
 0x193   :  { %v1783_v21 = vsel %vm11344_vm7, %v1316_v53, %v1782_v62  ;;  %v1765_v0 = vld [vmem:[#allocation2 + $0xbc] sm:$0x1]  ;;  %v4406_v39 = vshrl.u32 %v4213_v17, 16  ;;  %v1321_v3 = vrot.slane %v1319_v44, 7  ;;  %v1280_v29 = vshll.u32 %v985_v2, 16 }
 0x194   :  { %1784 = vst [vmem:[#allocation2 + $0xf0] sm:$0xf] %v1783_v21  ;;  %v1766_v43 = vsel %vm11278_vm3, %v1275_v50, %v1765_v0  ;;  %v4400_v34 = vrot.slane %v4399_v38, 4  ;;  %v12387_v6 = vld [vmem:[#allocation2 + $0xa0] sm:$0xf]  ;;  %v12395_v37 = vrot.slane %v1277_v8, 7 }
 0x195   :  { %1767 = vst [vmem:[#allocation2 + $0xbc] sm:$0x1] %v1766_v43  ;;  %v12392_v46 = vld [vmem:[%s15938_s2] ss:$0 sm:$0xff]  ;;  %v1324_v58 = vor.u32 %v1322_v48, %v1321_v3  ;;  %v5887_v52 = vld [vmem:[#allocation2 + $0x9c] sm:$0xf]  ;;  %v6012_v43 = vpop.permute.xlu0 %6011 }
 0x196   :  { %v582_v30 = vmul.f32 %v12392_v46, %v472_v61  ;;  %808 = vst [vmem:[#allocation2 + $0xc0] sm:$0x1] %v807_v16  ;;  %v6610_v33 = vshrl.u32 %v6282_v35, 16  ;;  %v6613_v50 = vshll.u32 %v6282_v35, 16  ;;  %v4405_v11 = vsel %vm11407_vm14, %v4400_v34, %v4404_v27  ;;  %v4214_v53 = vld [vmem:[#allocation2 + $0x44] sm:$0x1]  ;;  %v7132_v35 = vpop.permute.xlu2 %7131 }
 0x197   :  { %v1326_v45 = vrot.slane %v1321_v3, 4  ;;  %v6619_v63 = vshll.u32 %v12387_v6, 16  ;;  %v7399_v57 = vld [vmem:[#allocation2 + $0x90] sm:$0xe]  ;;  %v577_v40 = vmul.f32 %v12392_v46, %v459_v23  ;;  %5136 = vst.msk [vmem:[#allocation3 + $0x64] sm:$0xf] %vm742_vm6, %v4405_v11  ;;  %v1325_v54 = vsel %vm11367_vm9, %v1317_v7, %v1324_v58  ;;  %v474_v7 = vpop.f32.mrf.mxu2 }
 0x198   :  { %v6612_v51 = vrot.slane %v6610_v33, 4  ;;  %v6615_v9 = vrot.slane %v6613_v50, 5  ;;  %v6623_v10 = vshrl.u32 %v12387_v6, 16  ;;  %5808 = vst.msk [vmem:[#allocation3 + $0x64] sm:$0xf] %vm3074_vm2, %v5625_v56  ;;  %6037 = vrot.lane.b32.xlu2 %v5887_v52, %s11159_s1  ;;  %v4412_v28 = vshll.u32 %v4214_v53, 16 }
 0x199   :  { %v12407_v24 = vrot.slane %v6619_v63, 5  ;;  %v4408_v1 = vrot.slane %v4406_v39, 4  ;;  %v10419_v49 = vrot.slane %v7399_v57, 9  ;;  %6193 = vst.msk [vmem:[#allocation3 + $0x64] sm:$0xf] %vm3750_vm4, %v12315_v36  ;;  %v1282_v19 = vor.u32 %v1280_v29, %v12395_v37 }
 0x19a   :  { %v1786_v12 = vld [vmem:[#allocation2 + $0xf8] sm:$0x1]  ;;  %v6616_v17 = vor.u32 %v6615_v9, %v6612_v51  ;;  %v7400_v60 = vld [vmem:[#allocation2 + $0x94] sm:$0xf]  ;;  %v12415_v2 = vld [vmem:[%s15939_s3] ss:$0 sm:$0xff]  ;;  %v583_v39 = vmul.f32 %v12392_v46, %v474_v7 }
 0x19b   :  { %v650_v61 = vadd.f32 %v12415_v2, %v582_v30  ;;  %1785 = vst.msk [vmem:[#allocation2 + $0xf4] sm:$0xf] %vm742_vm6, %v1325_v54  ;;  %v1787_v13 = vsel %vm11278_vm3, %v1326_v45, %v1786_v12  ;;  %v4414_v36 = vrot.slane %v4412_v28, 5  ;;  %v4409_v14 = vor.u32 %v4408_v1, %v4404_v27  ;;  %v7401_v4 = vld [vmem:[#allocation2 + $0x98] sm:$0x1] }
 0x19c   :  { %v7633_v62 = vrot.slane %v7400_v60, 5  ;;  %1788 = vst [vmem:[#allocation2 + $0xf8] sm:$0x1] %v1787_v13  ;;  %v6617_v41 = vrot.slane %v6616_v17, 4  ;;  %v7636_v44 = vrot.slane %v7401_v4, 5  ;;  %v645_v16 = vadd.f32 %v12415_v2, %v577_v40 }
 0x19d   :  { %v5228_v48 = vld [vmem:[#allocation2 + $0x9c] sm:$0xe]  ;;  %v1768_v21 = vld [vmem:[#allocation2 + $0xc0] sm:$0xf]  ;;  %v4410_v0 = vrot.slane %v4409_v14, 4  ;;  %v714_v58 = vmax.f32 %v650_v61, 0.0  ;;  %v651_v51 = vadd.f32 %v12415_v2, %v583_v39 }
 0x19e   :  { %v7634_v38 = vsel %vm11416_vm15, %v10419_v49, %v7633_v62  ;;  %v7635_v56 = vrot.slane %v7633_v62, 4  ;;  %v5229_v8 = vld [vmem:[#allocation2 + $0xa0] sm:$0xf]  ;;  %v1769_v27 = vsel %vm11344_vm7, %v1282_v19, %v1768_v21  ;;  %v6622_v3 = vsel %vm11407_vm14, %v6617_v41, %v12407_v24  ;;  %v815_v29 = vld [vmem:[#allocation2 + $0xfc] sm:$0x1] }
 0x19f   :  { %7869 = vst.msk [vmem:[#allocation3 + $0xf8] sm:$0xf] %vm742_vm6, %v7634_v38  ;;  %v10389_v23 = vrot.slane %v5228_v48, 9  ;;  %v5470_v34 = vrot.slane %v5229_v8, 5  ;;  %7157 = vrot.lane.b32.xlu1 %v6622_v3, %s11160_s25  ;;  %v4415_v6 = vsel %vm11407_vm14, %v4410_v0, %v4414_v36  ;;  %v816_v52 = vsel %vm11278_vm3, 0, %v815_v29  ;;  %v7130_v36 = vpop.permute.xlu1 %7129  ;;  %v477_v21 = vpop.f32.mrf.mxu2 }
 0x1a0   :  { %1770 = vst [vmem:[#allocation2 + $0xc0] sm:$0xf] %v1769_v27  ;;  %v7637_v30 = vsel %vm11416_vm15, %v7635_v56, %v7636_v44  ;;  %v11012_v33 = vld [vmem:[#allocation3 + $0x4c] sm:$0xf]  ;;  %v10481_v11 = vld [vmem:[#allocation3 + $0x54] sm:$0xf0]  ;;  %v991_v53 = vpack.c.bf16 %v714_v58, %v714_v58  ;;  %v584_v8 = vmul.f32 %v12392_v46, %v477_v21  ;;  %v12464_v27 = vpop.permute.xlu2 %6017 }
 0x1a1   :  { %5137 = vst.msk [vmem:[#allocation3 + $0x70] sm:$0xf] %vm742_vm6, %v4415_v6  ;;  %v5471_v50 = vsel %vm11416_vm15, %v10389_v23, %v5470_v34  ;;  %v709_v45 = vmax.f32 %v645_v16, 0.0  ;;  %v6625_v63 = vrot.slane %v6623_v10, 4  ;;  %v10484_v57 = vor.u32 %v11012_v33, %v10481_v11  ;;  %v904_v40 = vld [vmem:[#allocation2 + $0xc8] sm:$0x1] }
 0x1a2   :  { %5809 = vst.msk [vmem:[#allocation3 + $0x70] sm:$0xf] %vm3074_vm2, %v5627_v55  ;;  %5656 = vrot.lane.b32.xlu0 %v5471_v50, %s11161_s26  ;;  %v6284_v54 = vld [vmem:[#allocation2 + $0xa4] sm:$0x1]  ;;  %v905_v9 = vsel %vm11288_vm5, 0, %v904_v40  ;;  %v1328_v12 = vshrl.u32 %v991_v53, 16 }
 0x1a3   :  { %7870 = vst.msk [vmem:[#allocation3 + $0x104] sm:$0xf] %vm742_vm6, %v7637_v30  ;;  %v986_v28 = vpack.c.bf16 %v709_v45, %v709_v45  ;;  %v6626_v1 = vor.u32 %v6625_v63, %v12407_v24  ;;  %v6629_v49 = vshll.u32 %v6284_v54, 16  ;;  %v5230_v10 = vld [vmem:[#allocation2 + $0xa4] sm:$0x1]  ;;  %v1331_v19 = vshll.u32 %v991_v53, 16  ;;  %8953 = vmatmul.bf16.gmra.mxu2 %v10484_v57  ;;  %v462_v54 = vpop.f32.mrf.mxu1 }
 0x1a4   :  { %6194 = vst.msk [vmem:[#allocation3 + $0x70] sm:$0xf] %vm3750_vm4, %v6012_v43  ;;  %v5472_v17 = vrot.slane %v5470_v34, 4  ;;  %v5473_v55 = vrot.slane %v5230_v10, 5  ;;  %v12450_v4 = vrot.slane %v1328_v12, 7  ;;  %v715_v24 = vmax.f32 %v651_v51, 0.0 }
 0x1a5   :  { %7314 = vst.msk [vmem:[#allocation3 + $0x70] sm:$0xf] %vm4135_vm8, %v7132_v35  ;;  %v1285_v60 = vshrl.u32 %v986_v28, 16  ;;  %v1288_v61 = vshll.u32 %v986_v28, 16  ;;  %v6627_v7 = vrot.slane %v6626_v1, 4  ;;  %v6631_v13 = vrot.slane %v6629_v49, 5 }
 0x1a6   :  { %v10571_v14 = vld [vmem:[#allocation3 + $0xf8] sm:$0xf]  ;;  %817 = vst [vmem:[#allocation2 + $0xfc] sm:$0x1] %v816_v52  ;;  %v1283_v62 = vrot.slane %v12395_v37, 4  ;;  %v5474_v48 = vsel %vm11416_vm15, %v5472_v17, %v5473_v55  ;;  %v1334_v0 = vrot.slane %v12450_v4, 4  ;;  %v12461_v37 = vpop.permute.xlu0 %5628  ;;  %v992_v56 = vpack.c.bf16 %v715_v24, %v715_v24 }
 0x1a7   :  { %906 = vst [vmem:[#allocation2 + $0xc8] sm:$0x1] %v905_v9  ;;  %v1287_v41 = vrot.slane %v1285_v60, 7  ;;  %v6632_v44 = vsel %vm11407_vm14, %v6627_v7, %v6631_v13  ;;  %v5890_v16 = vld [vmem:[#allocation2 + $0xac] sm:$0xf]  ;;  %5658 = vrot.lane.b32.xlu1 %v5474_v48, %s11161_s26  ;;  %v1333_v29 = vor.u32 %v1331_v19, %v12450_v4  ;;  %v652_v49 = vadd.f32 %v12415_v2, %v584_v8 }
 0x1a8   :  { %7159 = vrot.lane.b32.xlu2 %v6632_v44, %s11160_s25  ;;  %7313 = vst.msk [vmem:[#allocation3 + $0x64] sm:$0xf] %vm4135_vm8, %v7130_v36  ;;  %v4215_v38 = vld [vmem:[#allocation2 + $0x48] sm:$0xf]  ;;  %v4216_v23 = vld [vmem:[#allocation2 + $0x4c] sm:$0xf]  ;;  %v578_v10 = vmul.f32 %v12392_v46, %v462_v54 }
 0x1a9   :  { %v1290_v43 = vor.u32 %v1288_v61, %v1287_v41  ;;  %v1292_v39 = vrot.slane %v1287_v41, 4  ;;  %v4417_v3 = vshrl.u32 %v4215_v38, 16  ;;  %v4420_v35 = vshll.u32 %v4215_v38, 16  ;;  %v913_v58 = vld [vmem:[#allocation2 + $0x104] sm:$0x1]  ;;  %v5631_v38 = vpop.permute.xlu1 %5630 }
 0x1aa   :  { %v11035_v34 = vld [vmem:[#allocation3 + $0x100] sm:$0xf0]  ;;  %6043 = vrot.lane.b32.xlu0 %v5890_v16, %s11159_s1  ;;  %v4426_v6 = vshll.u32 %v4216_v23, 16  ;;  %v4430_v30 = vshrl.u32 %v4216_v23, 16  ;;  %v6285_v45 = vld [vmem:[#allocation2 + $0xa8] sm:$0xf] }
 0x1ab   :  { %v10572_v52 = vor.u32 %v11035_v34, %v10571_v14  ;;  %v1291_v33 = vsel %vm11367_vm9, %v1283_v62, %v1290_v43  ;;  %v4419_v50 = vrot.slane %v4417_v3, 4  ;;  %v4422_v11 = vrot.slane %v4420_v35, 5  ;;  %v5889_v28 = vld [vmem:[#allocation2 + $0xa8] sm:$0xf]  ;;  %v12474_v1 = vld [vmem:[#allocation2 + $0xac] sm:$0xf]  ;;  %v12484_v14 = vpop.f32.mrf.mxu3  ;;  %v479_v43 = vpop.f32.mrf.mxu2 }
 0x1ac   :  { %1771 = vst.msk [vmem:[#allocation2 + $0xc4] sm:$0xf] %vm742_vm6, %v1291_v33  ;;  %v4428_v63 = vrot.slane %v4426_v6, 5  ;;  %v914_v53 = vsel %vm11288_vm5, 0, %v913_v58  ;;  %v1336_v57 = vshrl.u32 %v992_v56, 16  ;;  %v1339_v40 = vshll.u32 %v992_v56, 16  ;;  %v7136_v58 = vpop.permute.xlu2 %7135 }
 0x1ad   :  { %10907 = vmatmul.msk.bf16.gmra.mxu3 %vm276_vm0, %v10572_v52  ;;  %v1789_v51 = vld [vmem:[#allocation2 + $0xfc] sm:$0xf]  ;;  %v4423_v9 = vor.u32 %v4422_v11, %v4419_v50  ;;  %915 = vst [vmem:[#allocation2 + $0x104] sm:$0x1] %v914_v53  ;;  %v6634_v55 = vshrl.u32 %v6285_v45, 16  ;;  %v6637_v60 = vshll.u32 %v6285_v45, 16  ;;  %v646_v50 = vadd.f32 %v12415_v2, %v578_v10 }
 0x1ae   :  { %v1790_v12 = vsel %vm11344_vm7, %v1333_v29, %v1789_v51  ;;  %v1772_v19 = vld [vmem:[#allocation2 + $0xc8] sm:$0x1]  ;;  %v1338_v17 = vrot.slane %v1336_v57, 7  ;;  %v6643_v13 = vshll.u32 %v12474_v1, 16  ;;  %v6647_v36 = vshrl.u32 %v12474_v1, 16  ;;  %v6016_v29 = vpop.permute.xlu0 %6015 }
 0x1af   :  { %1791 = vst [vmem:[#allocation2 + $0xfc] sm:$0xf] %v1790_v12  ;;  %v1773_v61 = vsel %vm11278_vm3, %v1292_v39, %v1772_v19  ;;  %v4424_v7 = vrot.slane %v4423_v9, 4  ;;  %v6636_v41 = vrot.slane %v6634_v55, 4  ;;  %v6639_v44 = vrot.slane %v6637_v60, 5 }
 0x1b0   :  { %1774 = vst [vmem:[#allocation2 + $0xc8] sm:$0x1] %v1773_v61  ;;  %v1341_v24 = vor.u32 %v1339_v40, %v1338_v17  ;;  %v1343_v62 = vrot.slane %v1338_v17, 4  ;;  %6041 = vrot.lane.b32.xlu2 %v5889_v28, %s11159_s1  ;;  %v12489_v16 = vrot.slane %v6643_v13, 5  ;;  %v4217_v21 = vld [vmem:[#allocation2 + $0x50] sm:$0x1]  ;;  %v585_v45 = vmul.f32 %v12392_v46, %v479_v43  ;;  %v464_v17 = vpop.f32.mrf.mxu1 }
 0x1b1   :  { %v4429_v48 = vsel %vm11407_vm14, %v4424_v7, %v4428_v63  ;;  %v4432_v56 = vrot.slane %v4430_v30, 4  ;;  %v7402_v8 = vld [vmem:[#allocation2 + $0x9c] sm:$0xe]  ;;  %v6640_v3 = vor.u32 %v6639_v44, %v6636_v41  ;;  %v4436_v35 = vshll.u32 %v4217_v21, 16  ;;  %v7403_v23 = vld [vmem:[#allocation2 + $0xa0] sm:$0xf] }
 0x1b2   :  { %5138 = vst.msk [vmem:[#allocation3 + $0x7c] sm:$0xf] %vm742_vm6, %v4429_v48  ;;  %v1342_v39 = vsel %vm11367_vm9, %v1334_v0, %v1341_v24  ;;  %v10420_v34 = vrot.slane %v7402_v8, 9  ;;  %v7404_v30 = vld [vmem:[#allocation2 + $0xa4] sm:$0x1]  ;;  %v7640_v52 = vrot.slane %v7403_v23, 5  ;;  %v653_v7 = vadd.f32 %v12415_v2, %v585_v45  ;;  %v7134_v23 = vpop.permute.xlu1 %7133 }
 0x1b3   :  { %5810 = vst.msk [vmem:[#allocation3 + $0x7c] sm:$0xf] %vm3074_vm2, %v12461_v37  ;;  %v4433_v6 = vor.u32 %v4432_v56, %v4428_v63  ;;  %v716_v33 = vmax.f32 %v652_v49, 0.0  ;;  %v6641_v0 = vrot.slane %v6640_v3, 4  ;;  %v4438_v11 = vrot.slane %v4436_v35, 5  ;;  %v12523_v44 = vpop.f32.mrf.mxu3 }
 0x1b4   :  { %6195 = vst.msk [vmem:[#allocation3 + $0x7c] sm:$0xf] %vm3750_vm4, %v12385_v42  ;;  %v1793_v4 = vld [vmem:[#allocation2 + $0x104] sm:$0x1]  ;;  %v7641_v53 = vsel %vm11416_vm15, %v10420_v34, %v7640_v52  ;;  %v7642_v57 = vrot.slane %v7640_v52, 4  ;;  %v7643_v54 = vrot.slane %v7404_v30, 5 }
 0x1b5   :  { %1792 = vst.msk [vmem:[#allocation2 + $0x100] sm:$0xf] %vm742_vm6, %v1342_v39  ;;  %v1794_v37 = vsel %vm11278_vm3, %v1343_v62, %v1793_v4  ;;  %v4434_v63 = vrot.slane %v4433_v6, 4  ;;  %v5231_v40 = vld [vmem:[#allocation2 + $0xa8] sm:$0xe]  ;;  %v6646_v42 = vsel %vm11407_vm14, %v6641_v0, %v12489_v16  ;;  %v993_v28 = vpack.c.bf16 %v716_v33, %v716_v33 }
 0x1b6   :  { %1795 = vst [vmem:[#allocation2 + $0x104] sm:$0x1] %v1794_v37  ;;  %v5232_v51 = vld [vmem:[#allocation2 + $0xac] sm:$0xf]  ;;  %v10390_v9 = vrot.slane %v5231_v40, 9  ;;  %7161 = vrot.lane.b32.xlu1 %v6646_v42, %s11160_s25  ;;  %v710_v19 = vmax.f32 %v646_v50, 0.0  ;;  %v7644_v55 = vsel %vm11416_vm15, %v7642_v57, %v7643_v54  ;;  %v12541_v50 = vpop.permute.xlu2 %6021 }
 0x1b7   :  { %v4439_v49 = vsel %vm11407_vm14, %v4434_v63, %v4438_v11  ;;  %7871 = vst.msk [vmem:[#allocation3 + $0x110] sm:$0xf] %vm742_vm6, %v7641_v53  ;;  %v5477_v10 = vrot.slane %v5232_v51, 5  ;;  %v818_v12 = vld [vmem:[#allocation2 + $0x108] sm:$0x1]  ;;  %v1345_v61 = vshrl.u32 %v993_v28, 16  ;;  %v482_v53 = vpop.f32.mrf.mxu2 }
 0x1b8   :  { %5139 = vst.msk [vmem:[#allocation3 + $0x88] sm:$0xf] %vm742_vm6, %v4439_v49  ;;  %v819_v60 = vsel %vm11278_vm3, 0, %v818_v12  ;;  %v11015_v24 = vld [vmem:[#allocation3 + $0x64] sm:$0xf]  ;;  %v987_v41 = vpack.c.bf16 %v710_v19, %v710_v19  ;;  %v1348_v48 = vshll.u32 %v993_v28, 16  ;;  %v586_v28 = vmul.f32 %v12392_v46, %v482_v53 }
 0x1b9   :  { %5811 = vst.msk [vmem:[#allocation3 + $0x88] sm:$0xf] %vm3074_vm2, %v5631_v38  ;;  %v5478_v13 = vsel %vm11416_vm15, %v10390_v9, %v5477_v10  ;;  %v10493_v62 = vld [vmem:[#allocation3 + $0x6c] sm:$0xf0]  ;;  %v809_v56 = vld [vmem:[#allocation2 + $0xe4] sm:$0x1]  ;;  %v579_v38 = vmul.f32 %v12392_v46, %v464_v17 }
 0x1ba   :  { %7872 = vst.msk [vmem:[#allocation3 + $0x11c] sm:$0xf] %vm742_vm6, %v7644_v55  ;;  %5660 = vrot.lane.b32.xlu0 %v5478_v13, %s11161_s26  ;;  %v10496_v21 = vor.u32 %v11015_v24, %v10493_v62  ;;  %v6649_v8 = vrot.slane %v6647_v36, 4  ;;  %v12531_v43 = vrot.slane %v1345_v61, 7  ;;  %v810_v39 = vsel %vm11278_vm3, 0, %v809_v56  ;;  %v12537_v36 = vpop.permute.xlu0 %5632 }
 0x1bb   :  { %6196 = vst.msk [vmem:[#allocation3 + $0x88] sm:$0xf] %vm3750_vm4, %v6016_v29  ;;  %v1294_v3 = vshrl.u32 %v987_v41, 16  ;;  %v1297_v35 = vshll.u32 %v987_v41, 16  ;;  %v6287_v34 = vld [vmem:[#allocation2 + $0xb0] sm:$0x1]  ;;  %v647_v63 = vadd.f32 %v12415_v2, %v579_v38  ;;  %v654_v53 = vadd.f32 %v12415_v2, %v586_v28 }
 0x1bc   :  { %7316 = vst.msk [vmem:[#allocation3 + $0x88] sm:$0xf] %vm4135_vm8, %v7136_v58  ;;  %8958 = vmatmul.bf16.gmra.mxu2 %v10496_v21  ;;  %v6650_v6 = vor.u32 %v6649_v8, %v12489_v16  ;;  %v5479_v1 = vrot.slane %v5477_v10, 4  ;;  %v717_v30 = vmax.f32 %v653_v7, 0.0  ;;  %v6653_v52 = vshll.u32 %v6287_v34, 16  ;;  %v12558_v21 = vpop.f32.mrf.mxu3 }
 0x1bd   :  { %820 = vst [vmem:[#allocation2 + $0x108] sm:$0x1] %v819_v60  ;;  %v12539_v29 = vrot.slane %v1294_v3, 7  ;;  %v5233_v33 = vld [vmem:[#allocation2 + $0xb0] sm:$0x1]  ;;  %v1351_v45 = vrot.slane %v12531_v43, 4  ;;  %v1350_v57 = vor.u32 %v1348_v48, %v12531_v43 }
 0x1be   :  { %v10583_v4 = vld [vmem:[#allocation3 + $0x110] sm:$0xf]  ;;  %811 = vst [vmem:[#allocation2 + $0xe4] sm:$0x1] %v810_v39  ;;  %v6651_v0 = vrot.slane %v6650_v6, 4  ;;  %v5480_v11 = vrot.slane %v5233_v33, 5  ;;  %v994_v58 = vpack.c.bf16 %v717_v30, %v717_v30  ;;  %v12566_v6 = vpop.permute.xlu1 %5634 }
 0x1bf   :  { %v6655_v37 = vrot.slane %v6653_v52, 5  ;;  %7315 = vst.msk [vmem:[#allocation3 + $0x7c] sm:$0xf] %vm4135_vm8, %v7134_v23  ;;  %v5892_v16 = vld [vmem:[#allocation2 + $0xb8] sm:$0xf]  ;;  %v1299_v40 = vor.u32 %v1297_v35, %v12539_v29  ;;  %v711_v38 = vmax.f32 %v647_v63, 0.0  ;;  %v12572_v63 = vpop.permute.xlu2 %7139 }
 0x1c0   :  { %v5481_v42 = vsel %vm11416_vm15, %v5479_v1, %v5480_v11  ;;  %v4218_v54 = vld [vmem:[#allocation2 + $0x54] sm:$0xf]  ;;  %v4219_v51 = vld [vmem:[#allocation2 + $0x58] sm:$0xf]  ;;  %v916_v9 = vld [vmem:[#allocation2 + $0x110] sm:$0x1] }
 0x1c1   :  { %v11038_v49 = vld [vmem:[#allocation3 + $0x118] sm:$0xf0]  ;;  %v6656_v10 = vsel %vm11407_vm14, %v6651_v0, %v6655_v37  ;;  %5662 = vrot.lane.b32.xlu1 %v5481_v42, %s11161_s26  ;;  %v4441_v12 = vshrl.u32 %v4218_v54, 16  ;;  %v4444_v19 = vshll.u32 %v4218_v54, 16  ;;  %v4450_v17 = vshll.u32 %v4219_v51, 16 }
 0x1c2   :  { %v10584_v55 = vor.u32 %v11038_v49, %v10583_v4  ;;  %7163 = vrot.lane.b32.xlu2 %v6656_v10, %s11160_s25  ;;  %6047 = vrot.lane.b32.xlu0 %v5892_v16, %s11159_s1  ;;  %v4454_v60 = vshrl.u32 %v4219_v51, 16  ;;  %v917_v61 = vsel %vm11288_vm5, 0, %v916_v9  ;;  %v1353_v7 = vshrl.u32 %v994_v58, 16  ;;  %v907_v13 = vld [vmem:[#allocation2 + $0xec] sm:$0x1]  ;;  %v12570_v0 = vpop.permute.xlu0 %6019 }
 0x1c3   :  { %v4443_v24 = vrot.slane %v4441_v12, 4  ;;  %v4446_v62 = vrot.slane %v4444_v19, 5  ;;  %v4452_v41 = vrot.slane %v4450_v17, 5  ;;  %918 = vst [vmem:[#allocation2 + $0x110] sm:$0x1] %v917_v61  ;;  %v1356_v48 = vshll.u32 %v994_v58, 16 }
 0x1c4   :  { %10908 = vmatmul.msk.bf16.gmra.mxu3 %vm276_vm0, %v10584_v55  ;;  %v1796_v56 = vld [vmem:[#allocation2 + $0x108] sm:$0xf]  ;;  %v1355_v8 = vrot.slane %v1353_v7, 7  ;;  %v908_v43 = vsel %vm11288_vm5, 0, %v907_v13  ;;  %v4456_v39 = vrot.slane %v4454_v60, 4  ;;  %v1300_v35 = vrot.slane %v12539_v29, 4 }
 0x1c5   :  { %v1797_v3 = vsel %vm11344_vm7, %v1350_v57, %v1796_v56  ;;  %v1775_v23 = vld [vmem:[#allocation2 + $0xe4] sm:$0xf]  ;;  %v4447_v34 = vor.u32 %v4446_v62, %v4443_v24  ;;  %909 = vst [vmem:[#allocation2 + $0xec] sm:$0x1] %v908_v43  ;;  %v988_v33 = vpack.c.bf16 %v711_v38, %v711_v38  ;;  %v6288_v4 = vld [vmem:[#allocation2 + $0xb4] sm:$0xf]  ;;  %v484_v57 = vpop.f32.mrf.mxu2 }
 0x1c6   :  { %1798 = vst [vmem:[#allocation2 + $0x108] sm:$0xf] %v1797_v3  ;;  %v1776_v1 = vsel %vm11344_vm7, %v1299_v40, %v1775_v23  ;;  %v1358_v30 = vor.u32 %v1356_v48, %v1355_v8  ;;  %v1360_v52 = vrot.slane %v1355_v8, 4  ;;  %v5891_v58 = vld [vmem:[#allocation2 + $0xb4] sm:$0xf]  ;;  %v6658_v29 = vshrl.u32 %v6288_v4, 16 }
 0x1c7   :  { %1777 = vst [vmem:[#allocation2 + $0xe4] sm:$0xf] %v1776_v1  ;;  %v4448_v11 = vrot.slane %v4447_v34, 4  ;;  %v6289_v37 = vld [vmem:[#allocation2 + $0xb8] sm:$0xf]  ;;  %v4457_v16 = vor.u32 %v4456_v39, %v4452_v41  ;;  %v1302_v42 = vshrl.u32 %v988_v33, 16  ;;  %v12590_v39 = vpop.f32.mrf.mxu3 }
 0x1c8   :  { %v1359_v40 = vsel %vm11367_vm9, %v1351_v45, %v1358_v30  ;;  %v1305_v54 = vshll.u32 %v988_v33, 16  ;;  %v6661_v51 = vshll.u32 %v6288_v4, 16  ;;  %v4220_v9 = vld [vmem:[#allocation2 + $0x5c] sm:$0x1]  ;;  %v6660_v10 = vrot.slane %v6658_v29, 4 }
 0x1c9   :  { %v4453_v49 = vsel %vm11407_vm14, %v4448_v11, %v4452_v41  ;;  %1799 = vst.msk [vmem:[#allocation2 + $0x10c] sm:$0xf] %vm742_vm6, %v1359_v40  ;;  %v6667_v12 = vshll.u32 %v6289_v37, 16  ;;  %v6671_v19 = vshrl.u32 %v6289_v37, 16  ;;  %v1304_v28 = vrot.slane %v1302_v42, 7  ;;  %v7138_v37 = vpop.permute.xlu1 %7137 }
 0x1ca   :  { %5140 = vst.msk [vmem:[#allocation3 + $0x94] sm:$0xf] %vm742_vm6, %v4453_v49  ;;  %v1800_v17 = vld [vmem:[#allocation2 + $0x110] sm:$0x1]  ;;  %6045 = vrot.lane.b32.xlu2 %v5891_v58, %s11159_s1  ;;  %v6663_v55 = vrot.slane %v6661_v51, 5  ;;  %v587_v45 = vmul.f32 %v12392_v46, %v484_v57  ;;  %v4460_v7 = vshll.u32 %v4220_v9, 16  ;;  %v12603_v57 = vpop.permute.xlu0 %5636  ;;  %v12609_v49 = vpop.permute.xlu2 %7147 }
 0x1cb   :  { %5812 = vst.msk [vmem:[#allocation3 + $0x94] sm:$0xf] %vm3074_vm2, %v12537_v36  ;;  %v1801_v60 = vsel %vm11278_vm3, %v1360_v52, %v1800_v17  ;;  %v6669_v61 = vrot.slane %v6667_v12, 5  ;;  %v4458_v13 = vrot.slane %v4457_v16, 4  ;;  %v1307_v24 = vor.u32 %v1305_v54, %v1304_v28  ;;  %v7405_v38 = vld [vmem:[#allocation2 + $0xa8] sm:$0xe] }
 0x1cc   :  { %6197 = vst.msk [vmem:[#allocation3 + $0x94] sm:$0xf] %vm3750_vm4, %v12464_v27  ;;  %v1309_v62 = vrot.slane %v1304_v28, 4  ;;  %v1779_v41 = vld [vmem:[#allocation2 + $0xec] sm:$0x1]  ;;  %v6664_v48 = vor.u32 %v6663_v55, %v6660_v10  ;;  %v718_v56 = vmax.f32 %v654_v53, 0.0  ;;  %v655_v36 = vadd.f32 %v12415_v2, %v587_v45 }
 0x1cd   :  { %1802 = vst [vmem:[#allocation2 + $0x110] sm:$0x1] %v1801_v60  ;;  %v4462_v8 = vrot.slane %v4460_v7, 5  ;;  %v6673_v43 = vrot.slane %v6671_v19, 4  ;;  %v1308_v3 = vsel %vm11367_vm9, %v1300_v35, %v1307_v24  ;;  %v7406_v34 = vld [vmem:[#allocation2 + $0xac] sm:$0xf] }
 0x1ce   :  { %v1780_v23 = vsel %vm11278_vm3, %v1309_v62, %v1779_v41  ;;  %v6665_v27 = vrot.slane %v6664_v48, 4  ;;  %v7407_v1 = vld [vmem:[#allocation2 + $0xb0] sm:$0x1]  ;;  %v10421_v30 = vrot.slane %v7405_v38, 9  ;;  %1778 = vst.msk [vmem:[#allocation2 + $0xe8] sm:$0xf] %vm742_vm6, %v1308_v3  ;;  %v12599_v58 = vpack.c.bf16 %v718_v56, %v718_v56 }
 0x1cf   :  { %v4463_v52 = vsel %vm11407_vm14, %v4458_v13, %v4462_v8  ;;  %v7647_v33 = vrot.slane %v7406_v34, 5  ;;  %v7650_v4 = vrot.slane %v7407_v1, 5  ;;  %v5234_v11 = vld [vmem:[#allocation2 + $0xb4] sm:$0xe]  ;;  %1781 = vst [vmem:[#allocation2 + $0xec] sm:$0x1] %v1780_v23  ;;  %v6674_v53 = vor.u32 %v6673_v43, %v6669_v61  ;;  %v12630_v3 = vpop.f32.mrf.mxu3 }
 0x1d0   :  { %v6670_v35 = vsel %vm11407_vm14, %v6665_v27, %v6669_v61  ;;  %v5235_v29 = vld [vmem:[#allocation2 + $0xb8] sm:$0xf]  ;;  %v10391_v16 = vrot.slane %v5234_v11, 9  ;;  %v719_v40 = vmax.f32 %v655_v36, 0.0  ;;  %5141 = vst.msk [vmem:[#allocation3 + $0xa0] sm:$0xf] %vm742_vm6, %v4463_v52 }
 0x1d1   :  { %7165 = vrot.lane.b32.xlu1 %v6670_v35, %s11160_s25  ;;  %v7648_v42 = vsel %vm11416_vm15, %v10421_v30, %v7647_v33  ;;  %v7649_v54 = vrot.slane %v7647_v33, 4  ;;  %v5484_v51 = vrot.slane %v5235_v29, 5  ;;  %v821_v9 = vld [vmem:[#allocation2 + $0x114] sm:$0x1]  ;;  %5813 = vst.msk [vmem:[#allocation3 + $0xa0] sm:$0xf] %vm3074_vm2, %v12566_v6  ;;  %v12638_v11 = vpop.permute.xlu1 %5638 }
 0x1d2   :  { %v822_v10 = vsel %vm11278_vm3, 0, %v821_v9  ;;  %v1362_v12 = vshrl.u32 %v12599_v58, 16  ;;  %v6675_v19 = vrot.slane %v6674_v53, 4  ;;  %7873 = vst.msk [vmem:[#allocation3 + $0x128] sm:$0xf] %vm742_vm6, %v7648_v42  ;;  %v996_v60 = vpack.c.bf16 %v719_v40, %v719_v40  ;;  %v12643_v53 = vpop.permute.xlu0 %5644 }
 0x1d3   :  { %v7651_v17 = vsel %vm11416_vm15, %v7649_v54, %v7650_v4  ;;  %v5485_v28 = vsel %vm11416_vm15, %v10391_v16, %v5484_v51  ;;  %v11018_v55 = vld [vmem:[#allocation3 + $0x7c] sm:$0xf]  ;;  %v10505_v45 = vld [vmem:[#allocation3 + $0x84] sm:$0xf0]  ;;  %v6290_v7 = vld [vmem:[#allocation2 + $0xbc] sm:$0x1] }
 0x1d4   :  { %7874 = vst.msk [vmem:[#allocation3 + $0x134] sm:$0xf] %vm742_vm6, %v7651_v17  ;;  %5664 = vrot.lane.b32.xlu0 %v5485_v28, %s11161_s26  ;;  %v1364_v6 = vrot.slane %v1362_v12, 7  ;;  %v10508_v61 = vor.u32 %v11018_v55, %v10505_v45  ;;  %v5486_v13 = vrot.slane %v5484_v51, 4  ;;  %v6677_v24 = vshll.u32 %v6290_v7, 16 }
 0x1d5   :  { %6198 = vst.msk [vmem:[#allocation3 + $0xa0] sm:$0xf] %vm3750_vm4, %v12570_v0  ;;  %v5236_v62 = vld [vmem:[#allocation2 + $0xbc] sm:$0x1]  ;;  %v1370_v41 = vshrl.u32 %v996_v60, 16  ;;  %v1365_v48 = vshll.u32 %v12599_v58, 16  ;;  %v487_v58 = vpop.f32.mrf.mxu2 }
 0x1d6   :  { %7318 = vst.msk [vmem:[#allocation3 + $0xa0] sm:$0xf] %vm4135_vm8, %v12572_v63  ;;  %v1368_v56 = vrot.slane %v1364_v6, 4  ;;  %8963 = vmatmul.bf16.gmra.mxu2 %v10508_v61  ;;  %v5487_v8 = vrot.slane %v5236_v62, 5  ;;  %v6679_v38 = vrot.slane %v6677_v24, 5  ;;  %v1373_v4 = vshll.u32 %v996_v60, 16 }
 0x1d7   :  { %823 = vst [vmem:[#allocation2 + $0x114] sm:$0x1] %v822_v10  ;;  %v4221_v43 = vld [vmem:[#allocation2 + $0x60] sm:$0xf]  ;;  %v12628_v36 = vrot.slane %v1370_v41, 7  ;;  %v1367_v42 = vor.u32 %v1365_v48, %v1364_v6  ;;  %v12646_v10 = vpop.permute.xlu2 %7143  ;;  %v588_v45 = vmul.f32 %v12392_v46, %v487_v58  ;;  %v12663_v58 = vpop.f32.mrf.mxu3 }
 0x1d8   :  { %v5488_v0 = vsel %vm11416_vm15, %v5486_v13, %v5487_v8  ;;  %7317 = vst.msk [vmem:[#allocation3 + $0x94] sm:$0xf] %vm4135_vm8, %v7138_v37  ;;  %v4465_v23 = vshrl.u32 %v4221_v43, 16  ;;  %v4468_v27 = vshll.u32 %v4221_v43, 16  ;;  %v4222_v63 = vld [vmem:[#allocation2 + $0x64] sm:$0xf]  ;;  %v6680_v34 = vsel %vm11407_vm14, %v6675_v19, %v6679_v38 }
 0x1d9   :  { %5666 = vrot.lane.b32.xlu1 %v5488_v0, %s11161_s26  ;;  %v5894_v1 = vld [vmem:[#allocation2 + $0xc4] sm:$0xf]  ;;  %v4474_v30 = vshll.u32 %v4222_v63, 16  ;;  %v4478_v52 = vshrl.u32 %v4222_v63, 16  ;;  %v919_v33 = vld [vmem:[#allocation2 + $0x11c] sm:$0x1]  ;;  %7167 = vrot.lane.b32.xlu2 %v6680_v34, %s11160_s25  ;;  %v1375_v51 = vor.u32 %v1373_v4, %v12628_v36 }
 0x1da   :  { %v10595_v35 = vld [vmem:[#allocation3 + $0x128] sm:$0xf]  ;;  %v4467_v37 = vrot.slane %v4465_v23, 4  ;;  %v4470_v29 = vrot.slane %v4468_v27, 5  ;;  %v920_v16 = vsel %vm11288_vm5, 0, %v919_v33  ;;  %v1377_v17 = vrot.slane %v12628_v36, 4 }
 0x1db   :  { %v11041_v40 = vld [vmem:[#allocation3 + $0x130] sm:$0xf0]  ;;  %v4476_v54 = vrot.slane %v4474_v30, 5  ;;  %921 = vst [vmem:[#allocation2 + $0x11c] sm:$0x1] %v920_v16  ;;  %v4480_v9 = vrot.slane %v4478_v52, 4  ;;  %v1376_v60 = vsel %vm11367_vm9, %v1368_v56, %v1375_v51  ;;  %v12672_v51 = vpop.permute.xlu1 %5646 }
 0x1dc   :  { %v10596_v12 = vor.u32 %v11041_v40, %v10595_v35  ;;  %6051 = vrot.lane.b32.xlu0 %v5894_v1, %s11159_s1  ;;  %v4471_v19 = vor.u32 %v4470_v29, %v4467_v37  ;;  %v6291_v28 = vld [vmem:[#allocation2 + $0xc0] sm:$0xf]  ;;  %v6292_v55 = vld [vmem:[#allocation2 + $0xc4] sm:$0xf]  ;;  %v4223_v13 = vld [vmem:[#allocation2 + $0x68] sm:$0x1]  ;;  %v656_v1 = vadd.f32 %v12415_v2, %v588_v45 }
 0x1dd   :  { %v6682_v6 = vshrl.u32 %v6291_v28, 16  ;;  %v6685_v61 = vshll.u32 %v6291_v28, 16  ;;  %v6691_v7 = vshll.u32 %v6292_v55, 16  ;;  %1806 = vst.msk [vmem:[#allocation2 + $0x118] sm:$0xf] %vm742_vm6, %v1376_v60  ;;  %v6695_v41 = vshrl.u32 %v6292_v55, 16 }
 0x1de   :  { %10909 = vmatmul.msk.bf16.gmra.mxu3 %vm276_vm0, %v10596_v12  ;;  %v1803_v24 = vld [vmem:[#allocation2 + $0x114] sm:$0xf]  ;;  %v4472_v62 = vrot.slane %v4471_v19, 4  ;;  %v4481_v48 = vor.u32 %v4480_v9, %v4476_v54  ;;  %v5893_v38 = vld [vmem:[#allocation2 + $0xc0] sm:$0xf]  ;;  %v4484_v27 = vshll.u32 %v4223_v13, 16  ;;  %v489_v9 = vpop.f32.mrf.mxu2 }
 0x1df   :  { %v1804_v8 = vsel %vm11344_vm7, %v1367_v42, %v1803_v24  ;;  %v6684_v43 = vrot.slane %v6682_v6, 4  ;;  %v6687_v36 = vrot.slane %v6685_v61, 5  ;;  %v12657_v0 = vrot.slane %v6691_v7, 5  ;;  %v7408_v56 = vld [vmem:[#allocation2 + $0xb4] sm:$0xe]  ;;  %v12684_v7 = vpop.permute.xlu2 %6029 }
 0x1e0   :  { %1805 = vst [vmem:[#allocation2 + $0x114] sm:$0xf] %v1804_v8  ;;  %v4477_v23 = vsel %vm11407_vm14, %v4472_v62, %v4476_v54  ;;  %v4482_v63 = vrot.slane %v4481_v48, 4  ;;  %v7409_v34 = vld [vmem:[#allocation2 + $0xb8] sm:$0xf]  ;;  %v10422_v33 = vrot.slane %v7408_v56, 9  ;;  %v589_v8 = vmul.f32 %v12392_v46, %v489_v9 }
 0x1e1   :  { %5142 = vst.msk [vmem:[#allocation3 + $0xac] sm:$0xf] %vm742_vm6, %v4477_v23  ;;  %v6688_v30 = vor.u32 %v6687_v36, %v6684_v43  ;;  %v7410_v52 = vld [vmem:[#allocation2 + $0xbc] sm:$0x1]  ;;  %v7654_v4 = vrot.slane %v7409_v34, 5  ;;  %6049 = vrot.lane.b32.xlu2 %v5893_v38, %s11159_s1  ;;  %v4486_v37 = vrot.slane %v4484_v27, 5 }
 0x1e2   :  { %5814 = vst.msk [vmem:[#allocation3 + $0xac] sm:$0xf] %vm3074_vm2, %v12603_v57  ;;  %v1807_v35 = vld [vmem:[#allocation2 + $0x11c] sm:$0x1]  ;;  %v7657_v29 = vrot.slane %v7410_v52, 5  ;;  %v720_v55 = vmax.f32 %v656_v1, 0.0 }
 0x1e3   :  { %6199 = vst.msk [vmem:[#allocation3 + $0xac] sm:$0xf] %vm3750_vm4, %v12541_v50  ;;  %v1808_v16 = vsel %vm11278_vm3, %v1377_v17, %v1807_v35  ;;  %v6689_v40 = vrot.slane %v6688_v30, 4  ;;  %v7656_v42 = vrot.slane %v7654_v4, 4  ;;  %v5237_v54 = vld [vmem:[#allocation2 + $0xc0] sm:$0xe]  ;;  %v4487_v57 = vsel %vm11407_vm14, %v4482_v63, %v4486_v37  ;;  %v6024_v50 = vpop.permute.xlu0 %6023 }
 0x1e4   :  { %1809 = vst [vmem:[#allocation2 + $0x11c] sm:$0x1] %v1808_v16  ;;  %v7655_v12 = vsel %vm11416_vm15, %v10422_v33, %v7654_v4  ;;  %v5238_v19 = vld [vmem:[#allocation2 + $0xc4] sm:$0xf]  ;;  %v10392_v28 = vrot.slane %v5237_v54, 9  ;;  %v6697_v61 = vrot.slane %v6695_v41, 4  ;;  %v997_v48 = vpack.c.bf16 %v720_v55, %v720_v55 }
 0x1e5   :  { %v6694_v17 = vsel %vm11407_vm14, %v6689_v40, %v12657_v0  ;;  %5143 = vst.msk [vmem:[#allocation3 + $0xb8] sm:$0xf] %vm742_vm6, %v4487_v57  ;;  %v7658_v45 = vsel %vm11416_vm15, %v7656_v42, %v7657_v29  ;;  %v5491_v60 = vrot.slane %v5238_v19, 5  ;;  %v4227_v6 = vld [vmem:[#allocation2 + $0x78] sm:$0xf]  ;;  %v657_v35 = vadd.f32 %v12415_v2, %v589_v8  ;;  %v12707_v2 = vpop.permute.xlu1 %7141 }
 0x1e6   :  { %7169 = vrot.lane.b32.xlu1 %v6694_v17, %s11160_s25  ;;  %5815 = vst.msk [vmem:[#allocation3 + $0xb8] sm:$0xf] %vm3074_vm2, %v12638_v11  ;;  %v4228_v13 = vld [vmem:[#allocation2 + $0x7c] sm:$0xf]  ;;  %v4513_v24 = vshrl.u32 %v4227_v6, 16  ;;  %v4516_v62 = vshll.u32 %v4227_v6, 16  ;;  %v6698_v56 = vor.u32 %v6697_v61, %v12657_v0 }
 0x1e7   :  { %7875 = vst.msk [vmem:[#allocation3 + $0x140] sm:$0xf] %vm742_vm6, %v7655_v12  ;;  %v5492_v38 = vsel %vm11416_vm15, %v10392_v28, %v5491_v60  ;;  %v4522_v43 = vshll.u32 %v4228_v13, 16  ;;  %v4526_v41 = vshrl.u32 %v4228_v13, 16  ;;  %v824_v36 = vld [vmem:[#allocation2 + $0x120] sm:$0x1]  ;;  %v12703_v12 = vpop.f32.mrf.mxu3 }
 0x1e8   :  { %7876 = vst.msk [vmem:[#allocation3 + $0x14c] sm:$0xf] %vm742_vm6, %v7658_v45  ;;  %5668 = vrot.lane.b32.xlu0 %v5492_v38, %s11161_s26  ;;  %v4515_v11 = vrot.slane %v4513_v24, 4  ;;  %v4518_v23 = vrot.slane %v4516_v62, 5  ;;  %v825_v27 = vsel %vm11278_vm3, 0, %v824_v36  ;;  %v1379_v46 = vshrl.u32 %v997_v48, 16  ;;  %v12721_v62 = vpop.permute.xlu2 %7151 }
 0x1e9   :  { %v4524_v63 = vrot.slane %v4522_v43, 5  ;;  %826 = vst [vmem:[#allocation2 + $0x120] sm:$0x1] %v825_v27  ;;  %v1382_v34 = vshll.u32 %v997_v48, 16  ;;  %v11021_v1 = vld [vmem:[#allocation3 + $0x94] sm:$0xf]  ;;  %v492_v48 = vpop.f32.mrf.mxu2 }
 0x1ea   :  { %v4519_v30 = vor.u32 %v4518_v23, %v4515_v11  ;;  %v12698_v52 = vrot.slane %v1379_v46, 7  ;;  %v10517_v33 = vld [vmem:[#allocation3 + $0x9c] sm:$0xf0]  ;;  %v6293_v4 = vld [vmem:[#allocation2 + $0xc8] sm:$0x1]  ;;  %v6699_v0 = vrot.slane %v6698_v56, 4 }
 0x1eb   :  { %v10520_v37 = vor.u32 %v11021_v1, %v10517_v33  ;;  %v6701_v29 = vshll.u32 %v6293_v4, 16  ;;  %v5239_v16 = vld [vmem:[#allocation2 + $0xc8] sm:$0x1]  ;;  %v5493_v40 = vrot.slane %v5491_v60, 4  ;;  %v4229_v42 = vld [vmem:[#allocation2 + $0x80] sm:$0x1]  ;;  %v12715_v61 = vpop.permute.xlu0 %5640 }
 0x1ec   :  { %v4520_v54 = vrot.slane %v4519_v30, 4  ;;  %v1384_v9 = vor.u32 %v1382_v34, %v12698_v52  ;;  %v5494_v57 = vrot.slane %v5239_v16, 5  ;;  %6200 = vst.msk [vmem:[#allocation3 + $0xb8] sm:$0xf] %vm3750_vm4, %v6024_v50  ;;  %v4528_v28 = vrot.slane %v4526_v41, 4 }
 0x1ed   :  { %8968 = vmatmul.bf16.gmra.mxu2 %v10520_v37  ;;  %v6703_v19 = vrot.slane %v6701_v29, 5  ;;  %v4532_v55 = vshll.u32 %v4229_v42, 16  ;;  %7320 = vst.msk [vmem:[#allocation3 + $0xb8] sm:$0xf] %vm4135_vm8, %v12646_v10  ;;  %v11162_v6 = vmov 0   ;;  %v721_v50 = vmax.f32 %v657_v35, 0.0  ;;  %v12749_v4 = vpop.permute.xlu1 %5642 }
 0x1ee   :  { %v10607_v17 = vld [vmem:[#allocation3 + $0x140] sm:$0xf]  ;;  %v4525_v45 = vsel %vm11407_vm14, %v4520_v54, %v4524_v63  ;;  %v5495_v60 = vsel %vm11416_vm15, %v5493_v40, %v5494_v57  ;;  %752 = vst.msk [vmem:[#allocation2 + $0xd0] sm:$0xf] %vm742_vm6, %v11162_v6  ;;  %v4529_v24 = vor.u32 %v4528_v28, %v4524_v63  ;;  %v12726_v43 = vld [vmem:[#allocation2 + $0x128] sm:$0x1] }
 0x1ef   :  { %v11044_v13 = vld [vmem:[#allocation3 + $0x148] sm:$0xf0]  ;;  %5146 = vst.msk [vmem:[#allocation3 + $0xdc] sm:$0xf] %vm742_vm6, %v4525_v45  ;;  %v6704_v10 = vsel %vm11407_vm14, %v6699_v0, %v6703_v19  ;;  %5670 = vrot.lane.b32.xlu1 %v5495_v60, %s11161_s26  ;;  %v998_v41 = vpack.c.bf16 %v721_v50, %v721_v50  ;;  %v4534_v11 = vrot.slane %v4532_v55, 5  ;;  %v1385_v46 = vrot.slane %v12698_v52, 4  ;;  %v12759_v40 = vpop.f32.mrf.mxu3 }
 0x1f0   :  { %v10608_v8 = vor.u32 %v11044_v13, %v10607_v17  ;;  %5818 = vst.msk [vmem:[#allocation3 + $0xdc] sm:$0xf] %vm3074_vm2, %v12643_v53  ;;  %v1810_v38 = vld [vmem:[#allocation2 + $0x120] sm:$0xf]  ;;  %7171 = vrot.lane.b32.xlu2 %v6704_v10, %s11160_s25  ;;  %v4530_v56 = vrot.slane %v4529_v24, 4  ;;  %v12768_v10 = vpop.permute.xlu2 %6033 }
 0x1f1   :  { %v1811_v36 = vsel %vm11344_vm7, %v1384_v9, %v1810_v38  ;;  %6203 = vst.msk [vmem:[#allocation3 + $0xdc] sm:$0xf] %vm3750_vm4, %v12684_v7  ;;  %v1387_v23 = vshrl.u32 %v998_v41, 16  ;;  %v11147_v53 = vld [vmem:[%s15938_s2] ss:$0 sm:$0xff]  ;;  %v923_v7 = vsel %vm11288_vm5, 0, %v12726_v43  ;;  %v494_v57 = vpop.f32.mrf.mxu2 }
 0x1f2   :  { %10910 = vmatmul.msk.bf16.gmra.mxu3 %vm276_vm0, %v10608_v8  ;;  %1812 = vst [vmem:[#allocation2 + $0x120] sm:$0xf] %v1811_v36  ;;  %v590_v27 = vmul.f32 %v11147_v53, %v492_v48  ;;  %v4535_v63 = vsel %vm11407_vm14, %v4530_v56, %v4534_v11  ;;  %v1390_v1 = vshll.u32 %v998_v41, 16  ;;  %v7412_v30 = vld [vmem:[#allocation2 + $0xc4] sm:$0xf]  ;;  %v591_v17 = vmul.f32 %v11147_v53, %v494_v57 }
 0x1f3   :  { %743 = vst.msk [vmem:[#allocation2] sm:$0xf] %vm742_vm6, %v11162_v6  ;;  %v12745_v34 = vrot.slane %v1387_v23, 7  ;;  %v5240_v33 = vld [vmem:[#allocation2 + $0xe4] sm:$0xe]  ;;  %v12757_v16 = vpop.permute.xlu0 %6031  ;;  %v7661_v54 = vrot.slane %v7412_v30, 5 }
 0x1f4   :  { %5147 = vst.msk [vmem:[#allocation3 + $0xe8] sm:$0xf] %vm742_vm6, %v4535_v63  ;;  %v7411_v35 = vld [vmem:[#allocation2 + $0xc0] sm:$0xe]  ;;  %v11148_v37 = vld [vmem:[%s15939_s3] ss:$0 sm:$0xff] }
 0x1f5   :  { %5819 = vst.msk [vmem:[#allocation3 + $0xe8] sm:$0xf] %vm3074_vm2, %v12672_v51  ;;  %v5896_v52 = vld [vmem:[#allocation2 + $0xd0] sm:$0xf]  ;;  %v658_v29 = vadd.f32 %v11148_v37, %v590_v27  ;;  %v7413_v42 = vld [vmem:[#allocation2 + $0xc8] sm:$0x1]  ;;  %v1392_v45 = vor.u32 %v1390_v1, %v12745_v34  ;;  %v659_v11 = vadd.f32 %v11148_v37, %v591_v17 }
 0x1f6   :  { %6055 = vrot.lane.b32.xlu0 %v5896_v52, %s11159_s1  ;;  %744 = vst.msk [vmem:[#allocation2 + $0x4] sm:$0xf] %vm742_vm6, %v11162_v6  ;;  %v6295_v0 = vld [vmem:[#allocation2 + $0xd0] sm:$0xf]  ;;  %v5241_v9 = vld [vmem:[#allocation2 + $0xe8] sm:$0xf] }
 0x1f7   :  { %746 = vst.msk [vmem:[#allocation2 + $0x8] sm:$0x1] %vm745_vm1, %v11162_v6  ;;  %v6719_v51 = vshrl.u32 %v6295_v0, 16  ;;  %v10393_v19 = vrot.slane %v5240_v33, 9  ;;  %v5498_v28 = vrot.slane %v5241_v9, 5  ;;  %v6715_v24 = vshll.u32 %v6295_v0, 16  ;;  %v12809_v17 = vpop.f32.mrf.mxu3 }
 0x1f8   :  { %747 = vst.msk [vmem:[#allocation2 + $0xd8] sm:$0xf] %vm742_vm6, %v11162_v6  ;;  %v4224_v55 = vld [vmem:[#allocation2 + $0x6c] sm:$0xf]  ;;  %v4225_v13 = vld [vmem:[#allocation2 + $0x70] sm:$0xf] }
 0x1f9   :  { %748 = vst.msk [vmem:[#allocation2 + $0xdc] sm:$0xf] %vm742_vm6, %v11162_v6  ;;  %v4489_v60 = vshrl.u32 %v4224_v55, 16  ;;  %v4492_v50 = vshll.u32 %v4224_v55, 16  ;;  %v4498_v48 = vshll.u32 %v4225_v13, 16  ;;  %v4502_v8 = vshrl.u32 %v4225_v13, 16 }
 0x1fa   :  { %749 = vst.msk [vmem:[#allocation2 + $0xe0] sm:$0x1] %vm745_vm1, %v11162_v6  ;;  %v722_v38 = vmax.f32 %v658_v29, 0.0  ;;  %v10423_v41 = vrot.slane %v7411_v35, 9  ;;  %v7663_v23 = vrot.slane %v7661_v54, 4  ;;  %v7664_v53 = vrot.slane %v7413_v42, 5 }
 0x1fb   :  { %751 = vst.msk [vmem:[#allocation2 + $0xcc] sm:$0xf] %vm742_vm6, %v11162_v6  ;;  %v4491_v36 = vrot.slane %v4489_v60, 4  ;;  %v4494_v56 = vrot.slane %v4492_v50, 5  ;;  %v5499_v27 = vsel %vm11416_vm15, %v10393_v19, %v5498_v28  ;;  %v4500_v63 = vrot.slane %v4498_v48, 5  ;;  %v12795_v19 = vpop.permute.xlu1 %7149 }
 0x1fc   :  { %753 = vst.msk [vmem:[#allocation2 + $0xd4] sm:$0x1] %vm745_vm1, %v11162_v6  ;;  %v12780_v30 = vld [vmem:[#allocation2 + $0x12c] sm:$0x1]  ;;  %v12782_v52 = vpack.c.bf16 %v722_v38, %v722_v38  ;;  %v6721_v33 = vrot.slane %v6719_v51, 4  ;;  %v4504_v0 = vrot.slane %v4502_v8, 4  ;;  %v1393_v35 = vsel %vm11367_vm9, %v1385_v46, %v1392_v45 }
 0x1fd   :  { %754 = vst.msk [vmem:[#allocation2 + $0x1a4] sm:$0xf] %vm742_vm6, %v11162_v6  ;;  %v4495_v1 = vor.u32 %v4494_v56, %v4491_v36  ;;  %v12788_v37 = vrot.slane %v6715_v24, 5  ;;  %v7662_v29 = vsel %vm11416_vm15, %v10423_v41, %v7661_v54  ;;  %v4226_v9 = vld [vmem:[#allocation2 + $0x74] sm:$0x1]  ;;  %v723_v57 = vmax.f32 %v659_v11, 0.0  ;;  %v12807_v54 = vpop.permute.xlu0 %5648 }
 0x1fe   :  { %755 = vst.msk [vmem:[#allocation2 + $0x1a8] sm:$0xf] %vm742_vm6, %v11162_v6  ;;  %5672 = vrot.lane.b32.xlu0 %v5499_v27, %s11161_s26  ;;  %v4505_v51 = vor.u32 %v4504_v0, %v4500_v63  ;;  %v1394_v46 = vrot.slane %v12745_v34, 4  ;;  %v7665_v55 = vsel %vm11416_vm15, %v7663_v23, %v7664_v53  ;;  %v1396_v45 = vshrl.u32 %v12782_v52, 16  ;;  %v12826_v56 = vld [vmem:[#allocation2 + $0xec] sm:$0x1] }
 0x1ff   :  { %756 = vst.msk [vmem:[#allocation2 + $0x1ac] sm:$0x1] %vm745_vm1, %v11162_v6  ;;  %v4496_v42 = vrot.slane %v4495_v1, 4  ;;  %v828_v6 = vsel %vm11278_vm3, 0, %v12780_v30  ;;  %v6722_v43 = vor.u32 %v6721_v33, %v12788_v37  ;;  %v4508_v34 = vshll.u32 %v4226_v9, 16 }
 0x200   :  { %924 = vst [vmem:[#allocation2 + $0x128] sm:$0x1] %v923_v7  ;;  %v12814_v7 = vrot.slane %v5498_v28, 4  ;;  %v1000_v24 = vpack.c.bf16 %v723_v57, %v723_v57  ;;  %v1399_v38 = vshll.u32 %v12782_v52, 16  ;;  %v4506_v41 = vrot.slane %v4505_v51, 4  ;;  %v12822_v28 = vpop.permute.xlu2 %7155 }
 0x201   :  { %1813 = vst.msk [vmem:[#allocation2 + $0x124] sm:$0xf] %vm742_vm6, %v1393_v35  ;;  %v4501_v13 = vsel %vm11407_vm14, %v4496_v42, %v4500_v63  ;;  %v5898_v11 = vld [vmem:[#allocation2 + $0xf4] sm:$0xf]  ;;  %v6723_v27 = vrot.slane %v6722_v43, 4  ;;  %v4510_v1 = vrot.slane %v4508_v34, 5 }
 0x202   :  { %v5895_v60 = vld [vmem:[#allocation2 + $0xcc] sm:$0xf]  ;;  %7877 = vst.msk [vmem:[#allocation3 + $0x158] sm:$0xf] %vm742_vm6, %v7662_v29  ;;  %v12832_v30 = vld [vmem:[#allocation2 + $0x134] sm:$0x1]  ;;  %v12836_v29 = vpop.f32.mrf.mxu2 }
 0x203   :  { %v6294_v50 = vld [vmem:[#allocation2 + $0xcc] sm:$0xf]  ;;  %6053 = vrot.lane.b32.xlu2 %v5895_v60, %s11159_s1  ;;  %7878 = vst.msk [vmem:[#allocation3 + $0x164] sm:$0xf] %vm742_vm6, %v7665_v55  ;;  %v6296_v36 = vld [vmem:[#allocation2 + $0xd4] sm:$0x1]  ;;  %v12838_v42 = vpop.permute.xlu1 %5650  ;;  %v4511_v51 = vsel %vm11407_vm14, %v4506_v41, %v4510_v1 }
 0x204   :  { %v6706_v48 = vshrl.u32 %v6294_v50, 16  ;;  %v6709_v8 = vshll.u32 %v6294_v50, 16  ;;  %7319 = vst.msk [vmem:[#allocation3 + $0xac] sm:$0xf] %vm4135_vm8, %v12707_v2  ;;  %v6725_v63 = vshll.u32 %v6296_v36, 16  ;;  %v1404_v52 = vshrl.u32 %v1000_v24, 16 }
 0x205   :  { %5144 = vst.msk [vmem:[#allocation3 + $0xc4] sm:$0xf] %vm742_vm6, %v4501_v13  ;;  %v1407_v35 = vshll.u32 %v1000_v24, 16  ;;  %v1398_v9 = vrot.slane %v1396_v45, 7  ;;  %v12848_v55 = vpop.permute.xlu0 %6035  ;;  %v5501_v60 = vrot.slane %v12826_v56, 5  ;;  %v926_v45 = vsel %vm11288_vm5, 0, %v12832_v30  ;;  %v12856_v13 = vpop.f32.mrf.mxu3 }
 0x206   :  { %v6708_v23 = vrot.slane %v6706_v48, 4  ;;  %v6711_v53 = vrot.slane %v6709_v8, 5  ;;  %5816 = vst.msk [vmem:[#allocation3 + $0xc4] sm:$0xf] %vm3074_vm2, %v12715_v61  ;;  %6059 = vrot.lane.b32.xlu0 %v5898_v11, %s11159_s1  ;;  %v6727_v0 = vrot.slane %v6725_v63, 5  ;;  %v12846_v57 = vrot.slane %v1404_v52, 7 }
 0x207   :  { %v1814_v2 = vld [vmem:[#allocation2 + $0x128] sm:$0x1]  ;;  %6201 = vst.msk [vmem:[#allocation3 + $0xc4] sm:$0xf] %vm3750_vm4, %v11965_v31  ;;  %v6298_v36 = vld [vmem:[#allocation2 + $0xf4] sm:$0xf]  ;;  %v1401_v63 = vor.u32 %v1399_v38, %v1398_v9 }
 0x208   :  { %v6712_v33 = vor.u32 %v6711_v53, %v6708_v23  ;;  %v1815_v61 = vsel %vm11278_vm3, %v1394_v46, %v1814_v2  ;;  %7321 = vst.msk [vmem:[#allocation3 + $0xc4] sm:$0xf] %vm4135_vm8, %v11983_v47  ;;  %v6728_v34 = vsel %vm11407_vm14, %v6723_v27, %v6727_v0  ;;  %v10529_v46 = vld [vmem:[#allocation3 + $0xb4] sm:$0xf0]  ;;  %v1402_v47 = vrot.slane %v1398_v9, 4  ;;  %v12871_v27 = vpop.permute.xlu2 %6037 }
 0x209   :  { %1816 = vst [vmem:[#allocation2 + $0x128] sm:$0x1] %v1815_v61  ;;  %v10619_v43 = vld [vmem:[#allocation3 + $0x158] sm:$0xf]  ;;  %v1409_v41 = vor.u32 %v1407_v35, %v12846_v57  ;;  %v6739_v23 = vshll.u32 %v6298_v36, 16  ;;  %v6743_v1 = vshrl.u32 %v6298_v36, 16 }
 0x20a   :  { %v6713_v31 = vrot.slane %v6712_v33, 4  ;;  %v11047_v50 = vld [vmem:[#allocation3 + $0x160] sm:$0xf0]  ;;  %829 = vst [vmem:[#allocation2 + $0x12c] sm:$0x1] %v828_v6 }
 0x20b   :  { %v10620_v48 = vor.u32 %v11047_v50, %v10619_v43  ;;  %7175 = vrot.lane.b32.xlu2 %v6728_v34, %s11160_s25  ;;  %5145 = vst.msk [vmem:[#allocation3 + $0xd0] sm:$0xf] %vm742_vm6, %v4511_v51  ;;  %v11024_v8 = vld [vmem:[#allocation3 + $0xac] sm:$0xf]  ;;  %v6297_v6 = vld [vmem:[#allocation2 + $0xf0] sm:$0xf]  ;;  %v5502_v50 = vsel %vm11416_vm15, %v12814_v7, %v5501_v60 }
 0x20c   :  { %v6718_v24 = vsel %vm11407_vm14, %v6713_v31, %v12788_v37  ;;  %5817 = vst.msk [vmem:[#allocation3 + $0xd0] sm:$0xf] %vm3074_vm2, %v12749_v4  ;;  %v10532_v20 = vor.u32 %v11024_v8, %v10529_v46  ;;  %v6730_v56 = vshrl.u32 %v6297_v6, 16  ;;  %v6733_v11 = vshll.u32 %v6297_v6, 16  ;;  %v7414_v53 = vld [vmem:[#allocation2 + $0xcc] sm:$0xe]  ;;  %v12883_v31 = vpop.f32.mrf.mxu2 }
 0x20d   :  { %7173 = vrot.lane.b32.xlu1 %v6718_v24, %s11160_s25  ;;  %10911 = vmatmul.msk.bf16.gmra.mxu3 %vm276_vm0, %v10620_v48  ;;  %6202 = vst.msk [vmem:[#allocation3 + $0xd0] sm:$0xf] %vm3750_vm4, %v11941_v5  ;;  %v1411_v37 = vrot.slane %v12846_v57, 4  ;;  %v7415_v30 = vld [vmem:[#allocation2 + $0xd0] sm:$0xf]  ;;  %v1410_v5 = vsel %vm11367_vm9, %v1402_v47, %v1409_v41  ;;  %v10424_v33 = vrot.slane %v7414_v53, 9  ;;  %v12881_v61 = vpop.permute.xlu0 %5652 }
 0x20e   :  { %7322 = vst.msk [vmem:[#allocation3 + $0xd0] sm:$0xf] %vm4135_vm8, %v12609_v49  ;;  %8973 = vmatmul.bf16.gmra.mxu2 %v10532_v20  ;;  %v6732_v4 = vrot.slane %v6730_v56, 4  ;;  %v6735_v52 = vrot.slane %v6733_v11, 5  ;;  %v7416_v2 = vld [vmem:[#allocation2 + $0xd4] sm:$0x1]  ;;  %v12900_v20 = vpop.f32.mrf.mxu3 }
 0x20f   :  { %6204 = vst.msk [vmem:[#allocation3 + $0xe8] sm:$0xf] %vm3750_vm4, %v12757_v16  ;;  %v5897_v38 = vld [vmem:[#allocation2 + $0xf0] sm:$0xf]  ;;  %v7668_v0 = vrot.slane %v7415_v30, 5  ;;  %v7671_v35 = vrot.slane %v7416_v2, 5  ;;  %v12885_v16 = vpop.permute.xlu1 %7153 }
 0x210   :  { %7324 = vst.msk [vmem:[#allocation3 + $0xe8] sm:$0xf] %vm4135_vm8, %v12721_v62  ;;  %v5243_v49 = vld [vmem:[#allocation2 + $0xf0] sm:$0xe]  ;;  %v5244_v51 = vld [vmem:[#allocation2 + $0xf4] sm:$0xf]  ;;  %v6736_v47 = vor.u32 %v6735_v52, %v6732_v4  ;;  %v12908_v2 = vpop.permute.xlu2 %7159 }
 0x211   :  { %v1817_v9 = vld [vmem:[#allocation2 + $0x12c] sm:$0xf]  ;;  %927 = vst [vmem:[#allocation2 + $0x134] sm:$0x1] %v926_v45  ;;  %v6741_v43 = vrot.slane %v6739_v23, 5  ;;  %v7669_v62 = vsel %vm11416_vm15, %v10424_v33, %v7668_v0  ;;  %v7670_v34 = vrot.slane %v7668_v0, 4 }
 0x212   :  { %v1818_v25 = vsel %vm11344_vm7, %v1401_v63, %v1817_v9  ;;  %1820 = vst.msk [vmem:[#allocation2 + $0x130] sm:$0xf] %vm742_vm6, %v1410_v5  ;;  %v4230_v46 = vld [vmem:[#allocation2 + $0x84] sm:$0xf]  ;;  %v10394_v45 = vrot.slane %v5243_v49, 9  ;;  %v5505_v24 = vrot.slane %v5244_v51, 5 }
 0x213   :  { %1819 = vst [vmem:[#allocation2 + $0x12c] sm:$0xf] %v1818_v25  ;;  %6057 = vrot.lane.b32.xlu2 %v5897_v38, %s11159_s1  ;;  %v4231_v59 = vld [vmem:[#allocation2 + $0x88] sm:$0xf]  ;;  %v7672_v48 = vsel %vm11416_vm15, %v7670_v34, %v7671_v35  ;;  %v4537_v8 = vshrl.u32 %v4230_v46, 16  ;;  %v4540_v41 = vshll.u32 %v4230_v46, 16 }
 0x214   :  { %7879 = vst.msk [vmem:[#allocation3 + $0x170] sm:$0xf] %vm742_vm6, %v7669_v62  ;;  %v6299_v6 = vld [vmem:[#allocation2 + $0xf8] sm:$0x1]  ;;  %v5506_v7 = vsel %vm11416_vm15, %v10394_v45, %v5505_v24  ;;  %v4546_v60 = vshll.u32 %v4231_v59, 16  ;;  %v4550_v36 = vshrl.u32 %v4231_v59, 16 }
 0x215   :  { %5674 = vrot.lane.b32.xlu1 %v5502_v50, %s11161_s26  ;;  %7880 = vst.msk [vmem:[#allocation3 + $0x17c] sm:$0xf] %vm742_vm6, %v7672_v48  ;;  %v6745_v56 = vrot.slane %v6743_v1, 4  ;;  %5676 = vrot.lane.b32.xlu0 %v5506_v7, %s11161_s26  ;;  %v4539_v11 = vrot.slane %v4537_v8, 4  ;;  %v4542_v23 = vrot.slane %v4540_v41, 5  ;;  %v6749_v53 = vshll.u32 %v6299_v6, 16  ;;  %v12916_v25 = vpop.permute.xlu0 %6039 }
 0x216   :  { %7323 = vst.msk [vmem:[#allocation3 + $0xdc] sm:$0xf] %vm4135_vm8, %v12795_v19  ;;  %v6737_v63 = vrot.slane %v6736_v47, 4  ;;  %v4548_v4 = vrot.slane %v4546_v60, 5  ;;  %v4232_v5 = vld [vmem:[#allocation2 + $0x8c] sm:$0x1] }
 0x217   :  { %v6746_v30 = vor.u32 %v6745_v56, %v6741_v43  ;;  %v4552_v52 = vrot.slane %v4550_v36, 4  ;;  %v4543_v38 = vor.u32 %v4542_v23, %v4539_v11  ;;  %v6751_v0 = vrot.slane %v6749_v53, 5  ;;  %v12910_v35 = vld [vmem:[#allocation2 + $0xf8] sm:$0x1]  ;;  %v10541_v46 = vld [vmem:[#allocation3 + $0xcc] sm:$0xf0]  ;;  %v12925_v48 = vpop.permute.xlu1 %5654 }
 0x218   :  { %v1821_v33 = vld [vmem:[#allocation2 + $0x134] sm:$0x1]  ;;  %v4556_v1 = vshll.u32 %v4232_v5, 16  ;;  %v5507_v9 = vrot.slane %v5505_v24, 4  ;;  %v6742_v50 = vsel %vm11407_vm14, %v6737_v63, %v6741_v43  ;;  %v5508_v57 = vrot.slane %v12910_v35, 5  ;;  %v12923_v24 = vpop.f32.mrf.mxu2 }
 0x219   :  { %v1822_v19 = vsel %vm11278_vm3, %v1411_v37, %v1821_v33  ;;  %v6747_v49 = vrot.slane %v6746_v30, 4  ;;  %v4553_v51 = vor.u32 %v4552_v52, %v4548_v4  ;;  %v4544_v62 = vrot.slane %v4543_v38, 4  ;;  %v5900_v37 = vld [vmem:[#allocation2 + $0x100] sm:$0xf]  ;;  %v11027_v59 = vld [vmem:[#allocation3 + $0xc4] sm:$0xf]  ;;  %v12937_v30 = vpop.f32.mrf.mxu3 }
 0x21a   :  { %1823 = vst [vmem:[#allocation2 + $0x134] sm:$0x1] %v1822_v19  ;;  %v4558_v34 = vrot.slane %v4556_v1, 5  ;;  %v10544_v43 = vor.u32 %v11027_v59, %v10541_v46  ;;  %v6300_v6 = vld [vmem:[#allocation2 + $0xfc] sm:$0xf] }
 0x21b   :  { %v10631_v47 = vld [vmem:[#allocation3 + $0x170] sm:$0xf]  ;;  %v6752_v45 = vsel %vm11407_vm14, %v6747_v49, %v6751_v0  ;;  %v4554_v15 = vrot.slane %v4553_v51, 4  ;;  %v4549_v41 = vsel %vm11407_vm14, %v4544_v62, %v4548_v4  ;;  %v6754_v56 = vshrl.u32 %v6300_v6, 16  ;;  %v7417_v23 = vld [vmem:[#allocation2 + $0xf0] sm:$0xe]  ;;  %v12947_v62 = vpop.permute.xlu2 %6041 }
 0x21c   :  { %v11050_v8 = vld [vmem:[#allocation3 + $0x178] sm:$0xf0]  ;;  %7179 = vrot.lane.b32.xlu2 %v6752_v45, %s11160_s25  ;;  %v6301_v7 = vld [vmem:[#allocation2 + $0x100] sm:$0xf]  ;;  %5148 = vst.msk [vmem:[#allocation3 + $0xf4] sm:$0xf] %vm742_vm6, %v4549_v41 }
 0x21d   :  { %7177 = vrot.lane.b32.xlu1 %v6742_v50, %s11160_s25  ;;  %v10632_v60 = vor.u32 %v11050_v8, %v10631_v47  ;;  %v4559_v36 = vsel %vm11407_vm14, %v4554_v15, %v4558_v34  ;;  %v6757_v11 = vshll.u32 %v6300_v6, 16  ;;  %5820 = vst.msk [vmem:[#allocation3 + $0xf4] sm:$0xf] %vm3074_vm2, %v12807_v54  ;;  %6063 = vrot.lane.b32.xlu0 %v5900_v37, %s11159_s1  ;;  %v6763_v53 = vshll.u32 %v6301_v7, 16  ;;  %v7418_v4 = vld [vmem:[#allocation2 + $0xf4] sm:$0xf]  ;;  %v12957_v15 = vpop.permute.xlu0 %5656 }
 0x21e   :  { %8978 = vmatmul.bf16.gmra.mxu2 %v10544_v43  ;;  %v6767_v63 = vshrl.u32 %v6301_v7, 16  ;;  %6205 = vst.msk [vmem:[#allocation3 + $0xf4] sm:$0xf] %vm3750_vm4, %v12768_v10  ;;  %v6756_v5 = vrot.slane %v6754_v56, 4  ;;  %v7419_v33 = vld [vmem:[#allocation2 + $0xf8] sm:$0x1]  ;;  %v5509_v47 = vsel %vm11416_vm15, %v5507_v9, %v5508_v57 }
 0x21f   :  { %10912 = vmatmul.msk.bf16.gmra.mxu3 %vm276_vm0, %v10632_v60  ;;  %v6759_v52 = vrot.slane %v6757_v11, 5  ;;  %5149 = vst.msk [vmem:[#allocation3 + $0x100] sm:$0xf] %vm742_vm6, %v4559_v36  ;;  %v12943_v38 = vrot.slane %v6763_v53, 5  ;;  %v10425_v54 = vrot.slane %v7417_v23, 9  ;;  %v7675_v0 = vrot.slane %v7418_v4, 5  ;;  %v12970_v7 = vpop.permute.xlu1 %7157 }
 0x220   :  { %v7678_v35 = vrot.slane %v7419_v33, 5  ;;  %5821 = vst.msk [vmem:[#allocation3 + $0x100] sm:$0xf] %vm3074_vm2, %v12838_v42  ;;  %v5899_v1 = vld [vmem:[#allocation2 + $0xfc] sm:$0xf]  ;;  %v6769_v45 = vrot.slane %v6767_v63, 4  ;;  %v12968_v6 = vpop.f32.mrf.mxu2 }
 0x221   :  { %v6760_v19 = vor.u32 %v6759_v52, %v6756_v5  ;;  %v5246_v49 = vld [vmem:[#allocation2 + $0xfc] sm:$0xe]  ;;  %v5247_v51 = vld [vmem:[#allocation2 + $0x100] sm:$0xf]  ;;  %6206 = vst.msk [vmem:[#allocation3 + $0x100] sm:$0xf] %vm3750_vm4, %v12848_v55  ;;  %v7676_v10 = vsel %vm11416_vm15, %v10425_v54, %v7675_v0  ;;  %v12977_v54 = vpop.f32.mrf.mxu3 }
 0x222   :  { %v7677_v34 = vrot.slane %v7675_v0, 4  ;;  %v10395_v46 = vrot.slane %v5246_v49, 9  ;;  %v5512_v50 = vrot.slane %v5247_v51, 5  ;;  %7326 = vst.msk [vmem:[#allocation3 + $0x100] sm:$0xf] %vm4135_vm8, %v12822_v28  ;;  %v6770_v43 = vor.u32 %v6769_v45, %v12943_v38 }
 0x223   :  { %v4233_v42 = vld [vmem:[#allocation2 + $0x90] sm:$0xf]  ;;  %7881 = vst.msk [vmem:[#allocation3 + $0x188] sm:$0xf] %vm742_vm6, %v7676_v10  ;;  %v4234_v37 = vld [vmem:[#allocation2 + $0x94] sm:$0xf] }
 0x224   :  { %6061 = vrot.lane.b32.xlu2 %v5899_v1, %s11159_s1  ;;  %v7679_v55 = vsel %vm11416_vm15, %v7677_v34, %v7678_v35  ;;  %v4561_v59 = vshrl.u32 %v4233_v42, 16  ;;  %v4564_v8 = vshll.u32 %v4233_v42, 16  ;;  %v5513_v28 = vsel %vm11416_vm15, %v10395_v46, %v5512_v50  ;;  %v6302_v41 = vld [vmem:[#allocation2 + $0x104] sm:$0x1]  ;;  %7325 = vst.msk [vmem:[#allocation3 + $0xf4] sm:$0xf] %vm4135_vm8, %v12885_v16 }
 0x225   :  { %5678 = vrot.lane.b32.xlu1 %v5509_v47, %s11161_s26  ;;  %7882 = vst.msk [vmem:[#allocation3 + $0x194] sm:$0xf] %vm742_vm6, %v7679_v55  ;;  %v4570_v9 = vshll.u32 %v4234_v37, 16  ;;  %v4574_v57 = vshrl.u32 %v4234_v37, 16  ;;  %v6761_v60 = vrot.slane %v6760_v19, 4  ;;  %5680 = vrot.lane.b32.xlu0 %v5513_v28, %s11161_s26  ;;  %v6773_v11 = vshll.u32 %v6302_v41, 16 }
 0x226   :  { %v4563_v36 = vrot.slane %v4561_v59, 4  ;;  %v4566_v56 = vrot.slane %v4564_v8, 5  ;;  %v6771_v53 = vrot.slane %v6770_v43, 4  ;;  %v12975_v63 = vld [vmem:[#allocation2 + $0x104] sm:$0x1]  ;;  %15967 = vst [vmem:[#allocation4_spill] sm:$0xff] %v12977_v54  ;;  %v12985_v59 = vpop.permute.xlu2 %7163 }
 0x227   :  { %v4572_v23 = vrot.slane %v4570_v9, 5  ;;  %v4235_v4 = vld [vmem:[#allocation2 + $0x98] sm:$0x1]  ;;  %v6775_v52 = vrot.slane %v6773_v11, 5  ;;  %v4576_v33 = vrot.slane %v4574_v57, 4  ;;  %v5514_v0 = vrot.slane %v5512_v50, 4 }
 0x228   :  { %v4567_v5 = vor.u32 %v4566_v56, %v4563_v36  ;;  %v4580_v35 = vshll.u32 %v4235_v4, 16  ;;  %v11030_v1 = vld [vmem:[#allocation3 + $0xdc] sm:$0xf]  ;;  %v6766_v16 = vsel %vm11407_vm14, %v6761_v60, %v12943_v38  ;;  %v5515_v49 = vrot.slane %v12975_v63, 5  ;;  %v10553_v10 = vld [vmem:[#allocation3 + $0xe4] sm:$0xf0]  ;;  %v12992_v56 = vpop.permute.xlu0 %6043 }
 0x229   :  { %v4577_v51 = vor.u32 %v4576_v33, %v4572_v23  ;;  %v6303_v34 = vld [vmem:[#allocation2 + $0x108] sm:$0xf]  ;;  %v6776_v47 = vsel %vm11407_vm14, %v6771_v53, %v6775_v52  ;;  %v5902_v45 = vld [vmem:[#allocation2 + $0x10c] sm:$0xf]  ;;  %v10556_v55 = vor.u32 %v11030_v1, %v10553_v10  ;;  %v7420_v36 = vld [vmem:[#allocation2 + $0xfc] sm:$0xe]  ;;  %v13004_v33 = vpop.f32.mrf.mxu2 }
 0x22a   :  { %v4568_v19 = vrot.slane %v4567_v5, 4  ;;  %v10643_v46 = vld [vmem:[#allocation3 + $0x188] sm:$0xf]  ;;  %v4582_v42 = vrot.slane %v4580_v35, 5  ;;  %v6304_v50 = vld [vmem:[#allocation2 + $0x10c] sm:$0xf] }
 0x22b   :  { %v6778_v37 = vshrl.u32 %v6303_v34, 16  ;;  %v4578_v28 = vrot.slane %v4577_v51, 4  ;;  %v6781_v9 = vshll.u32 %v6303_v34, 16  ;;  %v6787_v57 = vshll.u32 %v6304_v50, 16  ;;  %v7421_v63 = vld [vmem:[#allocation2 + $0x100] sm:$0xf] }
 0x22c   :  { %v11053_v38 = vld [vmem:[#allocation3 + $0x190] sm:$0xf0]  ;;  %v4573_v8 = vsel %vm11407_vm14, %v4568_v19, %v4572_v23  ;;  %7183 = vrot.lane.b32.xlu2 %v6776_v47, %s11160_s25  ;;  %v6791_v60 = vshrl.u32 %v6304_v50, 16  ;;  %v10426_v5 = vrot.slane %v7420_v36, 9  ;;  %v7682_v52 = vrot.slane %v7421_v63, 5 }
 0x22d   :  { %7181 = vrot.lane.b32.xlu1 %v6766_v16, %s11160_s25  ;;  %v10644_v41 = vor.u32 %v11053_v38, %v10643_v46  ;;  %5150 = vst.msk [vmem:[#allocation3 + $0x10c] sm:$0xf] %vm742_vm6, %v4573_v8  ;;  %v6780_v43 = vrot.slane %v6778_v37, 4  ;;  %v4583_v11 = vsel %vm11407_vm14, %v4578_v28, %v4582_v42  ;;  %6067 = vrot.lane.b32.xlu0 %v5902_v45, %s11159_s1  ;;  %v6783_v23 = vrot.slane %v6781_v9, 5  ;;  %v7422_v4 = vld [vmem:[#allocation2 + $0x104] sm:$0x1] }
 0x22e   :  { %5822 = vst.msk [vmem:[#allocation3 + $0x10c] sm:$0xf] %vm3074_vm2, %v12881_v61  ;;  %8983 = vmatmul.bf16.gmra.mxu2 %v10556_v55  ;;  %v12999_v53 = vrot.slane %v6787_v57, 5  ;;  %v13006_v61 = vpop.permute.xlu1 %5658  ;;  %v7685_v35 = vrot.slane %v7422_v4, 5  ;;  %v5249_v1 = vld [vmem:[#allocation2 + $0x108] sm:$0xe]  ;;  %v7683_v51 = vsel %vm11416_vm15, %v10426_v5, %v7682_v52  ;;  %v13016_v55 = vpop.f32.mrf.mxu3 }
 0x22f   :  { %10913 = vmatmul.msk.bf16.gmra.mxu3 %vm276_vm0, %v10644_v41  ;;  %6207 = vst.msk [vmem:[#allocation3 + $0x10c] sm:$0xf] %vm3750_vm4, %v12871_v27  ;;  %v6793_v16 = vrot.slane %v6791_v60, 4  ;;  %v5901_v19 = vld [vmem:[#allocation2 + $0x108] sm:$0xf]  ;;  %v7684_v27 = vrot.slane %v7682_v52, 4  ;;  %v6784_v46 = vor.u32 %v6783_v23, %v6780_v43  ;;  %v13030_v41 = vpop.permute.xlu2 %6045 }
 0x230   :  { %5151 = vst.msk [vmem:[#allocation3 + $0x118] sm:$0xf] %vm742_vm6, %v4583_v11  ;;  %v5250_v10 = vld [vmem:[#allocation2 + $0x10c] sm:$0xf]  ;;  %v10396_v34 = vrot.slane %v5249_v1, 9  ;;  %v13037_v52 = vpop.permute.xlu0 %5660 }
 0x231   :  { %5823 = vst.msk [vmem:[#allocation3 + $0x118] sm:$0xf] %vm3074_vm2, %v12925_v48  ;;  %v5519_v47 = vrot.slane %v5250_v10, 5  ;;  %v4236_v42 = vld [vmem:[#allocation2 + $0x9c] sm:$0xf]  ;;  %v6794_v45 = vor.u32 %v6793_v16, %v12999_v53  ;;  %v5516_v48 = vsel %vm11416_vm15, %v5514_v0, %v5515_v49  ;;  %v7686_v50 = vsel %vm11416_vm15, %v7684_v27, %v7685_v35  ;;  %v13039_v10 = vpop.f32.mrf.mxu2 }
 0x232   :  { %6208 = vst.msk [vmem:[#allocation3 + $0x118] sm:$0xf] %vm3750_vm4, %v12916_v25  ;;  %v4237_v37 = vld [vmem:[#allocation2 + $0xa0] sm:$0xf]  ;;  %v4585_v38 = vshrl.u32 %v4236_v42, 16  ;;  %v4588_v8 = vshll.u32 %v4236_v42, 16 }
 0x233   :  { %15968 = vst [vmem:[#allocation5_spill] sm:$0xff] %v13016_v55  ;;  %v4594_v25 = vshll.u32 %v4237_v37, 16  ;;  %v4598_v28 = vshrl.u32 %v4237_v37, 16  ;;  %v6305_v9 = vld [vmem:[#allocation2 + $0x110] sm:$0x1]  ;;  %v6785_v43 = vrot.slane %v6784_v46, 4 }
 0x234   :  { %7328 = vst.msk [vmem:[#allocation3 + $0x118] sm:$0xf] %vm4135_vm8, %v12908_v2  ;;  %6065 = vrot.lane.b32.xlu2 %v5901_v19, %s11159_s1  ;;  %v5520_v2 = vsel %vm11416_vm15, %v10396_v34, %v5519_v47  ;;  %v4587_v0 = vrot.slane %v4585_v38, 4  ;;  %v4590_v49 = vrot.slane %v4588_v8, 5  ;;  %v6797_v57 = vshll.u32 %v6305_v9, 16 }
 0x235   :  { %5682 = vrot.lane.b32.xlu1 %v5516_v48, %s11161_s26  ;;  %7883 = vst.msk [vmem:[#allocation3 + $0x1a0] sm:$0xf] %vm742_vm6, %v7683_v51  ;;  %5684 = vrot.lane.b32.xlu0 %v5520_v2, %s11161_s26  ;;  %v4596_v60 = vrot.slane %v4594_v25, 5  ;;  %v6795_v36 = vrot.slane %v6794_v45, 4  ;;  %v13035_v63 = vld [vmem:[#allocation2 + $0x110] sm:$0x1]  ;;  %v6790_v34 = vsel %vm11407_vm14, %v6785_v43, %v12999_v53 }
 0x236   :  { %7884 = vst.msk [vmem:[#allocation3 + $0x1ac] sm:$0xf] %vm742_vm6, %v7686_v50  ;;  %v4591_v11 = vor.u32 %v4590_v49, %v4587_v0  ;;  %v6799_v23 = vrot.slane %v6797_v57, 5  ;;  %v4238_v4 = vld [vmem:[#allocation2 + $0xa4] sm:$0x1]  ;;  %v4600_v5 = vrot.slane %v4598_v28, 4  ;;  %v13054_v49 = vpop.f32.mrf.mxu3 }
 0x237   :  { %7327 = vst.msk [vmem:[#allocation3 + $0x10c] sm:$0xf] %vm4135_vm8, %v12970_v7  ;;  %v4604_v35 = vshll.u32 %v4238_v4, 16  ;;  %v5521_v16 = vrot.slane %v5519_v47, 4  ;;  %v11033_v51 = vld [vmem:[#allocation3 + $0xf4] sm:$0xf]  ;;  %v13041_v7 = vpop.permute.xlu1 %7161 }
 0x238   :  { %v4592_v1 = vrot.slane %v4591_v11, 4  ;;  %v4601_v19 = vor.u32 %v4600_v5, %v4596_v60  ;;  %v10565_v27 = vld [vmem:[#allocation3 + $0xfc] sm:$0xf0]  ;;  %v6800_v46 = vsel %vm11407_vm14, %v6795_v36, %v6799_v23  ;;  %v5522_v42 = vrot.slane %v13035_v63, 5  ;;  %v6306_v48 = vld [vmem:[#allocation2 + $0x114] sm:$0xf] }
 0x239   :  { %v4606_v45 = vrot.slane %v4604_v35, 5  ;;  %v6307_v50 = vld [vmem:[#allocation2 + $0x118] sm:$0xf]  ;;  %v6802_v25 = vshrl.u32 %v6306_v48, 16  ;;  %v6805_v28 = vshll.u32 %v6306_v48, 16  ;;  %v10568_v53 = vor.u32 %v11033_v51, %v10565_v27  ;;  %15969 = vst [vmem:[#allocation6_spill] sm:$0xff] %v13054_v49 }
 0x23a   :  { %v4597_v37 = vsel %vm11407_vm14, %v4592_v1, %v4596_v60  ;;  %v4602_v38 = vrot.slane %v4601_v19, 4  ;;  %v5904_v8 = vld [vmem:[#allocation2 + $0x118] sm:$0xf]  ;;  %v6811_v2 = vshll.u32 %v6307_v50, 16  ;;  %v6815_v0 = vshrl.u32 %v6307_v50, 16  ;;  %v13067_v1 = vpop.permute.xlu2 %7167  ;;  %v13075_v50 = vpop.permute.xlu0 %6047 }
 0x23b   :  { %5152 = vst.msk [vmem:[#allocation3 + $0x124] sm:$0xf] %vm742_vm6, %v4597_v37  ;;  %v6804_v60 = vrot.slane %v6802_v25, 4  ;;  %v6807_v36 = vrot.slane %v6805_v28, 5  ;;  %v7423_v11 = vld [vmem:[#allocation2 + $0x108] sm:$0xe] }
 0x23c   :  { %v10655_v47 = vld [vmem:[#allocation3 + $0x1a0] sm:$0xf]  ;;  %7187 = vrot.lane.b32.xlu2 %v6800_v46, %s11160_s25  ;;  %5824 = vst.msk [vmem:[#allocation3 + $0x124] sm:$0xf] %vm3074_vm2, %v12957_v15  ;;  %v4607_v43 = vsel %vm11407_vm14, %v4602_v38, %v4606_v45  ;;  %v13063_v23 = vrot.slane %v6811_v2, 5  ;;  %v10427_v4 = vrot.slane %v7423_v11, 9 }
 0x23d   :  { %7185 = vrot.lane.b32.xlu1 %v6790_v34, %s11160_s25  ;;  %v11056_v9 = vld [vmem:[#allocation3 + $0x1a8] sm:$0xf0]  ;;  %6209 = vst.msk [vmem:[#allocation3 + $0x124] sm:$0xf] %vm3750_vm4, %v12947_v62  ;;  %6071 = vrot.lane.b32.xlu0 %v5904_v8, %s11159_s1  ;;  %v7424_v63 = vld [vmem:[#allocation2 + $0x10c] sm:$0xf]  ;;  %v6808_v15 = vor.u32 %v6807_v36, %v6804_v60 }
 0x23e   :  { %v10656_v57 = vor.u32 %v11056_v9, %v10655_v47  ;;  %8988 = vmatmul.bf16.gmra.mxu2 %v10568_v53  ;;  %5153 = vst.msk [vmem:[#allocation3 + $0x130] sm:$0xf] %vm742_vm6, %v4607_v43  ;;  %v7425_v5 = vld [vmem:[#allocation2 + $0x110] sm:$0x1]  ;;  %v7689_v35 = vrot.slane %v7424_v63, 5  ;;  %v6817_v19 = vrot.slane %v6815_v0, 4  ;;  %v13085_v53 = vpop.f32.mrf.mxu2 }
 0x23f   :  { %5825 = vst.msk [vmem:[#allocation3 + $0x130] sm:$0xf] %vm3074_vm2, %v13006_v61  ;;  %v7692_v62 = vrot.slane %v7425_v5, 5  ;;  %v5252_v51 = vld [vmem:[#allocation2 + $0x114] sm:$0xe]  ;;  %v6809_v34 = vrot.slane %v6808_v15, 4  ;;  %v13087_v2 = vpop.permute.xlu1 %5662  ;;  %v13099_v15 = vpop.f32.mrf.mxu3 }
 0x240   :  { %10914 = vmatmul.msk.bf16.gmra.mxu3 %vm276_vm0, %v10656_v57  ;;  %6210 = vst.msk [vmem:[#allocation3 + $0x130] sm:$0xf] %vm3750_vm4, %v12992_v56  ;;  %v5903_v27 = vld [vmem:[#allocation2 + $0x114] sm:$0xf]  ;;  %v7690_v46 = vsel %vm11416_vm15, %v10427_v4, %v7689_v35  ;;  %v7691_v45 = vrot.slane %v7689_v35, 4  ;;  %v10397_v47 = vrot.slane %v5252_v51, 9  ;;  %v6818_v38 = vor.u32 %v6817_v19, %v13063_v23 }
 0x241   :  { %v5253_v48 = vld [vmem:[#allocation2 + $0x118] sm:$0xf]  ;;  %7330 = vst.msk [vmem:[#allocation3 + $0x130] sm:$0xf] %vm4135_vm8, %v12985_v59  ;;  %v4239_v61 = vld [vmem:[#allocation2 + $0xa8] sm:$0xf]  ;;  %v5523_v56 = vsel %vm11416_vm15, %v5521_v16, %v5522_v42 }
 0x242   :  { %v5526_v37 = vrot.slane %v5253_v48, 5  ;;  %v7693_v8 = vsel %vm11416_vm15, %v7691_v45, %v7692_v62  ;;  %7885 = vst.msk [vmem:[#allocation3 + $0x1b8] sm:$0xf] %vm742_vm6, %v7690_v46  ;;  %v4240_v25 = vld [vmem:[#allocation2 + $0xac] sm:$0xf]  ;;  %v4609_v28 = vshrl.u32 %v4239_v61, 16  ;;  %v13102_v45 = vpop.permute.xlu2 %6049 }
 0x243   :  { %v4612_v9 = vshll.u32 %v4239_v61, 16  ;;  %7886 = vst.msk [vmem:[#allocation3 + $0x1c4] sm:$0xf] %vm742_vm6, %v7693_v8  ;;  %v4618_v59 = vshll.u32 %v4240_v25, 16  ;;  %v4622_v16 = vshrl.u32 %v4240_v25, 16  ;;  %v6819_v11 = vrot.slane %v6818_v38, 4 }
 0x244   :  { %6069 = vrot.lane.b32.xlu2 %v5903_v27, %s11159_s1  ;;  %v6308_v42 = vld [vmem:[#allocation2 + $0x11c] sm:$0x1]  ;;  %7329 = vst.msk [vmem:[#allocation3 + $0x124] sm:$0xf] %vm4135_vm8, %v13041_v7  ;;  %v5527_v0 = vsel %vm11416_vm15, %v10397_v47, %v5526_v37  ;;  %v4611_v57 = vrot.slane %v4609_v28, 4  ;;  %v5528_v62 = vrot.slane %v5526_v37, 4  ;;  %v6814_v38 = vsel %vm11407_vm14, %v6809_v34, %v13063_v23 }
 0x245   :  { %5686 = vrot.lane.b32.xlu1 %v5523_v56, %s11161_s26  ;;  %v4614_v43 = vrot.slane %v4612_v9, 5  ;;  %v6821_v60 = vshll.u32 %v6308_v42, 16  ;;  %5688 = vrot.lane.b32.xlu0 %v5527_v0, %s11161_s26  ;;  %v4620_v36 = vrot.slane %v4618_v59, 5  ;;  %v13097_v63 = vld [vmem:[#allocation2 + $0x11c] sm:$0x1]  ;;  %15970 = vst [vmem:[#allocation7_spill] sm:$0xff] %v13099_v15 }
 0x246   :  { %v4241_v4 = vld [vmem:[#allocation2 + $0xb0] sm:$0x1]  ;;  %v4624_v19 = vrot.slane %v4622_v16, 4  ;;  %v11036_v51 = vld [vmem:[#allocation3 + $0x10c] sm:$0xf]  ;;  %v5529_v46 = vrot.slane %v13097_v63, 5 }
 0x247   :  { %v4615_v5 = vor.u32 %v4614_v43, %v4611_v57  ;;  %v6823_v35 = vrot.slane %v6821_v60, 5  ;;  %v4628_v7 = vshll.u32 %v4241_v4, 16  ;;  %v10577_v47 = vld [vmem:[#allocation3 + $0x114] sm:$0xf0]  ;;  %v6309_v61 = vld [vmem:[#allocation2 + $0x120] sm:$0xf]  ;;  %v13111_v43 = vpop.permute.xlu0 %5664 }
 0x248   :  { %v4625_v48 = vor.u32 %v4624_v19, %v4620_v36  ;;  %v6310_v37 = vld [vmem:[#allocation2 + $0x124] sm:$0xf]  ;;  %v6826_v28 = vshrl.u32 %v6309_v61, 16  ;;  %v6829_v0 = vshll.u32 %v6309_v61, 16  ;;  %v10580_v23 = vor.u32 %v11036_v51, %v10577_v47  ;;  %v7427_v19 = vld [vmem:[#allocation2 + $0x118] sm:$0xf] }
 0x249   :  { %v4616_v27 = vrot.slane %v4615_v5, 4  ;;  %v10667_v56 = vld [vmem:[#allocation3 + $0x1b8] sm:$0xf]  ;;  %v6824_v8 = vsel %vm11407_vm14, %v6819_v11, %v6823_v35  ;;  %v4630_v25 = vrot.slane %v4628_v7, 5  ;;  %v5906_v42 = vld [vmem:[#allocation2 + $0x124] sm:$0xf]  ;;  %v13122_v35 = vpop.f32.mrf.mxu2  ;;  %v7166_v7 = vpop.permute.xlu1 %7165 }
 0x24a   :  { %v11059_v9 = vld [vmem:[#allocation3 + $0x1c0] sm:$0xf0]  ;;  %v4626_v16 = vrot.slane %v4625_v48, 4  ;;  %v6835_v57 = vshll.u32 %v6310_v37, 16  ;;  %v6828_v34 = vrot.slane %v6826_v28, 4  ;;  %v6839_v60 = vshrl.u32 %v6310_v37, 16 }
 0x24b   :  { %v4621_v59 = vsel %vm11407_vm14, %v4616_v27, %v4620_v36  ;;  %v7426_v11 = vld [vmem:[#allocation2 + $0x114] sm:$0xe]  ;;  %v10668_v63 = vor.u32 %v11059_v9, %v10667_v56  ;;  %v6831_v4 = vrot.slane %v6829_v0, 5  ;;  %v7428_v51 = vld [vmem:[#allocation2 + $0x11c] sm:$0x1]  ;;  %v7696_v48 = vrot.slane %v7427_v19, 5 }
 0x24c   :  { %5154 = vst.msk [vmem:[#allocation3 + $0x13c] sm:$0xf] %vm742_vm6, %v4621_v59  ;;  %7191 = vrot.lane.b32.xlu2 %v6824_v8, %s11160_s25  ;;  %v4631_v36 = vsel %vm11407_vm14, %v4626_v16, %v4630_v25  ;;  %v13120_v5 = vrot.slane %v6835_v57, 5  ;;  %v10428_v27 = vrot.slane %v7426_v11, 9  ;;  %v5255_v47 = vld [vmem:[#allocation2 + $0x120] sm:$0xe]  ;;  %v13133_v8 = vpop.f32.mrf.mxu3  ;;  %v5530_v59 = vsel %vm11416_vm15, %v5528_v62, %v5529_v46 }
 0x24d   :  { %7189 = vrot.lane.b32.xlu1 %v6814_v38, %s11160_s25  ;;  %5826 = vst.msk [vmem:[#allocation3 + $0x13c] sm:$0xf] %vm3074_vm2, %v13037_v52  ;;  %6075 = vrot.lane.b32.xlu0 %v5906_v42, %s11159_s1  ;;  %v7699_v52 = vrot.slane %v7428_v51, 5  ;;  %v6841_v61 = vrot.slane %v6839_v60, 4  ;;  %v5256_v56 = vld [vmem:[#allocation2 + $0x124] sm:$0xf]  ;;  %v6832_v57 = vor.u32 %v6831_v4, %v6828_v34 }
 0x24e   :  { %6211 = vst.msk [vmem:[#allocation3 + $0x13c] sm:$0xf] %vm3750_vm4, %v13030_v41  ;;  %8993 = vmatmul.bf16.gmra.mxu2 %v10580_v23  ;;  %v7697_v38 = vsel %vm11416_vm15, %v10428_v27, %v7696_v48  ;;  %v7698_v41 = vrot.slane %v7696_v48, 4  ;;  %v5905_v25 = vld [vmem:[#allocation2 + $0x120] sm:$0xf]  ;;  %v10398_v37 = vrot.slane %v5255_v47, 9 }
 0x24f   :  { %5155 = vst.msk [vmem:[#allocation3 + $0x148] sm:$0xf] %vm742_vm6, %v4631_v36  ;;  %v5533_v28 = vrot.slane %v5256_v56, 5  ;;  %v4242_v9 = vld [vmem:[#allocation2 + $0xb4] sm:$0xf]  ;;  %v6052_v4 = vpop.permute.xlu0 %6051  ;;  %v6833_v48 = vrot.slane %v6832_v57, 4 }
 0x250   :  { %10915 = vmatmul.msk.bf16.gmra.mxu3 %vm276_vm0, %v10668_v63  ;;  %5827 = vst.msk [vmem:[#allocation3 + $0x148] sm:$0xf] %vm3074_vm2, %v13087_v2  ;;  %v7700_v2 = vsel %vm11416_vm15, %v7698_v41, %v7699_v52  ;;  %v4243_v16 = vld [vmem:[#allocation2 + $0xb8] sm:$0xf]  ;;  %v4633_v42 = vshrl.u32 %v4242_v9, 16  ;;  %v4636_v0 = vshll.u32 %v4242_v9, 16  ;;  %v6842_v63 = vor.u32 %v6841_v61, %v13120_v5 }
 0x251   :  { %15971 = vst [vmem:[#allocation8_spill] sm:$0xff] %v13133_v8  ;;  %v4642_v23 = vshll.u32 %v4243_v16, 16  ;;  %v4646_v60 = vshrl.u32 %v4243_v16, 16  ;;  %v6311_v11 = vld [vmem:[#allocation2 + $0x128] sm:$0x1]  ;;  %v5534_v34 = vsel %vm11416_vm15, %v10398_v37, %v5533_v28  ;;  %v13154_v61 = vpop.f32.mrf.mxu2  ;;  %v5667_v41 = vpop.permute.xlu1 %5666 }
 0x252   :  { %6212 = vst.msk [vmem:[#allocation3 + $0x148] sm:$0xf] %vm3750_vm4, %v13075_v50  ;;  %v13144_v50 = vpop.permute.xlu2 %7171  ;;  %v4638_v62 = vrot.slane %v4636_v0, 5  ;;  %v6845_v46 = vshll.u32 %v6311_v11, 16  ;;  %v4244_v51 = vld [vmem:[#allocation2 + $0xbc] sm:$0x1] }
 0x253   :  { %7332 = vst.msk [vmem:[#allocation3 + $0x148] sm:$0xf] %vm4135_vm8, %v13067_v1  ;;  %v4635_v1 = vrot.slane %v4633_v42, 4  ;;  %v4644_v36 = vrot.slane %v4642_v23, 5  ;;  %v4648_v27 = vrot.slane %v4646_v60, 4  ;;  %v6843_v52 = vrot.slane %v6842_v63, 4 }
 0x254   :  { %7887 = vst.msk [vmem:[#allocation3 + $0x1d0] sm:$0xf] %vm742_vm6, %v7697_v38  ;;  %6073 = vrot.lane.b32.xlu2 %v5905_v25, %s11159_s1  ;;  %v6847_v47 = vrot.slane %v6845_v46, 5  ;;  %v4652_v38 = vshll.u32 %v4244_v51, 16  ;;  %v5257_v25 = vld [vmem:[#allocation2 + $0x128] sm:$0x1]  ;;  %v13158_v63 = vpop.f32.mrf.mxu3 }
 0x255   :  { %5690 = vrot.lane.b32.xlu1 %v5530_v59, %s11161_s26  ;;  %7888 = vst.msk [vmem:[#allocation3 + $0x1dc] sm:$0xf] %vm742_vm6, %v7700_v2  ;;  %5692 = vrot.lane.b32.xlu0 %v5534_v34, %s11161_s26  ;;  %v4639_v19 = vor.u32 %v4638_v62, %v4635_v1  ;;  %v11039_v9 = vld [vmem:[#allocation3 + $0x124] sm:$0xf]  ;;  %v5535_v59 = vrot.slane %v5533_v28, 4  ;;  %v6838_v1 = vsel %vm11407_vm14, %v6833_v48, %v13120_v5 }
 0x256   :  { %7331 = vst.msk [vmem:[#allocation3 + $0x13c] sm:$0xf] %vm4135_vm8, %v7166_v7  ;;  %v4649_v7 = vor.u32 %v4648_v27, %v4644_v36  ;;  %v4654_v37 = vrot.slane %v4652_v38, 5  ;;  %v10589_v2 = vld [vmem:[#allocation3 + $0x12c] sm:$0xf0]  ;;  %v6848_v28 = vsel %vm11407_vm14, %v6843_v52, %v6847_v47 }
 0x257   :  { %v4640_v56 = vrot.slane %v4639_v19, 4  ;;  %v6312_v16 = vld [vmem:[#allocation2 + $0x12c] sm:$0xf]  ;;  %v6313_v42 = vld [vmem:[#allocation2 + $0x130] sm:$0xf]  ;;  %15972 = vst [vmem:[#allocation9_spill] sm:$0xff] %v13158_v63  ;;  %v10592_v51 = vor.u32 %v11039_v9, %v10589_v2 }
 0x258   :  { %v4650_v57 = vrot.slane %v4649_v7, 4  ;;  %v6850_v60 = vshrl.u32 %v6312_v16, 16  ;;  %v6853_v11 = vshll.u32 %v6312_v16, 16  ;;  %v5908_v46 = vld [vmem:[#allocation2 + $0x130] sm:$0xf]  ;;  %v6859_v34 = vshll.u32 %v6313_v42, 16 }
 0x259   :  { %v4645_v23 = vsel %vm11407_vm14, %v4640_v56, %v4644_v36  ;;  %v6863_v19 = vshrl.u32 %v6313_v42, 16  ;;  %v5536_v36 = vrot.slane %v5257_v25, 5  ;;  %v7429_v48 = vld [vmem:[#allocation2 + $0x120] sm:$0xe]  ;;  %v7430_v56 = vld [vmem:[#allocation2 + $0x124] sm:$0xf] }
 0x25a   :  { %5156 = vst.msk [vmem:[#allocation3 + $0x154] sm:$0xf] %vm742_vm6, %v4645_v23  ;;  %v4655_v5 = vsel %vm11407_vm14, %v4650_v57, %v4654_v37  ;;  %v6852_v27 = vrot.slane %v6850_v60, 4  ;;  %v6855_v47 = vrot.slane %v6853_v11, 5  ;;  %v10429_v7 = vrot.slane %v7429_v48, 9  ;;  %v13182_v2 = vpop.permute.xlu0 %5668  ;;  %v13189_v60 = vpop.f32.mrf.mxu2 }
 0x25b   :  { %v10679_v0 = vld [vmem:[#allocation3 + $0x1d0] sm:$0xf]  ;;  %5828 = vst.msk [vmem:[#allocation3 + $0x154] sm:$0xf] %vm3074_vm2, %v13111_v43  ;;  %v13178_v43 = vrot.slane %v6859_v34, 5  ;;  %v7703_v9 = vrot.slane %v7430_v56, 5  ;;  %v7170_v11 = vpop.permute.xlu1 %7169 }
 0x25c   :  { %v11062_v62 = vld [vmem:[#allocation3 + $0x1d8] sm:$0xf0]  ;;  %7195 = vrot.lane.b32.xlu2 %v6848_v28, %s11160_s25  ;;  %6213 = vst.msk [vmem:[#allocation3 + $0x154] sm:$0xf] %vm3750_vm4, %v13102_v45  ;;  %v7431_v25 = vld [vmem:[#allocation2 + $0x128] sm:$0x1]  ;;  %v5537_v28 = vsel %vm11416_vm15, %v5535_v59, %v5536_v36 }
 0x25d   :  { %7193 = vrot.lane.b32.xlu1 %v6838_v1, %s11160_s25  ;;  %v10680_v38 = vor.u32 %v11062_v62, %v10679_v0  ;;  %v13174_v52 = vpop.permute.xlu2 %6053  ;;  %5157 = vst.msk [vmem:[#allocation3 + $0x160] sm:$0xf] %vm742_vm6, %v4655_v5  ;;  %6079 = vrot.lane.b32.xlu0 %v5908_v46, %s11159_s1  ;;  %v7706_v37 = vrot.slane %v7431_v25, 5  ;;  %v5258_v45 = vld [vmem:[#allocation2 + $0x12c] sm:$0xe]  ;;  %v6865_v16 = vrot.slane %v6863_v19, 4  ;;  %v7704_v42 = vsel %vm11416_vm15, %v10429_v7, %v7703_v9  ;;  %v13201_v7 = vpop.f32.mrf.mxu3 }
 0x25e   :  { %8998 = vmatmul.bf16.gmra.mxu2 %v10592_v51  ;;  %5829 = vst.msk [vmem:[#allocation3 + $0x160] sm:$0xf] %vm3074_vm2, %v5667_v41  ;;  %v7705_v0 = vrot.slane %v7703_v9, 4  ;;  %v5259_v23 = vld [vmem:[#allocation2 + $0x130] sm:$0xf]  ;;  %v10399_v41 = vrot.slane %v5258_v45, 9  ;;  %v6856_v5 = vor.u32 %v6855_v47, %v6852_v27 }
 0x25f   :  { %6214 = vst.msk [vmem:[#allocation3 + $0x160] sm:$0xf] %vm3750_vm4, %v6052_v4  ;;  %v5907_v57 = vld [vmem:[#allocation2 + $0x12c] sm:$0xf]  ;;  %v5540_v1 = vrot.slane %v5259_v23, 5 }
 0x260   :  { %10916 = vmatmul.msk.bf16.gmra.mxu3 %vm276_vm0, %v10680_v38  ;;  %7334 = vst.msk [vmem:[#allocation3 + $0x160] sm:$0xf] %vm4135_vm8, %v13144_v50  ;;  %v4245_v62 = vld [vmem:[#allocation2 + $0xc0] sm:$0xf]  ;;  %v7707_v4 = vsel %vm11416_vm15, %v7705_v0, %v7706_v37  ;;  %v4246_v46 = vld [vmem:[#allocation2 + $0xc4] sm:$0xf]  ;;  %v6866_v38 = vor.u32 %v6865_v16, %v13178_v43 }
 0x261   :  { %7889 = vst.msk [vmem:[#allocation3 + $0x1e8] sm:$0xf] %vm742_vm6, %v7704_v42  ;;  %v4657_v34 = vshrl.u32 %v4245_v62, 16  ;;  %v4660_v19 = vshll.u32 %v4245_v62, 16  ;;  %v4666_v50 = vshll.u32 %v4246_v46, 16  ;;  %v4670_v51 = vshrl.u32 %v4246_v46, 16 }
 0x262   :  { %7890 = vst.msk [vmem:[#allocation3 + $0x1f4] sm:$0xf] %vm742_vm6, %v7707_v4  ;;  %v6314_v48 = vld [vmem:[#allocation2 + $0x134] sm:$0x1]  ;;  %v5541_v27 = vsel %vm11416_vm15, %v10399_v41, %v5540_v1  ;;  %v4247_v9 = vld [vmem:[#allocation2 + $0xc8] sm:$0x1] }
 0x263   :  { %7333 = vst.msk [vmem:[#allocation3 + $0x154] sm:$0xf] %vm4135_vm8, %v7170_v11  ;;  %v4659_v59 = vrot.slane %v4657_v34, 4  ;;  %v4662_v36 = vrot.slane %v4660_v19, 5  ;;  %v6869_v56 = vshll.u32 %v6314_v48, 16  ;;  %v4668_v47 = vrot.slane %v4666_v50, 5 }
 0x264   :  { %6077 = vrot.lane.b32.xlu2 %v5907_v57, %s11159_s1  ;;  %15973 = vst [vmem:[#allocation10_spill] sm:$0xff] %v13201_v7  ;;  %v4672_v45 = vrot.slane %v4670_v51, 4  ;;  %v6857_v16 = vrot.slane %v6856_v5, 4  ;;  %v6867_v42 = vrot.slane %v6866_v38, 4  ;;  %v4676_v23 = vshll.u32 %v4247_v9, 16 }
 0x265   :  { %5694 = vrot.lane.b32.xlu1 %v5537_v28, %s11161_s26  ;;  %v13203_v25 = vpop.permute.xlu2 %7175  ;;  %5696 = vrot.lane.b32.xlu0 %v5541_v27, %s11161_s26  ;;  %v4663_v37 = vor.u32 %v4662_v36, %v4659_v59  ;;  %v6871_v0 = vrot.slane %v6869_v56, 5  ;;  %v13208_v11 = vrot.slane %v5540_v1, 4  ;;  %v11042_v28 = vld [vmem:[#allocation3 + $0x13c] sm:$0xf]  ;;  %v6315_v4 = vld [vmem:[#allocation2 + $0x138] sm:$0xf]  ;;  %v13218_v27 = vpop.f32.mrf.mxu2 }
 0x266   :  { %v4673_v62 = vor.u32 %v4672_v45, %v4668_v47  ;;  %v4678_v34 = vrot.slane %v4676_v23, 5  ;;  %v10601_v41 = vld [vmem:[#allocation3 + $0x144] sm:$0xf0]  ;;  %v6316_v50 = vld [vmem:[#allocation2 + $0x13c] sm:$0xf]  ;;  %v6874_v48 = vshrl.u32 %v6315_v4, 16  ;;  %v6862_v1 = vsel %vm11407_vm14, %v6857_v16, %v13178_v43 }
 0x267   :  { %v4664_v57 = vrot.slane %v4663_v37, 4  ;;  %v5260_v5 = vld [vmem:[#allocation2 + $0x134] sm:$0x1]  ;;  %v6877_v59 = vshll.u32 %v6315_v4, 16  ;;  %v6883_v36 = vshll.u32 %v6316_v50, 16  ;;  %v6872_v56 = vsel %vm11407_vm14, %v6867_v42, %v6871_v0 }
 0x268   :  { %v10691_v46 = vld [vmem:[#allocation3 + $0x1e8] sm:$0xf]  ;;  %v6056_v19 = vpop.permute.xlu0 %6055  ;;  %v4674_v38 = vrot.slane %v4673_v62, 4  ;;  %v5910_v9 = vld [vmem:[#allocation2 + $0x13c] sm:$0xf]  ;;  %v6876_v37 = vrot.slane %v6874_v48, 4  ;;  %v10604_v16 = vor.u32 %v11042_v28, %v10601_v41 }
 0x269   :  { %v11065_v26 = vld [vmem:[#allocation3 + $0x1f0] sm:$0xf0]  ;;  %v4669_v51 = vsel %vm11407_vm14, %v4664_v57, %v4668_v47  ;;  %v6887_v45 = vshrl.u32 %v6316_v50, 16  ;;  %v7432_v23 = vld [vmem:[#allocation2 + $0x12c] sm:$0xe]  ;;  %v5671_v47 = vpop.permute.xlu1 %5670  ;;  %v6879_v57 = vrot.slane %v6877_v59, 5 }
 0x26a   :  { %5158 = vst.msk [vmem:[#allocation3 + $0x16c] sm:$0xf] %vm742_vm6, %v4669_v51  ;;  %v4679_v43 = vsel %vm11407_vm14, %v4674_v38, %v4678_v34  ;;  %v13226_v42 = vrot.slane %v6883_v36, 5  ;;  %v7433_v0 = vld [vmem:[#allocation2 + $0x130] sm:$0xf]  ;;  %v10692_v62 = vor.u32 %v11065_v26, %v10691_v46  ;;  %v10430_v48 = vrot.slane %v7432_v23, 9  ;;  %v13234_v51 = vpop.f32.mrf.mxu3 }
 0x26b   :  { %5830 = vst.msk [vmem:[#allocation3 + $0x16c] sm:$0xf] %vm3074_vm2, %v13182_v2  ;;  %v7434_v50 = vld [vmem:[#allocation2 + $0x134] sm:$0x1]  ;;  %v7710_v2 = vrot.slane %v7433_v0, 5  ;;  %v6889_v41 = vrot.slane %v6887_v45, 4 }
 0x26c   :  { %7199 = vrot.lane.b32.xlu2 %v6872_v56, %s11160_s25  ;;  %6215 = vst.msk [vmem:[#allocation3 + $0x16c] sm:$0xf] %vm3750_vm4, %v13174_v52  ;;  %v7713_v34 = vrot.slane %v7434_v50, 5  ;;  %v5261_v28 = vld [vmem:[#allocation2 + $0x138] sm:$0xe]  ;;  %v5543_v26 = vrot.slane %v5260_v5, 5 }
 0x26d   :  { %7197 = vrot.lane.b32.xlu1 %v6862_v1, %s11160_s25  ;;  %v13230_v4 = vpop.permute.xlu2 %6057  ;;  %5159 = vst.msk [vmem:[#allocation3 + $0x178] sm:$0xf] %vm742_vm6, %v4679_v43  ;;  %6083 = vrot.lane.b32.xlu0 %v5910_v9, %s11159_s1  ;;  %v7711_v52 = vsel %vm11416_vm15, %v10430_v48, %v7710_v2  ;;  %v7712_v46 = vrot.slane %v7710_v2, 4  ;;  %v13240_v38 = vld [vmem:[#allocation2 + $0x13c] sm:$0xf]  ;;  %v10400_v59 = vrot.slane %v5261_v28, 9  ;;  %v6880_v43 = vor.u32 %v6879_v57, %v6876_v37 }
 0x26e   :  { %9003 = vmatmul.bf16.gmra.mxu2 %v10604_v16  ;;  %15974 = vst [vmem:[#allocation11_spill] sm:$0xff] %v13234_v51  ;;  %v5547_v36 = vrot.slane %v13240_v38, 5  ;;  %v4248_v1 = vld [vmem:[#allocation2 + $0xe4] sm:$0xf]  ;;  %v5909_v56 = vld [vmem:[#allocation2 + $0x138] sm:$0xf]  ;;  %v6890_v0 = vor.u32 %v6889_v41, %v13226_v42 }
 0x26f   :  { %5831 = vst.msk [vmem:[#allocation3 + $0x178] sm:$0xf] %vm3074_vm2, %v5671_v47  ;;  %v7714_v5 = vsel %vm11416_vm15, %v7712_v46, %v7713_v34  ;;  %v4249_v9 = vld [vmem:[#allocation2 + $0xe8] sm:$0xf]  ;;  %v4681_v45 = vshrl.u32 %v4248_v1, 16  ;;  %v4684_v23 = vshll.u32 %v4248_v1, 16  ;;  %v13256_v34 = vpop.f32.mrf.mxu2 }
 0x270   :  { %10917 = vmatmul.msk.bf16.gmra.mxu3 %vm276_vm0, %v10692_v62  ;;  %6216 = vst.msk [vmem:[#allocation3 + $0x178] sm:$0xf] %vm3750_vm4, %v6056_v19  ;;  %v4690_v47 = vshll.u32 %v4249_v9, 16  ;;  %v4694_v16 = vshrl.u32 %v4249_v9, 16  ;;  %v6317_v19 = vld [vmem:[#allocation2 + $0x140] sm:$0x1]  ;;  %v5544_v62 = vsel %vm11416_vm15, %v13208_v11, %v5543_v26  ;;  %v5673_v48 = vpop.permute.xlu0 %5672  ;;  %v5548_v28 = vsel %vm11416_vm15, %v10400_v59, %v5547_v36 }
 0x271   :  { %7336 = vst.msk [vmem:[#allocation3 + $0x178] sm:$0xf] %vm4135_vm8, %v13203_v25  ;;  %v4683_v25 = vrot.slane %v4681_v45, 4  ;;  %v4686_v50 = vrot.slane %v4684_v23, 5  ;;  %v6893_v2 = vshll.u32 %v6317_v19, 16  ;;  %v6881_v26 = vrot.slane %v6880_v43, 4 }
 0x272   :  { %7891 = vst.msk [vmem:[#allocation3 + $0x200] sm:$0xf] %vm742_vm6, %v7711_v52  ;;  %v4692_v37 = vrot.slane %v4690_v47, 5  ;;  %v4250_v57 = vld [vmem:[#allocation2 + $0xec] sm:$0x1]  ;;  %v4696_v41 = vrot.slane %v4694_v16, 4  ;;  %v13265_v51 = vpop.f32.mrf.mxu3 }
 0x273   :  { %7892 = vst.msk [vmem:[#allocation3 + $0x20c] sm:$0xf] %vm742_vm6, %v7714_v5  ;;  %v4687_v11 = vor.u32 %v4686_v50, %v4683_v25  ;;  %v6891_v46 = vrot.slane %v6890_v0, 4  ;;  %v4700_v1 = vshll.u32 %v4250_v57, 16  ;;  %v11045_v45 = vld [vmem:[#allocation3 + $0x154] sm:$0xf] }
 0x274   :  { %6081 = vrot.lane.b32.xlu2 %v5909_v56, %s11159_s1  ;;  %v6895_v56 = vrot.slane %v6893_v2, 5  ;;  %v4697_v9 = vor.u32 %v4696_v41, %v4692_v37  ;;  %v6318_v23 = vld [vmem:[#allocation2 + $0x144] sm:$0xf]  ;;  %v6319_v19 = vld [vmem:[#allocation2 + $0x148] sm:$0xf]  ;;  %15975 = vst [vmem:[#allocation12_spill] sm:$0xff] %v13265_v51  ;;  %v6886_v2 = vsel %vm11407_vm14, %v6881_v26, %v13226_v42 }
 0x275   :  { %5698 = vrot.lane.b32.xlu1 %v5544_v62, %s11161_s26  ;;  %5700 = vrot.lane.b32.xlu0 %v5548_v28, %s11161_s26  ;;  %v4688_v5 = vrot.slane %v4687_v11, 4  ;;  %v4702_v47 = vrot.slane %v4700_v1, 5  ;;  %v6898_v62 = vshrl.u32 %v6318_v23, 16  ;;  %v6901_v7 = vshll.u32 %v6318_v23, 16  ;;  %v10613_v25 = vld [vmem:[#allocation3 + $0x15c] sm:$0xf0] }
 0x276   :  { %v13262_v52 = vpop.permute.xlu2 %7179  ;;  %v4698_v16 = vrot.slane %v4697_v9, 4  ;;  %v6907_v50 = vshll.u32 %v6319_v19, 16  ;;  %v6911_v0 = vshrl.u32 %v6319_v19, 16  ;;  %v5263_v28 = vld [vmem:[#allocation2 + $0x140] sm:$0x1]  ;;  %v6896_v1 = vsel %vm11407_vm14, %v6891_v46, %v6895_v56 }
 0x277   :  { %v4693_v43 = vsel %vm11407_vm14, %v4688_v5, %v4692_v37  ;;  %v6900_v11 = vrot.slane %v6898_v62, 4  ;;  %v6903_v41 = vrot.slane %v6901_v7, 5  ;;  %v5912_v5 = vld [vmem:[#allocation2 + $0x148] sm:$0xf]  ;;  %v7435_v23 = vld [vmem:[#allocation2 + $0x138] sm:$0xe]  ;;  %v10616_v7 = vor.u32 %v11045_v45, %v10613_v25  ;;  %v13292_v25 = vpop.f32.mrf.mxu2 }
 0x278   :  { %5160 = vst.msk [vmem:[#allocation3 + $0x184] sm:$0xf] %vm742_vm6, %v4693_v43  ;;  %v4703_v37 = vsel %vm11407_vm14, %v4698_v16, %v4702_v47  ;;  %v13278_v9 = vrot.slane %v6907_v50, 5  ;;  %v6913_v19 = vrot.slane %v6911_v0, 4  ;;  %v7436_v42 = vld [vmem:[#allocation2 + $0x13c] sm:$0xf]  ;;  %v6060_v46 = vpop.permute.xlu0 %6059 }
 0x279   :  { %v10703_v59 = vld [vmem:[#allocation3 + $0x200] sm:$0xf]  ;;  %5832 = vst.msk [vmem:[#allocation3 + $0x184] sm:$0xf] %vm3074_vm2, %v5673_v48  ;;  %v7437_v48 = vld [vmem:[#allocation2 + $0x140] sm:$0x1] }
 0x27a   :  { %v11068_v57 = vld [vmem:[#allocation3 + $0x208] sm:$0xf0]  ;;  %6217 = vst.msk [vmem:[#allocation3 + $0x184] sm:$0xf] %vm3750_vm4, %v13230_v4  ;;  %v10431_v56 = vrot.slane %v7435_v23, 9  ;;  %v7717_v47 = vrot.slane %v7436_v42, 5 }
 0x27b   :  { %v10704_v26 = vor.u32 %v11068_v57, %v10703_v59  ;;  %5161 = vst.msk [vmem:[#allocation3 + $0x190] sm:$0xf] %vm742_vm6, %v4703_v37  ;;  %v7720_v62 = vrot.slane %v7437_v48, 5  ;;  %v5549_v16 = vrot.slane %v5547_v36, 4  ;;  %v5264_v4 = vld [vmem:[#allocation2 + $0x144] sm:$0xe]  ;;  %v6904_v36 = vor.u32 %v6903_v41, %v6900_v11  ;;  %v13303_v11 = vpop.f32.mrf.mxu3 }
 0x27c   :  { %7203 = vrot.lane.b32.xlu2 %v6896_v1, %s11160_s25  ;;  %v5265_v45 = vld [vmem:[#allocation2 + $0x148] sm:$0xf]  ;;  %v5550_v59 = vrot.slane %v5263_v28, 5  ;;  %v7718_v0 = vsel %vm11416_vm15, %v10431_v56, %v7717_v47  ;;  %v10401_v38 = vrot.slane %v5264_v4, 9  ;;  %v4251_v57 = vld [vmem:[#allocation2 + $0xf0] sm:$0xf]  ;;  %v6914_v37 = vor.u32 %v6913_v19, %v13278_v9 }
 0x27d   :  { %7201 = vrot.lane.b32.xlu1 %v6886_v2, %s11160_s25  ;;  %6087 = vrot.lane.b32.xlu0 %v5912_v5, %s11159_s1  ;;  %v7719_v2 = vrot.slane %v7717_v47, 4  ;;  %7893 = vst.msk [vmem:[#allocation3 + $0x218] sm:$0xf] %vm742_vm6, %v7718_v0  ;;  %v4252_v1 = vld [vmem:[#allocation2 + $0xf4] sm:$0xf]  ;;  %v4705_v28 = vshrl.u32 %v4251_v57, 16 }
 0x27e   :  { %v13287_v50 = vpop.permute.xlu2 %6061  ;;  %9008 = vmatmul.bf16.gmra.mxu2 %v10616_v7  ;;  %v5911_v5 = vld [vmem:[#allocation2 + $0x144] sm:$0xf]  ;;  %v5554_v7 = vrot.slane %v5265_v45, 5  ;;  %v4708_v42 = vshll.u32 %v4251_v57, 16  ;;  %v6320_v48 = vld [vmem:[#allocation2 + $0x14c] sm:$0x1]  ;;  %v5551_v41 = vsel %vm11416_vm15, %v5549_v16, %v5550_v59 }
 0x27f   :  { %v7174_v43 = vpop.permute.xlu1 %7173  ;;  %v7721_v23 = vsel %vm11416_vm15, %v7719_v2, %v7720_v62  ;;  %v4718_v56 = vshrl.u32 %v4252_v1, 16  ;;  %v13301_v47 = vld [vmem:[#allocation2 + $0x14c] sm:$0x1]  ;;  %15976 = vst [vmem:[#allocation13_spill] sm:$0xff] %v13303_v11  ;;  %v4707_v19 = vrot.slane %v4705_v28, 4  ;;  %v6917_v4 = vshll.u32 %v6320_v48, 16 }
 0x280   :  { %10918 = vmatmul.msk.bf16.gmra.mxu3 %vm276_vm0, %v10704_v26  ;;  %7335 = vst.msk [vmem:[#allocation3 + $0x16c] sm:$0xf] %vm4135_vm8, %v7174_v43  ;;  %v4714_v26 = vshll.u32 %v4252_v1, 16  ;;  %v4710_v43 = vrot.slane %v4708_v42, 5  ;;  %v4253_v0 = vld [vmem:[#allocation2 + $0xf8] sm:$0x1]  ;;  %v5555_v1 = vsel %vm11416_vm15, %v10401_v38, %v5554_v7 }
 0x281   :  { %7894 = vst.msk [vmem:[#allocation3 + $0x224] sm:$0xf] %vm742_vm6, %v7721_v23  ;;  %v6905_v62 = vrot.slane %v6904_v36, 4  ;;  %v4720_v2 = vrot.slane %v4718_v56, 4  ;;  %v4724_v57 = vshll.u32 %v4253_v0, 16  ;;  %v6915_v51 = vrot.slane %v6914_v37, 4  ;;  %v13321_v0 = vpop.f32.mrf.mxu2 }
 0x282   :  { %v4716_v45 = vrot.slane %v4714_v26, 5  ;;  %v4711_v23 = vor.u32 %v4710_v43, %v4707_v19  ;;  %v13311_v11 = vrot.slane %v5554_v7, 4  ;;  %v6321_v16 = vld [vmem:[#allocation2 + $0x150] sm:$0xf]  ;;  %v10625_v48 = vld [vmem:[#allocation3 + $0x174] sm:$0xf0] }
 0x283   :  { %v4726_v36 = vrot.slane %v4724_v57, 5  ;;  %v6322_v26 = vld [vmem:[#allocation2 + $0x154] sm:$0xf]  ;;  %v6919_v38 = vrot.slane %v6917_v4, 5  ;;  %v6922_v43 = vshrl.u32 %v6321_v16, 16  ;;  %v6925_v57 = vshll.u32 %v6321_v16, 16 }
 0x284   :  { %6085 = vrot.lane.b32.xlu2 %v5911_v5, %s11159_s1  ;;  %v4721_v5 = vor.u32 %v4720_v2, %v4716_v45  ;;  %v4712_v56 = vrot.slane %v4711_v23, 4  ;;  %v10715_v37 = vld [vmem:[#allocation3 + $0x218] sm:$0xf]  ;;  %v7438_v4 = vld [vmem:[#allocation2 + $0x144] sm:$0xe] }
 0x285   :  { %5702 = vrot.lane.b32.xlu1 %v5551_v41, %s11161_s26  ;;  %5704 = vrot.lane.b32.xlu0 %v5555_v1, %s11161_s26  ;;  %v6931_v1 = vshll.u32 %v6322_v26, 16  ;;  %v5916_v8 = vld [vmem:[#allocation2 + $0x160] sm:$0xf] }
 0x286   :  { %v13313_v28 = vpop.permute.xlu2 %7183  ;;  %v4722_v19 = vrot.slane %v4721_v5, 4  ;;  %v4717_v2 = vsel %vm11407_vm14, %v4712_v56, %v4716_v45  ;;  %v6910_v5 = vsel %vm11407_vm14, %v6905_v62, %v13278_v9  ;;  %v5914_v45 = vld [vmem:[#allocation2 + $0x154] sm:$0xf]  ;;  %v7439_v56 = vld [vmem:[#allocation2 + $0x148] sm:$0xf]  ;;  %v13338_v62 = vpop.f32.mrf.mxu3 }
 0x287   :  { %v5675_v59 = vpop.permute.xlu1 %5674  ;;  %v11048_v41 = vld [vmem:[#allocation3 + $0x16c] sm:$0xf]  ;;  %v5677_v7 = vpop.permute.xlu0 %5676  ;;  %5162 = vst.msk [vmem:[#allocation3 + $0x19c] sm:$0xf] %vm742_vm6, %v4717_v2  ;;  %v7724_v2 = vrot.slane %v7439_v56, 5 }
 0x288   :  { %5833 = vst.msk [vmem:[#allocation3 + $0x190] sm:$0xf] %vm3074_vm2, %v5675_v59  ;;  %v6935_v59 = vshrl.u32 %v6322_v26, 16  ;;  %v11071_v23 = vld [vmem:[#allocation3 + $0x220] sm:$0xf0]  ;;  %v10628_v16 = vor.u32 %v11048_v41, %v10625_v48  ;;  %v13341_v48 = vrot.slane %v6931_v1, 5 }
 0x289   :  { %6218 = vst.msk [vmem:[#allocation3 + $0x190] sm:$0xf] %vm3750_vm4, %v6060_v46  ;;  %v4727_v46 = vsel %vm11407_vm14, %v4722_v19, %v4726_v36  ;;  %v7440_v26 = vld [vmem:[#allocation2 + $0x14c] sm:$0x1]  ;;  %v6924_v36 = vrot.slane %v6922_v43, 4  ;;  %v10432_v19 = vrot.slane %v7438_v4, 9 }
 0x28a   :  { %7338 = vst.msk [vmem:[#allocation3 + $0x190] sm:$0xf] %vm4135_vm8, %v13262_v52  ;;  %v6920_v52 = vsel %vm11407_vm14, %v6915_v51, %v6919_v38  ;;  %v7727_v9 = vrot.slane %v7440_v26, 5  ;;  %v6927_v51 = vrot.slane %v6925_v57, 5  ;;  %v5267_v38 = vld [vmem:[#allocation2 + $0x150] sm:$0xe] }
 0x28b   :  { %5834 = vst.msk [vmem:[#allocation3 + $0x19c] sm:$0xf] %vm3074_vm2, %v5677_v7  ;;  %v10716_v7 = vor.u32 %v11071_v23, %v10715_v37  ;;  %v7726_v43 = vrot.slane %v7724_v2, 4  ;;  %v13348_v4 = vld [vmem:[#allocation2 + $0x154] sm:$0xf]  ;;  %v6937_v37 = vrot.slane %v6935_v59, 4 }
 0x28c   :  { %6219 = vst.msk [vmem:[#allocation3 + $0x19c] sm:$0xf] %vm3750_vm4, %v13287_v50  ;;  %7207 = vrot.lane.b32.xlu2 %v6920_v52, %s11160_s25  ;;  %v7725_v50 = vsel %vm11416_vm15, %v10432_v19, %v7724_v2  ;;  %v4254_v52 = vld [vmem:[#allocation2 + $0xfc] sm:$0xf]  ;;  %v10402_v57 = vrot.slane %v5267_v38, 9  ;;  %v6928_v2 = vor.u32 %v6927_v51, %v6924_v36  ;;  %v5561_v59 = vrot.slane %v13348_v4, 5 }
 0x28d   :  { %7205 = vrot.lane.b32.xlu1 %v6910_v5, %s11160_s25  ;;  %15977 = vst [vmem:[#allocation14_spill] sm:$0xff] %v13338_v62  ;;  %6091 = vrot.lane.b32.xlu0 %v5914_v45, %s11159_s1  ;;  %v4255_v1 = vld [vmem:[#allocation2 + $0x100] sm:$0xf]  ;;  %v4729_v23 = vshrl.u32 %v4254_v52, 16  ;;  %v7728_v45 = vsel %vm11416_vm15, %v7726_v43, %v7727_v9  ;;  %v6323_v38 = vld [vmem:[#allocation2 + $0x158] sm:$0x1]  ;;  %v6938_v62 = vor.u32 %v6937_v37, %v13341_v48 }
 0x28e   :  { %5163 = vst.msk [vmem:[#allocation3 + $0x1a8] sm:$0xf] %vm742_vm6, %v4727_v46  ;;  %v13343_v5 = vpop.permute.xlu2 %6065  ;;  %9013 = vmatmul.bf16.gmra.mxu2 %v10628_v16  ;;  %v4732_v16 = vshll.u32 %v4254_v52, 16  ;;  %v4738_v56 = vshll.u32 %v4255_v1, 16  ;;  %v4742_v26 = vshrl.u32 %v4255_v1, 16  ;;  %v6941_v63 = vshll.u32 %v6323_v38, 16 }
 0x28f   :  { %v7178_v41 = vpop.permute.xlu1 %7177  ;;  %v6064_v46 = vpop.permute.xlu0 %6063  ;;  %7895 = vst.msk [vmem:[#allocation3 + $0x230] sm:$0xf] %vm742_vm6, %v7725_v50  ;;  %v15979_v9 = vrot.slane %v13301_v47, 5  ;;  %v5913_v43 = vld [vmem:[#allocation2 + $0x150] sm:$0xf]  ;;  %v6929_v1 = vrot.slane %v6928_v2, 4  ;;  %v5562_v37 = vsel %vm11416_vm15, %v10402_v57, %v5561_v59 }
 0x290   :  { %10919 = vmatmul.msk.bf16.gmra.mxu3 %vm276_vm0, %v10716_v7  ;;  %7337 = vst.msk [vmem:[#allocation3 + $0x184] sm:$0xf] %vm4135_vm8, %v7178_v41  ;;  %v4731_v7 = vrot.slane %v4729_v23, 4  ;;  %v4734_v41 = vrot.slane %v4732_v16, 5  ;;  %v4740_v42 = vrot.slane %v4738_v56, 5  ;;  %v4744_v36 = vrot.slane %v4742_v26, 4 }
 0x291   :  { %v13355_v19 = vpop.f32.mrf.mxu2  ;;  %7896 = vst.msk [vmem:[#allocation3 + $0x23c] sm:$0xf] %vm742_vm6, %v7728_v45  ;;  %v5558_v50 = vsel %vm11416_vm15, %v13311_v11, %v15979_v9  ;;  %v4256_v52 = vld [vmem:[#allocation2 + $0x104] sm:$0x1]  ;;  %v6324_v45 = vld [vmem:[#allocation2 + $0x15c] sm:$0xf] }
 0x292   :  { %15978 = vst [vmem:[#allocation15_spill] sm:$0xff] %v13355_v19  ;;  %v4735_v51 = vor.u32 %v4734_v41, %v4731_v7  ;;  %v4748_v4 = vshll.u32 %v4256_v52, 16  ;;  %v4745_v23 = vor.u32 %v4744_v36, %v4740_v42  ;;  %v6325_v47 = vld [vmem:[#allocation2 + $0x160] sm:$0xf]  ;;  %v6939_v26 = vrot.slane %v6938_v62, 4 }
 0x293   :  { %v6943_v38 = vrot.slane %v6941_v63, 5  ;;  %v6946_v57 = vshrl.u32 %v6324_v45, 16  ;;  %v6949_v41 = vshll.u32 %v6324_v45, 16  ;;  %v6955_v62 = vshll.u32 %v6325_v47, 16 }
 0x294   :  { %6089 = vrot.lane.b32.xlu2 %v5913_v43, %s11159_s1  ;;  %v4736_v11 = vrot.slane %v4735_v51, 4  ;;  %v4750_v9 = vrot.slane %v4748_v4, 5  ;;  %v13372_v43 = vpop.f32.mrf.mxu3  ;;  %v4746_v2 = vrot.slane %v4745_v23, 4  ;;  %v10637_v4 = vld [vmem:[#allocation3 + $0x18c] sm:$0xf0]  ;;  %v6934_v45 = vsel %vm11407_vm14, %v6929_v1, %v13341_v48 }
 0x295   :  { %5706 = vrot.lane.b32.xlu1 %v5558_v50, %s11161_s26  ;;  %5708 = vrot.lane.b32.xlu0 %v5562_v37, %s11161_s26  ;;  %v7441_v50 = vld [vmem:[#allocation2 + $0x150] sm:$0xe]  ;;  %15980 = vst [vmem:[#allocation16_spill] sm:$0xff] %v13372_v43  ;;  %v7442_v23 = vld [vmem:[#allocation2 + $0x154] sm:$0xf]  ;;  %v6951_v49 = vrot.slane %v6949_v41, 5 }
 0x296   :  { %v13369_v56 = vpop.permute.xlu2 %7187  ;;  %v10727_v52 = vld [vmem:[#allocation3 + $0x230] sm:$0xf]  ;;  %v4741_v37 = vsel %vm11407_vm14, %v4736_v11, %v4740_v42  ;;  %v5269_v42 = vld [vmem:[#allocation2 + $0x158] sm:$0x1]  ;;  %v4751_v11 = vsel %vm11407_vm14, %v4746_v2, %v4750_v9  ;;  %v7731_v15 = vrot.slane %v7442_v23, 5  ;;  %v5563_v48 = vrot.slane %v5561_v59, 4 }
 0x297   :  { %v5679_v16 = vpop.permute.xlu1 %5678  ;;  %v11051_v7 = vld [vmem:[#allocation3 + $0x184] sm:$0xf]  ;;  %v5681_v51 = vpop.permute.xlu0 %5680  ;;  %5164 = vst.msk [vmem:[#allocation3 + $0x1b4] sm:$0xf] %vm742_vm6, %v4741_v37  ;;  %v7443_v43 = vld [vmem:[#allocation2 + $0x158] sm:$0x1] }
 0x298   :  { %5835 = vst.msk [vmem:[#allocation3 + $0x1a8] sm:$0xf] %vm3074_vm2, %v5679_v16  ;;  %v11074_v36 = vld [vmem:[#allocation3 + $0x238] sm:$0xf0]  ;;  %v6959_v16 = vshrl.u32 %v6325_v47, 16  ;;  %v6948_v47 = vrot.slane %v6946_v57, 4  ;;  %v10640_v1 = vor.u32 %v11051_v7, %v10637_v4 }
 0x299   :  { %6220 = vst.msk [vmem:[#allocation3 + $0x1a8] sm:$0xf] %vm3750_vm4, %v6064_v46  ;;  %v13380_v63 = vpop.f32.mrf.mxu2  ;;  %v6944_v46 = vsel %vm11407_vm14, %v6939_v26, %v6943_v38  ;;  %v7734_v54 = vrot.slane %v7443_v43, 5  ;;  %v13395_v26 = vrot.slane %v6955_v62, 5  ;;  %v5270_v38 = vld [vmem:[#allocation2 + $0x15c] sm:$0xe]  ;;  %v10728_v9 = vor.u32 %v11074_v36, %v10727_v52 }
 0x29a   :  { %7340 = vst.msk [vmem:[#allocation3 + $0x1a8] sm:$0xf] %vm4135_vm8, %v13313_v28  ;;  %v10433_v28 = vrot.slane %v7441_v50, 9  ;;  %v7733_v2 = vrot.slane %v7731_v15, 4  ;;  %v13400_v43 = vld [vmem:[#allocation2 + $0x160] sm:$0xf]  ;;  %v6952_v52 = vor.u32 %v6951_v49, %v6948_v47 }
 0x29b   :  { %15981 = vst [vmem:[#allocation17_spill] sm:$0xff] %v13380_v63  ;;  %v6961_v57 = vrot.slane %v6959_v16, 4  ;;  %v4258_v59 = vld [vmem:[#allocation2 + $0x10c] sm:$0xf]  ;;  %v5564_v7 = vrot.slane %v5269_v42, 5 }
 0x29c   :  { %5836 = vst.msk [vmem:[#allocation3 + $0x1b4] sm:$0xf] %vm3074_vm2, %v5681_v51  ;;  %7211 = vrot.lane.b32.xlu2 %v6944_v46, %s11160_s25  ;;  %v7732_v50 = vsel %vm11416_vm15, %v10433_v28, %v7731_v15  ;;  %v7735_v15 = vsel %vm11416_vm15, %v7733_v2, %v7734_v54  ;;  %v6326_v51 = vld [vmem:[#allocation2 + $0x164] sm:$0x1]  ;;  %v4762_v16 = vshll.u32 %v4258_v59, 16  ;;  %v4766_v23 = vshrl.u32 %v4258_v59, 16 }
 0x29d   :  { %7209 = vrot.lane.b32.xlu1 %v6934_v45, %s11160_s25  ;;  %6221 = vst.msk [vmem:[#allocation3 + $0x1b4] sm:$0xf] %vm3750_vm4, %v13343_v5  ;;  %6095 = vrot.lane.b32.xlu0 %v5916_v8, %s11159_s1  ;;  %v4257_v5 = vld [vmem:[#allocation2 + $0x108] sm:$0xf]  ;;  %v10403_v8 = vrot.slane %v5270_v38, 9  ;;  %v13411_v45 = vpop.f32.mrf.mxu3  ;;  %v6962_v49 = vor.u32 %v6961_v57, %v13395_v26  ;;  %v6965_v28 = vshll.u32 %v6326_v51, 16  ;;  %v5565_v38 = vsel %vm11416_vm15, %v5563_v48, %v5564_v7 }
 0x29e   :  { %5165 = vst.msk [vmem:[#allocation3 + $0x1c0] sm:$0xf] %vm742_vm6, %v4751_v11  ;;  %v13402_v37 = vpop.permute.xlu2 %6069  ;;  %9018 = vmatmul.bf16.gmra.mxu2 %v10640_v1  ;;  %v4753_v36 = vshrl.u32 %v4257_v5, 16  ;;  %v4756_v4 = vshll.u32 %v4257_v5, 16  ;;  %v15949_v11 = vrot.slane %v13400_v43, 5  ;;  %v4764_v47 = vrot.slane %v4762_v16, 5 }
 0x29f   :  { %v7182_v41 = vpop.permute.xlu1 %7181  ;;  %7897 = vst.msk [vmem:[#allocation3 + $0x248] sm:$0xf] %vm742_vm6, %v7732_v50  ;;  %v6068_v62 = vpop.permute.xlu0 %6067  ;;  %v4259_v1 = vld [vmem:[#allocation2 + $0x110] sm:$0x1]  ;;  %v5915_v50 = vld [vmem:[#allocation2 + $0x15c] sm:$0xf] }
 0x2a0   :  { %10920 = vmatmul.msk.bf16.gmra.mxu3 %vm276_vm0, %v10728_v9  ;;  %7339 = vst.msk [vmem:[#allocation3 + $0x19c] sm:$0xf] %vm4135_vm8, %v7182_v41  ;;  %v4755_v42 = vrot.slane %v4753_v36, 4  ;;  %v4758_v54 = vrot.slane %v4756_v4, 5  ;;  %v4768_v9 = vrot.slane %v4766_v23, 4  ;;  %v4772_v2 = vshll.u32 %v4259_v1, 16 }
 0x2a1   :  { %7898 = vst.msk [vmem:[#allocation3 + $0x254] sm:$0xf] %vm742_vm6, %v7735_v15  ;;  %v13413_v46 = vpop.f32.mrf.mxu2  ;;  %v6953_v41 = vrot.slane %v6952_v52, 4  ;;  %v6327_v15 = vld [vmem:[#allocation2 + $0x168] sm:$0xf]  ;;  %v5569_v57 = vsel %vm11416_vm15, %v10403_v8, %v15949_v11  ;;  %v6963_v51 = vrot.slane %v6962_v49, 4 }
 0x2a2   :  { %15982 = vst [vmem:[#allocation18_spill] sm:$0xff] %v13411_v45  ;;  %v4759_v5 = vor.u32 %v4758_v54, %v4755_v42  ;;  %v4769_v59 = vor.u32 %v4768_v9, %v4764_v47  ;;  %v6328_v36 = vld [vmem:[#allocation2 + $0x16c] sm:$0xf]  ;;  %v6967_v4 = vrot.slane %v6965_v28, 5  ;;  %v4774_v16 = vrot.slane %v4772_v2, 5 }
 0x2a3   :  { %15983 = vst [vmem:[#allocation19_spill] sm:$0xff] %v13413_v46  ;;  %v6970_v52 = vshrl.u32 %v6327_v15, 16  ;;  %v6973_v42 = vshll.u32 %v6327_v15, 16  ;;  %v6979_v9 = vshll.u32 %v6328_v36, 16  ;;  %v7444_v2 = vld [vmem:[#allocation2 + $0x15c] sm:$0xe] }
 0x2a4   :  { %6093 = vrot.lane.b32.xlu2 %v5915_v50, %s11159_s1  ;;  %v4760_v23 = vrot.slane %v4759_v5, 4  ;;  %v4770_v1 = vrot.slane %v4769_v59, 4  ;;  %v6958_v5 = vsel %vm11407_vm14, %v6953_v41, %v13395_v26  ;;  %v10649_v15 = vld [vmem:[#allocation3 + $0x1a4] sm:$0xf0]  ;;  %v5918_v26 = vld [vmem:[#allocation2 + $0x16c] sm:$0xf] }
 0x2a5   :  { %5710 = vrot.lane.b32.xlu1 %v5565_v38, %s11161_s26  ;;  %5712 = vrot.lane.b32.xlu0 %v5569_v57, %s11161_s26  ;;  %v6983_v38 = vshrl.u32 %v6328_v36, 16  ;;  %v7445_v36 = vld [vmem:[#allocation2 + $0x160] sm:$0xf]  ;;  %v7446_v57 = vld [vmem:[#allocation2 + $0x164] sm:$0x1]  ;;  %v13442_v45 = vpop.f32.mrf.mxu3  ;;  %v6972_v41 = vrot.slane %v6970_v52, 4 }
 0x2a6   :  { %v13425_v7 = vpop.permute.xlu2 %7191  ;;  %v10739_v8 = vld [vmem:[#allocation3 + $0x248] sm:$0xf]  ;;  %v4765_v28 = vsel %vm11407_vm14, %v4760_v23, %v4764_v47  ;;  %v4775_v47 = vsel %vm11407_vm14, %v4770_v1, %v4774_v16  ;;  %v7738_v23 = vrot.slane %v7445_v36, 5  ;;  %v7741_v11 = vrot.slane %v7446_v57, 5  ;;  %15985 = vst [vmem:[#allocation21_spill] sm:$0xff] %v13442_v45 }
 0x2a7   :  { %v5683_v48 = vpop.permute.xlu1 %5682  ;;  %v11054_v54 = vld [vmem:[#allocation3 + $0x19c] sm:$0xf]  ;;  %v5685_v50 = vpop.permute.xlu0 %5684  ;;  %5166 = vst.msk [vmem:[#allocation3 + $0x1cc] sm:$0xf] %vm742_vm6, %v4765_v28  ;;  %v6975_v46 = vrot.slane %v6973_v42, 5 }
 0x2a8   :  { %5837 = vst.msk [vmem:[#allocation3 + $0x1c0] sm:$0xf] %vm3074_vm2, %v5683_v48  ;;  %v11077_v49 = vld [vmem:[#allocation3 + $0x250] sm:$0xf0]  ;;  %v10434_v48 = vrot.slane %v7444_v2, 9  ;;  %v10652_v16 = vor.u32 %v11054_v54, %v10649_v15  ;;  %v7740_v28 = vrot.slane %v7738_v23, 4 }
 0x2a9   :  { %6222 = vst.msk [vmem:[#allocation3 + $0x1c0] sm:$0xf] %vm3750_vm4, %v6068_v62  ;;  %v13437_v59 = vpop.f32.mrf.mxu2  ;;  %v5272_v62 = vld [vmem:[#allocation2 + $0x164] sm:$0x1]  ;;  %v6985_v2 = vrot.slane %v6983_v38, 4 }
 0x2aa   :  { %7342 = vst.msk [vmem:[#allocation3 + $0x1c0] sm:$0xf] %vm4135_vm8, %v13369_v56  ;;  %v6968_v56 = vsel %vm11407_vm14, %v6963_v51, %v6967_v4  ;;  %v7739_v1 = vsel %vm11416_vm15, %v10434_v48, %v7738_v23  ;;  %v10740_v51 = vor.u32 %v11077_v49, %v10739_v8  ;;  %v13456_v4 = vld [vmem:[#allocation2 + $0x16c] sm:$0xf]  ;;  %v4260_v52 = vld [vmem:[#allocation2 + $0x114] sm:$0xf]  ;;  %v6976_v48 = vor.u32 %v6975_v46, %v6972_v41 }
 0x2ab   :  { %15984 = vst [vmem:[#allocation20_spill] sm:$0xff] %v13437_v59  ;;  %v13447_v59 = vrot.slane %v6979_v9, 5  ;;  %v4261_v54 = vld [vmem:[#allocation2 + $0x118] sm:$0xf]  ;;  %v4780_v38 = vshll.u32 %v4260_v52, 16  ;;  %v15986_v8 = vrot.slane %v13400_v43, 5 }
 0x2ac   :  { %5838 = vst.msk [vmem:[#allocation3 + $0x1cc] sm:$0xf] %vm3074_vm2, %v5685_v50  ;;  %7215 = vrot.lane.b32.xlu2 %v6968_v56, %s11160_s25  ;;  %v5273_v50 = vld [vmem:[#allocation2 + $0x168] sm:$0xe]  ;;  %v5571_v15 = vrot.slane %v5272_v62, 5  ;;  %v4786_v36 = vshll.u32 %v4261_v54, 16 }
 0x2ad   :  { %7213 = vrot.lane.b32.xlu1 %v6958_v5, %s11160_s25  ;;  %6223 = vst.msk [vmem:[#allocation3 + $0x1cc] sm:$0xf] %vm3750_vm4, %v13402_v37  ;;  %6099 = vrot.lane.b32.xlu0 %v5918_v26, %s11159_s1  ;;  %v7742_v37 = vsel %vm11416_vm15, %v7740_v28, %v7741_v11  ;;  %v4777_v5 = vshrl.u32 %v4260_v52, 16  ;;  %v5570_v49 = vrot.slane %v15986_v8, 4  ;;  %v4790_v57 = vshrl.u32 %v4261_v54, 16  ;;  %v13477_v8 = vpop.f32.mrf.mxu3 }
 0x2ae   :  { %5167 = vst.msk [vmem:[#allocation3 + $0x1d8] sm:$0xf] %vm742_vm6, %v4775_v47  ;;  %v13458_v9 = vpop.permute.xlu2 %6073  ;;  %9023 = vmatmul.bf16.gmra.mxu2 %v10652_v16  ;;  %v4782_v23 = vrot.slane %v4780_v38, 5  ;;  %v6329_v56 = vld [vmem:[#allocation2 + $0x170] sm:$0x1]  ;;  %v10404_v16 = vrot.slane %v5273_v50, 9 }
 0x2af   :  { %v7186_v42 = vpop.permute.xlu1 %7185  ;;  %7899 = vst.msk [vmem:[#allocation3 + $0x260] sm:$0xf] %vm742_vm6, %v7739_v1  ;;  %v6072_v47 = vpop.permute.xlu0 %6071  ;;  %v4779_v11 = vrot.slane %v4777_v5, 4  ;;  %v15950_v1 = vrot.slane %v13456_v4, 5  ;;  %v4788_v28 = vrot.slane %v4786_v36, 5  ;;  %v4792_v62 = vrot.slane %v4790_v57, 4 }
 0x2b0   :  { %10921 = vmatmul.msk.bf16.gmra.mxu3 %vm276_vm0, %v10740_v51  ;;  %7341 = vst.msk [vmem:[#allocation3 + $0x1b4] sm:$0xf] %vm4135_vm8, %v7186_v42  ;;  %v6986_v51 = vor.u32 %v6985_v2, %v13447_v59  ;;  %v4262_v43 = vld [vmem:[#allocation2 + $0x11c] sm:$0x1]  ;;  %v5572_v42 = vsel %vm11416_vm15, %v5570_v49, %v5571_v15  ;;  %v5917_v46 = vld [vmem:[#allocation2 + $0x168] sm:$0xf] }
 0x2b1   :  { %7900 = vst.msk [vmem:[#allocation3 + $0x26c] sm:$0xf] %vm742_vm6, %v7742_v37  ;;  %v13469_v26 = vpop.f32.mrf.mxu2  ;;  %v4783_v52 = vor.u32 %v4782_v23, %v4779_v11  ;;  %v6989_v41 = vshll.u32 %v6329_v56, 16  ;;  %v4796_v37 = vshll.u32 %v4262_v43, 16  ;;  %v4793_v50 = vor.u32 %v4792_v62, %v4788_v28  ;;  %v6330_v5 = vld [vmem:[#allocation2 + $0x174] sm:$0xf] }
 0x2b2   :  { %15987 = vst [vmem:[#allocation22_spill] sm:$0xff] %v13469_v26  ;;  %v6331_v38 = vld [vmem:[#allocation2 + $0x178] sm:$0xf]  ;;  %v6977_v2 = vrot.slane %v6976_v48, 4  ;;  %v5576_v36 = vsel %vm11416_vm15, %v10404_v16, %v15950_v1  ;;  %v6987_v49 = vrot.slane %v6986_v51, 4  ;;  %v6994_v15 = vshrl.u32 %v6330_v5, 16 }
 0x2b3   :  { %v4784_v54 = vrot.slane %v4783_v52, 4  ;;  %15988 = vst [vmem:[#allocation23_spill] sm:$0xff] %v13477_v8  ;;  %v4794_v23 = vrot.slane %v4793_v50, 4  ;;  %v4798_v56 = vrot.slane %v4796_v37, 5  ;;  %v6997_v43 = vshll.u32 %v6330_v5, 16 }
 0x2b4   :  { %6097 = vrot.lane.b32.xlu2 %v5917_v46, %s11159_s1  ;;  %v7003_v52 = vshll.u32 %v6331_v38, 16  ;;  %v7447_v62 = vld [vmem:[#allocation2 + $0x168] sm:$0xe]  ;;  %v7007_v16 = vshrl.u32 %v6331_v38, 16  ;;  %v7448_v45 = vld [vmem:[#allocation2 + $0x16c] sm:$0xf]  ;;  %v6982_v37 = vsel %vm11407_vm14, %v6977_v2, %v13447_v59 }
 0x2b5   :  { %5714 = vrot.lane.b32.xlu1 %v5572_v42, %s11161_s26  ;;  %5716 = vrot.lane.b32.xlu0 %v5576_v36, %s11161_s26  ;;  %v4789_v48 = vsel %vm11407_vm14, %v4784_v54, %v4788_v28  ;;  %v6991_v42 = vrot.slane %v6989_v41, 5  ;;  %v10435_v36 = vrot.slane %v7447_v62, 9  ;;  %v5275_v50 = vld [vmem:[#allocation2 + $0x170] sm:$0x1]  ;;  %v13497_v41 = vrot.slane %v6994_v15, 4 }
 0x2b6   :  { %v13483_v11 = vpop.permute.xlu2 %7195  ;;  %v10751_v51 = vld [vmem:[#allocation3 + $0x260] sm:$0xf]  ;;  %5168 = vst.msk [vmem:[#allocation3 + $0x1e4] sm:$0xf] %vm742_vm6, %v4789_v48  ;;  %v4799_v38 = vsel %vm11407_vm14, %v4794_v23, %v4798_v56  ;;  %v13502_v62 = vrot.slane %v7003_v52, 5  ;;  %v7009_v26 = vrot.slane %v7007_v16, 4 }
 0x2b7   :  { %v5687_v57 = vpop.permute.xlu1 %5686  ;;  %v11057_v46 = vld [vmem:[#allocation3 + $0x1b4] sm:$0xf]  ;;  %v5689_v8 = vpop.permute.xlu0 %5688  ;;  %v10661_v28 = vld [vmem:[#allocation3 + $0x1bc] sm:$0xf0]  ;;  %v6992_v59 = vsel %vm11407_vm14, %v6987_v49, %v6991_v42  ;;  %v5920_v2 = vld [vmem:[#allocation2 + $0x178] sm:$0xf] }
 0x2b8   :  { %5839 = vst.msk [vmem:[#allocation3 + $0x1d8] sm:$0xf] %vm3074_vm2, %v5687_v57  ;;  %v11080_v1 = vld [vmem:[#allocation3 + $0x268] sm:$0xf0]  ;;  %v7449_v54 = vld [vmem:[#allocation2 + $0x170] sm:$0x1]  ;;  %v10664_v23 = vor.u32 %v11057_v46, %v10661_v28 }
 0x2b9   :  { %6224 = vst.msk [vmem:[#allocation3 + $0x1d8] sm:$0xf] %vm3750_vm4, %v6072_v47  ;;  %v13495_v5 = vpop.f32.mrf.mxu2  ;;  %v7745_v47 = vrot.slane %v7448_v45, 5  ;;  %v6999_v57 = vrot.slane %v6997_v43, 5  ;;  %v5276_v45 = vld [vmem:[#allocation2 + $0x174] sm:$0xe]  ;;  %v10752_v43 = vor.u32 %v11080_v1, %v10751_v51  ;;  %v13522_v51 = vpop.f32.mrf.mxu3 }
 0x2ba   :  { %7344 = vst.msk [vmem:[#allocation3 + $0x1d8] sm:$0xf] %vm4135_vm8, %v13425_v7  ;;  %v7748_v7 = vrot.slane %v7449_v54, 5  ;;  %v5277_v56 = vld [vmem:[#allocation2 + $0x178] sm:$0xf]  ;;  %v5578_v54 = vrot.slane %v5275_v50, 5 }
 0x2bb   :  { %15989 = vst [vmem:[#allocation24_spill] sm:$0xff] %v13495_v5  ;;  %v7746_v15 = vsel %vm11416_vm15, %v10435_v36, %v7745_v47  ;;  %v7747_v5 = vrot.slane %v7745_v47, 4  ;;  %v4264_v52 = vld [vmem:[#allocation2 + $0x124] sm:$0xf]  ;;  %v15990_v36 = vrot.slane %v13456_v4, 5 }
 0x2bc   :  { %5840 = vst.msk [vmem:[#allocation3 + $0x1e4] sm:$0xf] %vm3074_vm2, %v5689_v8  ;;  %7219 = vrot.lane.b32.xlu2 %v6992_v59, %s11160_s25  ;;  %v4263_v8 = vld [vmem:[#allocation2 + $0x120] sm:$0xf]  ;;  %v4810_v1 = vshll.u32 %v4264_v52, 16  ;;  %v4814_v46 = vshrl.u32 %v4264_v52, 16 }
 0x2bd   :  { %7217 = vrot.lane.b32.xlu1 %v6982_v37, %s11160_s25  ;;  %6225 = vst.msk [vmem:[#allocation3 + $0x1e4] sm:$0xf] %vm3750_vm4, %v13458_v9  ;;  %v7749_v49 = vsel %vm11416_vm15, %v7747_v5, %v7748_v7  ;;  %v4801_v48 = vshrl.u32 %v4263_v8, 16  ;;  %v4804_v42 = vshll.u32 %v4263_v8, 16  ;;  %v5577_v37 = vrot.slane %v15990_v36, 4  ;;  %6103 = vrot.lane.b32.xlu0 %v5920_v2, %s11159_s1 }
 0x2be   :  { %5169 = vst.msk [vmem:[#allocation3 + $0x1f0] sm:$0xf] %vm742_vm6, %v4799_v38  ;;  %v13518_v9 = vpop.permute.xlu2 %6077  ;;  %9028 = vmatmul.bf16.gmra.mxu2 %v10664_v23  ;;  %v7000_v5 = vor.u32 %v6999_v57, %v13497_v41  ;;  %v6332_v50 = vld [vmem:[#allocation2 + $0x17c] sm:$0x1]  ;;  %v10405_v38 = vrot.slane %v5276_v45, 9  ;;  %v5582_v7 = vrot.slane %v5277_v56, 5  ;;  %v7010_v2 = vor.u32 %v7009_v26, %v13502_v62 }
 0x2bf   :  { %v7190_v16 = vpop.permute.xlu1 %7189  ;;  %7901 = vst.msk [vmem:[#allocation3 + $0x278] sm:$0xf] %vm742_vm6, %v7746_v15  ;;  %v4803_v4 = vrot.slane %v4801_v48, 4  ;;  %v4806_v28 = vrot.slane %v4804_v42, 5  ;;  %v6076_v47 = vpop.permute.xlu0 %6075  ;;  %v4812_v59 = vrot.slane %v4810_v1, 5  ;;  %v5579_v41 = vsel %vm11416_vm15, %v5577_v37, %v5578_v54 }
 0x2c0   :  { %15991 = vst [vmem:[#allocation25_spill] sm:$0xff] %v13522_v51  ;;  %10922 = vmatmul.msk.bf16.gmra.mxu3 %vm276_vm0, %v10752_v43  ;;  %v4265_v8 = vld [vmem:[#allocation2 + $0x128] sm:$0x1]  ;;  %v4816_v43 = vrot.slane %v4814_v46, 4  ;;  %v5919_v52 = vld [vmem:[#allocation2 + $0x174] sm:$0xf]  ;;  %v5583_v56 = vsel %vm11416_vm15, %v10405_v38, %v5582_v7 }
 0x2c1   :  { %7343 = vst.msk [vmem:[#allocation3 + $0x1cc] sm:$0xf] %vm4135_vm8, %v7190_v16  ;;  %v13529_v15 = vpop.f32.mrf.mxu2  ;;  %v4807_v23 = vor.u32 %v4806_v28, %v4803_v4  ;;  %v7013_v16 = vshll.u32 %v6332_v50, 16  ;;  %v4820_v36 = vshll.u32 %v4265_v8, 16  ;;  %v13533_v48 = vld [vmem:[#allocation2 + $0x17c] sm:$0x1] }
 0x2c2   :  { %7902 = vst.msk [vmem:[#allocation3 + $0x284] sm:$0xf] %vm742_vm6, %v7749_v49  ;;  %v4817_v49 = vor.u32 %v4816_v43, %v4812_v59  ;;  %v6333_v45 = vld [vmem:[#allocation2 + $0x180] sm:$0xf]  ;;  %v7001_v26 = vrot.slane %v7000_v5, 4  ;;  %v7011_v42 = vrot.slane %v7010_v2, 4 }
 0x2c3   :  { %15992 = vst [vmem:[#allocation26_spill] sm:$0xff] %v13529_v15  ;;  %v4808_v57 = vrot.slane %v4807_v23, 4  ;;  %v6334_v1 = vld [vmem:[#allocation2 + $0x184] sm:$0xf]  ;;  %v13541_v4 = vrot.slane %v5582_v7, 4  ;;  %v4822_v54 = vrot.slane %v4820_v36, 5 }
 0x2c4   :  { %6101 = vrot.lane.b32.xlu2 %v5919_v52, %s11159_s1  ;;  %v4818_v37 = vrot.slane %v4817_v49, 4  ;;  %v7015_v5 = vrot.slane %v7013_v16, 5  ;;  %v7018_v38 = vshrl.u32 %v6333_v45, 16  ;;  %v7021_v2 = vshll.u32 %v6333_v45, 16  ;;  %v7450_v36 = vld [vmem:[#allocation2 + $0x174] sm:$0xe] }
 0x2c5   :  { %5718 = vrot.lane.b32.xlu1 %v5579_v41, %s11161_s26  ;;  %v4813_v46 = vsel %vm11407_vm14, %v4808_v57, %v4812_v59  ;;  %5720 = vrot.lane.b32.xlu0 %v5583_v56, %s11161_s26  ;;  %v7027_v59 = vshll.u32 %v6334_v1, 16  ;;  %v7031_v7 = vshrl.u32 %v6334_v1, 16  ;;  %v7451_v41 = vld [vmem:[#allocation2 + $0x178] sm:$0xf]  ;;  %v13550_v57 = vpop.f32.mrf.mxu3  ;;  %v10673_v45 = vld [vmem:[#allocation3 + $0x1d4] sm:$0xf0] }
 0x2c6   :  { %v13543_v50 = vpop.permute.xlu2 %7199  ;;  %5170 = vst.msk [vmem:[#allocation3 + $0x1fc] sm:$0xf] %vm742_vm6, %v4813_v46  ;;  %v10763_v43 = vld [vmem:[#allocation3 + $0x278] sm:$0xf]  ;;  %v4823_v49 = vsel %vm11407_vm14, %v4818_v37, %v4822_v54  ;;  %v7452_v56 = vld [vmem:[#allocation2 + $0x17c] sm:$0x1] }
 0x2c7   :  { %v5691_v28 = vpop.permute.xlu1 %5690  ;;  %v5693_v52 = vpop.permute.xlu0 %5692  ;;  %15993 = vst [vmem:[#allocation27_spill] sm:$0xff] %v13550_v57  ;;  %v10436_v46 = vrot.slane %v7450_v36, 9  ;;  %v7752_v1 = vrot.slane %v7451_v41, 5  ;;  %v7020_v23 = vrot.slane %v7018_v38, 4  ;;  %v7755_v57 = vrot.slane %v7452_v56, 5 }
 0x2c8   :  { %5841 = vst.msk [vmem:[#allocation3 + $0x1f0] sm:$0xf] %vm3074_vm2, %v5691_v28  ;;  %v11060_v8 = vld [vmem:[#allocation3 + $0x1cc] sm:$0xf]  ;;  %v5922_v37 = vld [vmem:[#allocation2 + $0x184] sm:$0xf] }
 0x2c9   :  { %6226 = vst.msk [vmem:[#allocation3 + $0x1f0] sm:$0xf] %vm3750_vm4, %v6076_v47  ;;  %v13554_v16 = vpop.f32.mrf.mxu2  ;;  %v7006_v47 = vsel %vm11407_vm14, %v7001_v26, %v13502_v62  ;;  %v11083_v28 = vld [vmem:[#allocation3 + $0x280] sm:$0xf0]  ;;  %v7023_v54 = vrot.slane %v7021_v2, 5  ;;  %v7753_v36 = vsel %vm11416_vm15, %v10436_v46, %v7752_v1  ;;  %v7754_v41 = vrot.slane %v7752_v1, 4 }
 0x2ca   :  { %7346 = vst.msk [vmem:[#allocation3 + $0x1f0] sm:$0xf] %vm4135_vm8, %v13483_v11  ;;  %v7016_v11 = vsel %vm11407_vm14, %v7011_v42, %v7015_v5  ;;  %v5279_v51 = vld [vmem:[#allocation2 + $0x180] sm:$0xe]  ;;  %v10676_v62 = vor.u32 %v11060_v8, %v10673_v45  ;;  %v13571_v26 = vld [vmem:[#allocation2 + $0x184] sm:$0xf]  ;;  %v10764_v38 = vor.u32 %v11083_v28, %v10763_v43 }
 0x2cb   :  { %15994 = vst [vmem:[#allocation28_spill] sm:$0xff] %v13554_v16  ;;  %v7756_v42 = vsel %vm11416_vm15, %v7754_v41, %v7755_v57  ;;  %v4267_v5 = vld [vmem:[#allocation2 + $0x130] sm:$0xf]  ;;  %v7033_v45 = vrot.slane %v7031_v7, 4  ;;  %v10406_v57 = vrot.slane %v5279_v51, 9  ;;  %v15951_v1 = vrot.slane %v13571_v26, 5 }
 0x2cc   :  { %5842 = vst.msk [vmem:[#allocation3 + $0x1fc] sm:$0xf] %vm3074_vm2, %v5693_v52  ;;  %7223 = vrot.lane.b32.xlu2 %v7016_v11, %s11160_s25  ;;  %v4834_v8 = vshll.u32 %v4267_v5, 16  ;;  %v4838_v43 = vshrl.u32 %v4267_v5, 16  ;;  %v6335_v41 = vld [vmem:[#allocation2 + $0x188] sm:$0x1] }
 0x2cd   :  { %6227 = vst.msk [vmem:[#allocation3 + $0x1fc] sm:$0xf] %vm3750_vm4, %v13518_v9  ;;  %7221 = vrot.lane.b32.xlu1 %v7006_v47, %s11160_s25  ;;  %v4266_v9 = vld [vmem:[#allocation2 + $0x12c] sm:$0xf]  ;;  %6107 = vrot.lane.b32.xlu0 %v5922_v37, %s11159_s1  ;;  %v5921_v7 = vld [vmem:[#allocation2 + $0x180] sm:$0xf]  ;;  %v13588_v51 = vpop.f32.mrf.mxu3 }
 0x2ce   :  { %5171 = vst.msk [vmem:[#allocation3 + $0x208] sm:$0xf] %vm742_vm6, %v4823_v49  ;;  %v4825_v2 = vshrl.u32 %v4266_v9, 16  ;;  %v4828_v52 = vshll.u32 %v4266_v9, 16  ;;  %v13576_v46 = vpop.permute.xlu2 %6081  ;;  %9033 = vmatmul.bf16.gmra.mxu2 %v10676_v62  ;;  %v13579_v49 = vrot.slane %v7027_v59, 5  ;;  %v4836_v37 = vrot.slane %v4834_v8, 5 }
 0x2cf   :  { %7903 = vst.msk [vmem:[#allocation3 + $0x290] sm:$0xf] %vm742_vm6, %v7753_v36  ;;  %v7194_v56 = vpop.permute.xlu1 %7193  ;;  %v6080_v11 = vpop.permute.xlu0 %6079  ;;  %v7024_v36 = vor.u32 %v7023_v54, %v7020_v23  ;;  %v4268_v59 = vld [vmem:[#allocation2 + $0x134] sm:$0x1]  ;;  %v4840_v62 = vrot.slane %v4838_v43, 4 }
 0x2d0   :  { %7904 = vst.msk [vmem:[#allocation3 + $0x29c] sm:$0xf] %vm742_vm6, %v7756_v42  ;;  %10923 = vmatmul.msk.bf16.gmra.mxu3 %vm276_vm0, %v10764_v38  ;;  %v4827_v47 = vrot.slane %v4825_v2, 4  ;;  %v4830_v28 = vrot.slane %v4828_v52, 5  ;;  %v4844_v5 = vshll.u32 %v4268_v59, 16  ;;  %v7034_v38 = vor.u32 %v7033_v45, %v13579_v49 }
 0x2d1   :  { %7345 = vst.msk [vmem:[#allocation3 + $0x1e4] sm:$0xf] %vm4135_vm8, %v7194_v56  ;;  %v13585_v9 = vpop.f32.mrf.mxu2  ;;  %v4841_v16 = vor.u32 %v4840_v62, %v4836_v37  ;;  %v6336_v56 = vld [vmem:[#allocation2 + $0x18c] sm:$0xf]  ;;  %v15997_v2 = vrot.slane %v13533_v48, 5  ;;  %v7037_v52 = vshll.u32 %v6335_v41, 16  ;;  %v5590_v45 = vsel %vm11416_vm15, %v10406_v57, %v15951_v1 }
 0x2d2   :  { %15995 = vst [vmem:[#allocation29_spill] sm:$0xff] %v13585_v9  ;;  %v4831_v42 = vor.u32 %v4830_v28, %v4827_v47  ;;  %v6337_v8 = vld [vmem:[#allocation2 + $0x190] sm:$0xf]  ;;  %v7453_v43 = vld [vmem:[#allocation2 + $0x180] sm:$0xe]  ;;  %v7025_v47 = vrot.slane %v7024_v36, 4 }
 0x2d3   :  { %15996 = vst [vmem:[#allocation30_spill] sm:$0xff] %v13588_v51  ;;  %v5586_v23 = vsel %vm11416_vm15, %v13541_v4, %v15997_v2  ;;  %v4846_v28 = vrot.slane %v4844_v5, 5  ;;  %v4842_v59 = vrot.slane %v4841_v16, 4  ;;  %v7042_v4 = vshrl.u32 %v6336_v56, 16  ;;  %v7454_v41 = vld [vmem:[#allocation2 + $0x184] sm:$0xf] }
 0x2d4   :  { %v4832_v54 = vrot.slane %v4831_v42, 4  ;;  %6105 = vrot.lane.b32.xlu2 %v5921_v7, %s11159_s1  ;;  %v7045_v62 = vshll.u32 %v6336_v56, 16  ;;  %v7035_v36 = vrot.slane %v7034_v38, 4  ;;  %v7051_v7 = vshll.u32 %v6337_v8, 16  ;;  %v7455_v5 = vld [vmem:[#allocation2 + $0x188] sm:$0x1] }
 0x2d5   :  { %5722 = vrot.lane.b32.xlu1 %v5586_v23, %s11161_s26  ;;  %5724 = vrot.lane.b32.xlu0 %v5590_v45, %s11161_s26  ;;  %v7055_v23 = vshrl.u32 %v6337_v8, 16  ;;  %v10437_v51 = vrot.slane %v7453_v43, 9  ;;  %v7039_v57 = vrot.slane %v7037_v52, 5  ;;  %v7762_v9 = vrot.slane %v7455_v5, 5  ;;  %v10685_v8 = vld [vmem:[#allocation3 + $0x1ec] sm:$0xf0] }
 0x2d6   :  { %v4837_v48 = vsel %vm11407_vm14, %v4832_v54, %v4836_v37  ;;  %v13603_v2 = vpop.permute.xlu2 %7203  ;;  %v7759_v37 = vrot.slane %v7454_v41, 5  ;;  %v10775_v16 = vld [vmem:[#allocation3 + $0x290] sm:$0xf]  ;;  %v4847_v38 = vsel %vm11407_vm14, %v4842_v59, %v4846_v28  ;;  %v7044_v43 = vrot.slane %v7042_v4, 4  ;;  %v5281_v41 = vld [vmem:[#allocation2 + $0x188] sm:$0x1] }
 0x2d7   :  { %v5695_v42 = vpop.permute.xlu1 %5694  ;;  %5172 = vst.msk [vmem:[#allocation3 + $0x214] sm:$0xf] %vm742_vm6, %v4837_v48  ;;  %v11086_v56 = vld [vmem:[#allocation3 + $0x298] sm:$0xf0]  ;;  %v5697_v54 = vpop.permute.xlu0 %5696  ;;  %v7047_v52 = vrot.slane %v7045_v62, 5  ;;  %v7057_v15 = vrot.slane %v7055_v23, 4  ;;  %v7040_v28 = vsel %vm11407_vm14, %v7035_v36, %v7039_v57 }
 0x2d8   :  { %5843 = vst.msk [vmem:[#allocation3 + $0x208] sm:$0xf] %vm3074_vm2, %v5695_v42  ;;  %v11063_v1 = vld [vmem:[#allocation3 + $0x1e4] sm:$0xf]  ;;  %v7761_v48 = vrot.slane %v7759_v37, 4  ;;  %v13619_v42 = vrot.slane %v7051_v7, 5  ;;  %v10776_v36 = vor.u32 %v11086_v56, %v10775_v16 }
 0x2d9   :  { %6228 = vst.msk [vmem:[#allocation3 + $0x208] sm:$0xf] %vm3750_vm4, %v6080_v11  ;;  %v13611_v45 = vpop.f32.mrf.mxu2  ;;  %v7030_v11 = vsel %vm11407_vm14, %v7025_v47, %v13579_v49  ;;  %v5282_v5 = vld [vmem:[#allocation2 + $0x18c] sm:$0xe]  ;;  %v5924_v59 = vld [vmem:[#allocation2 + $0x190] sm:$0xf]  ;;  %v7048_v56 = vor.u32 %v7047_v52, %v7044_v43 }
 0x2da   :  { %7348 = vst.msk [vmem:[#allocation3 + $0x208] sm:$0xf] %vm4135_vm8, %v13543_v50  ;;  %v7760_v50 = vsel %vm11416_vm15, %v10437_v51, %v7759_v37  ;;  %v7763_v49 = vsel %vm11416_vm15, %v7761_v48, %v7762_v9  ;;  %v4270_v47 = vld [vmem:[#allocation2 + $0x13c] sm:$0xf]  ;;  %v10688_v51 = vor.u32 %v11063_v1, %v10685_v8  ;;  %v5283_v7 = vld [vmem:[#allocation2 + $0x190] sm:$0xf]  ;;  %v13632_v37 = vpop.f32.mrf.mxu3 }
 0x2db   :  { %15998 = vst [vmem:[#allocation31_spill] sm:$0xff] %v13611_v45  ;;  %v4269_v45 = vld [vmem:[#allocation2 + $0x138] sm:$0xf]  ;;  %v4858_v23 = vshll.u32 %v4270_v47, 16  ;;  %v5592_v16 = vrot.slane %v5281_v41, 5  ;;  %v7049_v52 = vrot.slane %v7048_v56, 4 }
 0x2dc   :  { %5844 = vst.msk [vmem:[#allocation3 + $0x214] sm:$0xf] %vm3074_vm2, %v5697_v54  ;;  %v4849_v4 = vshrl.u32 %v4269_v45, 16  ;;  %v4852_v62 = vshll.u32 %v4269_v45, 16  ;;  %7227 = vrot.lane.b32.xlu2 %v7040_v28, %s11160_s25  ;;  %v6338_v54 = vld [vmem:[#allocation2 + $0x194] sm:$0x1] }
 0x2dd   :  { %6229 = vst.msk [vmem:[#allocation3 + $0x214] sm:$0xf] %vm3750_vm4, %v13576_v46  ;;  %7225 = vrot.lane.b32.xlu1 %v7030_v11, %s11160_s25  ;;  %v4862_v46 = vshrl.u32 %v4270_v47, 16  ;;  %v16000_v45 = vrot.slane %v13571_v26, 5  ;;  %6111 = vrot.lane.b32.xlu0 %v5924_v59, %s11159_s1  ;;  %v4860_v1 = vrot.slane %v4858_v23, 5  ;;  %v5596_v26 = vrot.slane %v5283_v7, 5 }
 0x2de   :  { %5173 = vst.msk [vmem:[#allocation3 + $0x220] sm:$0xf] %vm742_vm6, %v4847_v38  ;;  %v4851_v57 = vrot.slane %v4849_v4, 4  ;;  %v4854_v9 = vrot.slane %v4852_v62, 5  ;;  %v13637_v55 = vpop.permute.xlu2 %6085  ;;  %9038 = vmatmul.bf16.gmra.mxu2 %v10688_v51  ;;  %v10407_v38 = vrot.slane %v5282_v5, 9  ;;  %v7058_v47 = vor.u32 %v7057_v15, %v13619_v42 }
 0x2df   :  { %15999 = vst [vmem:[#allocation32_spill] sm:$0xff] %v13632_v37  ;;  %v7198_v48 = vpop.permute.xlu1 %7197  ;;  %v5591_v11 = vrot.slane %v16000_v45, 4  ;;  %v6084_v28 = vpop.permute.xlu0 %6083  ;;  %v7061_v4 = vshll.u32 %v6338_v54, 16  ;;  %v4864_v62 = vrot.slane %v4862_v46, 4  ;;  %v6339_v23 = vld [vmem:[#allocation2 + $0x198] sm:$0xf] }
 0x2e0   :  { %7905 = vst.msk [vmem:[#allocation3 + $0x2a8] sm:$0xf] %vm742_vm6, %v7760_v50  ;;  %10924 = vmatmul.msk.bf16.gmra.mxu3 %vm276_vm0, %v10776_v36  ;;  %v4855_v8 = vor.u32 %v4854_v9, %v4851_v57  ;;  %v4271_v50 = vld [vmem:[#allocation2 + $0x140] sm:$0x1]  ;;  %v5923_v45 = vld [vmem:[#allocation2 + $0x18c] sm:$0xf]  ;;  %v5597_v46 = vsel %vm11416_vm15, %v10407_v38, %v5596_v26 }
 0x2e1   :  { %7906 = vst.msk [vmem:[#allocation3 + $0x2b4] sm:$0xf] %vm742_vm6, %v7763_v49  ;;  %v13644_v59 = vpop.f32.mrf.mxu2  ;;  %v4868_v49 = vshll.u32 %v4271_v50, 16  ;;  %v4865_v36 = vor.u32 %v4864_v62, %v4860_v1  ;;  %v13646_v37 = vld [vmem:[#allocation2 + $0x19c] sm:$0xf]  ;;  %v7066_v41 = vshrl.u32 %v6339_v23, 16  ;;  %v5593_v43 = vsel %vm11416_vm15, %v5591_v11, %v5592_v16 }
 0x2e2   :  { %7347 = vst.msk [vmem:[#allocation3 + $0x1fc] sm:$0xf] %vm4135_vm8, %v7198_v48  ;;  %v4856_v51 = vrot.slane %v4855_v8, 4  ;;  %v7456_v15 = vld [vmem:[#allocation2 + $0x18c] sm:$0xe]  ;;  %v7059_v57 = vrot.slane %v7058_v47, 4 }
 0x2e3   :  { %16001 = vst [vmem:[#allocation33_spill] sm:$0xff] %v13644_v59  ;;  %v7457_v7 = vld [vmem:[#allocation2 + $0x190] sm:$0xf]  ;;  %v7063_v9 = vrot.slane %v7061_v4, 5  ;;  %v13657_v54 = vrot.slane %v5596_v26, 4  ;;  %v4866_v48 = vrot.slane %v4865_v36, 4  ;;  %v13666_v26 = vpop.f32.mrf.mxu3  ;;  %v7054_v36 = vsel %vm11407_vm14, %v7049_v52, %v13619_v42 }
 0x2e4   :  { %v4861_v5 = vsel %vm11407_vm14, %v4856_v51, %v4860_v1  ;;  %6109 = vrot.lane.b32.xlu2 %v5923_v45, %s11159_s1  ;;  %v4870_v11 = vrot.slane %v4868_v49, 5  ;;  %v7069_v16 = vshll.u32 %v6339_v23, 16  ;;  %v7075_v1 = vshll.u32 %v13646_v37, 16  ;;  %v7458_v56 = vld [vmem:[#allocation2 + $0x194] sm:$0x1]  ;;  %16002 = vst [vmem:[#allocation34_spill] sm:$0xff] %v13666_v26 }
 0x2e5   :  { %5726 = vrot.lane.b32.xlu1 %v5593_v43, %s11161_s26  ;;  %5174 = vst.msk [vmem:[#allocation3 + $0x22c] sm:$0xf] %vm742_vm6, %v4861_v5  ;;  %5728 = vrot.lane.b32.xlu0 %v5597_v46, %s11161_s26  ;;  %v13663_v62 = vrot.slane %v7066_v41, 4  ;;  %v7079_v38 = vshrl.u32 %v13646_v37, 16  ;;  %v10438_v51 = vrot.slane %v7456_v15, 9  ;;  %v7766_v47 = vrot.slane %v7457_v7, 5 }
 0x2e6   :  { %v13660_v50 = vpop.permute.xlu2 %7207  ;;  %v2015_v4 = vld [vmem:[#allocation2] sm:$0xf]  ;;  %v7769_v49 = vrot.slane %v7458_v56, 5  ;;  %v2016_v23 = vld [vmem:[#allocation2 + $0x4] sm:$0xf]  ;;  %v13679_v26 = vrot.slane %v7069_v16, 5  ;;  %v7064_v52 = vsel %vm11407_vm14, %v7059_v57, %v7063_v9 }
 0x2e7   :  { %v5699_v8 = vpop.permute.xlu1 %5698  ;;  %v2115_v45 = vshrl.u32 %v2015_v4, 16  ;;  %v10787_v41 = vld [vmem:[#allocation3 + $0x2a8] sm:$0xf]  ;;  %v5701_v5 = vpop.permute.xlu0 %5700  ;;  %v7768_v7 = vrot.slane %v7766_v47, 4  ;;  %v2118_v46 = vshll.u32 %v2015_v4, 16  ;;  %v13681_v59 = vrot.slane %v7075_v1, 5 }
 0x2e8   :  { %5845 = vst.msk [vmem:[#allocation3 + $0x220] sm:$0xf] %vm3074_vm2, %v5699_v8  ;;  %v11089_v43 = vld [vmem:[#allocation3 + $0x2b0] sm:$0xf0]  ;;  %v10697_v15 = vld [vmem:[#allocation3 + $0x204] sm:$0xf0]  ;;  %v7767_v4 = vsel %vm11416_vm15, %v10438_v51, %v7766_v47 }
 0x2e9   :  { %6230 = vst.msk [vmem:[#allocation3 + $0x220] sm:$0xf] %vm3750_vm4, %v6084_v28  ;;  %v11066_v37 = vld [vmem:[#allocation3 + $0x1fc] sm:$0xf]  ;;  %v5284_v8 = vld [vmem:[#allocation2 + $0x194] sm:$0x1]  ;;  %v13675_v56 = vpop.f32.mrf.mxu2  ;;  %v4871_v28 = vsel %vm11407_vm14, %v4866_v48, %v4870_v11  ;;  %v7770_v16 = vsel %vm11416_vm15, %v7768_v7, %v7769_v49 }
 0x2ea   :  { %7350 = vst.msk [vmem:[#allocation3 + $0x220] sm:$0xf] %vm4135_vm8, %v13603_v2  ;;  %v2117_v42 = vrot.slane %v2115_v45, 4  ;;  %v2120_v2 = vrot.slane %v2118_v46, 5  ;;  %v2124_v19 = vshll.u32 %v2016_v23, 16  ;;  %v10700_v11 = vor.u32 %v11066_v37, %v10697_v15 }
 0x2eb   :  { %16003 = vst [vmem:[#allocation35_spill] sm:$0xff] %v13675_v56  ;;  %v4272_v63 = vld [vmem:[#allocation2 + $0x144] sm:$0xf]  ;;  %v5926_v48 = vld [vmem:[#allocation2 + $0x19c] sm:$0xf]  ;;  %v2128_v9 = vshrl.u32 %v2016_v23, 16  ;;  %v10788_v46 = vor.u32 %v11089_v43, %v10787_v41 }
 0x2ec   :  { %5846 = vst.msk [vmem:[#allocation3 + $0x22c] sm:$0xf] %vm3074_vm2, %v5701_v5  ;;  %v4273_v1 = vld [vmem:[#allocation2 + $0x148] sm:$0xf]  ;;  %v4873_v45 = vshrl.u32 %v4272_v63, 16  ;;  %v4876_v5 = vshll.u32 %v4272_v63, 16  ;;  %7231 = vrot.lane.b32.xlu2 %v7064_v52, %s11160_s25  ;;  %v2121_v57 = vor.u32 %v2120_v2, %v2117_v42  ;;  %v13704_v2 = vpop.f32.mrf.mxu3 }
 0x2ed   :  { %6231 = vst.msk [vmem:[#allocation3 + $0x22c] sm:$0xf] %vm3750_vm4, %v13637_v55  ;;  %7229 = vrot.lane.b32.xlu1 %v7054_v36, %s11160_s25  ;;  %v4882_v51 = vshll.u32 %v4273_v1, 16  ;;  %v4886_v47 = vshrl.u32 %v4273_v1, 16  ;;  %v7081_v15 = vrot.slane %v7079_v38, 4  ;;  %v5599_v7 = vrot.slane %v5284_v8, 5  ;;  %6115 = vrot.lane.b32.xlu0 %v5926_v48, %s11159_s1 }
 0x2ee   :  { %5175 = vst.msk [vmem:[#allocation3 + $0x238] sm:$0xf] %vm742_vm6, %v4871_v28  ;;  %v4875_v55 = vrot.slane %v4873_v45, 4  ;;  %v4878_v37 = vrot.slane %v4876_v5, 5  ;;  %v13696_v56 = vpop.permute.xlu2 %6089  ;;  %9043 = vmatmul.bf16.gmra.mxu2 %v10700_v11  ;;  %v6341_v36 = vld [vmem:[#allocation2 + $0x1a0] sm:$0x1]  ;;  %v7072_v48 = vor.u32 %v13679_v26, %v13663_v62 }
 0x2ef   :  { %7907 = vst.msk [vmem:[#allocation3 + $0x2c0] sm:$0xf] %vm742_vm6, %v7767_v4  ;;  %v7202_v49 = vpop.permute.xlu1 %7201  ;;  %v4884_v63 = vrot.slane %v4882_v51, 5  ;;  %v2122_v23 = vrot.slane %v2121_v57, 4  ;;  %v2126_v41 = vrot.slane %v2124_v19, 5  ;;  %v6088_v38 = vpop.permute.xlu0 %6087  ;;  %v2130_v42 = vrot.slane %v2128_v9, 4 }
 0x2f0   :  { %7908 = vst.msk [vmem:[#allocation3 + $0x2cc] sm:$0xf] %vm742_vm6, %v7770_v16  ;;  %10925 = vmatmul.msk.bf16.gmra.mxu3 %vm276_vm0, %v10788_v46  ;;  %v4879_v43 = vor.u32 %v4878_v37, %v4875_v55  ;;  %v2017_v28 = vld [vmem:[#allocation2 + $0x8] sm:$0x1]  ;;  %v4274_v8 = vld [vmem:[#allocation2 + $0x14c] sm:$0x1]  ;;  %v7082_v1 = vor.u32 %v7081_v15, %v13681_v59  ;;  %v5600_v9 = vsel %vm11416_vm15, %v13657_v54, %v5599_v7 }
 0x2f1   :  { %7349 = vst.msk [vmem:[#allocation3 + $0x214] sm:$0xf] %vm4135_vm8, %v7202_v49  ;;  %v4888_v52 = vrot.slane %v4886_v47, 4  ;;  %v13702_v4 = vld [vmem:[#allocation2 + $0x4] sm:$0xf]  ;;  %v13708_v11 = vpop.f32.mrf.mxu2  ;;  %v7085_v45 = vshll.u32 %v6341_v36, 16  ;;  %v2127_v47 = vsel %vm11407_vm14, %v2122_v23, %v2126_v41  ;;  %v2131_v55 = vor.u32 %v2130_v42, %v2126_v41 }
 0x2f2   :  { %16004 = vst [vmem:[#allocation36_spill] sm:$0xff] %v13704_v2  ;;  %v4880_v16 = vrot.slane %v4879_v43, 4  ;;  %v2134_v19 = vshll.u32 %v2017_v28, 16  ;;  %v4892_v57 = vshll.u32 %v4274_v8, 16  ;;  %v5925_v51 = vld [vmem:[#allocation2 + $0x198] sm:$0xf] }
 0x2f3   :  { %16005 = vst [vmem:[#allocation37_spill] sm:$0xff] %v13708_v11  ;;  %v4889_v5 = vor.u32 %v4888_v52, %v4884_v63  ;;  %v15952_v26 = vrot.slane %v13702_v4, 5  ;;  %v7459_v46 = vld [vmem:[#allocation2 + $0x198] sm:$0xe]  ;;  %v3141_v37 = vld [vmem:[#allocation2 + $0x8] sm:$0x1] }
 0x2f4   :  { %v4885_v62 = vsel %vm11407_vm14, %v4880_v16, %v4884_v63  ;;  %6113 = vrot.lane.b32.xlu2 %v5925_v51, %s11159_s1  ;;  %v7073_v15 = vrot.slane %v7072_v48, 4  ;;  %v7083_v54 = vrot.slane %v7082_v1, 4  ;;  %v4894_v7 = vrot.slane %v4892_v57, 5  ;;  %v7460_v36 = vld [vmem:[#allocation2 + $0x19c] sm:$0xf] }
 0x2f5   :  { %5730 = vrot.lane.b32.xlu1 %v5600_v9, %s11161_s26  ;;  %5176 = vst.msk [vmem:[#allocation3 + $0x244] sm:$0xf] %vm742_vm6, %v4885_v62  ;;  %v4890_v49 = vrot.slane %v4889_v5, 4  ;;  %2882 = vrot.lane.b32.xlu0 %v2127_v47, %s11161_s26  ;;  %v7087_v63 = vrot.slane %v7085_v45, 5  ;;  %v13725_v28 = vrot.slane %v2134_v19, 5  ;;  %v10439_v52 = vrot.slane %v7459_v46, 9 }
 0x2f6   :  { %v13722_v43 = vpop.permute.xlu2 %7211  ;;  %v7461_v8 = vld [vmem:[#allocation2 + $0x1a0] sm:$0x1]  ;;  %v7773_v16 = vrot.slane %v7460_v36, 5  ;;  %v3338_v41 = vrot.slane %v15952_v26, 4  ;;  %v3339_v42 = vrot.slane %v3141_v37, 5  ;;  %v11106_v5 = vld [vmem:[%s15941_s4 + $0x38] sm:$0xff]  ;;  %v7078_v47 = vsel %vm11407_vm14, %v7073_v15, %v13681_v59  ;;  %v13748_v59 = vpop.f32.mrf.mxu3 }
 0x2f7   :  { %v5703_v23 = vpop.permute.xlu1 %5702  ;;  %v3139_v48 = vld [vmem:[#allocation2] sm:$0xe]  ;;  %v7776_v1 = vrot.slane %v7461_v8, 5  ;;  %v10799_v45 = vld [vmem:[#allocation3 + $0x2c0] sm:$0xf]  ;;  %v5705_v57 = vpop.permute.xlu0 %5704  ;;  %v2132_v9 = vrot.slane %v2131_v55, 4  ;;  %v4895_v46 = vsel %vm11407_vm14, %v4890_v49, %v4894_v7  ;;  %8761 = vmatpush.bf16.msrb.mxu1 %v11106_v5 }
 0x2f8   :  { %5847 = vst.msk [vmem:[#allocation3 + $0x238] sm:$0xf] %vm3074_vm2, %v5703_v23  ;;  %v11092_v19 = vld [vmem:[#allocation3 + $0x2c8] sm:$0xf0]  ;;  %v7775_v51 = vrot.slane %v7773_v16, 4  ;;  %v3340_v15 = vsel %vm11416_vm15, %v3338_v41, %v3339_v42 }
 0x2f9   :  { %6232 = vst.msk [vmem:[#allocation3 + $0x238] sm:$0xf] %vm3750_vm4, %v6088_v38  ;;  %v13739_v62 = vpop.f32.mrf.mxu2  ;;  %v11069_v37 = vld [vmem:[#allocation3 + $0x214] sm:$0xf]  ;;  %v4275_v36 = vld [vmem:[#allocation2 + $0x150] sm:$0xf]  ;;  %v7088_v38 = vsel %vm11407_vm14, %v7083_v54, %v7087_v63 }
 0x2fa   :  { %7352 = vst.msk [vmem:[#allocation3 + $0x238] sm:$0xf] %vm4135_vm8, %v13660_v50  ;;  %v7774_v50 = vsel %vm11416_vm15, %v10439_v52, %v7773_v16  ;;  %v4276_v55 = vld [vmem:[#allocation2 + $0x154] sm:$0xf]  ;;  %v4897_v23 = vshrl.u32 %v4275_v36, 16  ;;  %v4900_v8 = vshll.u32 %v4275_v36, 16  ;;  %v7777_v7 = vsel %vm11416_vm15, %v7775_v51, %v7776_v1 }
 0x2fb   :  { %16006 = vst [vmem:[#allocation38_spill] sm:$0xff] %v13739_v62  ;;  %v10709_v49 = vld [vmem:[#allocation3 + $0x21c] sm:$0xf0]  ;;  %v4906_v5 = vshll.u32 %v4276_v55, 16  ;;  %v4910_v54 = vshrl.u32 %v4276_v55, 16  ;;  %v10345_v52 = vrot.slane %v3139_v48, 9 }
 0x2fc   :  { %5848 = vst.msk [vmem:[#allocation3 + $0x244] sm:$0xf] %vm3074_vm2, %v5705_v57  ;;  %7235 = vrot.lane.b32.xlu2 %v7088_v38, %s11160_s25  ;;  %v10712_v63 = vor.u32 %v11069_v37, %v10709_v49  ;;  %v4899_v16 = vrot.slane %v4897_v23, 4  ;;  %v4902_v57 = vrot.slane %v4900_v8, 5  ;;  %v5285_v41 = vld [vmem:[#allocation2 + $0x198] sm:$0xe] }
 0x2fd   :  { %16007 = vst [vmem:[#allocation39_spill] sm:$0xff] %v13748_v59  ;;  %7233 = vrot.lane.b32.xlu1 %v7078_v47, %s11160_s25  ;;  %v4908_v42 = vrot.slane %v4906_v5, 5  ;;  %v4912_v36 = vrot.slane %v4910_v54, 4  ;;  %3560 = vrot.lane.b32.xlu0 %v3340_v15, %s11159_s1  ;;  %v13764_v51 = vld [vmem:[#allocation2 + $0x19c] sm:$0xf]  ;;  %v16008_v38 = vrot.slane %v13702_v4, 5 }
 0x2fe   :  { %6233 = vst.msk [vmem:[#allocation3 + $0x244] sm:$0xf] %vm3750_vm4, %v13696_v56  ;;  %v10800_v56 = vor.u32 %v11092_v19, %v10799_v45  ;;  %v13760_v1 = vpop.permute.xlu2 %6093  ;;  %9048 = vmatmul.bf16.gmra.mxu2 %v10712_v63  ;;  %v4903_v47 = vor.u32 %v4902_v57, %v4899_v16  ;;  %v4277_v48 = vld [vmem:[#allocation2 + $0x158] sm:$0x1]  ;;  %v10408_v8 = vrot.slane %v5285_v41, 9  ;;  %v15953_v15 = vrot.slane %v13764_v51, 5 }
 0x2ff   :  { %5177 = vst.msk [vmem:[#allocation3 + $0x250] sm:$0xf] %vm742_vm6, %v4895_v46  ;;  %v7206_v26 = vpop.permute.xlu1 %7205  ;;  %v4913_v45 = vor.u32 %v4912_v36, %v4908_v42  ;;  %v4916_v19 = vshll.u32 %v4277_v48, 16  ;;  %v2137_v46 = vsel %vm11407_vm14, %v2132_v9, %v13725_v28  ;;  %v6092_v37 = vpop.permute.xlu0 %6091  ;;  %v6342_v5 = vld [vmem:[#allocation2 + $0x1a4] sm:$0xf] }
 0x300   :  { %7909 = vst.msk [vmem:[#allocation3 + $0x2d8] sm:$0xf] %vm742_vm6, %v7774_v50  ;;  %10926 = vmatmul.msk.bf16.gmra.mxu3 %vm276_vm0, %v10800_v56  ;;  %v3337_v50 = vsel %vm11416_vm15, %v10345_v52, %v16008_v38  ;;  %v4904_v55 = vrot.slane %v4903_v47, 4  ;;  %v2018_v54 = vld [vmem:[#allocation2 + $0xc] sm:$0xf]  ;;  %v13786_v9 = vpop.f32.mrf.mxu3  ;;  %v5604_v63 = vsel %vm11416_vm15, %v10408_v8, %v15953_v15  ;;  %v7090_v52 = vshrl.u32 %v6342_v5, 16 }
 0x301   :  { %7910 = vst.msk [vmem:[#allocation3 + $0x2e4] sm:$0xf] %vm742_vm6, %v7777_v7  ;;  %v13775_v23 = vpop.f32.mrf.mxu2  ;;  %v4914_v49 = vrot.slane %v4913_v45, 4  ;;  %v6343_v28 = vld [vmem:[#allocation2 + $0x1a8] sm:$0xf]  ;;  %v2139_v16 = vshrl.u32 %v2018_v54, 16 }
 0x302   :  { %7351 = vst.msk [vmem:[#allocation3 + $0x22c] sm:$0xf] %vm4135_vm8, %v7206_v26  ;;  %v4918_v26 = vrot.slane %v4916_v19, 5  ;;  %v4909_v7 = vsel %vm11407_vm14, %v4904_v55, %v4908_v42  ;;  %v7093_v41 = vshll.u32 %v6342_v5, 16  ;;  %v7099_v42 = vshll.u32 %v6343_v28, 16 }
 0x303   :  { %16009 = vst [vmem:[#allocation40_spill] sm:$0xff] %v13775_v23  ;;  %v7103_v36 = vshrl.u32 %v6343_v28, 16  ;;  %v2142_v47 = vshll.u32 %v2018_v54, 16  ;;  %v4278_v48 = vld [vmem:[#allocation2 + $0x15c] sm:$0xf] }
 0x304   :  { %5178 = vst.msk [vmem:[#allocation3 + $0x25c] sm:$0xf] %vm742_vm6, %v4909_v7  ;;  %v4919_v4 = vsel %vm11407_vm14, %v4914_v49, %v4918_v26  ;;  %3558 = vrot.lane.b32.xlu2 %v3337_v50, %s11159_s1  ;;  %v13796_v45 = vld [vmem:[#allocation2 + $0x10] sm:$0xf]  ;;  %v4279_v19 = vld [vmem:[#allocation2 + $0x160] sm:$0xf] }
 0x305   :  { %2884 = vrot.lane.b32.xlu1 %v2137_v46, %s11161_s26  ;;  %5179 = vst.msk [vmem:[#allocation3 + $0x268] sm:$0xf] %vm742_vm6, %v4919_v4  ;;  %5732 = vrot.lane.b32.xlu0 %v5604_v63, %s11161_s26  ;;  %v4921_v55 = vshrl.u32 %v4278_v48, 16  ;;  %v4924_v8 = vshll.u32 %v4278_v48, 16  ;;  %v4930_v49 = vshll.u32 %v4279_v19, 16  ;;  %v11105_v26 = vld [vmem:[%s15941_s4 + $0x30] sm:$0xff] }
 0x306   :  { %16010 = vst [vmem:[#allocation41_spill] sm:$0xff] %v13786_v9  ;;  %v13792_v56 = vpop.permute.xlu2 %7215  ;;  %v3815_v7 = vld [vmem:[#allocation2 + $0xc] sm:$0xf]  ;;  %v3816_v5 = vld [vmem:[#allocation2 + $0x10] sm:$0xf]  ;;  %v2141_v63 = vrot.slane %v2139_v16, 4  ;;  %8762 = vmatpush.bf16.msrb.mxu1 %v11105_v26 }
 0x307   :  { %v5707_v57 = vpop.permute.xlu1 %5706  ;;  %v10811_v46 = vld [vmem:[#allocation3 + $0x2d8] sm:$0xf]  ;;  %v5709_v50 = vpop.permute.xlu0 %5708  ;;  %v2144_v48 = vrot.slane %v2142_v47, 5  ;;  %v4923_v15 = vrot.slane %v4921_v55, 4  ;;  %v4926_v9 = vrot.slane %v4924_v8, 5  ;;  %v4932_v2 = vrot.slane %v4930_v49, 5 }
 0x308   :  { %5849 = vst.msk [vmem:[#allocation3 + $0x250] sm:$0xf] %vm3074_vm2, %v5707_v57  ;;  %v11095_v38 = vld [vmem:[#allocation3 + $0x2e0] sm:$0xf0]  ;;  %v5928_v4 = vld [vmem:[#allocation2 + $0x1a8] sm:$0xf]  ;;  %v13817_v62 = vpop.f32.mrf.mxu3 }
 0x309   :  { %6234 = vst.msk [vmem:[#allocation3 + $0x250] sm:$0xf] %vm3750_vm4, %v6092_v37  ;;  %v13804_v54 = vpop.f32.mrf.mxu2  ;;  %v11072_v28 = vld [vmem:[#allocation3 + $0x22c] sm:$0xf]  ;;  %v10721_v37 = vld [vmem:[#allocation3 + $0x234] sm:$0xf0]  ;;  %v10812_v8 = vor.u32 %v11095_v38, %v10811_v46 }
 0x30a   :  { %7354 = vst.msk [vmem:[#allocation3 + $0x250] sm:$0xf] %vm4135_vm8, %v13722_v43  ;;  %v4934_v57 = vshrl.u32 %v4279_v19, 16  ;;  %v7092_v43 = vrot.slane %v7090_v52, 4  ;;  %v7095_v59 = vrot.slane %v7093_v41, 5  ;;  %v2148_v23 = vshll.u32 %v13796_v45, 16 }
 0x30b   :  { %16011 = vst [vmem:[#allocation42_spill] sm:$0xff] %v13804_v54  ;;  %v5287_v16 = vld [vmem:[#allocation2 + $0x1a0] sm:$0x1]  ;;  %v10724_v19 = vor.u32 %v11072_v28, %v10721_v37  ;;  %v4927_v54 = vor.u32 %v4926_v9, %v4923_v15  ;;  %v4280_v47 = vld [vmem:[#allocation2 + $0x164] sm:$0x1]  ;;  %v2145_v52 = vor.u32 %v2144_v48, %v2141_v63  ;;  %v16013_v15 = vrot.slane %v13764_v51, 5 }
 0x30c   :  { %5850 = vst.msk [vmem:[#allocation3 + $0x25c] sm:$0xf] %vm3074_vm2, %v5709_v50  ;;  %3945 = vrot.lane.b32.xlu2 %v3816_v5, %s11160_s25  ;;  %v7105_v50 = vrot.slane %v7103_v36, 4  ;;  %v4936_v55 = vrot.slane %v4934_v57, 4  ;;  %v4940_v49 = vshll.u32 %v4280_v47, 16  ;;  %v5606_v36 = vrot.slane %v5287_v16, 5 }
 0x30d   :  { %6235 = vst.msk [vmem:[#allocation3 + $0x25c] sm:$0xf] %vm3750_vm4, %v13760_v1  ;;  %3943 = vrot.lane.b32.xlu1 %v3815_v7, %s11160_s25  ;;  %6119 = vrot.lane.b32.xlu0 %v5928_v4, %s11159_s1  ;;  %v13815_v1 = vrot.slane %v7099_v42, 5  ;;  %v4928_v41 = vrot.slane %v4927_v54, 4  ;;  %v6344_v7 = vld [vmem:[#allocation2 + $0x1ac] sm:$0x1]  ;;  %v7096_v46 = vor.u32 %v7095_v59, %v7092_v43 }
 0x30e   :  { %v13812_v11 = vpop.permute.xlu2 %6097  ;;  %9053 = vmatmul.bf16.gmra.mxu2 %v10724_v19  ;;  %v4937_v5 = vor.u32 %v4936_v55, %v4932_v2  ;;  %16012 = vst [vmem:[#allocation43_spill] sm:$0xff] %v13817_v62  ;;  %v5605_v9 = vrot.slane %v16013_v15, 4  ;;  %v4942_v38 = vrot.slane %v4940_v49, 5  ;;  %v5927_v28 = vld [vmem:[#allocation2 + $0x1a4] sm:$0xf]  ;;  %v13823_v42 = vrot.slane %v2148_v23, 5 }
 0x30f   :  { %v7210_v26 = vpop.permute.xlu1 %7209  ;;  %v6096_v4 = vpop.permute.xlu0 %6095  ;;  %v4933_v54 = vsel %vm11407_vm14, %v4928_v41, %v4932_v2  ;;  %v7106_v37 = vor.u32 %v7105_v50, %v13815_v1  ;;  %v7109_v48 = vshll.u32 %v6344_v7, 16  ;;  %v13831_v51 = vld [vmem:[#allocation2 + $0x10] sm:$0xf]  ;;  %v2146_v16 = vrot.slane %v2145_v52, 4  ;;  %v4281_v43 = vld [vmem:[#allocation2 + $0x168] sm:$0xf] }
 0x310   :  { %10927 = vmatmul.msk.bf16.gmra.mxu3 %vm276_vm0, %v10812_v8  ;;  %7353 = vst.msk [vmem:[#allocation3 + $0x244] sm:$0xf] %vm4135_vm8, %v7210_v26  ;;  %v4938_v63 = vrot.slane %v4937_v5, 4  ;;  %v2152_v59 = vshrl.u32 %v13796_v45, 16  ;;  %v5607_v2 = vsel %vm11416_vm15, %v5605_v9, %v5606_v36  ;;  %v7097_v19 = vrot.slane %v7096_v46, 4 }
 0x311   :  { %v13828_v57 = vpop.f32.mrf.mxu2  ;;  %5180 = vst.msk [vmem:[#allocation3 + $0x274] sm:$0xf] %vm742_vm6, %v4933_v54  ;;  %v4282_v50 = vld [vmem:[#allocation2 + $0x16c] sm:$0xf]  ;;  %v4945_v47 = vshrl.u32 %v4281_v43, 16  ;;  %v2151_v45 = vsel %vm11407_vm14, %v2146_v16, %v13823_v42  ;;  %v7107_v55 = vrot.slane %v7106_v37, 4 }
 0x312   :  { %v4943_v23 = vsel %vm11407_vm14, %v4938_v63, %v4942_v38  ;;  %v3343_v8 = vrot.slane %v13831_v51, 5  ;;  %v2021_v49 = vld [vmem:[#allocation2 + $0x18] sm:$0xf]  ;;  %v4948_v26 = vshll.u32 %v4281_v43, 16  ;;  %v7111_v52 = vrot.slane %v7109_v48, 5 }
 0x313   :  { %5181 = vst.msk [vmem:[#allocation3 + $0x280] sm:$0xf] %vm742_vm6, %v4943_v23  ;;  %v4947_v41 = vrot.slane %v4945_v47, 4  ;;  %v4954_v7 = vshll.u32 %v4282_v50, 16  ;;  %v4958_v5 = vshrl.u32 %v4282_v50, 16  ;;  %v2154_v36 = vrot.slane %v2152_v59, 4 }
 0x314   :  { %6117 = vrot.lane.b32.xlu2 %v5927_v28, %s11159_s1  ;;  %v3144_v46 = vld [vmem:[#allocation2 + $0x14] sm:$0x1]  ;;  %v4950_v38 = vrot.slane %v4948_v26, 5  ;;  %v4283_v28 = vld [vmem:[#allocation2 + $0x170] sm:$0x1]  ;;  %v2163_v37 = vshrl.u32 %v2021_v49, 16  ;;  %v7102_v47 = vsel %vm11407_vm14, %v7097_v19, %v13815_v1 }
 0x315   :  { %5734 = vrot.lane.b32.xlu1 %v5607_v2, %s11161_s26  ;;  %2886 = vrot.lane.b32.xlu0 %v2151_v45, %s11161_s26  ;;  %v2020_v54 = vld [vmem:[#allocation2 + $0x14] sm:$0x1]  ;;  %v2166_v63 = vshll.u32 %v2021_v49, 16  ;;  %v4956_v16 = vrot.slane %v4954_v7, 5  ;;  %v4960_v23 = vrot.slane %v4958_v5, 4  ;;  %v3345_v43 = vrot.slane %v3343_v8, 4 }
 0x316   :  { %v13845_v9 = vpop.permute.xlu2 %7219  ;;  %v4951_v2 = vor.u32 %v4950_v38, %v4947_v41  ;;  %v4964_v50 = vshll.u32 %v4283_v28, 16  ;;  %v11104_v59 = vld [vmem:[%s15941_s4 + $0x28] sm:$0xff]  ;;  %v10733_v26 = vld [vmem:[#allocation3 + $0x24c] sm:$0xf0]  ;;  %v2155_v7 = vor.u32 %v2154_v36, %v13823_v42  ;;  %v2022_v5 = vld [vmem:[#allocation2 + $0x1c] sm:$0xf] }
 0x317   :  { %v5711_v15 = vpop.permute.xlu1 %5710  ;;  %v5713_v48 = vpop.permute.xlu0 %5712  ;;  %v11075_v49 = vld [vmem:[#allocation3 + $0x244] sm:$0xf]  ;;  %v4961_v41 = vor.u32 %v4960_v23, %v4956_v16  ;;  %8763 = vmatpush.bf16.msrb.mxu1 %v11104_v59  ;;  %v2165_v1 = vrot.slane %v2163_v37, 4  ;;  %v2168_v19 = vrot.slane %v2166_v63, 5  ;;  %v3142_v23 = vld [vmem:[#allocation2 + $0xc] sm:$0xe] }
 0x318   :  { %5851 = vst.msk [vmem:[#allocation3 + $0x268] sm:$0xf] %vm3074_vm2, %v5711_v15  ;;  %v4952_v15 = vrot.slane %v4951_v2, 4  ;;  %v4966_v38 = vrot.slane %v4964_v50, 5  ;;  %v10736_v28 = vor.u32 %v11075_v49, %v10733_v26  ;;  %v2156_v37 = vrot.slane %v2155_v7, 4 }
 0x319   :  { %6236 = vst.msk [vmem:[#allocation3 + $0x268] sm:$0xf] %vm3750_vm4, %v6096_v4  ;;  %v7112_v4 = vsel %vm11407_vm14, %v7107_v55, %v7111_v52  ;;  %v13862_v45 = vpop.f32.mrf.mxu2  ;;  %v4962_v55 = vrot.slane %v4961_v41, 4  ;;  %v2158_v52 = vshll.u32 %v2020_v54, 16  ;;  %v2169_v54 = vor.u32 %v2168_v19, %v2165_v1  ;;  %v4284_v41 = vld [vmem:[#allocation2 + $0x174] sm:$0xf] }
 0x31a   :  { %7356 = vst.msk [vmem:[#allocation3 + $0x268] sm:$0xf] %vm4135_vm8, %v13792_v56  ;;  %v3346_v56 = vrot.slane %v3144_v46, 5  ;;  %v4957_v42 = vsel %vm11407_vm14, %v4952_v15, %v4956_v16  ;;  %v10346_v2 = vrot.slane %v3142_v23, 9  ;;  %v2176_v50 = vshrl.u32 %v2022_v5, 16 }
 0x31b   :  { %5852 = vst.msk [vmem:[#allocation3 + $0x274] sm:$0xf] %vm3074_vm2, %v5713_v48  ;;  %v2172_v48 = vshll.u32 %v2022_v5, 16  ;;  %v2160_v16 = vrot.slane %v2158_v52, 5  ;;  %v4285_v7 = vld [vmem:[#allocation2 + $0x178] sm:$0xf] }
 0x31c   :  { %6237 = vst.msk [vmem:[#allocation3 + $0x274] sm:$0xf] %vm3750_vm4, %v13812_v11  ;;  %7239 = vrot.lane.b32.xlu2 %v7112_v4, %s11160_s25  ;;  %v3347_v36 = vsel %vm11416_vm15, %v3345_v43, %v3346_v56  ;;  %v4967_v11 = vsel %vm11407_vm14, %v4962_v55, %v4966_v38  ;;  %v13884_v4 = vld [vmem:[#allocation2 + $0x1c] sm:$0xf]  ;;  %v3344_v26 = vsel %vm11416_vm15, %v10346_v2, %v3343_v8  ;;  %v2170_v15 = vrot.slane %v2169_v54, 4 }
 0x31d   :  { %7237 = vrot.lane.b32.xlu1 %v7102_v47, %s11160_s25  ;;  %5182 = vst.msk [vmem:[#allocation3 + $0x28c] sm:$0xf] %vm742_vm6, %v4957_v42  ;;  %3564 = vrot.lane.b32.xlu0 %v3347_v36, %s11159_s1  ;;  %v13882_v47 = vrot.slane %v2172_v48, 5  ;;  %v2161_v49 = vsel %vm11407_vm14, %v2156_v37, %v2160_v16  ;;  %v2024_v38 = vld [vmem:[#allocation2 + $0x24] sm:$0xf]  ;;  %v4969_v56 = vshrl.u32 %v4284_v41, 16 }
 0x31e   :  { %v6102_v63 = vpop.permute.xlu2 %6101  ;;  %9058 = vmatmul.bf16.gmra.mxu2 %v10736_v28  ;;  %5183 = vst.msk [vmem:[#allocation3 + $0x298] sm:$0xf] %vm742_vm6, %v4967_v11  ;;  %v4972_v5 = vshll.u32 %v4284_v41, 16  ;;  %v4978_v1 = vshll.u32 %v4285_v7, 16  ;;  %v2178_v19 = vrot.slane %v2176_v50, 4  ;;  %v3350_v55 = vrot.slane %v13884_v4, 5 }
 0x31f   :  { %v7214_v46 = vpop.permute.xlu1 %7213  ;;  %v6100_v43 = vpop.permute.xlu0 %6099  ;;  %v4982_v52 = vshrl.u32 %v4285_v7, 16  ;;  %v4286_v28 = vld [vmem:[#allocation2 + $0x17c] sm:$0x1]  ;;  %v2175_v51 = vsel %vm11407_vm14, %v2170_v15, %v13882_v47  ;;  %v4971_v8 = vrot.slane %v4969_v56, 4  ;;  %v2187_v11 = vshrl.u32 %v2024_v38, 16 }
 0x320   :  { %7355 = vst.msk [vmem:[#allocation3 + $0x25c] sm:$0xf] %vm4135_vm8, %v7214_v46  ;;  %v4974_v42 = vrot.slane %v4972_v5, 5  ;;  %v4980_v36 = vrot.slane %v4978_v1, 5  ;;  %v2190_v46 = vshll.u32 %v2024_v38, 16  ;;  %v4988_v54 = vshll.u32 %v4286_v28, 16 }
 0x321   :  { %v13880_v59 = vpop.f32.mrf.mxu2  ;;  %v4984_v37 = vrot.slane %v4982_v52, 4  ;;  %v2023_v16 = vld [vmem:[#allocation2 + $0x20] sm:$0x1]  ;;  %v13906_v41 = vld [vmem:[#allocation2 + $0x28] sm:$0xf]  ;;  %v3352_v1 = vrot.slane %v3350_v55, 4 }
 0x322   :  { %v3147_v2 = vld [vmem:[#allocation2 + $0x20] sm:$0x1]  ;;  %v4975_v50 = vor.u32 %v4974_v42, %v4971_v8  ;;  %v4990_v15 = vrot.slane %v4988_v54, 5  ;;  %v3817_v38 = vld [vmem:[#allocation2 + $0x18] sm:$0xf]  ;;  %v2192_v8 = vrot.slane %v2190_v46, 5 }
 0x323   :  { %v4985_v7 = vor.u32 %v4984_v37, %v4980_v36  ;;  %v3818_v56 = vld [vmem:[#allocation2 + $0x1c] sm:$0xf]  ;;  %v2182_v54 = vshll.u32 %v2023_v16, 16 }
 0x324   :  { %3562 = vrot.lane.b32.xlu2 %v3344_v26, %s11159_s1  ;;  %v4976_v28 = vrot.slane %v4975_v50, 4 }
 0x325   :  { %2888 = vrot.lane.b32.xlu1 %v2161_v49, %s11161_s26  ;;  %2890 = vrot.lane.b32.xlu0 %v2175_v51, %s11161_s26  ;;  %v11103_v49 = vld [vmem:[%s15941_s4 + $0x20] sm:$0xff]  ;;  %v2189_v51 = vrot.slane %v2187_v11, 4  ;;  %v4986_v42 = vrot.slane %v4985_v7, 4 }
 0x326   :  { %v13898_v48 = vpop.permute.xlu2 %7223  ;;  %8764 = vmatpush.bf16.msrb.mxu1 %v11103_v49  ;;  %v4981_v37 = vsel %vm11407_vm14, %v4976_v28, %v4980_v36  ;;  %v2196_v49 = vshll.u32 %v13906_v41, 16  ;;  %v1889_v28 = vld [vmem:[#allocation2 + $0xc] sm:$0xf] }
 0x327   :  { %v5715_v23 = vpop.permute.xlu1 %5714  ;;  %v5717_v26 = vpop.permute.xlu0 %5716  ;;  %v11078_v52 = vld [vmem:[#allocation3 + $0x25c] sm:$0xf]  ;;  %5184 = vst.msk [vmem:[#allocation3 + $0x2a4] sm:$0xf] %vm742_vm6, %v4981_v37  ;;  %v2193_v16 = vor.u32 %v2192_v8, %v2189_v51 }
 0x328   :  { %5853 = vst.msk [vmem:[#allocation3 + $0x280] sm:$0xf] %vm3074_vm2, %v5715_v23  ;;  %v10745_v23 = vld [vmem:[#allocation3 + $0x264] sm:$0xf0] }
 0x329   :  { %6238 = vst.msk [vmem:[#allocation3 + $0x280] sm:$0xf] %vm3750_vm4, %v6100_v43  ;;  %v13910_v5 = vpop.f32.mrf.mxu2  ;;  %v2179_v43 = vor.u32 %v2178_v19, %v13882_v47  ;;  %v10748_v50 = vor.u32 %v11078_v52, %v10745_v23  ;;  %v4991_v47 = vsel %vm11407_vm14, %v4986_v42, %v4990_v15  ;;  %v3145_v19 = vld [vmem:[#allocation2 + $0x18] sm:$0xe]  ;;  %v2027_v52 = vld [vmem:[#allocation2 + $0x30] sm:$0xf] }
 0x32a   :  { %7358 = vst.msk [vmem:[#allocation3 + $0x280] sm:$0xf] %vm4135_vm8, %v13845_v9  ;;  %v3353_v9 = vrot.slane %v3147_v2, 5  ;;  %v13932_v2 = vld [vmem:[#allocation2 + $0x28] sm:$0xf]  ;;  %v10347_v15 = vrot.slane %v3145_v19, 9 }
 0x32b   :  { %5854 = vst.msk [vmem:[#allocation3 + $0x28c] sm:$0xf] %vm3074_vm2, %v5717_v26  ;;  %v2180_v11 = vrot.slane %v2179_v43, 4  ;;  %v2184_v26 = vrot.slane %v2182_v54, 5  ;;  %v2194_v8 = vrot.slane %v2193_v16, 4  ;;  %v3357_v42 = vrot.slane %v13932_v2, 5 }
 0x32c   :  { %6239 = vst.msk [vmem:[#allocation3 + $0x28c] sm:$0xf] %vm3750_vm4, %v6102_v63  ;;  %3949 = vrot.lane.b32.xlu2 %v3818_v56, %s11160_s25  ;;  %v3354_v63 = vsel %vm11416_vm15, %v3352_v1, %v3353_v9  ;;  %v2200_v1 = vshrl.u32 %v13906_v41, 16  ;;  %v3351_v51 = vsel %vm11416_vm15, %v10347_v15, %v3350_v55  ;;  %v4287_v9 = vld [vmem:[#allocation2 + $0x180] sm:$0xf]  ;;  %v2211_v55 = vshrl.u32 %v2027_v52, 16 }
 0x32d   :  { %3947 = vrot.lane.b32.xlu1 %v3817_v38, %s11160_s25  ;;  %5185 = vst.msk [vmem:[#allocation3 + $0x2b0] sm:$0xf] %vm742_vm6, %v4991_v47  ;;  %3568 = vrot.lane.b32.xlu0 %v3354_v63, %s11159_s1  ;;  %v13934_v38 = vrot.slane %v2196_v49, 5  ;;  %v2185_v43 = vsel %vm11407_vm14, %v2180_v11, %v2184_v26  ;;  %v4288_v23 = vld [vmem:[#allocation2 + $0x184] sm:$0xf]  ;;  %v4993_v37 = vshrl.u32 %v4287_v9, 16 }
 0x32e   :  { %v13928_v46 = vpop.permute.xlu2 %6105  ;;  %9063 = vmatmul.bf16.gmra.mxu2 %v10748_v50  ;;  %v4996_v54 = vshll.u32 %v4287_v9, 16  ;;  %v5002_v50 = vshll.u32 %v4288_v23, 16  ;;  %v5006_v49 = vshrl.u32 %v4288_v23, 16  ;;  %1953 = vst.msk [vmem:[#allocation3 + $0x18] sm:$0xf] %vm742_vm6, %v1889_v28  ;;  %v2214_v41 = vshll.u32 %v2027_v52, 16 }
 0x32f   :  { %v7218_v36 = vpop.permute.xlu1 %7217  ;;  %v6104_v7 = vpop.permute.xlu0 %6103  ;;  %v2199_v4 = vsel %vm11407_vm14, %v2194_v8, %v13934_v38  ;;  %v4289_v47 = vld [vmem:[#allocation2 + $0x188] sm:$0x1]  ;;  %v1890_v63 = vld [vmem:[#allocation2 + $0x10] sm:$0xf]  ;;  %v4995_v19 = vrot.slane %v4993_v37, 4  ;;  %v16014_v52 = vrot.slane %v11463_v18, 5 }
 0x330   :  { %7357 = vst.msk [vmem:[#allocation3 + $0x274] sm:$0xf] %vm4135_vm8, %v7218_v36  ;;  %v4998_v36 = vrot.slane %v4996_v54, 5  ;;  %v5004_v11 = vrot.slane %v5002_v50, 5  ;;  %v5008_v16 = vrot.slane %v5006_v49, 4  ;;  %v5012_v9 = vshll.u32 %v4289_v47, 16 }
 0x331   :  { %v13936_v56 = vpop.f32.mrf.mxu2  ;;  %1954 = vst.msk [vmem:[#allocation3 + $0x24] sm:$0xf] %vm742_vm6, %v1890_v63  ;;  %v2026_v28 = vld [vmem:[#allocation2 + $0x2c] sm:$0x1]  ;;  %v7371_v8 = vld [vmem:[#allocation2 + $0x20] sm:$0x1] }
 0x332   :  { %v7565_v23 = vrot.slane %v16014_v52, 4  ;;  %v13959_v37 = vld [vmem:[#allocation2 + $0x34] sm:$0xf]  ;;  %v4999_v54 = vor.u32 %v4998_v36, %v4995_v19  ;;  %v5009_v50 = vor.u32 %v5008_v16, %v5004_v11  ;;  %v11102_v49 = vld [vmem:[%s15941_s4 + $0x18] sm:$0xff]  ;;  %v2213_v47 = vrot.slane %v2211_v55, 4 }
 0x333   :  { %v2216_v63 = vrot.slane %v2214_v41, 5  ;;  %v5014_v18 = vrot.slane %v5012_v9, 5  ;;  %8765 = vmatpush.bf16.msrb.mxu1 %v11102_v49  ;;  %v3819_v52 = vld [vmem:[#allocation2 + $0x24] sm:$0xf]  ;;  %v2206_v55 = vshll.u32 %v2026_v28, 16 }
 0x334   :  { %3566 = vrot.lane.b32.xlu2 %v3351_v51, %s11159_s1  ;;  %v3150_v51 = vld [vmem:[#allocation2 + $0x2c] sm:$0x1]  ;;  %v5000_v36 = vrot.slane %v4999_v54, 4  ;;  %v5010_v16 = vrot.slane %v5009_v50, 4  ;;  %v10757_v9 = vld [vmem:[#allocation3 + $0x27c] sm:$0xf0] }
 0x335   :  { %2892 = vrot.lane.b32.xlu1 %v2185_v43, %s11161_s26  ;;  %2894 = vrot.lane.b32.xlu0 %v2199_v4, %s11161_s26  ;;  %v2202_v43 = vrot.slane %v2200_v1, 4  ;;  %v3359_v1 = vrot.slane %v3357_v42, 4  ;;  %v3360_v41 = vrot.slane %v3150_v51, 5  ;;  %v7566_v50 = vrot.slane %v7371_v8, 5  ;;  %v3148_v28 = vld [vmem:[#allocation2 + $0x24] sm:$0xe] }
 0x336   :  { %v13953_v15 = vpop.permute.xlu2 %7227  ;;  %v5015_v54 = vsel %vm11407_vm14, %v5010_v16, %v5014_v18 }
 0x337   :  { %v5719_v26 = vpop.permute.xlu1 %5718  ;;  %v5721_v4 = vpop.permute.xlu0 %5720  ;;  %v11081_v19 = vld [vmem:[#allocation3 + $0x274] sm:$0xf]  ;;  %v2203_v62 = vor.u32 %v2202_v43, %v13934_v38  ;;  %v2220_v38 = vshll.u32 %v13959_v37, 16  ;;  %v2217_v43 = vor.u32 %v2216_v63, %v2213_v47  ;;  %5187 = vst.msk [vmem:[#allocation3 + $0x2c8] sm:$0xf] %vm742_vm6, %v5015_v54  ;;  %v7567_v18 = vsel %vm11416_vm15, %v7565_v23, %v7566_v50 }
 0x338   :  { %5855 = vst.msk [vmem:[#allocation3 + $0x298] sm:$0xf] %vm3074_vm2, %v5719_v26  ;;  %v10760_v49 = vor.u32 %v11081_v19, %v10757_v9  ;;  %v2208_v19 = vrot.slane %v2206_v55, 5  ;;  %v13994_v47 = vld [vmem:[#allocation2 + $0x34] sm:$0xf] }
 0x339   :  { %6240 = vst.msk [vmem:[#allocation3 + $0x298] sm:$0xf] %vm3750_vm4, %v6104_v7  ;;  %v13969_v26 = vpop.f32.mrf.mxu2  ;;  %v3820_v7 = vld [vmem:[#allocation2 + $0x28] sm:$0xf]  ;;  %v13992_v16 = vrot.slane %v2220_v38, 5  ;;  %v2218_v63 = vrot.slane %v2217_v43, 4 }
 0x33a   :  { %7360 = vst.msk [vmem:[#allocation3 + $0x298] sm:$0xf] %vm4135_vm8, %v13898_v48  ;;  %v5005_v48 = vsel %vm11407_vm14, %v5000_v36, %v5004_v11  ;;  %v1891_v11 = vld [vmem:[#allocation2 + $0x18] sm:$0xf]  ;;  %v4291_v9 = vld [vmem:[#allocation2 + $0x190] sm:$0xf] }
 0x33b   :  { %5856 = vst.msk [vmem:[#allocation3 + $0x2a4] sm:$0xf] %vm3074_vm2, %v5721_v4  ;;  %v2204_v4 = vrot.slane %v2203_v62, 4  ;;  %v5026_v50 = vshll.u32 %v4291_v9, 16  ;;  %v15954_v2 = vrot.slane %v13994_v47, 5 }
 0x33c   :  { %6241 = vst.msk [vmem:[#allocation3 + $0x2a4] sm:$0xf] %vm3750_vm4, %v13928_v46  ;;  %3953 = vrot.lane.b32.xlu2 %v3820_v7, %s11160_s25  ;;  %v3361_v46 = vsel %vm11416_vm15, %v3359_v1, %v3360_v41  ;;  %v10348_v1 = vrot.slane %v3148_v28, 9  ;;  %v1892_v7 = vld [vmem:[#allocation2 + $0x1c] sm:$0xf] }
 0x33d   :  { %3951 = vrot.lane.b32.xlu1 %v3819_v52, %s11160_s25  ;;  %5186 = vst.msk [vmem:[#allocation3 + $0x2bc] sm:$0xf] %vm742_vm6, %v5005_v48  ;;  %3572 = vrot.lane.b32.xlu0 %v3361_v46, %s11159_s1  ;;  %v2224_v52 = vshrl.u32 %v13959_v37, 16  ;;  %v2209_v23 = vsel %vm11407_vm14, %v2204_v4, %v2208_v19  ;;  %v4290_v41 = vld [vmem:[#allocation2 + $0x18c] sm:$0xf]  ;;  %v2223_v37 = vsel %vm11407_vm14, %v2218_v63, %v13992_v16  ;;  %v5028_v43 = vrot.slane %v5026_v50, 5 }
 0x33e   :  { %v13986_v8 = vpop.permute.xlu2 %6109  ;;  %9068 = vmatmul.bf16.gmra.mxu2 %v10760_v49  ;;  %1955 = vst.msk [vmem:[#allocation3 + $0x30] sm:$0xf] %vm742_vm6, %v1891_v11  ;;  %v3358_v55 = vsel %vm11416_vm15, %v10348_v1, %v3357_v42  ;;  %v5017_v48 = vshrl.u32 %v4290_v41, 16  ;;  %v5020_v54 = vshll.u32 %v4290_v41, 16  ;;  %v5030_v49 = vshrl.u32 %v4291_v9, 16  ;;  %v11101_v41 = vld [vmem:[%s15941_s4 + $0x10] sm:$0xff] }
 0x33f   :  { %v7222_v51 = vpop.permute.xlu1 %7221  ;;  %v6108_v36 = vpop.permute.xlu0 %6107  ;;  %7850 = vst.msk [vmem:[#allocation3 + $0x14] sm:$0xf] %vm742_vm6, %v7567_v18  ;;  %v2030_v38 = vld [vmem:[#allocation2 + $0x3c] sm:$0xf]  ;;  %v4292_v42 = vld [vmem:[#allocation2 + $0x194] sm:$0x1]  ;;  %8766 = vmatpush.bf16.msrb.mxu1 %v11101_v41 }
 0x340   :  { %7359 = vst.msk [vmem:[#allocation3 + $0x28c] sm:$0xf] %vm4135_vm8, %v7222_v51  ;;  %v5019_v46 = vrot.slane %v5017_v48, 4  ;;  %v5022_v28 = vrot.slane %v5020_v54, 5  ;;  %v5032_v11 = vrot.slane %v5030_v49, 4  ;;  %v2226_v18 = vrot.slane %v2224_v52, 4 }
 0x341   :  { %v13997_v62 = vpop.f32.mrf.mxu2  ;;  %1956 = vst.msk [vmem:[#allocation3 + $0x3c] sm:$0xf] %vm742_vm6, %v1892_v7  ;;  %v3153_v19 = vld [vmem:[#allocation2 + $0x38] sm:$0x1]  ;;  %v5036_v1 = vshll.u32 %v4292_v42, 16  ;;  %v2235_v7 = vshrl.u32 %v2030_v38, 16 }
 0x342   :  { %16015 = vst [vmem:[#allocation44_spill] sm:$0xff] %v13997_v62  ;;  %v2238_v63 = vshll.u32 %v2030_v38, 16  ;;  %v2029_v48 = vld [vmem:[#allocation2 + $0x38] sm:$0x1]  ;;  %v3366_v54 = vrot.slane %v15954_v2, 4 }
 0x343   :  { %v5038_v52 = vrot.slane %v5036_v1, 5  ;;  %v3821_v50 = vld [vmem:[#allocation2 + $0x30] sm:$0xf]  ;;  %v3822_v49 = vld [vmem:[#allocation2 + $0x34] sm:$0xf]  ;;  %v2237_v1 = vrot.slane %v2235_v7, 4 }
 0x344   :  { %3570 = vrot.lane.b32.xlu2 %v3358_v55, %s11159_s1  ;;  %v5033_v55 = vor.u32 %v5032_v11, %v5028_v43  ;;  %v2031_v11 = vld [vmem:[#allocation2 + $0x40] sm:$0xf] }
 0x345   :  { %2896 = vrot.lane.b32.xlu1 %v2209_v23, %s11161_s26  ;;  %2898 = vrot.lane.b32.xlu0 %v2223_v37, %s11161_s26  ;;  %v5023_v23 = vor.u32 %v5022_v28, %v5019_v46  ;;  %v3367_v28 = vrot.slane %v3153_v19, 5 }
 0x346   :  { %v14014_v4 = vpop.permute.xlu2 %7231  ;;  %v5034_v46 = vrot.slane %v5033_v55, 4  ;;  %v2230_v55 = vshll.u32 %v2029_v48, 16 }
 0x347   :  { %v5723_v51 = vpop.permute.xlu1 %5722  ;;  %v5725_v9 = vpop.permute.xlu0 %5724  ;;  %v11084_v38 = vld [vmem:[#allocation3 + $0x28c] sm:$0xf]  ;;  %v5024_v42 = vrot.slane %v5023_v23, 4 }
 0x348   :  { %5857 = vst.msk [vmem:[#allocation3 + $0x2b0] sm:$0xf] %vm3074_vm2, %v5723_v51  ;;  %v10769_v51 = vld [vmem:[#allocation3 + $0x294] sm:$0xf0]  ;;  %v5039_v23 = vsel %vm11407_vm14, %v5034_v46, %v5038_v52  ;;  %v1893_v52 = vld [vmem:[#allocation2 + $0x24] sm:$0xf] }
 0x349   :  { %6242 = vst.msk [vmem:[#allocation3 + $0x2b0] sm:$0xf] %vm3750_vm4, %v6108_v36  ;;  %v14026_v37 = vpop.f32.mrf.mxu2  ;;  %v2227_v36 = vor.u32 %v2226_v18, %v13992_v16  ;;  %v5029_v2 = vsel %vm11407_vm14, %v5024_v42, %v5028_v43  ;;  %v10772_v16 = vor.u32 %v11084_v38, %v10769_v51  ;;  %v2244_v18 = vshll.u32 %v2031_v11, 16  ;;  %v3151_v43 = vld [vmem:[#allocation2 + $0x30] sm:$0xe] }
 0x34a   :  { %7362 = vst.msk [vmem:[#allocation3 + $0x2b0] sm:$0xf] %vm4135_vm8, %v13953_v15  ;;  %v2240_v15 = vrot.slane %v2238_v63, 5  ;;  %v2248_v38 = vshrl.u32 %v2031_v11, 16  ;;  %v1887_v42 = vld [vmem:[#allocation2] sm:$0xf] }
 0x34b   :  { %5858 = vst.msk [vmem:[#allocation3 + $0x2bc] sm:$0xf] %vm3074_vm2, %v5725_v9  ;;  %v2228_v63 = vrot.slane %v2227_v36, 4  ;;  %v2232_v9 = vrot.slane %v2230_v55, 5  ;;  %v1888_v11 = vld [vmem:[#allocation2 + $0x4] sm:$0xf] }
 0x34c   :  { %6243 = vst.msk [vmem:[#allocation3 + $0x2bc] sm:$0xf] %vm3750_vm4, %v13986_v8  ;;  %3957 = vrot.lane.b32.xlu2 %v3822_v49, %s11160_s25  ;;  %v3368_v8 = vsel %vm11416_vm15, %v3366_v54, %v3367_v28  ;;  %v2241_v41 = vor.u32 %v2240_v15, %v2237_v1  ;;  %v2246_v54 = vrot.slane %v2244_v18, 5  ;;  %v14046_v49 = vld [vmem:[#allocation2 + $0x40] sm:$0xf]  ;;  %v16017_v28 = vrot.slane %v13994_v47, 5 }
 0x34d   :  { %3955 = vrot.lane.b32.xlu1 %v3821_v50, %s11160_s25  ;;  %5188 = vst.msk [vmem:[#allocation3 + $0x2d4] sm:$0xf] %vm742_vm6, %v5029_v2  ;;  %3576 = vrot.lane.b32.xlu0 %v3368_v8, %s11159_s1  ;;  %v10349_v2 = vrot.slane %v3151_v43, 9  ;;  %v2233_v46 = vsel %vm11407_vm14, %v2228_v63, %v2232_v9  ;;  %v2033_v1 = vld [vmem:[#allocation2 + $0x48] sm:$0xf]  ;;  %v3371_v15 = vrot.slane %v14046_v49, 5 }
 0x34e   :  { %5189 = vst.msk [vmem:[#allocation3 + $0x2e0] sm:$0xf] %vm742_vm6, %v5039_v23  ;;  %v6114_v7 = vpop.permute.xlu2 %6113  ;;  %9073 = vmatmul.bf16.gmra.mxu2 %v10772_v16  ;;  %v2242_v51 = vrot.slane %v2241_v41, 4  ;;  %v2250_v16 = vrot.slane %v2248_v38, 4  ;;  %v2259_v8 = vshrl.u32 %v2033_v1, 16  ;;  %v2262_v18 = vshll.u32 %v2033_v1, 16 }
 0x34f   :  { %v7226_v19 = vpop.permute.xlu1 %7225  ;;  %v6112_v48 = vpop.permute.xlu0 %6111  ;;  %1957 = vst.msk [vmem:[#allocation3 + $0x48] sm:$0xf] %vm742_vm6, %v1893_v52  ;;  %v3365_v36 = vsel %vm11416_vm15, %v10349_v2, %v16017_v28  ;;  %v3156_v43 = vld [vmem:[#allocation2 + $0x44] sm:$0x1]  ;;  %v11100_v63 = vld [vmem:[%s15941_s4 + $0x8] sm:$0xff]  ;;  %v3373_v9 = vrot.slane %v3371_v15, 4 }
 0x350   :  { %7361 = vst.msk [vmem:[#allocation3 + $0x2a4] sm:$0xf] %vm4135_vm8, %v7226_v19  ;;  %v2247_v23 = vsel %vm11407_vm14, %v2242_v51, %v2246_v54  ;;  %v2032_v19 = vld [vmem:[#allocation2 + $0x44] sm:$0x1]  ;;  %v14070_v52 = vld [vmem:[#allocation2 + $0x4c] sm:$0xf]  ;;  %8767 = vmatpush.bf16.msrb.mxu1 %v11100_v63  ;;  %v2251_v28 = vor.u32 %v2250_v16, %v2246_v54 }
 0x351   :  { %v14044_v50 = vpop.f32.mrf.mxu2  ;;  %1951 = vst.msk [vmem:[#allocation3] sm:$0xf] %vm742_vm6, %v1887_v42  ;;  %v3823_v2 = vld [vmem:[#allocation2 + $0x3c] sm:$0xf]  ;;  %v1894_v42 = vld [vmem:[#allocation2 + $0x28] sm:$0xf] }
 0x352   :  { %16016 = vst [vmem:[#allocation45_spill] sm:$0xff] %v14044_v50  ;;  %v2264_v51 = vrot.slane %v2262_v18, 5  ;;  %v10781_v1 = vld [vmem:[#allocation3 + $0x2ac] sm:$0xf0]  ;;  %v3154_v16 = vld [vmem:[#allocation2 + $0x3c] sm:$0xe] }
 0x353   :  { %1952 = vst.msk [vmem:[#allocation3 + $0xc] sm:$0xf] %vm742_vm6, %v1888_v11  ;;  %v2252_v18 = vrot.slane %v2251_v28, 4 }
 0x354   :  { %3574 = vrot.lane.b32.xlu2 %v3365_v36, %s11159_s1  ;;  %v2261_v36 = vrot.slane %v2259_v8, 4  ;;  %1958 = vst.msk [vmem:[#allocation3 + $0x54] sm:$0xf] %vm742_vm6, %v1894_v42  ;;  %v14092_v42 = vld [vmem:[#allocation2 + $0x4c] sm:$0xf] }
 0x355   :  { %2900 = vrot.lane.b32.xlu1 %v2233_v46, %s11161_s26  ;;  %2902 = vrot.lane.b32.xlu0 %v2247_v23, %s11161_s26  ;;  %v3824_v46 = vld [vmem:[#allocation2 + $0x40] sm:$0xf]  ;;  %v2268_v23 = vshll.u32 %v14070_v52, 16 }
 0x356   :  { %v14062_v55 = vpop.permute.xlu2 %7235 }
 0x357   :  { %v5727_v47 = vpop.permute.xlu1 %5726  ;;  %v5729_v41 = vpop.permute.xlu0 %5728  ;;  %v11087_v38 = vld [vmem:[#allocation3 + $0x2a4] sm:$0xf] }
 0x358   :  { %5859 = vst.msk [vmem:[#allocation3 + $0x2c8] sm:$0xf] %vm3074_vm2, %v5727_v47  ;;  %v10784_v11 = vor.u32 %v11087_v38, %v10781_v1  ;;  %v1907_v47 = vld [vmem:[#allocation2 + $0x78] sm:$0xf]  ;;  %v14088_v38 = vrot.slane %v2268_v23, 5 }
 0x359   :  { %6244 = vst.msk [vmem:[#allocation3 + $0x2c8] sm:$0xf] %vm3750_vm4, %v6112_v48  ;;  %v14074_v49 = vpop.f32.mrf.mxu2  ;;  %v3374_v48 = vrot.slane %v3156_v43, 5  ;;  %v4294_v1 = vld [vmem:[#allocation2 + $0x19c] sm:$0xf] }
 0x35a   :  { %7364 = vst.msk [vmem:[#allocation3 + $0x2c8] sm:$0xf] %vm4135_vm8, %v14014_v4  ;;  %v2254_v4 = vshll.u32 %v2032_v19, 16  ;;  %v2265_v19 = vor.u32 %v2264_v51, %v2261_v36  ;;  %v2272_v51 = vshrl.u32 %v14070_v52, 16  ;;  %v5050_v23 = vshll.u32 %v4294_v1, 16  ;;  %v11099_v52 = vld [vmem:[%s15941_s4] sm:$0xff] }
 0x35b   :  { %16018 = vst [vmem:[#allocation46_spill] sm:$0xff] %v14074_v49  ;;  %v3375_v54 = vsel %vm11416_vm15, %v3373_v9, %v3374_v48  ;;  %v4293_v48 = vld [vmem:[#allocation2 + $0x198] sm:$0xf]  ;;  %8768 = vmatpush.bf16.msrb.mxu1 %v11099_v52 }
 0x35c   :  { %5860 = vst.msk [vmem:[#allocation3 + $0x2d4] sm:$0xf] %vm3074_vm2, %v5729_v41  ;;  %3961 = vrot.lane.b32.xlu2 %v3824_v46, %s11160_s25  ;;  %v2256_v63 = vrot.slane %v2254_v4, 5  ;;  %v2266_v36 = vrot.slane %v2265_v19, 4  ;;  %v2036_v4 = vld [vmem:[#allocation2 + $0x54] sm:$0xf] }
 0x35d   :  { %6245 = vst.msk [vmem:[#allocation3 + $0x2d4] sm:$0xf] %vm3750_vm4, %v6114_v7  ;;  %3959 = vrot.lane.b32.xlu1 %v3823_v2, %s11160_s25  ;;  %v1908_v7 = vld [vmem:[#allocation2 + $0x7c] sm:$0xf]  ;;  %3580 = vrot.lane.b32.xlu0 %v3375_v54, %s11159_s1  ;;  %v10350_v2 = vrot.slane %v3154_v16, 9  ;;  %v5054_v54 = vshrl.u32 %v4294_v1, 16 }
 0x35e   :  { %1971 = vst.msk [vmem:[#allocation3 + $0xf0] sm:$0xf] %vm742_vm6, %v1907_v47  ;;  %v3559_v43 = vpop.permute.xlu2 %3558  ;;  %9078 = vmatmul.bf16.gmra.mxu2 %v10784_v11  ;;  %v2257_v46 = vsel %vm11407_vm14, %v2252_v18, %v2256_v63  ;;  %v5041_v11 = vshrl.u32 %v4293_v48, 16  ;;  %v5044_v47 = vshll.u32 %v4293_v48, 16  ;;  %v2271_v16 = vsel %vm11407_vm14, %v2266_v36, %v14088_v38 }
 0x35f   :  { %v7230_v8 = vpop.permute.xlu1 %7229  ;;  %1972 = vst.msk [vmem:[#allocation3 + $0xfc] sm:$0xf] %vm742_vm6, %v1908_v7  ;;  %v6116_v41 = vpop.permute.xlu0 %6115  ;;  %v3372_v28 = vsel %vm11416_vm15, %v10350_v2, %v3371_v15  ;;  %v4295_v7 = vld [vmem:[#allocation2 + $0x1a0] sm:$0x1]  ;;  %v5052_v63 = vrot.slane %v5050_v23, 5  ;;  %v5056_v2 = vrot.slane %v5054_v54, 4 }
 0x360   :  { %7363 = vst.msk [vmem:[#allocation3 + $0x2bc] sm:$0xf] %vm4135_vm8, %v7230_v8  ;;  %v3159_v8 = vld [vmem:[#allocation2 + $0x50] sm:$0x1]  ;;  %v5043_v18 = vrot.slane %v5041_v11, 4  ;;  %v5046_v19 = vrot.slane %v5044_v47, 5 }
 0x361   :  { %v14090_v9 = vpop.f32.mrf.mxu2  ;;  %v2286_v1 = vshll.u32 %v2036_v4, 16  ;;  %v5060_v36 = vshll.u32 %v4295_v7, 16  ;;  %v2274_v15 = vrot.slane %v2272_v51, 4  ;;  %v5057_v50 = vor.u32 %v5056_v2, %v5052_v63  ;;  %v2035_v47 = vld [vmem:[#allocation2 + $0x50] sm:$0x1] }
 0x362   :  { %16019 = vst [vmem:[#allocation47_spill] sm:$0xff] %v14090_v9  ;;  %v5047_v9 = vor.u32 %v5046_v19, %v5043_v18  ;;  %v16020_v23 = vrot.slane %v14092_v42, 5  ;;  %v3381_v49 = vrot.slane %v3159_v8, 5 }
 0x363   :  { %v5062_v62 = vrot.slane %v5060_v36, 5  ;;  %v5058_v18 = vrot.slane %v5057_v50, 4  ;;  %v2288_v2 = vrot.slane %v2286_v1, 5  ;;  %v2275_v8 = vor.u32 %v2274_v15, %v14088_v38 }
 0x364   :  { %3578 = vrot.lane.b32.xlu2 %v3372_v28, %s11159_s1  ;;  %v2283_v28 = vshrl.u32 %v2036_v4, 16  ;;  %v3380_v54 = vrot.slane %v16020_v23, 4  ;;  %v3825_v4 = vld [vmem:[#allocation2 + $0x48] sm:$0xf]  ;;  %v5048_v51 = vrot.slane %v5047_v9, 4  ;;  %v2278_v9 = vshll.u32 %v2035_v47, 16 }
 0x365   :  { %2904 = vrot.lane.b32.xlu1 %v2257_v46, %s11161_s26  ;;  %2906 = vrot.lane.b32.xlu0 %v2271_v16, %s11161_s26  ;;  %v3826_v16 = vld [vmem:[#allocation2 + $0x4c] sm:$0xf]  ;;  %v5063_v36 = vsel %vm11407_vm14, %v5058_v18, %v5062_v62  ;;  %v1895_v23 = vld [vmem:[#allocation2 + $0x30] sm:$0xf]  ;;  %v3157_v62 = vld [vmem:[#allocation2 + $0x48] sm:$0xe] }
 0x366   :  { %v14108_v46 = vpop.permute.xlu2 %3945  ;;  %v2285_v19 = vrot.slane %v2283_v28, 4  ;;  %5191 = vst.msk [vmem:[#allocation3 + $0x2f8] sm:$0xf] %vm742_vm6, %v5063_v36  ;;  %v2276_v28 = vrot.slane %v2275_v8, 4  ;;  %v2280_v47 = vrot.slane %v2278_v9, 5  ;;  %v16022_v18 = vrot.slane %v14092_v42, 5 }
 0x367   :  { %v5731_v48 = vpop.permute.xlu1 %5730  ;;  %v2883_v11 = vpop.permute.xlu0 %2882  ;;  %v11090_v7 = vld [vmem:[#allocation3 + $0x2bc] sm:$0xf]  ;;  %1959 = vst.msk [vmem:[#allocation3 + $0x60] sm:$0xf] %vm742_vm6, %v1895_v23  ;;  %v1896_v36 = vld [vmem:[#allocation2 + $0x34] sm:$0xf] }
 0x368   :  { %5861 = vst.msk [vmem:[#allocation3 + $0x2e0] sm:$0xf] %vm3074_vm2, %v5731_v48  ;;  %v10793_v48 = vld [vmem:[#allocation3 + $0x2c4] sm:$0xf0]  ;;  %v2289_v1 = vor.u32 %v2288_v2, %v2285_v19  ;;  %v2039_v19 = vld [vmem:[#allocation2 + $0x60] sm:$0xf] }
 0x369   :  { %6246 = vst.msk [vmem:[#allocation3 + $0x2e0] sm:$0xf] %vm3750_vm4, %v6116_v41  ;;  %v14117_v52 = vpop.f32.mrf.mxu2  ;;  %v2037_v41 = vld [vmem:[#allocation2 + $0x58] sm:$0xf]  ;;  %v10796_v50 = vor.u32 %v11090_v7, %v10793_v48  ;;  %v2307_v9 = vshrl.u32 %v2039_v19, 16 }
 0x36a   :  { %7366 = vst.msk [vmem:[#allocation3 + $0x2e0] sm:$0xf] %vm4135_vm8, %v14062_v55  ;;  %v5053_v55 = vsel %vm11407_vm14, %v5048_v51, %v5052_v63  ;;  %v2292_v38 = vshll.u32 %v2037_v41, 16  ;;  %v3161_v7 = vld [vmem:[#allocation2 + $0x58] sm:$0xf]  ;;  %v2281_v51 = vsel %vm11407_vm14, %v2276_v28, %v2280_v47 }
 0x36b   :  { %3075 = vst.msk [vmem:[#allocation3] sm:$0xf] %vm3074_vm2, %v2883_v11  ;;  %v3385_v2 = vrot.slane %v3161_v7, 5  ;;  %v3828_v28 = vld [vmem:[#allocation2 + $0x58] sm:$0xf] }
 0x36c   :  { %3751 = vst.msk [vmem:[#allocation3] sm:$0xf] %vm3750_vm4, %v3559_v43  ;;  %3965 = vrot.lane.b32.xlu2 %v3826_v16, %s11160_s25  ;;  %v3382_v43 = vsel %vm11416_vm15, %v3380_v54, %v3381_v49  ;;  %v2294_v49 = vrot.slane %v2292_v38, 5  ;;  %v2296_v54 = vshrl.u32 %v2037_v41, 16  ;;  %v2040_v7 = vld [vmem:[#allocation2 + $0x64] sm:$0xf] }
 0x36d   :  { %3963 = vrot.lane.b32.xlu1 %v3825_v4, %s11160_s25  ;;  %5190 = vst.msk [vmem:[#allocation3 + $0x2ec] sm:$0xf] %vm742_vm6, %v5053_v55  ;;  %3584 = vrot.lane.b32.xlu0 %v3382_v43, %s11159_s1  ;;  %v10351_v4 = vrot.slane %v3157_v62, 9  ;;  %v2290_v55 = vrot.slane %v2289_v1, 4  ;;  %v2310_v43 = vshll.u32 %v2039_v19, 16  ;;  %v3387_v47 = vrot.slane %v3385_v2, 4 }
 0x36e   :  { %v6118_v63 = vpop.permute.xlu2 %6117  ;;  %9083 = vmatmul.bf16.gmra.mxu2 %v10796_v50  ;;  %1960 = vst.msk [vmem:[#allocation3 + $0x6c] sm:$0xf] %vm742_vm6, %v1896_v36  ;;  %v2298_v42 = vrot.slane %v2296_v54, 4  ;;  %v3162_v50 = vld [vmem:[#allocation2 + $0x5c] sm:$0x1] }
 0x36f   :  { %v7234_v15 = vpop.permute.xlu1 %7233  ;;  %v3561_v11 = vpop.permute.xlu0 %3560  ;;  %v3379_v48 = vsel %vm11416_vm15, %v10351_v4, %v16022_v18  ;;  %v2295_v41 = vsel %vm11407_vm14, %v2290_v55, %v2294_v49  ;;  %v3827_v62 = vld [vmem:[#allocation2 + $0x54] sm:$0xf]  ;;  %v3388_v54 = vrot.slane %v3162_v50, 5  ;;  %v1897_v55 = vld [vmem:[#allocation2 + $0x3c] sm:$0xf] }
 0x370   :  { %7365 = vst.msk [vmem:[#allocation3 + $0x2d4] sm:$0xf] %vm4135_vm8, %v7234_v15  ;;  %v2038_v15 = vld [vmem:[#allocation2 + $0x5c] sm:$0x1] }
 0x371   :  { %v14135_v16 = vpop.f32.mrf.mxu2  ;;  %v10805_v18 = vld [vmem:[#allocation3 + $0x2dc] sm:$0xf0]  ;;  %v2302_v36 = vshll.u32 %v2038_v15, 16  ;;  %v3389_v19 = vsel %vm11416_vm15, %v3387_v47, %v3388_v54  ;;  %1961 = vst.msk [vmem:[#allocation3 + $0x78] sm:$0xf] %vm742_vm6, %v1897_v55 }
 0x372   :  { %16021 = vst [vmem:[#allocation48_spill] sm:$0xff] %v14135_v16  ;;  %v2042_v47 = vld [vmem:[#allocation2 + $0x6c] sm:$0xf]  ;;  %v1898_v55 = vld [vmem:[#allocation2 + $0x40] sm:$0xf] }
 0x373   :  { %1962 = vst.msk [vmem:[#allocation3 + $0x84] sm:$0xf] %vm742_vm6, %v1898_v55  ;;  %v2043_v55 = vld [vmem:[#allocation2 + $0x70] sm:$0xf] }
 0x374   :  { %3582 = vrot.lane.b32.xlu2 %v3379_v48, %s11159_s1  ;;  %v2312_v48 = vrot.slane %v2310_v43, 5  ;;  %v2304_v43 = vrot.slane %v2302_v36, 5  ;;  %v2334_v36 = vshll.u32 %v2042_v47, 16 }
 0x375   :  { %2908 = vrot.lane.b32.xlu1 %v2281_v51, %s11161_s26  ;;  %2910 = vrot.lane.b32.xlu0 %v2295_v41, %s11161_s26  ;;  %v2299_v51 = vor.u32 %v2298_v42, %v2294_v49  ;;  %v2316_v41 = vshll.u32 %v2040_v7, 16 }
 0x376   :  { %v14148_v23 = vpop.permute.xlu2 %7239 }
 0x377   :  { %v2885_v8 = vpop.permute.xlu1 %2884  ;;  %v5733_v38 = vpop.permute.xlu0 %5732  ;;  %v11093_v4 = vld [vmem:[#allocation3 + $0x2d4] sm:$0xf]  ;;  %v2300_v49 = vrot.slane %v2299_v51, 4 }
 0x378   :  { %3076 = vst.msk [vmem:[#allocation3 + $0xc] sm:$0xf] %vm3074_vm2, %v2885_v8 }
 0x379   :  { %3752 = vst.msk [vmem:[#allocation3 + $0xc] sm:$0xf] %vm3750_vm4, %v3561_v11  ;;  %v14155_v1 = vpop.f32.mrf.mxu2  ;;  %v2309_v11 = vrot.slane %v2307_v9, 4 }
 0x37a   :  { %4137 = vst.msk [vmem:[#allocation3 + $0xc] sm:$0xf] %vm4135_vm8, %v14108_v46  ;;  %v10808_v46 = vor.u32 %v11093_v4, %v10805_v18  ;;  %v2305_v4 = vsel %vm11407_vm14, %v2300_v49, %v2304_v43  ;;  %v3829_v43 = vld [vmem:[#allocation2 + $0x60] sm:$0xf] }
 0x37b   :  { %16023 = vst [vmem:[#allocation49_spill] sm:$0xff] %v14155_v1  ;;  %v2313_v42 = vor.u32 %v2312_v48, %v2309_v11  ;;  %v2331_v48 = vshrl.u32 %v2042_v47, 16 }
 0x37c   :  { %5862 = vst.msk [vmem:[#allocation3 + $0x2ec] sm:$0xf] %vm3074_vm2, %v5733_v38  ;;  %3969 = vrot.lane.b32.xlu2 %v3828_v28, %s11160_s25  ;;  %v14168_v28 = vld [vmem:[#allocation2 + $0x64] sm:$0xf] }
 0x37d   :  { %6247 = vst.msk [vmem:[#allocation3 + $0x2ec] sm:$0xf] %vm3750_vm4, %v6118_v63  ;;  %3967 = vrot.lane.b32.xlu1 %v3827_v62, %s11160_s25  ;;  %3588 = vrot.lane.b32.xlu0 %v3389_v19, %s11159_s1  ;;  %v3160_v63 = vld [vmem:[#allocation2 + $0x54] sm:$0xe]  ;;  %v2318_v62 = vrot.slane %v2316_v41, 5  ;;  %v2314_v18 = vrot.slane %v2313_v42, 4 }
 0x37e   :  { %v3563_v50 = vpop.permute.xlu2 %3562  ;;  %9088 = vmatmul.bf16.gmra.mxu2 %v10808_v46  ;;  %v10352_v38 = vrot.slane %v3160_v63, 9  ;;  %v2320_v46 = vshrl.u32 %v2040_v7, 16  ;;  %v3392_v11 = vrot.slane %v14168_v28, 5  ;;  %v3165_v42 = vld [vmem:[#allocation2 + $0x68] sm:$0x1] }
 0x37f   :  { %v3944_v8 = vpop.permute.xlu1 %3943  ;;  %v6120_v9 = vpop.permute.xlu0 %6119  ;;  %v2319_v51 = vsel %vm11407_vm14, %v2314_v18, %v2318_v62  ;;  %v2041_v18 = vld [vmem:[#allocation2 + $0x68] sm:$0x1] }
 0x380   :  { %4136 = vst.msk [vmem:[#allocation3] sm:$0xf] %vm4135_vm8, %v3944_v8  ;;  %v3386_v54 = vsel %vm11416_vm15, %v10352_v38, %v3385_v2  ;;  %v2322_v63 = vrot.slane %v2320_v46, 4  ;;  %v3830_v38 = vld [vmem:[#allocation2 + $0x64] sm:$0xf]  ;;  %v3394_v47 = vrot.slane %v3392_v11, 4 }
 0x381   :  { %v14166_v15 = vpop.f32.mrf.mxu2  ;;  %v11004_v8 = vld [vmem:[#allocation3 + $0x8] sm:$0xf0]  ;;  %v3395_v46 = vrot.slane %v3165_v42, 5 }
 0x382   :  { %16024 = vst [vmem:[#allocation50_spill] sm:$0xff] %v14166_v15  ;;  %v1913_v15 = vld [vmem:[#allocation2 + $0x9c] sm:$0xf] }
 0x383   :  { %1977 = vst.msk [vmem:[#allocation3 + $0x138] sm:$0xf] %vm742_vm6, %v1913_v15  ;;  %v3186_v15 = vld [vmem:[#allocation2 + $0xbc] sm:$0x1] }
 0x384   :  { %3586 = vrot.lane.b32.xlu2 %v3386_v54, %s11159_s1  ;;  %v2336_v54 = vrot.slane %v2334_v36, 5 }
 0x385   :  { %2912 = vrot.lane.b32.xlu1 %v2305_v4, %s11161_s26  ;;  %2914 = vrot.lane.b32.xlu0 %v2319_v51, %s11161_s26  ;;  %v2333_v4 = vrot.slane %v2331_v48, 4  ;;  %v1899_v51 = vld [vmem:[#allocation2 + $0x48] sm:$0xf]  ;;  %v3396_v48 = vsel %vm11416_vm15, %v3394_v47, %v3395_v46  ;;  %v2344_v46 = vshrl.u32 %v2043_v55, 16 }
 0x386   :  { %v14180_v2 = vpop.permute.xlu2 %3949  ;;  %1963 = vst.msk [vmem:[#allocation3 + $0x90] sm:$0xf] %vm742_vm6, %v1899_v51  ;;  %v1900_v51 = vld [vmem:[#allocation2 + $0x4c] sm:$0xf] }
 0x387   :  { %v5735_v19 = vpop.permute.xlu1 %5734  ;;  %v10443_v41 = vld [vmem:[#allocation3] sm:$0xf]  ;;  %v2887_v49 = vpop.permute.xlu0 %2886  ;;  %v2337_v36 = vor.u32 %v2336_v54, %v2333_v4  ;;  %v2045_v54 = vld [vmem:[#allocation2 + $0x78] sm:$0xf]  ;;  %1964 = vst.msk [vmem:[#allocation3 + $0x9c] sm:$0xf] %vm742_vm6, %v1900_v51 }
 0x388   :  { %5863 = vst.msk [vmem:[#allocation3 + $0x2f8] sm:$0xf] %vm3074_vm2, %v5735_v19  ;;  %v10444_v7 = vor.u32 %v11004_v8, %v10443_v41  ;;  %v2340_v19 = vshll.u32 %v2043_v55, 16  ;;  %v3167_v4 = vld [vmem:[#allocation2 + $0x70] sm:$0xf]  ;;  %v2346_v55 = vrot.slane %v2344_v46, 4 }
 0x389   :  { %6248 = vst.msk [vmem:[#allocation3 + $0x2f8] sm:$0xf] %vm3750_vm4, %v6120_v9  ;;  %v14187_v28 = vpop.f32.mrf.mxu2  ;;  %v2323_v9 = vor.u32 %v2322_v63, %v2318_v62 }
 0x38a   :  { %8769 = vmatmul.bf16.vlgmr.msrb.gmra.mxu1 %v10444_v7  ;;  %7368 = vst.msk [vmem:[#allocation3 + $0x2f8] sm:$0xf] %vm4135_vm8, %v14148_v23  ;;  %v2326_v23 = vshll.u32 %v2041_v18, 16  ;;  %v11118_v7 = vld [vmem:[%s15942_s7 + $0x8] sm:$0xff]  ;;  %v2342_v47 = vrot.slane %v2340_v19, 5  ;;  %v2355_v19 = vshrl.u32 %v2045_v54, 16 }
 0x38b   :  { %16025 = vst [vmem:[#allocation51_spill] sm:$0xff] %v14187_v28  ;;  %v2324_v62 = vrot.slane %v2323_v9, 4  ;;  %9618 = vmatpush.bf16.msrb.mxu0 %v11118_v7  ;;  %11127 = vmatpush.bf16.msrb.mxu2 %v11118_v7  ;;  %v2358_v7 = vshll.u32 %v2045_v54, 16  ;;  %v1925_v28 = vld [vmem:[#allocation2 + $0xfc] sm:$0xf] }
 0x38c   :  { %3077 = vst.msk [vmem:[#allocation3 + $0x18] sm:$0xf] %vm3074_vm2, %v2887_v49  ;;  %3973 = vrot.lane.b32.xlu2 %v3830_v38, %s11160_s25  ;;  %v2328_v49 = vrot.slane %v2326_v23, 5  ;;  %v2338_v38 = vrot.slane %v2337_v36, 4  ;;  %v3399_v36 = vrot.slane %v3167_v4, 5  ;;  %v2357_v51 = vrot.slane %v2355_v19, 4 }
 0x38d   :  { %3753 = vst.msk [vmem:[#allocation3 + $0x18] sm:$0xf] %vm3750_vm4, %v3563_v50  ;;  %3971 = vrot.lane.b32.xlu1 %v3829_v43, %s11160_s25  ;;  %3592 = vrot.lane.b32.xlu0 %v3396_v48, %s11159_s1  ;;  %v3163_v50 = vld [vmem:[#allocation2 + $0x60] sm:$0xe]  ;;  %v2347_v54 = vor.u32 %v2346_v55, %v2342_v47  ;;  %v2360_v46 = vrot.slane %v2358_v7, 5 }
 0x38e   :  { %v3567_v8 = vpop.permute.xlu2 %3566  ;;  %v10353_v42 = vrot.slane %v3163_v50, 9  ;;  %v2329_v18 = vsel %vm11407_vm14, %v2324_v62, %v2328_v49  ;;  %v2343_v48 = vsel %vm11407_vm14, %v2338_v38, %v2342_v47  ;;  %v3831_v38 = vld [vmem:[#allocation2 + $0x6c] sm:$0xf]  ;;  %1989 = vst.msk [vmem:[#allocation3 + $0x1c8] sm:$0xf] %vm742_vm6, %v1925_v28 }
 0x38f   :  { %v7238_v41 = vpop.permute.xlu1 %7237  ;;  %v3565_v63 = vpop.permute.xlu0 %3564  ;;  %v2348_v47 = vrot.slane %v2347_v54, 4  ;;  %v2361_v55 = vor.u32 %v2360_v46, %v2357_v51  ;;  %v11005_v51 = vld [vmem:[#allocation3 + $0x10] sm:$0xf0] }
 0x390   :  { %7367 = vst.msk [vmem:[#allocation3 + $0x2ec] sm:$0xf] %vm4135_vm8, %v7238_v41  ;;  %v3393_v9 = vsel %vm11416_vm15, %v10353_v42, %v3392_v11  ;;  %v3168_v42 = vld [vmem:[#allocation2 + $0x74] sm:$0x1] }
 0x391   :  { %v14201_v43 = vpop.f32.mrf.mxu2  ;;  %v10817_v23 = vld [vmem:[#allocation3 + $0x2f4] sm:$0xf0] }
 0x392   :  { %16026 = vst [vmem:[#allocation52_spill] sm:$0xff] %v14201_v43  ;;  %v2048_v43 = vld [vmem:[#allocation2 + $0x84] sm:$0xf] }
 0x394   :  { %3590 = vrot.lane.b32.xlu2 %v3393_v9, %s11159_s1  ;;  %v3401_v9 = vrot.slane %v3399_v36, 4 }
 0x395   :  { %2916 = vrot.lane.b32.xlu1 %v2329_v18, %s11161_s26  ;;  %2918 = vrot.lane.b32.xlu0 %v2343_v48, %s11161_s26  ;;  %v2046_v18 = vld [vmem:[#allocation2 + $0x7c] sm:$0xf]  ;;  %v3832_v48 = vld [vmem:[#allocation2 + $0x70] sm:$0xf] }
 0x396   :  { %v14212_v62 = vpop.permute.xlu2 %3953 }
 0x397   :  { %v2889_v41 = vpop.permute.xlu1 %2888  ;;  %v11096_v50 = vld [vmem:[#allocation3 + $0x2ec] sm:$0xf]  ;;  %v2891_v49 = vpop.permute.xlu0 %2890 }
 0x398   :  { %3078 = vst.msk [vmem:[#allocation3 + $0x24] sm:$0xf] %vm3074_vm2, %v2889_v41  ;;  %v10820_v11 = vor.u32 %v11096_v50, %v10817_v23  ;;  %v2044_v23 = vld [vmem:[#allocation2 + $0x74] sm:$0x1]  ;;  %v2364_v50 = vshll.u32 %v2046_v18, 16 }
 0x399   :  { %3754 = vst.msk [vmem:[#allocation3 + $0x24] sm:$0xf] %vm3750_vm4, %v3565_v63  ;;  %v14219_v4 = vpop.f32.mrf.mxu2  ;;  %v3402_v63 = vrot.slane %v3168_v42, 5  ;;  %v1901_v41 = vld [vmem:[#allocation2 + $0x54] sm:$0xf] }
 0x39a   :  { %4139 = vst.msk [vmem:[#allocation3 + $0x24] sm:$0xf] %vm4135_vm8, %v14180_v2  ;;  %9093 = vmatmul.bf16.gmra.mxu2 %v10820_v11  ;;  %v2350_v2 = vshll.u32 %v2044_v23, 16  ;;  %v14232_v23 = vld [vmem:[#allocation2 + $0x7c] sm:$0xf] }
 0x39b   :  { %16027 = vst [vmem:[#allocation53_spill] sm:$0xff] %v14219_v4  ;;  %v3403_v19 = vsel %vm11416_vm15, %v3401_v9, %v3402_v63  ;;  %v2368_v4 = vshrl.u32 %v2046_v18, 16  ;;  %v3406_v46 = vrot.slane %v14232_v23, 5 }
 0x39c   :  { %3079 = vst.msk [vmem:[#allocation3 + $0x30] sm:$0xf] %vm3074_vm2, %v2891_v49  ;;  %3977 = vrot.lane.b32.xlu2 %v3832_v48, %s11160_s25  ;;  %v2352_v42 = vrot.slane %v2350_v2, 5  ;;  %v2379_v2 = vshrl.u32 %v2048_v43, 16 }
 0x39d   :  { %3755 = vst.msk [vmem:[#allocation3 + $0x30] sm:$0xf] %vm3750_vm4, %v3567_v8  ;;  %3975 = vrot.lane.b32.xlu1 %v3831_v38, %s11160_s25  ;;  %3596 = vrot.lane.b32.xlu0 %v3403_v19, %s11159_s1  ;;  %v3166_v8 = vld [vmem:[#allocation2 + $0x6c] sm:$0xe]  ;;  %v2362_v19 = vrot.slane %v2361_v55, 4 }
 0x39e   :  { %1965 = vst.msk [vmem:[#allocation3 + $0xa8] sm:$0xf] %vm742_vm6, %v1901_v41  ;;  %v3571_v49 = vpop.permute.xlu2 %3570  ;;  %v10354_v48 = vrot.slane %v3166_v8, 9  ;;  %v2366_v41 = vrot.slane %v2364_v50, 5  ;;  %v2353_v9 = vsel %vm11407_vm14, %v2348_v47, %v2352_v42  ;;  %v2382_v50 = vshll.u32 %v2048_v43, 16 }
 0x39f   :  { %v3948_v11 = vpop.permute.xlu1 %3947  ;;  %v3569_v7 = vpop.permute.xlu0 %3568  ;;  %v10451_v55 = vld [vmem:[#allocation3 + $0x8] sm:$0xf] }
 0x3a0   :  { %4138 = vst.msk [vmem:[#allocation3 + $0x18] sm:$0xf] %vm4135_vm8, %v3948_v11  ;;  %v3400_v63 = vsel %vm11416_vm15, %v10354_v48, %v3399_v36  ;;  %v1902_v11 = vld [vmem:[#allocation2 + $0x58] sm:$0xf]  ;;  %v2367_v54 = vsel %vm11407_vm14, %v2362_v19, %v2366_v41  ;;  %v10452_v48 = vor.u32 %v11005_v51, %v10451_v55  ;;  %v3171_v19 = vld [vmem:[#allocation2 + $0x80] sm:$0x1] }
 0x3a1   :  { %v14230_v38 = vpop.f32.mrf.mxu2  ;;  %1966 = vst.msk [vmem:[#allocation3 + $0xb4] sm:$0xf] %vm742_vm6, %v1902_v11  ;;  %v11007_v36 = vld [vmem:[#allocation3 + $0x20] sm:$0xf0]  ;;  %v3833_v43 = vld [vmem:[#allocation2 + $0x78] sm:$0xf] }
 0x3a2   :  { %16028 = vst [vmem:[#allocation54_spill] sm:$0xff] %v14230_v38  ;;  %v3408_v11 = vrot.slane %v3406_v46, 4  ;;  %v2384_v38 = vrot.slane %v2382_v50, 5  ;;  %v3834_v51 = vld [vmem:[#allocation2 + $0x7c] sm:$0xf] }
 0x3a4   :  { %3594 = vrot.lane.b32.xlu2 %v3400_v63, %s11159_s1 }
 0x3a5   :  { %2920 = vrot.lane.b32.xlu1 %v2353_v9, %s11161_s26  ;;  %2922 = vrot.lane.b32.xlu0 %v2367_v54, %s11161_s26  ;;  %v2370_v9 = vrot.slane %v2368_v4, 4  ;;  %v2381_v54 = vrot.slane %v2379_v2, 4  ;;  %v2047_v4 = vld [vmem:[#allocation2 + $0x80] sm:$0x1] }
 0x3a6   :  { %v14244_v18 = vpop.permute.xlu2 %3957 }
 0x3a7   :  { %v2893_v8 = vpop.permute.xlu1 %2892  ;;  %v10455_v47 = vld [vmem:[#allocation3 + $0x18] sm:$0xf]  ;;  %v2895_v63 = vpop.permute.xlu0 %2894  ;;  %v2385_v50 = vor.u32 %v2384_v38, %v2381_v54 }
 0x3a8   :  { %3080 = vst.msk [vmem:[#allocation3 + $0x3c] sm:$0xf] %vm3074_vm2, %v2893_v8  ;;  %v10456_v42 = vor.u32 %v11007_v36, %v10455_v47  ;;  %v3409_v8 = vrot.slane %v3171_v19, 5  ;;  %v1903_v47 = vld [vmem:[#allocation2 + $0x60] sm:$0xf]  ;;  %v2374_v36 = vshll.u32 %v2047_v4, 16 }
 0x3a9   :  { %3756 = vst.msk [vmem:[#allocation3 + $0x3c] sm:$0xf] %vm3750_vm4, %v3569_v7  ;;  %v14252_v23 = vpop.f32.mrf.mxu2  ;;  %v2371_v7 = vor.u32 %v2370_v9, %v2366_v41  ;;  %v14265_v4 = vld [vmem:[#allocation2 + $0x88] sm:$0xf] }
 0x3aa   :  { %8774 = vmatmul.bf16.gmra.mxu1 %v10456_v42  ;;  %4141 = vst.msk [vmem:[#allocation3 + $0x3c] sm:$0xf] %vm4135_vm8, %v14212_v62  ;;  %10897 = vmatmul.msk.bf16.vlgmr.msra.gmra.mxu2 %vm276_vm0, %v10452_v48  ;;  %v2049_v62 = vld [vmem:[#allocation2 + $0x88] sm:$0xf]  ;;  %v3410_v2 = vsel %vm11416_vm15, %v3408_v11, %v3409_v8 }
 0x3ab   :  { %16029 = vst [vmem:[#allocation55_spill] sm:$0xff] %v14252_v23  ;;  %v2372_v41 = vrot.slane %v2371_v7, 4  ;;  %v2388_v48 = vshll.u32 %v2049_v62, 16  ;;  %v2392_v8 = vshrl.u32 %v2049_v62, 16  ;;  %v3174_v62 = vld [vmem:[#allocation2 + $0x8c] sm:$0x1] }
 0x3ac   :  { %3081 = vst.msk [vmem:[#allocation3 + $0x48] sm:$0xf] %vm3074_vm2, %v2895_v63  ;;  %3981 = vrot.lane.b32.xlu2 %v3834_v51, %s11160_s25  ;;  %v2376_v63 = vrot.slane %v2374_v36, 5  ;;  %v2386_v51 = vrot.slane %v2385_v50, 4  ;;  %v3413_v36 = vrot.slane %v14265_v4, 5 }
 0x3ad   :  { %3757 = vst.msk [vmem:[#allocation3 + $0x48] sm:$0xf] %vm3750_vm4, %v3571_v49  ;;  %3979 = vrot.lane.b32.xlu1 %v3833_v43, %s11160_s25  ;;  %3600 = vrot.lane.b32.xlu0 %v3410_v2, %s11159_s1  ;;  %v3169_v49 = vld [vmem:[#allocation2 + $0x78] sm:$0xe]  ;;  %v2390_v54 = vrot.slane %v2388_v48, 5 }
 0x3ae   :  { %1967 = vst.msk [vmem:[#allocation3 + $0xc0] sm:$0xf] %vm742_vm6, %v1903_v47  ;;  %v3575_v42 = vpop.permute.xlu2 %3574  ;;  %v10355_v43 = vrot.slane %v3169_v49, 9  ;;  %v2051_v47 = vld [vmem:[#allocation2 + $0x90] sm:$0xf]  ;;  %v2377_v38 = vsel %vm11407_vm14, %v2372_v41, %v2376_v63 }
 0x3af   :  { %v3952_v55 = vpop.permute.xlu1 %3951  ;;  %v3573_v9 = vpop.permute.xlu0 %3572  ;;  %v1904_v2 = vld [vmem:[#allocation2 + $0x64] sm:$0xf]  ;;  %v2391_v7 = vsel %vm11407_vm14, %v2386_v51, %v2390_v54  ;;  %v2403_v50 = vshrl.u32 %v2051_v47, 16  ;;  %v2050_v51 = vld [vmem:[#allocation2 + $0x8c] sm:$0x1] }
 0x3b0   :  { %4140 = vst.msk [vmem:[#allocation3 + $0x30] sm:$0xf] %vm4135_vm8, %v3952_v55  ;;  %v3407_v11 = vsel %vm11416_vm15, %v10355_v43, %v3406_v46  ;;  %v2406_v55 = vshll.u32 %v2051_v47, 16  ;;  %v2394_v43 = vrot.slane %v2392_v8, 4  ;;  %v3415_v47 = vrot.slane %v3413_v36, 4 }
 0x3b1   :  { %v14263_v19 = vpop.f32.mrf.mxu2  ;;  %1968 = vst.msk [vmem:[#allocation3 + $0xcc] sm:$0xf] %vm742_vm6, %v1904_v2  ;;  %v11010_v63 = vld [vmem:[#allocation3 + $0x38] sm:$0xf0]  ;;  %v2405_v2 = vrot.slane %v2403_v50, 4 }
 0x3b2   :  { %16030 = vst [vmem:[#allocation56_spill] sm:$0xff] %v14263_v19  ;;  %v2408_v19 = vrot.slane %v2406_v55, 5  ;;  %v3836_v8 = vld [vmem:[#allocation2 + $0x88] sm:$0xf]  ;;  %v2054_v23 = vld [vmem:[#allocation2 + $0x9c] sm:$0xf] }
 0x3b4   :  { %3598 = vrot.lane.b32.xlu2 %v3407_v11, %s11159_s1  ;;  %v3416_v11 = vrot.slane %v3174_v62, 5  ;;  %v2409_v62 = vor.u32 %v2408_v19, %v2405_v2 }
 0x3b5   :  { %2924 = vrot.lane.b32.xlu1 %v2377_v38, %s11161_s26  ;;  %2926 = vrot.lane.b32.xlu0 %v2391_v7, %s11161_s26  ;;  %v3835_v7 = vld [vmem:[#allocation2 + $0x84] sm:$0xf] }
 0x3b6   :  { %v14277_v46 = vpop.permute.xlu2 %3961 }
 0x3b7   :  { %v2897_v49 = vpop.permute.xlu1 %2896  ;;  %v10467_v41 = vld [vmem:[#allocation3 + $0x30] sm:$0xf]  ;;  %v2899_v38 = vpop.permute.xlu0 %2898 }
 0x3b8   :  { %3082 = vst.msk [vmem:[#allocation3 + $0x54] sm:$0xf] %vm3074_vm2, %v2897_v49  ;;  %v10468_v48 = vor.u32 %v11010_v63, %v10467_v41  ;;  %v2395_v49 = vor.u32 %v2394_v43, %v2390_v54  ;;  %v3172_v41 = vld [vmem:[#allocation2 + $0x84] sm:$0xe]  ;;  %v3417_v63 = vsel %vm11416_vm15, %v3415_v47, %v3416_v11 }
 0x3b9   :  { %3758 = vst.msk [vmem:[#allocation3 + $0x54] sm:$0xf] %vm3750_vm4, %v3573_v9  ;;  %v14284_v4 = vpop.f32.mrf.mxu2  ;;  %v2398_v9 = vshll.u32 %v2050_v51, 16  ;;  %v10356_v54 = vrot.slane %v3172_v41, 9 }
 0x3ba   :  { %8779 = vmatmul.bf16.gmra.mxu1 %v10468_v48  ;;  %4143 = vst.msk [vmem:[#allocation3 + $0x54] sm:$0xf] %vm4135_vm8, %v14244_v18  ;;  %v2052_v18 = vld [vmem:[#allocation2 + $0x94] sm:$0xf] }
 0x3bb   :  { %16031 = vst [vmem:[#allocation57_spill] sm:$0xff] %v14284_v4  ;;  %v2400_v48 = vrot.slane %v2398_v9, 5  ;;  %v2412_v43 = vshll.u32 %v2052_v18, 16  ;;  %v14296_v4 = vld [vmem:[#allocation2 + $0x94] sm:$0xf]  ;;  %v3414_v47 = vsel %vm11416_vm15, %v10356_v54, %v3413_v36  ;;  %v2416_v2 = vshrl.u32 %v2052_v18, 16 }
 0x3bc   :  { %3083 = vst.msk [vmem:[#allocation3 + $0x60] sm:$0xf] %vm3074_vm2, %v2899_v38  ;;  %3985 = vrot.lane.b32.xlu2 %v3836_v8, %s11160_s25  ;;  %v1905_v8 = vld [vmem:[#allocation2 + $0x6c] sm:$0xf]  ;;  %v3420_v41 = vrot.slane %v14296_v4, 5 }
 0x3bd   :  { %3759 = vst.msk [vmem:[#allocation3 + $0x60] sm:$0xf] %vm3750_vm4, %v3575_v42  ;;  %3983 = vrot.lane.b32.xlu1 %v3835_v7, %s11160_s25  ;;  %3604 = vrot.lane.b32.xlu0 %v3417_v63, %s11159_s1  ;;  %v2396_v42 = vrot.slane %v2395_v49, 4  ;;  %v2410_v7 = vrot.slane %v2409_v62, 4  ;;  %v2414_v11 = vrot.slane %v2412_v43, 5  ;;  %v2427_v63 = vshrl.u32 %v2054_v23, 16 }
 0x3be   :  { %v3579_v55 = vpop.permute.xlu2 %3578  ;;  %1969 = vst.msk [vmem:[#allocation3 + $0xd8] sm:$0xf] %vm742_vm6, %v1905_v8  ;;  %v1906_v49 = vld [vmem:[#allocation2 + $0x70] sm:$0xf]  ;;  %v2430_v62 = vshll.u32 %v2054_v23, 16  ;;  %v2418_v43 = vrot.slane %v2416_v2, 4 }
 0x3bf   :  { %v3956_v50 = vpop.permute.xlu1 %3955  ;;  %v3577_v38 = vpop.permute.xlu0 %3576  ;;  %v2401_v19 = vsel %vm11407_vm14, %v2396_v42, %v2400_v48  ;;  %1970 = vst.msk [vmem:[#allocation3 + $0xe4] sm:$0xf] %vm742_vm6, %v1906_v49  ;;  %v2415_v9 = vsel %vm11407_vm14, %v2410_v7, %v2414_v11  ;;  %v3177_v18 = vld [vmem:[#allocation2 + $0x98] sm:$0x1]  ;;  %v3422_v4 = vrot.slane %v3420_v41, 4 }
 0x3c0   :  { %4142 = vst.msk [vmem:[#allocation3 + $0x48] sm:$0xf] %vm4135_vm8, %v3956_v50  ;;  %v2053_v7 = vld [vmem:[#allocation2 + $0x98] sm:$0x1]  ;;  %v2432_v49 = vrot.slane %v2430_v62, 5 }
 0x3c1   :  { %v14294_v51 = vpop.f32.mrf.mxu2  ;;  %v11013_v48 = vld [vmem:[#allocation3 + $0x50] sm:$0xf0]  ;;  %v3838_v2 = vld [vmem:[#allocation2 + $0x94] sm:$0xf] }
 0x3c2   :  { %16032 = vst [vmem:[#allocation58_spill] sm:$0xff] %v14294_v51  ;;  %v2057_v51 = vld [vmem:[#allocation2 + $0xa8] sm:$0xf] }
 0x3c4   :  { %3602 = vrot.lane.b32.xlu2 %v3414_v47, %s11159_s1  ;;  %v2429_v47 = vrot.slane %v2427_v63, 4 }
 0x3c5   :  { %2928 = vrot.lane.b32.xlu1 %v2401_v19, %s11161_s26  ;;  %2930 = vrot.lane.b32.xlu0 %v2415_v9, %s11161_s26  ;;  %v3423_v19 = vrot.slane %v3177_v18, 5  ;;  %v3837_v9 = vld [vmem:[#allocation2 + $0x90] sm:$0xf] }
 0x3c6   :  { %v14309_v36 = vpop.permute.xlu2 %3965  ;;  %v2433_v18 = vor.u32 %v2432_v49, %v2429_v47 }
 0x3c7   :  { %v2901_v50 = vpop.permute.xlu1 %2900  ;;  %v10479_v42 = vld [vmem:[#allocation3 + $0x48] sm:$0xf]  ;;  %v2903_v8 = vpop.permute.xlu0 %2902 }
 0x3c8   :  { %3084 = vst.msk [vmem:[#allocation3 + $0x6c] sm:$0xf] %vm3074_vm2, %v2901_v50  ;;  %v10480_v54 = vor.u32 %v11013_v48, %v10479_v42  ;;  %v2419_v50 = vor.u32 %v2418_v43, %v2414_v11  ;;  %v3175_v42 = vld [vmem:[#allocation2 + $0x90] sm:$0xe]  ;;  %v3424_v48 = vsel %vm11416_vm15, %v3422_v4, %v3423_v19 }
 0x3c9   :  { %3760 = vst.msk [vmem:[#allocation3 + $0x6c] sm:$0xf] %vm3750_vm4, %v3577_v38  ;;  %v14316_v23 = vpop.f32.mrf.mxu2  ;;  %v2422_v38 = vshll.u32 %v2053_v7, 16  ;;  %v10357_v11 = vrot.slane %v3175_v42, 9  ;;  %v3180_v42 = vld [vmem:[#allocation2 + $0xa4] sm:$0x1] }
 0x3ca   :  { %8784 = vmatmul.bf16.gmra.mxu1 %v10480_v54  ;;  %4145 = vst.msk [vmem:[#allocation3 + $0x6c] sm:$0xf] %vm4135_vm8, %v14277_v46  ;;  %v2055_v46 = vld [vmem:[#allocation2 + $0xa0] sm:$0xf] }
 0x3cb   :  { %16033 = vst [vmem:[#allocation59_spill] sm:$0xff] %v14316_v23  ;;  %v2424_v54 = vrot.slane %v2422_v38, 5  ;;  %v2436_v43 = vshll.u32 %v2055_v46, 16  ;;  %v1909_v23 = vld [vmem:[#allocation2 + $0x84] sm:$0xf]  ;;  %v3421_v19 = vsel %vm11416_vm15, %v10357_v11, %v3420_v41  ;;  %v2440_v49 = vshrl.u32 %v2055_v46, 16 }
 0x3cc   :  { %3085 = vst.msk [vmem:[#allocation3 + $0x78] sm:$0xf] %vm3074_vm2, %v2903_v8  ;;  %3989 = vrot.lane.b32.xlu2 %v3838_v2, %s11160_s25  ;;  %v14328_v2 = vld [vmem:[#allocation2 + $0xa0] sm:$0xf] }
 0x3cd   :  { %3761 = vst.msk [vmem:[#allocation3 + $0x78] sm:$0xf] %vm3750_vm4, %v3579_v55  ;;  %3987 = vrot.lane.b32.xlu1 %v3837_v9, %s11160_s25  ;;  %3608 = vrot.lane.b32.xlu0 %v3424_v48, %s11159_s1  ;;  %v2420_v55 = vrot.slane %v2419_v50, 4  ;;  %v2434_v9 = vrot.slane %v2433_v18, 4  ;;  %v2438_v47 = vrot.slane %v2436_v43, 5  ;;  %v3427_v48 = vrot.slane %v14328_v2, 5 }
 0x3ce   :  { %v3583_v62 = vpop.permute.xlu2 %3582  ;;  %1973 = vst.msk [vmem:[#allocation3 + $0x108] sm:$0xf] %vm742_vm6, %v1909_v23  ;;  %v1910_v50 = vld [vmem:[#allocation2 + $0x88] sm:$0xf]  ;;  %v2451_v18 = vshrl.u32 %v2057_v51, 16  ;;  %v2442_v11 = vrot.slane %v2440_v49, 4 }
 0x3cf   :  { %v3960_v63 = vpop.permute.xlu1 %3959  ;;  %v3581_v8 = vpop.permute.xlu0 %3580  ;;  %v2425_v4 = vsel %vm11407_vm14, %v2420_v55, %v2424_v54  ;;  %1974 = vst.msk [vmem:[#allocation3 + $0x114] sm:$0xf] %vm742_vm6, %v1910_v50  ;;  %v2439_v38 = vsel %vm11407_vm14, %v2434_v9, %v2438_v47  ;;  %v2056_v9 = vld [vmem:[#allocation2 + $0xa4] sm:$0x1]  ;;  %v3429_v2 = vrot.slane %v3427_v48, 4 }
 0x3d0   :  { %4144 = vst.msk [vmem:[#allocation3 + $0x60] sm:$0xf] %vm4135_vm8, %v3960_v63  ;;  %v2454_v63 = vshll.u32 %v2057_v51, 16  ;;  %v2443_v49 = vor.u32 %v2442_v11, %v2438_v47 }
 0x3d1   :  { %v14326_v7 = vpop.f32.mrf.mxu2  ;;  %v11016_v46 = vld [vmem:[#allocation3 + $0x68] sm:$0xf0] }
 0x3d2   :  { %16034 = vst [vmem:[#allocation60_spill] sm:$0xff] %v14326_v7  ;;  %v2456_v50 = vrot.slane %v2454_v63, 5  ;;  %v2060_v7 = vld [vmem:[#allocation2 + $0xb4] sm:$0xf] }
 0x3d4   :  { %3606 = vrot.lane.b32.xlu2 %v3421_v19, %s11159_s1  ;;  %v2453_v19 = vrot.slane %v2451_v18, 4  ;;  %v2058_v18 = vld [vmem:[#allocation2 + $0xac] sm:$0xf] }
 0x3d5   :  { %2932 = vrot.lane.b32.xlu1 %v2425_v4, %s11161_s26  ;;  %2934 = vrot.lane.b32.xlu0 %v2439_v38, %s11161_s26  ;;  %v3430_v4 = vrot.slane %v3180_v42, 5  ;;  %v11117_v38 = vld [vmem:[%s15942_s7] sm:$0xff]  ;;  %v2446_v42 = vshll.u32 %v2056_v9, 16 }
 0x3d6   :  { %v14341_v54 = vpop.permute.xlu2 %3969  ;;  %9619 = vmatpush.bf16.msrb.mxu0 %v11117_v38  ;;  %11128 = vmatpush.bf16.msrb.mxu2 %v11117_v38 }
 0x3d7   :  { %v2905_v41 = vpop.permute.xlu1 %2904  ;;  %v10491_v55 = vld [vmem:[#allocation3 + $0x60] sm:$0xf]  ;;  %v2907_v43 = vpop.permute.xlu0 %2906  ;;  %v3431_v63 = vsel %vm11416_vm15, %v3429_v2, %v3430_v4  ;;  %v2448_v47 = vrot.slane %v2446_v42, 5 }
 0x3d8   :  { %3086 = vst.msk [vmem:[#allocation3 + $0x84] sm:$0xf] %vm3074_vm2, %v2905_v41  ;;  %v10492_v23 = vor.u32 %v11016_v46, %v10491_v55  ;;  %v3839_v41 = vld [vmem:[#allocation2 + $0x9c] sm:$0xf]  ;;  %v2457_v55 = vor.u32 %v2456_v50, %v2453_v19  ;;  %v2464_v50 = vshrl.u32 %v2058_v18, 16 }
 0x3d9   :  { %3762 = vst.msk [vmem:[#allocation3 + $0x84] sm:$0xf] %vm3750_vm4, %v3581_v8  ;;  %v14348_v51 = vpop.f32.mrf.mxu2  ;;  %v3840_v8 = vld [vmem:[#allocation2 + $0xa0] sm:$0xf] }
 0x3da   :  { %8789 = vmatmul.bf16.gmra.mxu1 %v10492_v23  ;;  %4147 = vst.msk [vmem:[#allocation3 + $0x84] sm:$0xf] %vm4135_vm8, %v14309_v36  ;;  %v3178_v36 = vld [vmem:[#allocation2 + $0x9c] sm:$0xe] }
 0x3db   :  { %16035 = vst [vmem:[#allocation61_spill] sm:$0xff] %v14348_v51  ;;  %v10358_v11 = vrot.slane %v3178_v36, 9  ;;  %v1911_v51 = vld [vmem:[#allocation2 + $0x90] sm:$0xf] }
 0x3dc   :  { %3087 = vst.msk [vmem:[#allocation3 + $0x90] sm:$0xf] %vm3074_vm2, %v2907_v43  ;;  %3993 = vrot.lane.b32.xlu2 %v3840_v8, %s11160_s25  ;;  %v2460_v43 = vshll.u32 %v2058_v18, 16  ;;  %v14363_v8 = vld [vmem:[#allocation2 + $0xac] sm:$0xf] }
 0x3dd   :  { %3763 = vst.msk [vmem:[#allocation3 + $0x90] sm:$0xf] %vm3750_vm4, %v3583_v62  ;;  %3991 = vrot.lane.b32.xlu1 %v3839_v41, %s11160_s25  ;;  %3612 = vrot.lane.b32.xlu0 %v3431_v63, %s11159_s1  ;;  %v2444_v62 = vrot.slane %v2443_v49, 4  ;;  %v2458_v41 = vrot.slane %v2457_v55, 4  ;;  %v3428_v2 = vsel %vm11416_vm15, %v10358_v11, %v3427_v48  ;;  %v1912_v49 = vld [vmem:[#allocation2 + $0x94] sm:$0xf] }
 0x3de   :  { %v3587_v23 = vpop.permute.xlu2 %3586  ;;  %v2462_v19 = vrot.slane %v2460_v43, 5  ;;  %1975 = vst.msk [vmem:[#allocation3 + $0x120] sm:$0xf] %vm742_vm6, %v1911_v51  ;;  %v3434_v36 = vrot.slane %v14363_v8, 5  ;;  %v2475_v63 = vshrl.u32 %v2060_v7, 16  ;;  %v2478_v55 = vshll.u32 %v2060_v7, 16 }
 0x3df   :  { %v3964_v46 = vpop.permute.xlu1 %3963  ;;  %v3585_v9 = vpop.permute.xlu0 %3584  ;;  %v2449_v4 = vsel %vm11407_vm14, %v2444_v62, %v2448_v47  ;;  %1976 = vst.msk [vmem:[#allocation3 + $0x12c] sm:$0xf] %vm742_vm6, %v1912_v49  ;;  %v3183_v51 = vld [vmem:[#allocation2 + $0xb0] sm:$0x1]  ;;  %v2466_v11 = vrot.slane %v2464_v50, 4 }
 0x3e0   :  { %4146 = vst.msk [vmem:[#allocation3 + $0x78] sm:$0xf] %vm4135_vm8, %v3964_v46  ;;  %v2463_v42 = vsel %vm11407_vm14, %v2458_v41, %v2462_v19  ;;  %v2059_v41 = vld [vmem:[#allocation2 + $0xb0] sm:$0x1]  ;;  %v3436_v8 = vrot.slane %v3434_v36, 4  ;;  %v2480_v49 = vrot.slane %v2478_v55, 5 }
 0x3e1   :  { %v14361_v38 = vpop.f32.mrf.mxu2  ;;  %v11019_v62 = vld [vmem:[#allocation3 + $0x80] sm:$0xf0]  ;;  %v2467_v50 = vor.u32 %v2466_v11, %v2462_v19 }
 0x3e2   :  { %16036 = vst [vmem:[#allocation62_spill] sm:$0xff] %v14361_v38 }
 0x3e4   :  { %3610 = vrot.lane.b32.xlu2 %v3428_v2, %s11159_s1  ;;  %v2477_v2 = vrot.slane %v2475_v63, 4 }
 0x3e5   :  { %2936 = vrot.lane.b32.xlu1 %v2449_v4, %s11161_s26  ;;  %2938 = vrot.lane.b32.xlu0 %v2463_v42, %s11161_s26  ;;  %v3437_v4 = vrot.slane %v3183_v51, 5  ;;  %v3841_v42 = vld [vmem:[#allocation2 + $0xa8] sm:$0xf] }
 0x3e6   :  { %v14376_v18 = vpop.permute.xlu2 %3973  ;;  %v2481_v51 = vor.u32 %v2480_v49, %v2477_v2 }
 0x3e7   :  { %v2909_v46 = vpop.permute.xlu1 %2908  ;;  %v10503_v48 = vld [vmem:[#allocation3 + $0x78] sm:$0xf]  ;;  %v2911_v43 = vpop.permute.xlu0 %2910 }
 0x3e8   :  { %3088 = vst.msk [vmem:[#allocation3 + $0x9c] sm:$0xf] %vm3074_vm2, %v2909_v46  ;;  %v10504_v47 = vor.u32 %v11019_v62, %v10503_v48  ;;  %v3842_v46 = vld [vmem:[#allocation2 + $0xac] sm:$0xf]  ;;  %v2061_v48 = vld [vmem:[#allocation2 + $0xb8] sm:$0xf]  ;;  %v3438_v62 = vsel %vm11416_vm15, %v3436_v8, %v3437_v4 }
 0x3e9   :  { %3764 = vst.msk [vmem:[#allocation3 + $0x9c] sm:$0xf] %vm3750_vm4, %v3585_v9  ;;  %v14383_v7 = vpop.f32.mrf.mxu2  ;;  %v2470_v9 = vshll.u32 %v2059_v41, 16  ;;  %v2063_v41 = vld [vmem:[#allocation2 + $0xd8] sm:$0xf] }
 0x3ea   :  { %8794 = vmatmul.bf16.gmra.mxu1 %v10504_v47  ;;  %4149 = vst.msk [vmem:[#allocation3 + $0x9c] sm:$0xf] %vm4135_vm8, %v14341_v54  ;;  %v3181_v54 = vld [vmem:[#allocation2 + $0xa8] sm:$0xe]  ;;  %v2484_v47 = vshll.u32 %v2061_v48, 16  ;;  %v2499_v49 = vshrl.u32 %v2063_v41, 16 }
 0x3eb   :  { %16037 = vst [vmem:[#allocation63_spill] sm:$0xff] %v14383_v7  ;;  %v2472_v19 = vrot.slane %v2470_v9, 5  ;;  %v10359_v11 = vrot.slane %v3181_v54, 9  ;;  %v14393_v7 = vld [vmem:[#allocation2 + $0xb8] sm:$0xf] }
 0x3ec   :  { %3089 = vst.msk [vmem:[#allocation3 + $0xa8] sm:$0xf] %vm3074_vm2, %v2911_v43  ;;  %3997 = vrot.lane.b32.xlu2 %v3842_v46, %s11160_s25  ;;  %v2486_v38 = vrot.slane %v2484_v47, 5  ;;  %v2488_v46 = vshrl.u32 %v2061_v48, 16  ;;  %v1914_v9 = vld [vmem:[#allocation2 + $0xa0] sm:$0xf] }
 0x3ed   :  { %3765 = vst.msk [vmem:[#allocation3 + $0xa8] sm:$0xf] %vm3750_vm4, %v3587_v23  ;;  %3995 = vrot.lane.b32.xlu1 %v3841_v42, %s11160_s25  ;;  %3616 = vrot.lane.b32.xlu0 %v3438_v62, %s11159_s1  ;;  %v2468_v23 = vrot.slane %v2467_v50, 4  ;;  %v2482_v42 = vrot.slane %v2481_v51, 4  ;;  %v3435_v2 = vsel %vm11416_vm15, %v10359_v11, %v3434_v36  ;;  %v2502_v50 = vshll.u32 %v2063_v41, 16 }
 0x3ee   :  { %v3591_v55 = vpop.permute.xlu2 %3590  ;;  %1978 = vst.msk [vmem:[#allocation3 + $0x144] sm:$0xf] %vm742_vm6, %v1914_v9  ;;  %v2062_v54 = vld [vmem:[#allocation2 + $0xbc] sm:$0x1]  ;;  %v3441_v62 = vrot.slane %v14393_v7, 5  ;;  %v2501_v11 = vrot.slane %v2499_v49, 4 }
 0x3ef   :  { %v3968_v63 = vpop.permute.xlu1 %3967  ;;  %v3589_v43 = vpop.permute.xlu0 %3588  ;;  %v2473_v8 = vsel %vm11407_vm14, %v2468_v23, %v2472_v19  ;;  %v2487_v48 = vsel %vm11407_vm14, %v2482_v42, %v2486_v38  ;;  %v2490_v19 = vrot.slane %v2488_v46, 4  ;;  %v2504_v41 = vrot.slane %v2502_v50, 5  ;;  %v3843_v9 = vld [vmem:[#allocation2 + $0xb4] sm:$0xf] }
 0x3f0   :  { %4148 = vst.msk [vmem:[#allocation3 + $0x90] sm:$0xf] %vm4135_vm8, %v3968_v63  ;;  %v3443_v7 = vrot.slane %v3441_v62, 4 }
 0x3f1   :  { %v14397_v4 = vpop.f32.mrf.mxu2  ;;  %v11022_v36 = vld [vmem:[#allocation3 + $0x98] sm:$0xf0]  ;;  %v2491_v46 = vor.u32 %v2490_v19, %v2486_v38  ;;  %v2505_v49 = vor.u32 %v2504_v41, %v2501_v11  ;;  %v3188_v41 = vld [vmem:[#allocation2 + $0xdc] sm:$0xf] }
 0x3f2   :  { %16038 = vst [vmem:[#allocation64_spill] sm:$0xff] %v14397_v4 }
 0x3f3   :  { %v2492_v38 = vrot.slane %v2491_v46, 4  ;;  %v1916_v46 = vld [vmem:[#allocation2 + $0xac] sm:$0xf] }
 0x3f4   :  { %3614 = vrot.lane.b32.xlu2 %v3435_v2, %s11159_s1  ;;  %v3444_v2 = vrot.slane %v3186_v15, 5  ;;  %1980 = vst.msk [vmem:[#allocation3 + $0x15c] sm:$0xf] %vm742_vm6, %v1916_v46  ;;  %v3187_v46 = vld [vmem:[#allocation2 + $0xd8] sm:$0xe] }
 0x3f5   :  { %2940 = vrot.lane.b32.xlu1 %v2473_v8, %s11161_s26  ;;  %2942 = vrot.lane.b32.xlu0 %v2487_v48, %s11161_s26  ;;  %v2064_v8 = vld [vmem:[#allocation2 + $0xdc] sm:$0xf]  ;;  %v2494_v48 = vshll.u32 %v2062_v54, 16  ;;  %v2506_v54 = vrot.slane %v2505_v49, 4 }
 0x3f6   :  { %v14408_v47 = vpop.permute.xlu2 %3977  ;;  %v2508_v50 = vshll.u32 %v2064_v8, 16 }
 0x3f7   :  { %v2913_v51 = vpop.permute.xlu1 %2912  ;;  %v10515_v63 = vld [vmem:[#allocation3 + $0x90] sm:$0xf]  ;;  %v2915_v42 = vpop.permute.xlu0 %2914  ;;  %v2496_v15 = vrot.slane %v2494_v48, 5  ;;  %v3448_v48 = vrot.slane %v3188_v41, 5 }
 0x3f8   :  { %3090 = vst.msk [vmem:[#allocation3 + $0xb4] sm:$0xf] %vm3074_vm2, %v2913_v51  ;;  %v10516_v23 = vor.u32 %v11022_v36, %v10515_v63  ;;  %v3844_v51 = vld [vmem:[#allocation2 + $0xb8] sm:$0xf]  ;;  %v2510_v19 = vrot.slane %v2508_v50, 5 }
 0x3f9   :  { %3766 = vst.msk [vmem:[#allocation3 + $0xb4] sm:$0xf] %vm3750_vm4, %v3589_v43  ;;  %v3184_v43 = vld [vmem:[#allocation2 + $0xb4] sm:$0xe]  ;;  %v14419_v63 = vpop.f32.mrf.mxu2  ;;  %v2497_v4 = vsel %vm11407_vm14, %v2492_v38, %v2496_v15  ;;  %v2065_v15 = vld [vmem:[#allocation2 + $0xe0] sm:$0x1] }
 0x3fa   :  { %8799 = vmatmul.bf16.gmra.mxu1 %v10516_v23  ;;  %4151 = vst.msk [vmem:[#allocation3 + $0xb4] sm:$0xf] %vm4135_vm8, %v14376_v18  ;;  %v3445_v18 = vsel %vm11416_vm15, %v3443_v7, %v3444_v2  ;;  %v2511_v2 = vsel %vm11407_vm14, %v2506_v54, %v2510_v19 }
 0x3fb   :  { %3091 = vst.msk [vmem:[#allocation3 + $0xc0] sm:$0xf] %vm3074_vm2, %v2915_v42  ;;  %v2512_v42 = vshrl.u32 %v2064_v8, 16  ;;  %v3189_v8 = vld [vmem:[#allocation2 + $0xe0] sm:$0x1] }
 0x3fc   :  { %3767 = vst.msk [vmem:[#allocation3 + $0xc0] sm:$0xf] %vm3750_vm4, %v3591_v55  ;;  %4001 = vrot.lane.b32.xlu2 %v3844_v51, %s11160_s25  ;;  %v10360_v55 = vrot.slane %v3184_v43, 9  ;;  %v1915_v51 = vld [vmem:[#allocation2 + $0xa8] sm:$0xf]  ;;  %v3451_v54 = vrot.slane %v3189_v8, 5 }
 0x3fd   :  { %3999 = vrot.lane.b32.xlu1 %v3843_v9, %s11160_s25  ;;  %16039 = vst [vmem:[#allocation65_spill] sm:$0xff] %v14419_v63  ;;  %3620 = vrot.lane.b32.xlu0 %v3445_v18, %s11159_s1  ;;  %v2066_v9 = vld [vmem:[#allocation2 + $0xe4] sm:$0xf]  ;;  %v2514_v49 = vrot.slane %v2512_v42, 4 }
 0x3fe   :  { %v3595_v23 = vpop.permute.xlu2 %3594  ;;  %v3442_v7 = vsel %vm11416_vm15, %v10360_v55, %v3441_v62  ;;  %1979 = vst.msk [vmem:[#allocation3 + $0x150] sm:$0xf] %vm742_vm6, %v1915_v51  ;;  %v2523_v50 = vshrl.u32 %v2066_v9, 16  ;;  %v2526_v43 = vshll.u32 %v2066_v9, 16  ;;  %v2518_v51 = vshll.u32 %v2065_v15, 16 }
 0x3ff   :  { %v3972_v36 = vpop.permute.xlu1 %3971  ;;  %v3593_v11 = vpop.permute.xlu0 %3592  ;;  %v2515_v9 = vor.u32 %v2514_v49, %v2510_v19  ;;  %v3846_v8 = vld [vmem:[#allocation2 + $0xc4] sm:$0xf]  ;;  %v10361_v49 = vrot.slane %v3187_v46, 9  ;;  %v2069_v46 = vld [vmem:[#allocation2 + $0xf0] sm:$0xf] }
 0x400   :  { %4150 = vst.msk [vmem:[#allocation3 + $0xa8] sm:$0xf] %vm4135_vm8, %v3972_v36  ;;  %v2520_v19 = vrot.slane %v2518_v51, 5  ;;  %v1917_v51 = vld [vmem:[#allocation2 + $0xb4] sm:$0xf] }
 0x401   :  { %v11025_v62 = vld [vmem:[#allocation3 + $0xb0] sm:$0xf0]  ;;  %v14440_v41 = vpop.f32.mrf.mxu2  ;;  %1981 = vst.msk [vmem:[#allocation3 + $0x168] sm:$0xf] %vm742_vm6, %v1917_v51 }
 0x402   :  { %16040 = vst [vmem:[#allocation66_spill] sm:$0xff] %v14440_v41 }
 0x404   :  { %3618 = vrot.lane.b32.xlu2 %v3442_v7, %s11159_s1  ;;  %v2525_v7 = vrot.slane %v2523_v50, 4 }
 0x405   :  { %2944 = vrot.lane.b32.xlu1 %v2497_v4, %s11161_s26  ;;  %2946 = vrot.lane.b32.xlu0 %v2511_v2, %s11161_s26  ;;  %v3450_v4 = vrot.slane %v3448_v48, 4  ;;  %v2528_v2 = vrot.slane %v2526_v43, 5 }
 0x406   :  { %v14437_v55 = vpop.permute.xlu2 %3981 }
 0x407   :  { %v2917_v18 = vpop.permute.xlu1 %2916  ;;  %v10527_v36 = vld [vmem:[#allocation3 + $0xa8] sm:$0xf]  ;;  %v2919_v42 = vpop.permute.xlu0 %2918  ;;  %v2529_v50 = vor.u32 %v2528_v2, %v2525_v7 }
 0x408   :  { %3092 = vst.msk [vmem:[#allocation3 + $0xcc] sm:$0xf] %vm3074_vm2, %v2917_v18  ;;  %v10528_v38 = vor.u32 %v11025_v62, %v10527_v36  ;;  %v3845_v18 = vld [vmem:[#allocation2 + $0xc0] sm:$0xf]  ;;  %v2067_v36 = vld [vmem:[#allocation2 + $0xe8] sm:$0xf] }
 0x409   :  { %3768 = vst.msk [vmem:[#allocation3 + $0xcc] sm:$0xf] %vm3750_vm4, %v3593_v11  ;;  %v3452_v11 = vsel %vm11416_vm15, %v3450_v4, %v3451_v54  ;;  %v3449_v4 = vsel %vm11416_vm15, %v10361_v49, %v3448_v48  ;;  %v2530_v54 = vrot.slane %v2529_v50, 4  ;;  %v2536_v2 = vshrl.u32 %v2067_v36, 16 }
 0x40a   :  { %8804 = vmatmul.bf16.gmra.mxu1 %v10528_v38  ;;  %4153 = vst.msk [vmem:[#allocation3 + $0xcc] sm:$0xf] %vm4135_vm8, %v14408_v47  ;;  %v2516_v47 = vrot.slane %v2515_v9, 4  ;;  %v14458_v9 = vld [vmem:[#allocation2 + $0xe8] sm:$0xf]  ;;  %v2550_v49 = vshll.u32 %v2069_v46, 16 }
 0x40b   :  { %3093 = vst.msk [vmem:[#allocation3 + $0xd8] sm:$0xf] %vm3074_vm2, %v2919_v42  ;;  %v14456_v42 = vpop.f32.mrf.mxu2 }
 0x40c   :  { %3769 = vst.msk [vmem:[#allocation3 + $0xd8] sm:$0xf] %vm3750_vm4, %v3595_v23  ;;  %4005 = vrot.lane.b32.xlu2 %v3846_v8, %s11160_s25  ;;  %v2532_v23 = vshll.u32 %v2067_v36, 16  ;;  %v2521_v38 = vsel %vm11407_vm14, %v2516_v47, %v2520_v19  ;;  %v14460_v8 = vpop.f32.mrf.mxu1  ;;  %v3455_v47 = vrot.slane %v14458_v9, 5  ;;  %v2547_v19 = vshrl.u32 %v2069_v46, 16 }
 0x40d   :  { %4003 = vrot.lane.b32.xlu1 %v3845_v18, %s11160_s25  ;;  %3624 = vrot.lane.b32.xlu0 %v3452_v11, %s11159_s1  ;;  %16041 = vst [vmem:[#allocation67_spill] sm:$0xff] %v14456_v42  ;;  %v1918_v18 = vld [vmem:[#allocation2 + $0xb8] sm:$0xf]  ;;  %v3192_v11 = vld [vmem:[#allocation2 + $0xec] sm:$0x1] }
 0x40e   :  { %v3599_v62 = vpop.permute.xlu2 %3598  ;;  %v2534_v7 = vrot.slane %v2532_v23, 5  ;;  %1982 = vst.msk [vmem:[#allocation3 + $0x174] sm:$0xf] %vm742_vm6, %v1918_v18  ;;  %v2068_v9 = vld [vmem:[#allocation2 + $0xec] sm:$0x1]  ;;  %v3457_v51 = vrot.slane %v3455_v47, 4 }
 0x40f   :  { %v3976_v43 = vpop.permute.xlu1 %3975  ;;  %v3597_v15 = vpop.permute.xlu0 %3596  ;;  %v3458_v46 = vrot.slane %v3192_v11, 5  ;;  %v2549_v41 = vrot.slane %v2547_v19, 4  ;;  %v3847_v42 = vld [vmem:[#allocation2 + $0xe4] sm:$0xf]  ;;  %v3848_v18 = vld [vmem:[#allocation2 + $0xe8] sm:$0xf] }
 0x410   :  { %4152 = vst.msk [vmem:[#allocation3 + $0xc0] sm:$0xf] %vm4135_vm8, %v3976_v43  ;;  %v2535_v48 = vsel %vm11407_vm14, %v2530_v54, %v2534_v7 }
 0x411   :  { %v11028_v43 = vld [vmem:[#allocation3 + $0xc8] sm:$0xf0]  ;;  %v3459_v11 = vsel %vm11416_vm15, %v3457_v51, %v3458_v46 }
 0x414   :  { %3622 = vrot.lane.b32.xlu2 %v3449_v4, %s11159_s1  ;;  %v2538_v4 = vrot.slane %v2536_v2, 4  ;;  %v2542_v2 = vshll.u32 %v2068_v9, 16 }
 0x415   :  { %2948 = vrot.lane.b32.xlu1 %v2521_v38, %s11161_s26  ;;  %2950 = vrot.lane.b32.xlu0 %v2535_v48, %s11161_s26  ;;  %v2552_v48 = vrot.slane %v2550_v49, 5  ;;  %v14485_v49 = vpop.f32.mrf.mxu1 }
 0x416   :  { %v14471_v38 = vpop.permute.xlu2 %3985 }
 0x417   :  { %v2921_v50 = vpop.permute.xlu1 %2920  ;;  %v10539_v36 = vld [vmem:[#allocation3 + $0xc0] sm:$0xf]  ;;  %v2923_v54 = vpop.permute.xlu0 %2922  ;;  %v2553_v19 = vor.u32 %v2552_v48, %v2549_v41  ;;  %v14490_v41 = vld [vmem:[#allocation2 + $0xf4] sm:$0xf] }
 0x418   :  { %3094 = vst.msk [vmem:[#allocation3 + $0xe4] sm:$0xf] %vm3074_vm2, %v2921_v50  ;;  %v10540_v23 = vor.u32 %v11028_v43, %v10539_v36  ;;  %v2539_v50 = vor.u32 %v2538_v4, %v2534_v7  ;;  %v1923_v43 = vld [vmem:[#allocation2 + $0xf0] sm:$0xf]  ;;  %v1924_v7 = vld [vmem:[#allocation2 + $0xf4] sm:$0xf] }
 0x419   :  { %3770 = vst.msk [vmem:[#allocation3 + $0xe4] sm:$0xf] %vm3750_vm4, %v3597_v15  ;;  %v3190_v15 = vld [vmem:[#allocation2 + $0xe4] sm:$0xe]  ;;  %v2554_v51 = vrot.slane %v2553_v19, 4 }
 0x41a   :  { %8809 = vmatmul.bf16.gmra.mxu1 %v10540_v23  ;;  %4155 = vst.msk [vmem:[#allocation3 + $0xe4] sm:$0xf] %vm4135_vm8, %v14437_v55  ;;  %v2070_v55 = vld [vmem:[#allocation2 + $0xf4] sm:$0xf]  ;;  %v2544_v23 = vrot.slane %v2542_v2, 5 }
 0x41b   :  { %3095 = vst.msk [vmem:[#allocation3 + $0xf0] sm:$0xf] %vm3074_vm2, %v2923_v54  ;;  %v10362_v54 = vrot.slane %v3190_v15, 9  ;;  %v2556_v9 = vshll.u32 %v2070_v55, 16  ;;  %v3462_v15 = vrot.slane %v14490_v41, 5 }
 0x41c   :  { %3771 = vst.msk [vmem:[#allocation3 + $0xf0] sm:$0xf] %vm3750_vm4, %v3599_v62  ;;  %4009 = vrot.lane.b32.xlu2 %v3848_v18, %s11160_s25  ;;  %v3849_v41 = vld [vmem:[#allocation2 + $0xf0] sm:$0xf] }
 0x41d   :  { %v14478_v36 = vpop.f32.mrf.mxu2  ;;  %4007 = vrot.lane.b32.xlu1 %v3847_v42, %s11160_s25  ;;  %1987 = vst.msk [vmem:[#allocation3 + $0x1b0] sm:$0xf] %vm742_vm6, %v1923_v43  ;;  %3628 = vrot.lane.b32.xlu0 %v3459_v11, %s11159_s1  ;;  %v2540_v42 = vrot.slane %v2539_v50, 4  ;;  %v3456_v48 = vsel %vm11416_vm15, %v10362_v54, %v3455_v47  ;;  %v2558_v43 = vrot.slane %v2556_v9, 5  ;;  %v2560_v11 = vshrl.u32 %v2070_v55, 16 }
 0x41e   :  { %16042 = vst [vmem:[#allocation68_spill] sm:$0xff] %v14478_v36  ;;  %v3603_v4 = vpop.permute.xlu2 %3602  ;;  %v3195_v55 = vld [vmem:[#allocation2 + $0xf8] sm:$0x1] }
 0x41f   :  { %v3980_v62 = vpop.permute.xlu1 %3979  ;;  %v3601_v18 = vpop.permute.xlu0 %3600  ;;  %1988 = vst.msk [vmem:[#allocation3 + $0x1bc] sm:$0xf] %vm742_vm6, %v1924_v7  ;;  %v2545_v46 = vsel %vm11407_vm14, %v2540_v42, %v2544_v23  ;;  %v2559_v2 = vsel %vm11407_vm14, %v2554_v51, %v2558_v43  ;;  %v3465_v36 = vrot.slane %v3195_v55, 5  ;;  %v1926_v55 = vld [vmem:[#allocation2 + $0x100] sm:$0xf] }
 0x420   :  { %4154 = vst.msk [vmem:[#allocation3 + $0xd8] sm:$0xf] %vm4135_vm8, %v3980_v62  ;;  %v2072_v62 = vld [vmem:[#allocation2 + $0xfc] sm:$0xf] }
 0x421   :  { %v2571_v19 = vshrl.u32 %v2072_v62, 16  ;;  %v2574_v7 = vshll.u32 %v2072_v62, 16  ;;  %v11031_v54 = vld [vmem:[#allocation3 + $0xe0] sm:$0xf0]  ;;  %v3464_v62 = vrot.slane %v3462_v15, 4 }
 0x422   :  { %1990 = vst.msk [vmem:[#allocation3 + $0x1d4] sm:$0xf] %vm742_vm6, %v1926_v55 }
 0x423   :  { %v2573_v63 = vrot.slane %v2571_v19, 4  ;;  %v8940_v19 = vadd.f32 %v12836_v29, %v14460_v8  ;;  %v14527_v29 = vld [vmem:[%s15943_s5] ss:$0 sm:$0xff]  ;;  %v8942_v8 = vadd.f32 %v12883_v31, %v14485_v49 }
 0x424   :  { %3626 = vrot.lane.b32.xlu2 %v3456_v48, %s11159_s1  ;;  %v2071_v48 = vld [vmem:[#allocation2 + $0xf8] sm:$0x1] }
 0x425   :  { %v14496_v50 = vpop.f32.mrf.mxu2  ;;  %2952 = vrot.lane.b32.xlu1 %v2545_v46, %s11161_s26  ;;  %2954 = vrot.lane.b32.xlu0 %v2559_v2, %s11161_s26  ;;  %v2576_v2 = vrot.slane %v2574_v7, 5  ;;  %v3466_v7 = vsel %vm11416_vm15, %v3464_v62, %v3465_v36  ;;  %v14533_v62 = vld [vmem:[#allocation2 + $0x100] sm:$0xf] }
 0x426   :  { %16043 = vst [vmem:[#allocation69_spill] sm:$0xff] %v14496_v50  ;;  %v14507_v46 = vpop.permute.xlu2 %3989  ;;  %v2562_v50 = vrot.slane %v2560_v11, 4  ;;  %v3193_v11 = vld [vmem:[#allocation2 + $0xf0] sm:$0xe] }
 0x427   :  { %v14503_v42 = vpop.f32.mrf.mxu1  ;;  %v2925_v23 = vpop.permute.xlu1 %2924  ;;  %v10551_v47 = vld [vmem:[#allocation3 + $0xd8] sm:$0xf] }
 0x428   :  { %3096 = vst.msk [vmem:[#allocation3 + $0xfc] sm:$0xf] %vm3074_vm2, %v2925_v23  ;;  %v10552_v9 = vor.u32 %v11031_v54, %v10551_v47  ;;  %v2927_v51 = vpop.permute.xlu0 %2926  ;;  %v3850_v23 = vld [vmem:[#allocation2 + $0xf4] sm:$0xf]  ;;  %v2566_v47 = vshll.u32 %v2071_v48, 16  ;;  %v2563_v54 = vor.u32 %v2562_v50, %v2558_v43  ;;  %v10363_v50 = vrot.slane %v3193_v11, 9 }
 0x429   :  { %3772 = vst.msk [vmem:[#allocation3 + $0xfc] sm:$0xf] %vm3750_vm4, %v3601_v18 }
 0x42a   :  { %4157 = vst.msk [vmem:[#allocation3 + $0xfc] sm:$0xf] %vm4135_vm8, %v14471_v38  ;;  %8814 = vmatmul.bf16.gmra.mxu1 %v10552_v9  ;;  %v2073_v38 = vld [vmem:[#allocation2 + $0x100] sm:$0xf]  ;;  %v2577_v9 = vor.u32 %v2576_v2, %v2573_v63  ;;  %v2568_v28 = vrot.slane %v2566_v47, 5  ;;  %v3463_v36 = vsel %vm11416_vm15, %v10363_v50, %v3462_v15 }
 0x42b   :  { %3097 = vst.msk [vmem:[#allocation3 + $0x108] sm:$0xf] %vm3074_vm2, %v2927_v51  ;;  %v2564_v51 = vrot.slane %v2563_v54, 4  ;;  %v2584_v11 = vshrl.u32 %v2073_v38, 16  ;;  %v3198_v15 = vld [vmem:[#allocation2 + $0x104] sm:$0x1] }
 0x42c   :  { %3773 = vst.msk [vmem:[#allocation3 + $0x108] sm:$0xf] %vm3750_vm4, %v3603_v4  ;;  %4013 = vrot.lane.b32.xlu2 %v3850_v23, %s11160_s25  ;;  %v2580_v23 = vshll.u32 %v2073_v38, 16  ;;  %v2578_v63 = vrot.slane %v2577_v9, 4 }
 0x42d   :  { %v9108_v18 = vpop.f32.mrf.mxu2  ;;  %4011 = vrot.lane.b32.xlu1 %v3849_v41, %s11160_s25  ;;  %3632 = vrot.lane.b32.xlu0 %v3466_v7, %s11159_s1  ;;  %v2569_v47 = vsel %vm11407_vm14, %v2564_v51, %v2568_v28  ;;  %v2075_v7 = vld [vmem:[#allocation2 + $0x108] sm:$0xf] }
 0x42e   :  { %v9109_v48 = vadd.f32 %v9108_v18, %v8940_v19  ;;  %v3607_v41 = vpop.permute.xlu2 %3606  ;;  %v2582_v54 = vrot.slane %v2580_v23, 5  ;;  %v14541_v18 = vld [vmem:[%s15944_s6] ss:$0 sm:$0xff]  ;;  %v2598_v51 = vshll.u32 %v2075_v7, 16  ;;  %v2074_v19 = vld [vmem:[#allocation2 + $0x104] sm:$0x1] }
 0x42f   :  { %v8777_v4 = vpop.f32.mrf.mxu1  ;;  %v3984_v43 = vpop.permute.xlu1 %3983 }
 0x430   :  { %4156 = vst.msk [vmem:[#allocation3 + $0xf0] sm:$0xf] %vm4135_vm8, %v3984_v43  ;;  %v3605_v16 = vpop.permute.xlu0 %3604  ;;  %v9272_v2 = vmul.f32 %v14527_v29, %v9109_v48  ;;  %v2583_v49 = vsel %vm11407_vm14, %v2578_v63, %v2582_v54  ;;  %v2595_v48 = vshrl.u32 %v2075_v7, 16 }
 0x431   :  { %v11034_v50 = vld [vmem:[#allocation3 + $0xf8] sm:$0xf0] }
 0x432   :  { %v9340_v28 = vadd.f32 %v14541_v18, %v9272_v2  ;;  %v2597_v1 = vrot.slane %v2595_v48, 4  ;;  %v16044_v2 = vrot.slane %v14533_v62, 5  ;;  %v2590_v48 = vshll.u32 %v2074_v19, 16 }
 0x434   :  { %3630 = vrot.lane.b32.xlu2 %v3463_v36, %s11159_s1  ;;  %v2586_v36 = vrot.slane %v2584_v11, 4  ;;  %v8945_v11 = vadd.f32 %v12923_v24, %v14503_v42 }
 0x435   :  { %v9110_v55 = vpop.f32.mrf.mxu2  ;;  %2956 = vrot.lane.b32.xlu1 %v2569_v47, %s11161_s26  ;;  %2958 = vrot.lane.b32.xlu0 %v2583_v49, %s11161_s26  ;;  %v8947_v47 = vadd.f32 %v12968_v6, %v8777_v4  ;;  %v2600_v49 = vrot.slane %v2598_v51, 5  ;;  %v3851_v6 = vld [vmem:[#allocation2 + $0xfc] sm:$0xf]  ;;  %v9404_v4 = vmax.f32 %v9340_v28, 0.0  ;;  %v2076_v51 = vld [vmem:[#allocation2 + $0x10c] sm:$0xf] }
 0x436   :  { %v9111_v31 = vadd.f32 %v9110_v55, %v8942_v8  ;;  %v14554_v8 = vpop.permute.xlu2 %3993  ;;  %v9114_v28 = vadd.f32 %v12484_v14, %v8945_v11  ;;  %v14580_v11 = vld [vmem:[#allocation2 + $0x10c] sm:$0xf] }
 0x437   :  { %v14548_v9 = vpop.f32.mrf.mxu1  ;;  %v2929_v38 = vpop.permute.xlu1 %2928  ;;  %v10563_v43 = vld [vmem:[#allocation3 + $0xf0] sm:$0xf] }
 0x438   :  { %v9273_v23 = vmul.f32 %v14527_v29, %v9111_v31  ;;  %3098 = vst.msk [vmem:[#allocation3 + $0x114] sm:$0xf] %vm3074_vm2, %v2929_v38  ;;  %v10564_v63 = vor.u32 %v11034_v50, %v10563_v43  ;;  %v2931_v55 = vpop.permute.xlu0 %2930  ;;  %v3471_v31 = vrot.slane %v16044_v2, 4  ;;  %v3472_v38 = vrot.slane %v3198_v15, 5  ;;  %v3196_v15 = vld [vmem:[#allocation2 + $0xfc] sm:$0xe] }
 0x439   :  { %3774 = vst.msk [vmem:[#allocation3 + $0x114] sm:$0xf] %vm3750_vm4, %v3605_v16  ;;  %v3852_v16 = vld [vmem:[#allocation2 + $0x100] sm:$0xf]  ;;  %v2587_v50 = vor.u32 %v2586_v36, %v2582_v54  ;;  %v10364_v36 = vrot.slane %v3196_v15, 9 }
 0x43a   :  { %v9341_v7 = vadd.f32 %v14541_v18, %v9273_v23  ;;  %4159 = vst.msk [vmem:[#allocation3 + $0x114] sm:$0xf] %vm4135_vm8, %v14507_v46  ;;  %8819 = vmatmul.bf16.gmra.mxu1 %v10564_v63  ;;  %v9116_v46 = vadd.f32 %v12523_v44, %v8947_v47  ;;  %v2601_v23 = vor.u32 %v2600_v49, %v2597_v1  ;;  %v1921_v63 = vld [vmem:[#allocation2 + $0xe4] sm:$0xf]  ;;  %v1922_v44 = vld [vmem:[#allocation2 + $0xe8] sm:$0xf] }
 0x43b   :  { %3099 = vst.msk [vmem:[#allocation3 + $0x120] sm:$0xf] %vm3074_vm2, %v2931_v55  ;;  %v3473_v42 = vsel %vm11416_vm15, %v3471_v31, %v3472_v38  ;;  %v2588_v54 = vrot.slane %v2587_v50, 4  ;;  %v2592_v1 = vrot.slane %v2590_v48, 5  ;;  %v2604_v47 = vshll.u32 %v2076_v51, 16 }
 0x43c   :  { %v9405_v43 = vmax.f32 %v9341_v7, 0.0  ;;  %3775 = vst.msk [vmem:[#allocation3 + $0x120] sm:$0xf] %vm3750_vm4, %v3607_v41  ;;  %4017 = vrot.lane.b32.xlu2 %v3852_v16, %s11160_s25  ;;  %v9275_v49 = vmul.f32 %v14527_v29, %v9116_v46  ;;  %v2602_v14 = vrot.slane %v2601_v23, 4  ;;  %v1927_v2 = vld [vmem:[#allocation2 + $0x108] sm:$0xf]  ;;  %v9274_v38 = vmul.f32 %v14527_v29, %v9114_v28 }
 0x43d   :  { %4015 = vrot.lane.b32.xlu1 %v3851_v6, %s11160_s25  ;;  %3636 = vrot.lane.b32.xlu0 %v3473_v42, %s11159_s1  ;;  %1985 = vst.msk [vmem:[#allocation3 + $0x198] sm:$0xf] %vm742_vm6, %v1921_v63  ;;  %v1928_v31 = vld [vmem:[#allocation2 + $0x10c] sm:$0xf]  ;;  %v2593_v6 = vsel %vm11407_vm14, %v2588_v54, %v2592_v1  ;;  %v16045_v16 = vrot.slane %v14533_v62, 5  ;;  %v2608_v50 = vshrl.u32 %v2076_v51, 16 }
 0x43e   :  { %v9468_v24 = vpack.c.bf16 %v9405_v43, %v9404_v4  ;;  %v3611_v19 = vpop.permute.xlu2 %3610  ;;  %1986 = vst.msk [vmem:[#allocation3 + $0x1a4] sm:$0xf] %vm742_vm6, %v1922_v44  ;;  %v2606_v43 = vrot.slane %v2604_v47, 5  ;;  %v9343_v48 = vadd.f32 %v14541_v18, %v9275_v49  ;;  %v3201_v15 = vld [vmem:[#allocation2 + $0x110] sm:$0x1]  ;;  %v3476_v23 = vrot.slane %v14580_v11, 5 }
 0x43f   :  { %v8782_v55 = vpop.f32.mrf.mxu1  ;;  %v3988_v41 = vpop.permute.xlu1 %3987  ;;  %1991 = vst.msk [vmem:[#allocation3 + $0x1e0] sm:$0xf] %vm742_vm6, %v1927_v2  ;;  %v3470_v4 = vsel %vm11416_vm15, %v10364_v36, %v16045_v16  ;;  %v2078_v62 = vld [vmem:[#allocation2 + $0x114] sm:$0xf]  ;;  %v9342_v1 = vadd.f32 %v14541_v18, %v9274_v38  ;;  %v2610_v36 = vrot.slane %v2608_v50, 4  ;;  %v8950_v38 = vadd.f32 %v13004_v33, %v14548_v9 }
 0x440   :  { %4158 = vst.msk [vmem:[#allocation3 + $0x108] sm:$0xf] %vm4135_vm8, %v3988_v41  ;;  %10937 = vmatmul.msk.bf16.vlgmr.msrb.gmra.mxu0 %vm276_vm0, %v9468_v24  ;;  %v3609_v7 = vpop.permute.xlu0 %3608  ;;  %v2607_v46 = vsel %vm11407_vm14, %v2602_v14, %v2606_v43  ;;  %v2619_v28 = vshrl.u32 %v2078_v62, 16  ;;  %v2622_v41 = vshll.u32 %v2078_v62, 16  ;;  %v8952_v47 = vadd.f32 %v13039_v10, %v8782_v55  ;;  %v2077_v2 = vld [vmem:[#allocation2 + $0x110] sm:$0x1] }
 0x441   :  { %1992 = vst.msk [vmem:[#allocation3 + $0x1ec] sm:$0xf] %vm742_vm6, %v1928_v31  ;;  %v11037_v51 = vld [vmem:[#allocation3 + $0x110] sm:$0xf0]  ;;  %v9407_v49 = vmax.f32 %v9343_v48, 0.0  ;;  %v3478_v31 = vrot.slane %v3476_v23, 4 }
 0x442   :  { %v2621_v16 = vrot.slane %v2619_v28, 4  ;;  %v3853_v50 = vld [vmem:[#allocation2 + $0x108] sm:$0xf]  ;;  %v9406_v10 = vmax.f32 %v9342_v1, 0.0  ;;  %v3854_v55 = vld [vmem:[#allocation2 + $0x10c] sm:$0xf] }
 0x443   :  { %v2614_v48 = vshll.u32 %v2077_v2, 16 }
 0x444   :  { %3634 = vrot.lane.b32.xlu2 %v3470_v4, %s11159_s1  ;;  %v2624_v4 = vrot.slane %v2622_v41, 5  ;;  %v9469_v62 = vpack.c.bf16 %v9407_v49, %v9406_v10 }
 0x445   :  { %2960 = vrot.lane.b32.xlu1 %v2593_v6, %s11161_s26  ;;  %2962 = vrot.lane.b32.xlu0 %v2607_v46, %s11161_s26  ;;  %v3479_v6 = vrot.slane %v3201_v15, 5  ;;  %v3199_v46 = vld [vmem:[#allocation2 + $0x108] sm:$0xe]  ;;  %v2079_v15 = vld [vmem:[#allocation2 + $0x118] sm:$0xf]  ;;  %v2616_v28 = vrot.slane %v2614_v48, 5 }
 0x446   :  { %v14600_v54 = vpop.permute.xlu2 %3997  ;;  %v2625_v9 = vor.u32 %v2624_v4, %v2621_v16  ;;  %v2628_v1 = vshll.u32 %v2079_v15, 16  ;;  %v2632_v16 = vshrl.u32 %v2079_v15, 16 }
 0x447   :  { %v14596_v24 = vpop.f32.mrf.mxu1  ;;  %v2933_v42 = vpop.permute.xlu1 %2932  ;;  %v10575_v63 = vld [vmem:[#allocation3 + $0x108] sm:$0xf]  ;;  %v3480_v33 = vsel %vm11416_vm15, %v3478_v31, %v3479_v6 }
 0x448   :  { %3100 = vst.msk [vmem:[#allocation3 + $0x12c] sm:$0xf] %vm3074_vm2, %v2933_v42  ;;  %v10576_v44 = vor.u32 %v11037_v51, %v10575_v63  ;;  %v2935_v14 = vpop.permute.xlu0 %2934  ;;  %v1929_v42 = vld [vmem:[#allocation2 + $0x114] sm:$0xf]  ;;  %v1930_v63 = vld [vmem:[#allocation2 + $0x118] sm:$0xf] }
 0x449   :  { %3776 = vst.msk [vmem:[#allocation3 + $0x12c] sm:$0xf] %vm3750_vm4, %v3609_v7  ;;  %v2611_v7 = vor.u32 %v2610_v36, %v2606_v43  ;;  %v2630_v6 = vrot.slane %v2628_v1, 5 }
 0x44a   :  { %4161 = vst.msk [vmem:[#allocation3 + $0x12c] sm:$0xf] %vm4135_vm8, %v14554_v8  ;;  %8824 = vmatmul.bf16.gmra.mxu1 %v10576_v44  ;;  %v9121_v8 = vadd.f32 %v12590_v39, %v8952_v47  ;;  %v10365_v44 = vrot.slane %v3199_v46, 9 }
 0x44b   :  { %3101 = vst.msk [vmem:[#allocation3 + $0x138] sm:$0xf] %vm3074_vm2, %v2935_v14  ;;  %v2612_v39 = vrot.slane %v2611_v7, 4  ;;  %v14626_v14 = vld [vmem:[#allocation2 + $0x118] sm:$0xf] }
 0x44c   :  { %3777 = vst.msk [vmem:[#allocation3 + $0x138] sm:$0xf] %vm3750_vm4, %v3611_v19  ;;  %4021 = vrot.lane.b32.xlu2 %v3854_v55, %s11160_s25  ;;  %v9119_v19 = vadd.f32 %v12558_v21, %v8950_v38  ;;  %v9277_v36 = vmul.f32 %v14527_v29, %v9121_v8  ;;  %v2626_v21 = vrot.slane %v2625_v9, 4  ;;  %v3477_v31 = vsel %vm11416_vm15, %v10365_v44, %v3476_v23  ;;  %v2081_v55 = vld [vmem:[#allocation2 + $0x120] sm:$0xf] }
 0x44d   :  { %4019 = vrot.lane.b32.xlu1 %v3853_v50, %s11160_s25  ;;  %3640 = vrot.lane.b32.xlu0 %v3480_v33, %s11159_s1  ;;  %1993 = vst.msk [vmem:[#allocation3 + $0x1f8] sm:$0xf] %vm742_vm6, %v1929_v42  ;;  %v2617_v2 = vsel %vm11407_vm14, %v2612_v39, %v2616_v28  ;;  %v3204_v50 = vld [vmem:[#allocation2 + $0x11c] sm:$0x1]  ;;  %v3483_v10 = vrot.slane %v14626_v14, 5  ;;  %v2643_v8 = vshrl.u32 %v2081_v55, 16 }
 0x44e   :  { %v3615_v41 = vpop.permute.xlu2 %3614  ;;  %1994 = vst.msk [vmem:[#allocation3 + $0x204] sm:$0xf] %vm742_vm6, %v1930_v63  ;;  %v9276_v49 = vmul.f32 %v14527_v29, %v9119_v19  ;;  %v9345_v4 = vadd.f32 %v14541_v18, %v9277_v36  ;;  %v2631_v38 = vsel %vm11407_vm14, %v2626_v21, %v2630_v6  ;;  %v2646_v46 = vshll.u32 %v2081_v55, 16  ;;  %v3855_v21 = vld [vmem:[#allocation2 + $0x114] sm:$0xf] }
 0x44f   :  { %v8787_v51 = vpop.f32.mrf.mxu1  ;;  %v3992_v43 = vpop.permute.xlu1 %3991  ;;  %v2634_v9 = vrot.slane %v2632_v16, 4  ;;  %v3485_v39 = vrot.slane %v3483_v10, 4  ;;  %v3486_v28 = vrot.slane %v3204_v50, 5  ;;  %v2645_v44 = vrot.slane %v2643_v8, 4 }
 0x450   :  { %4160 = vst.msk [vmem:[#allocation3 + $0x120] sm:$0xf] %vm4135_vm8, %v3992_v43  ;;  %10938 = vmatmul.msk.bf16.gmra.mxu0 %vm276_vm0, %v9469_v62  ;;  %v3613_v47 = vpop.permute.xlu0 %3612  ;;  %v9344_v33 = vadd.f32 %v14541_v18, %v9276_v49  ;;  %v8957_v42 = vadd.f32 %v13122_v35, %v8787_v51  ;;  %v9409_v63 = vmax.f32 %v9345_v4, 0.0  ;;  %v2080_v43 = vld [vmem:[#allocation2 + $0x11c] sm:$0x1]  ;;  %v2648_v1 = vrot.slane %v2646_v46, 5 }
 0x451   :  { %v11040_v23 = vld [vmem:[#allocation3 + $0x128] sm:$0xf0]  ;;  %v8955_v36 = vadd.f32 %v13085_v53, %v14596_v24  ;;  %v3856_v51 = vld [vmem:[#allocation2 + $0x118] sm:$0xf]  ;;  %v2638_v49 = vshll.u32 %v2080_v43, 16  ;;  %v3487_v53 = vsel %vm11416_vm15, %v3485_v39, %v3486_v28 }
 0x452   :  { %v9408_v35 = vmax.f32 %v9344_v33, 0.0  ;;  %v2649_v24 = vor.u32 %v2648_v1, %v2645_v44  ;;  %v1931_v4 = vld [vmem:[#allocation2 + $0x120] sm:$0xf]  ;;  %v3207_v44 = vld [vmem:[#allocation2 + $0x128] sm:$0x1] }
 0x453   :  { %1995 = vst.msk [vmem:[#allocation3 + $0x210] sm:$0xf] %vm742_vm6, %v1931_v4  ;;  %v2640_v55 = vrot.slane %v2638_v49, 5  ;;  %v2084_v1 = vld [vmem:[#allocation2 + $0x12c] sm:$0xf]  ;;  %v3493_v4 = vrot.slane %v3207_v44, 5 }
 0x454   :  { %3638 = vrot.lane.b32.xlu2 %v3477_v31, %s11159_s1  ;;  %v2082_v31 = vld [vmem:[#allocation2 + $0x124] sm:$0xf]  ;;  %v9470_v16 = vpack.c.bf16 %v9409_v63, %v9408_v35 }
 0x455   :  { %2964 = vrot.lane.b32.xlu1 %v2617_v2, %s11161_s26  ;;  %2966 = vrot.lane.b32.xlu0 %v2631_v38, %s11161_s26  ;;  %v3202_v2 = vld [vmem:[#allocation2 + $0x114] sm:$0xe]  ;;  %v1932_v38 = vld [vmem:[#allocation2 + $0x124] sm:$0xf] }
 0x456   :  { %v14644_v62 = vpop.permute.xlu2 %4001  ;;  %1996 = vst.msk [vmem:[#allocation3 + $0x21c] sm:$0xf] %vm742_vm6, %v1932_v38 }
 0x457   :  { %v14640_v7 = vpop.f32.mrf.mxu1  ;;  %v2937_v11 = vpop.permute.xlu1 %2936  ;;  %v10587_v48 = vld [vmem:[#allocation3 + $0x120] sm:$0xf] }
 0x458   :  { %3102 = vst.msk [vmem:[#allocation3 + $0x144] sm:$0xf] %vm3074_vm2, %v2937_v11  ;;  %v10588_v15 = vor.u32 %v11040_v23, %v10587_v48  ;;  %v2939_v19 = vpop.permute.xlu0 %2938  ;;  %v10366_v48 = vrot.slane %v3202_v2, 9  ;;  %v2652_v23 = vshll.u32 %v2082_v31, 16  ;;  %v2083_v2 = vld [vmem:[#allocation2 + $0x128] sm:$0x1] }
 0x459   :  { %3778 = vst.msk [vmem:[#allocation3 + $0x144] sm:$0xf] %vm3750_vm4, %v3613_v47  ;;  %v2635_v47 = vor.u32 %v2634_v9, %v2630_v6 }
 0x45a   :  { %4163 = vst.msk [vmem:[#allocation3 + $0x144] sm:$0xf] %vm4135_vm8, %v14600_v54  ;;  %8829 = vmatmul.bf16.gmra.mxu1 %v10588_v15  ;;  %v9126_v54 = vadd.f32 %v12663_v58, %v8957_v42  ;;  %v14669_v15 = vld [vmem:[#allocation2 + $0x124] sm:$0xf]  ;;  %v3484_v42 = vsel %vm11416_vm15, %v10366_v48, %v3483_v10  ;;  %v2654_v63 = vrot.slane %v2652_v23, 5  ;;  %v8960_v48 = vadd.f32 %v13154_v61, %v14640_v7 }
 0x45b   :  { %3103 = vst.msk [vmem:[#allocation3 + $0x150] sm:$0xf] %vm3074_vm2, %v2939_v19  ;;  %v2636_v58 = vrot.slane %v2635_v47, 4  ;;  %v2656_v19 = vshrl.u32 %v2082_v31, 16  ;;  %v3490_v39 = vrot.slane %v14669_v15, 5  ;;  %v2670_v47 = vshll.u32 %v2084_v1, 16 }
 0x45c   :  { %3779 = vst.msk [vmem:[#allocation3 + $0x150] sm:$0xf] %vm3750_vm4, %v3615_v41  ;;  %4025 = vrot.lane.b32.xlu2 %v3856_v51, %s11160_s25  ;;  %v9124_v41 = vadd.f32 %v12630_v3, %v8955_v36  ;;  %v9279_v8 = vmul.f32 %v14527_v29, %v9126_v54  ;;  %v2650_v3 = vrot.slane %v2649_v24, 4  ;;  %v2667_v51 = vshrl.u32 %v2084_v1, 16  ;;  %v3857_v23 = vld [vmem:[#allocation2 + $0x120] sm:$0xf] }
 0x45d   :  { %4023 = vrot.lane.b32.xlu1 %v3855_v21, %s11160_s25  ;;  %3644 = vrot.lane.b32.xlu0 %v3487_v53, %s11159_s1  ;;  %v2641_v9 = vsel %vm11407_vm14, %v2636_v58, %v2640_v55  ;;  %v2658_v31 = vrot.slane %v2656_v19, 4  ;;  %v3492_v24 = vrot.slane %v3490_v39, 4  ;;  %v1919_v58 = vld [vmem:[#allocation2 + $0xd8] sm:$0xf]  ;;  %v1920_v1 = vld [vmem:[#allocation2 + $0xdc] sm:$0xf] }
 0x45e   :  { %v3619_v11 = vpop.permute.xlu2 %3618  ;;  %v9278_v33 = vmul.f32 %v14527_v29, %v9124_v41  ;;  %v9347_v43 = vadd.f32 %v14541_v18, %v9279_v8  ;;  %v2655_v28 = vsel %vm11407_vm14, %v2650_v3, %v2654_v63  ;;  %v2669_v41 = vrot.slane %v2667_v51, 4  ;;  %1983 = vst.msk [vmem:[#allocation3 + $0x180] sm:$0xf] %vm742_vm6, %v1919_v58  ;;  %v14715_v51 = vld [vmem:[#allocation2 + $0x130] sm:$0xf] }
 0x45f   :  { %v8792_v50 = vpop.f32.mrf.mxu1  ;;  %v3996_v6 = vpop.permute.xlu1 %3995  ;;  %v2662_v8 = vshll.u32 %v2083_v2, 16  ;;  %v2659_v3 = vor.u32 %v2658_v31, %v2654_v63  ;;  %v3494_v61 = vsel %vm11416_vm15, %v3492_v24, %v3493_v4  ;;  %1984 = vst.msk [vmem:[#allocation3 + $0x18c] sm:$0xf] %vm742_vm6, %v1920_v1  ;;  %v3497_v24 = vrot.slane %v14715_v51, 5 }
 0x460   :  { %4162 = vst.msk [vmem:[#allocation3 + $0x138] sm:$0xf] %vm4135_vm8, %v3996_v6  ;;  %10939 = vmatmul.msk.bf16.gmra.mxu0 %vm276_vm0, %v9470_v16  ;;  %v3617_v46 = vpop.permute.xlu0 %3616  ;;  %v9346_v14 = vadd.f32 %v14541_v18, %v9278_v33  ;;  %v9411_v16 = vmax.f32 %v9347_v43, 0.0  ;;  %v8962_v38 = vadd.f32 %v13189_v60, %v8792_v50  ;;  %v2672_v6 = vrot.slane %v2670_v47, 5  ;;  %v3205_v60 = vld [vmem:[#allocation2 + $0x120] sm:$0xe] }
 0x461   :  { %v11043_v35 = vld [vmem:[#allocation3 + $0x140] sm:$0xf0]  ;;  %v2664_v19 = vrot.slane %v2662_v8, 5  ;;  %v10367_v43 = vrot.slane %v3205_v60, 9 }
 0x462   :  { %v9410_v55 = vmax.f32 %v9346_v14, 0.0  ;;  %v9131_v50 = vadd.f32 %v12759_v40, %v8962_v38  ;;  %v2673_v7 = vor.u32 %v2672_v6, %v2669_v41  ;;  %v2660_v40 = vrot.slane %v2659_v3, 4 }
 0x464   :  { %3642 = vrot.lane.b32.xlu2 %v3484_v42, %s11159_s1  ;;  %v9471_v33 = vpack.c.bf16 %v9411_v16, %v9410_v55  ;;  %v2665_v47 = vsel %vm11407_vm14, %v2660_v40, %v2664_v19 }
 0x465   :  { %2968 = vrot.lane.b32.xlu1 %v2641_v9, %s11161_s26  ;;  %2970 = vrot.lane.b32.xlu0 %v2655_v28, %s11161_s26  ;;  %v1933_v9 = vld [vmem:[#allocation2 + $0x12c] sm:$0xf] }
 0x466   :  { %v14689_v54 = vpop.permute.xlu2 %4005  ;;  %1997 = vst.msk [vmem:[#allocation3 + $0x228] sm:$0xf] %vm742_vm6, %v1933_v9  ;;  %v3859_v9 = vld [vmem:[#allocation2 + $0x12c] sm:$0xf] }
 0x467   :  { %v14685_v36 = vpop.f32.mrf.mxu1  ;;  %v2941_v10 = vpop.permute.xlu1 %2940  ;;  %v10599_v21 = vld [vmem:[#allocation3 + $0x138] sm:$0xf] }
 0x468   :  { %3104 = vst.msk [vmem:[#allocation3 + $0x15c] sm:$0xf] %vm3074_vm2, %v2941_v10  ;;  %v10600_v49 = vor.u32 %v11043_v35, %v10599_v21  ;;  %v2943_v53 = vpop.permute.xlu0 %2942  ;;  %v2674_v10 = vrot.slane %v2673_v7, 4  ;;  %v1934_v21 = vld [vmem:[#allocation2 + $0x130] sm:$0xf]  ;;  %v8965_v7 = vadd.f32 %v13218_v27, %v14685_v36 }
 0x469   :  { %3780 = vst.msk [vmem:[#allocation3 + $0x15c] sm:$0xf] %vm3750_vm4, %v3617_v46  ;;  %v3858_v46 = vld [vmem:[#allocation2 + $0x124] sm:$0xf] }
 0x46a   :  { %4165 = vst.msk [vmem:[#allocation3 + $0x15c] sm:$0xf] %vm4135_vm8, %v14644_v62  ;;  %8834 = vmatmul.bf16.gmra.mxu1 %v10600_v49  ;;  %v2085_v62 = vld [vmem:[#allocation2 + $0x130] sm:$0xf]  ;;  %v3491_v49 = vsel %vm11416_vm15, %v10367_v43, %v3490_v39  ;;  %v3210_v39 = vld [vmem:[#allocation2 + $0x134] sm:$0x1] }
 0x46b   :  { %3105 = vst.msk [vmem:[#allocation3 + $0x168] sm:$0xf] %vm3074_vm2, %v2943_v53  ;;  %v2676_v44 = vshll.u32 %v2085_v62, 16  ;;  %v2680_v31 = vshrl.u32 %v2085_v62, 16  ;;  %v3860_v43 = vld [vmem:[#allocation2 + $0x130] sm:$0xf] }
 0x46c   :  { %3781 = vst.msk [vmem:[#allocation3 + $0x168] sm:$0xf] %vm3750_vm4, %v3619_v11  ;;  %4029 = vrot.lane.b32.xlu2 %v3858_v46, %s11160_s25  ;;  %v9129_v11 = vadd.f32 %v12703_v12, %v8960_v48  ;;  %v9281_v12 = vmul.f32 %v14527_v29, %v9131_v50  ;;  %v2086_v46 = vld [vmem:[#allocation2 + $0x134] sm:$0x1] }
 0x46d   :  { %4027 = vrot.lane.b32.xlu1 %v3857_v23, %s11160_s25  ;;  %3648 = vrot.lane.b32.xlu0 %v3494_v61, %s11159_s1  ;;  %1998 = vst.msk [vmem:[#allocation3 + $0x234] sm:$0xf] %vm742_vm6, %v1934_v21  ;;  %v2678_v2 = vrot.slane %v2676_v44, 5  ;;  %v2682_v48 = vrot.slane %v2680_v31, 4  ;;  %v2087_v23 = vld [vmem:[#allocation2 + $0x138] sm:$0xf] }
 0x46e   :  { %v3623_v28 = vpop.permute.xlu2 %3622  ;;  %v9280_v35 = vmul.f32 %v14527_v29, %v9129_v11  ;;  %v9349_v16 = vadd.f32 %v14541_v18, %v9281_v12  ;;  %v2691_v3 = vshrl.u32 %v2087_v23, 16  ;;  %v2694_v60 = vshll.u32 %v2087_v23, 16 }
 0x46f   :  { %v8797_v42 = vpop.f32.mrf.mxu1  ;;  %v4000_v63 = vpop.permute.xlu1 %3999  ;;  %v2679_v53 = vsel %vm11407_vm14, %v2674_v10, %v2678_v2  ;;  %v3500_v61 = vrot.slane %v3210_v39, 5  ;;  %v2683_v40 = vor.u32 %v2682_v48, %v2678_v2 }
 0x470   :  { %4164 = vst.msk [vmem:[#allocation3 + $0x150] sm:$0xf] %vm4135_vm8, %v4000_v63  ;;  %10940 = vmatmul.msk.bf16.gmra.mxu0 %vm276_vm0, %v9471_v33  ;;  %v3621_v14 = vpop.permute.xlu0 %3620  ;;  %v9348_v6 = vadd.f32 %v14541_v18, %v9280_v35  ;;  %v9413_v62 = vmax.f32 %v9349_v16, 0.0  ;;  %v8967_v50 = vadd.f32 %v13256_v34, %v8797_v42  ;;  %v3499_v33 = vrot.slane %v3497_v24, 4  ;;  %v2088_v42 = vld [vmem:[#allocation2 + $0x13c] sm:$0xf] }
 0x471   :  { %v11046_v41 = vld [vmem:[#allocation3 + $0x158] sm:$0xf0]  ;;  %v2693_v11 = vrot.slane %v2691_v3, 4  ;;  %v2696_v63 = vrot.slane %v2694_v60, 5  ;;  %v2686_v34 = vshll.u32 %v2086_v46, 16  ;;  %v2684_v10 = vrot.slane %v2683_v40, 4 }
 0x472   :  { %v9412_v19 = vmax.f32 %v9348_v6, 0.0  ;;  %v9136_v44 = vadd.f32 %v12856_v13, %v8967_v50  ;;  %v3501_v36 = vsel %vm11416_vm15, %v3499_v33, %v3500_v61  ;;  %v2700_v13 = vshll.u32 %v2088_v42, 16  ;;  %v2090_v50 = vld [vmem:[#allocation2 + $0x144] sm:$0xf]  ;;  %v2089_v61 = vld [vmem:[#allocation2 + $0x140] sm:$0x1] }
 0x473   :  { %v2697_v1 = vor.u32 %v2696_v63, %v2693_v11  ;;  %v2688_v21 = vrot.slane %v2686_v34, 5  ;;  %v3861_v34 = vld [vmem:[#allocation2 + $0x138] sm:$0xf] }
 0x474   :  { %3646 = vrot.lane.b32.xlu2 %v3491_v49, %s11159_s1  ;;  %v9472_v27 = vpack.c.bf16 %v9413_v62, %v9412_v19  ;;  %v9283_v49 = vmul.f32 %v14527_v29, %v9136_v44 }
 0x475   :  { %2972 = vrot.lane.b32.xlu1 %v2665_v47, %s11161_s26  ;;  %2974 = vrot.lane.b32.xlu0 %v2679_v53, %s11161_s26  ;;  %v2698_v2 = vrot.slane %v2697_v1, 4  ;;  %v2689_v16 = vsel %vm11407_vm14, %v2684_v10, %v2688_v21  ;;  %v2091_v1 = vld [vmem:[#allocation2 + $0x148] sm:$0xf] }
 0x476   :  { %v14735_v55 = vpop.permute.xlu2 %4009 }
 0x477   :  { %v14730_v4 = vpop.f32.mrf.mxu1  ;;  %v2945_v38 = vpop.permute.xlu1 %2944  ;;  %v10611_v15 = vld [vmem:[#allocation3 + $0x150] sm:$0xf] }
 0x478   :  { %3106 = vst.msk [vmem:[#allocation3 + $0x174] sm:$0xf] %vm3074_vm2, %v2945_v38  ;;  %v10612_v58 = vor.u32 %v11046_v41, %v10611_v15  ;;  %v2947_v8 = vpop.permute.xlu0 %2946  ;;  %v2702_v38 = vrot.slane %v2700_v13, 5  ;;  %v2704_v15 = vshrl.u32 %v2088_v42, 16  ;;  %v9351_v41 = vadd.f32 %v14541_v18, %v9283_v49 }
 0x479   :  { %3782 = vst.msk [vmem:[#allocation3 + $0x174] sm:$0xf] %vm3750_vm4, %v3621_v14  ;;  %v9134_v14 = vadd.f32 %v12809_v17, %v8965_v7  ;;  %v14756_v17 = vld [vmem:[#allocation2 + $0x13c] sm:$0xf]  ;;  %v2715_v7 = vshrl.u32 %v2090_v50, 16  ;;  %v8970_v40 = vadd.f32 %v13292_v25, %v14730_v4 }
 0x47a   :  { %4167 = vst.msk [vmem:[#allocation3 + $0x174] sm:$0xf] %vm4135_vm8, %v14689_v54  ;;  %8839 = vmatmul.bf16.gmra.mxu1 %v10612_v58  ;;  %v3208_v54 = vld [vmem:[#allocation2 + $0x12c] sm:$0xe]  ;;  %v2703_v39 = vsel %vm11407_vm14, %v2698_v2, %v2702_v38  ;;  %v3504_v6 = vrot.slane %v14756_v17, 5  ;;  %v2706_v62 = vrot.slane %v2704_v15, 4 }
 0x47b   :  { %3107 = vst.msk [vmem:[#allocation3 + $0x180] sm:$0xf] %vm3074_vm2, %v2947_v8  ;;  %v10368_v51 = vrot.slane %v3208_v54, 9  ;;  %v9282_v31 = vmul.f32 %v14527_v29, %v9134_v14  ;;  %v9415_v11 = vmax.f32 %v9351_v41, 0.0  ;;  %v2717_v54 = vrot.slane %v2715_v7, 4 }
 0x47c   :  { %3783 = vst.msk [vmem:[#allocation3 + $0x180] sm:$0xf] %vm3750_vm4, %v3623_v28  ;;  %4033 = vrot.lane.b32.xlu2 %v3860_v43, %s11160_s25  ;;  %v3506_v19 = vrot.slane %v3504_v6, 4  ;;  %v2728_v15 = vshrl.u32 %v2091_v1, 16 }
 0x47d   :  { %4031 = vrot.lane.b32.xlu1 %v3859_v9, %s11160_s25  ;;  %3652 = vrot.lane.b32.xlu0 %v3501_v36, %s11159_s1  ;;  %v3498_v53 = vsel %vm11416_vm15, %v10368_v51, %v3497_v24  ;;  %v3213_v24 = vld [vmem:[#allocation2 + $0x140] sm:$0x1]  ;;  %v9350_v46 = vadd.f32 %v14541_v18, %v9282_v31  ;;  %v2718_v9 = vshll.u32 %v2090_v50, 16  ;;  %v2707_v36 = vor.u32 %v2706_v62, %v2702_v38 }
 0x47e   :  { %v3627_v35 = vpop.permute.xlu2 %3626  ;;  %v3507_v43 = vrot.slane %v3213_v24, 5 }
 0x47f   :  { %v8802_v12 = vpop.f32.mrf.mxu1  ;;  %v4004_v28 = vpop.permute.xlu1 %4003  ;;  %v2720_v42 = vrot.slane %v2718_v9, 5  ;;  %v9414_v44 = vmax.f32 %v9350_v46, 0.0  ;;  %v2092_v9 = vld [vmem:[#allocation2 + $0x14c] sm:$0x1] }
 0x480   :  { %4166 = vst.msk [vmem:[#allocation3 + $0x168] sm:$0xf] %vm4135_vm8, %v4004_v28  ;;  %10941 = vmatmul.msk.bf16.gmra.mxu0 %vm276_vm0, %v9472_v27  ;;  %v3625_v47 = vpop.permute.xlu0 %3624  ;;  %v8972_v63 = vadd.f32 %v13321_v0, %v8802_v12  ;;  %v3862_v27 = vld [vmem:[#allocation2 + $0x13c] sm:$0xf]  ;;  %v2710_v0 = vshll.u32 %v2089_v61, 16  ;;  %v3508_v4 = vsel %vm11416_vm15, %v3506_v19, %v3507_v43  ;;  %v9139_v28 = vadd.f32 %v12900_v20, %v8970_v40 }
 0x481   :  { %v11049_v8 = vld [vmem:[#allocation3 + $0x170] sm:$0xf0]  ;;  %v9473_v25 = vpack.c.bf16 %v9415_v11, %v9414_v44  ;;  %v2721_v12 = vor.u32 %v2720_v42, %v2717_v54  ;;  %v14794_v20 = vld [vmem:[#allocation2 + $0x148] sm:$0xf]  ;;  %v2093_v61 = vld [vmem:[#allocation2 + $0x150] sm:$0xf] }
 0x482   :  { %v9141_v14 = vadd.f32 %v12937_v30, %v8972_v63  ;;  %v2712_v51 = vrot.slane %v2710_v0, 5  ;;  %v2724_v30 = vshll.u32 %v2091_v1, 16  ;;  %v9284_v17 = vmul.f32 %v14527_v29, %v9139_v28  ;;  %v16046_v43 = vld [vmem:[#allocation17_spill] sm:$0xff]  ;;  %v16047_v42 = vld [vmem:[#allocation15_spill] sm:$0xff] }
 0x483   :  { %v2722_v31 = vrot.slane %v2721_v12, 4  ;;  %v2739_v11 = vshrl.u32 %v2093_v61, 16  ;;  %v2742_v63 = vshll.u32 %v2093_v61, 16  ;;  %v3864_v1 = vld [vmem:[#allocation2 + $0x148] sm:$0xf]  ;;  %v16048_v12 = vld [vmem:[#allocation5_spill] sm:$0xff] }
 0x484   :  { %3650 = vrot.lane.b32.xlu2 %v3498_v53, %s11159_s1  ;;  %v9285_v2 = vmul.f32 %v14527_v29, %v9141_v14  ;;  %v2726_v38 = vrot.slane %v2724_v30, 5 }
 0x485   :  { %2976 = vrot.lane.b32.xlu1 %v2689_v16, %s11161_s26  ;;  %2978 = vrot.lane.b32.xlu0 %v2703_v39, %s11161_s26  ;;  %v2744_v0 = vrot.slane %v2742_v63, 5 }
 0x486   :  { %v14773_v60 = vpop.permute.xlu2 %4013  ;;  %v9353_v41 = vadd.f32 %v14541_v18, %v9285_v2  ;;  %v2727_v39 = vsel %vm11407_vm14, %v2722_v31, %v2726_v38 }
 0x487   :  { %v14768_v58 = vpop.f32.mrf.mxu1  ;;  %v2949_v48 = vpop.permute.xlu1 %2948  ;;  %v10623_v23 = vld [vmem:[#allocation3 + $0x168] sm:$0xf] }
 0x488   :  { %3108 = vst.msk [vmem:[#allocation3 + $0x18c] sm:$0xf] %vm3074_vm2, %v2949_v48  ;;  %v10624_v3 = vor.u32 %v11049_v8, %v10623_v23  ;;  %v2951_v33 = vpop.permute.xlu0 %2950  ;;  %v3511_v48 = vrot.slane %v14794_v20, 5  ;;  %v9417_v19 = vmax.f32 %v9353_v41, 0.0  ;;  %v8975_v44 = vadd.f32 %v16047_v42, %v14768_v58  ;;  %v1935_v41 = vld [vmem:[#allocation2 + $0x138] sm:$0xf] }
 0x489   :  { %3784 = vst.msk [vmem:[#allocation3 + $0x18c] sm:$0xf] %vm3750_vm4, %v3625_v47 }
 0x48a   :  { %4169 = vst.msk [vmem:[#allocation3 + $0x18c] sm:$0xf] %vm4135_vm8, %v14735_v55  ;;  %8844 = vmatmul.bf16.gmra.mxu1 %v10624_v3  ;;  %v3211_v55 = vld [vmem:[#allocation2 + $0x138] sm:$0xe]  ;;  %v9352_v3 = vadd.f32 %v14541_v18, %v9284_v17 }
 0x48b   :  { %3109 = vst.msk [vmem:[#allocation3 + $0x198] sm:$0xf] %vm3074_vm2, %v2951_v33  ;;  %v10369_v47 = vrot.slane %v3211_v55, 9  ;;  %v2730_v33 = vrot.slane %v2728_v15, 4  ;;  %v14832_v15 = vld [vmem:[#allocation2 + $0x154] sm:$0xf] }
 0x48c   :  { %3785 = vst.msk [vmem:[#allocation3 + $0x198] sm:$0xf] %vm3750_vm4, %v3627_v35  ;;  %4037 = vrot.lane.b32.xlu2 %v3862_v27, %s11160_s25  ;;  %v2708_v35 = vrot.slane %v2707_v36, 4  ;;  %v3863_v27 = vld [vmem:[#allocation2 + $0x144] sm:$0xf]  ;;  %v2741_v36 = vrot.slane %v2739_v11, 4 }
 0x48d   :  { %4035 = vrot.lane.b32.xlu1 %v3861_v34, %s11160_s25  ;;  %3656 = vrot.lane.b32.xlu0 %v3508_v4, %s11159_s1  ;;  %v3505_v53 = vsel %vm11416_vm15, %v10369_v47, %v3504_v6  ;;  %v3216_v6 = vld [vmem:[#allocation2 + $0x14c] sm:$0x1]  ;;  %v3513_v34 = vrot.slane %v3511_v48, 4  ;;  %v9416_v55 = vmax.f32 %v9352_v3, 0.0  ;;  %v2731_v14 = vor.u32 %v2730_v33, %v2726_v38  ;;  %v2094_v4 = vld [vmem:[#allocation2 + $0x154] sm:$0xf] }
 0x48e   :  { %v3631_v13 = vpop.permute.xlu2 %3630  ;;  %v2713_v16 = vsel %vm11407_vm14, %v2708_v35, %v2712_v51  ;;  %v3514_v54 = vrot.slane %v3216_v6, 5  ;;  %v16049_v35 = vld [vmem:[#allocation4_spill] sm:$0xff]  ;;  %v2748_v17 = vshll.u32 %v2094_v4, 16  ;;  %v2752_v6 = vshrl.u32 %v2094_v4, 16  ;;  %1999 = vst.msk [vmem:[#allocation3 + $0x240] sm:$0xf] %vm742_vm6, %v1935_v41 }
 0x48f   :  { %v8807_v10 = vpop.f32.mrf.mxu1  ;;  %v4008_v21 = vpop.permute.xlu1 %4007  ;;  %v9474_v58 = vpack.c.bf16 %v9417_v19, %v9416_v55  ;;  %v9144_v51 = vadd.f32 %v16049_v35, %v8975_v44  ;;  %v2732_v30 = vrot.slane %v2731_v14, 4  ;;  %v16052_v35 = vld [vmem:[#allocation7_spill] sm:$0xff] }
 0x490   :  { %4168 = vst.msk [vmem:[#allocation3 + $0x180] sm:$0xf] %vm4135_vm8, %v4008_v21  ;;  %10942 = vmatmul.msk.bf16.gmra.mxu0 %vm276_vm0, %v9473_v25  ;;  %v3629_v49 = vpop.permute.xlu0 %3628  ;;  %v8977_v40 = vadd.f32 %v16046_v43, %v8807_v10  ;;  %v2734_v25 = vshll.u32 %v2092_v9, 16  ;;  %v3515_v10 = vsel %vm11416_vm15, %v3513_v34, %v3514_v54  ;;  %v2745_v21 = vor.u32 %v2744_v0, %v2741_v36  ;;  %v3219_v9 = vld [vmem:[#allocation2 + $0x158] sm:$0x1]  ;;  %v16050_v36 = vld [vmem:[#allocation20_spill] sm:$0xff] }
 0x491   :  { %v11052_v46 = vld [vmem:[#allocation3 + $0x188] sm:$0xf0]  ;;  %v9286_v38 = vmul.f32 %v14527_v29, %v9144_v51  ;;  %v2754_v43 = vrot.slane %v2752_v6, 4  ;;  %v2095_v54 = vld [vmem:[#allocation2 + $0x158] sm:$0x1]  ;;  %v3521_v55 = vrot.slane %v3219_v9, 5 }
 0x492   :  { %v9146_v28 = vadd.f32 %v16048_v12, %v8977_v40  ;;  %v2096_v40 = vld [vmem:[#allocation2 + $0x15c] sm:$0xf]  ;;  %v14879_v6 = vld [vmem:[#allocation2 + $0x160] sm:$0xf] }
 0x493   :  { %v9354_v11 = vadd.f32 %v14541_v18, %v9286_v38  ;;  %v2763_v42 = vshrl.u32 %v2096_v40, 16  ;;  %v2766_v44 = vshll.u32 %v2096_v40, 16  ;;  %v2098_v40 = vld [vmem:[#allocation2 + $0x164] sm:$0x1] }
 0x494   :  { %3654 = vrot.lane.b32.xlu2 %v3505_v53, %s11159_s1  ;;  %v2746_v53 = vrot.slane %v2745_v21, 4  ;;  %v2097_v21 = vld [vmem:[#allocation2 + $0x160] sm:$0xf] }
 0x495   :  { %2980 = vrot.lane.b32.xlu1 %v2713_v16, %s11161_s26  ;;  %2982 = vrot.lane.b32.xlu0 %v2727_v39, %s11161_s26  ;;  %v9287_v16 = vmul.f32 %v14527_v29, %v9146_v28  ;;  %v1936_v39 = vld [vmem:[#allocation2 + $0x13c] sm:$0xf]  ;;  %v2768_v4 = vrot.slane %v2766_v44, 5  ;;  %v9418_v12 = vmax.f32 %v9354_v11, 0.0  ;;  %v3866_v28 = vld [vmem:[#allocation2 + $0x154] sm:$0xf] }
 0x496   :  { %v14811_v50 = vpop.permute.xlu2 %4017  ;;  %2000 = vst.msk [vmem:[#allocation3 + $0x24c] sm:$0xf] %vm742_vm6, %v1936_v39  ;;  %v2772_v38 = vshll.u32 %v2097_v21, 16  ;;  %v14875_v39 = vld [vmem:[%s15943_s5] ss:$0 sm:$0xff]  ;;  %v2776_v9 = vshrl.u32 %v2097_v21, 16 }
 0x497   :  { %v14806_v23 = vpop.f32.mrf.mxu1  ;;  %v2953_v8 = vpop.permute.xlu1 %2952  ;;  %v10635_v24 = vld [vmem:[#allocation3 + $0x180] sm:$0xf]  ;;  %v9355_v29 = vadd.f32 %v14541_v18, %v9287_v16  ;;  %v16054_v11 = vld [vmem:[#allocation22_spill] sm:$0xff] }
 0x498   :  { %3110 = vst.msk [vmem:[#allocation3 + $0x1a4] sm:$0xf] %vm3074_vm2, %v2953_v8  ;;  %v10636_v62 = vor.u32 %v11052_v46, %v10635_v24  ;;  %v2955_v7 = vpop.permute.xlu0 %2954  ;;  %v2750_v46 = vrot.slane %v2748_v17, 5  ;;  %v14925_v21 = vld [vmem:[%s15940_s0] sm:$0xff]  }
 0x499   :  { %3786 = vst.msk [vmem:[#allocation3 + $0x1a4] sm:$0xf] %vm3750_vm4, %v3629_v49  ;;  %v2736_v49 = vrot.slane %v2734_v25, 5  ;;  %v3865_v25 = vld [vmem:[#allocation2 + $0x150] sm:$0xf] }
 0x49a   :  { %4171 = vst.msk [vmem:[#allocation3 + $0x1a4] sm:$0xf] %vm4135_vm8, %v14773_v60  ;;  %8849 = vmatmul.bf16.gmra.mxu1 %v10636_v62  ;;  %v3214_v60 = vld [vmem:[#allocation2 + $0x144] sm:$0xe]  ;;  %v2751_v3 = vsel %vm11407_vm14, %v2746_v53, %v2750_v46  ;;  %v3518_v62 = vrot.slane %v14832_v15, 5 }
 0x49b   :  { %3111 = vst.msk [vmem:[#allocation3 + $0x1b0] sm:$0xf] %vm3074_vm2, %v2955_v7  ;;  %v10370_v31 = vrot.slane %v3214_v60, 9  ;;  %v2737_v8 = vsel %vm11407_vm14, %v2732_v30, %v2736_v49  ;;  %v2765_v60 = vrot.slane %v2763_v42, 4  ;;  %v16053_v30 = vld [vmem:[#allocation6_spill] sm:$0xff] }
 0x49c   :  { %3787 = vst.msk [vmem:[#allocation3 + $0x1b0] sm:$0xf] %vm3750_vm4, %v3631_v13  ;;  %4041 = vrot.lane.b32.xlu2 %v3864_v1, %s11160_s25  ;;  %v3520_v18 = vrot.slane %v3518_v62, 4  ;;  %v16051_v1 = vld [vmem:[#allocation19_spill] sm:$0xff]  ;;  %v14898_v15 = vld [vmem:[%s15944_s6] ss:$0 sm:$0xff] }
 0x49d   :  { %4039 = vrot.lane.b32.xlu1 %v3863_v27, %s11160_s25  ;;  %3660 = vrot.lane.b32.xlu0 %v3515_v10, %s11159_s1  ;;  %v3512_v24 = vsel %vm11416_vm15, %v10370_v31, %v3511_v48  ;;  %v9419_v27 = vmax.f32 %v9355_v29, 0.0  ;;  %v8980_v14 = vadd.f32 %v16051_v1, %v14806_v23  ;;  %v2758_v10 = vshll.u32 %v2095_v54, 16  ;;  %v1937_v29 = vld [vmem:[#allocation2 + $0x144] sm:$0xf]  ;;  %v2099_v1 = vld [vmem:[#allocation2 + $0x168] sm:$0xf] }
 0x49e   :  { %v3635_v2 = vpop.permute.xlu2 %3634  ;;  %2001 = vst.msk [vmem:[#allocation3 + $0x258] sm:$0xf] %vm742_vm6, %v1937_v29 }
 0x49f   :  { %v8812_v47 = vpop.f32.mrf.mxu1  ;;  %v4012_v13 = vpop.permute.xlu1 %4011  ;;  %v9475_v23 = vpack.c.bf16 %v9419_v27, %v9418_v12  ;;  %v9149_v49 = vadd.f32 %v16053_v30, %v8980_v14  ;;  %v16055_v14 = vld [vmem:[#allocation8_spill] sm:$0xff]  ;;  %v14918_v12 = vld [vmem:[%s15945_s8] ss:$0 sm:$0xff] }
 0x4a0   :  { %4170 = vst.msk [vmem:[#allocation3 + $0x198] sm:$0xf] %vm4135_vm8, %v4012_v13  ;;  %10943 = vmatmul.msk.bf16.gmra.mxu0 %vm276_vm0, %v9474_v58  ;;  %v3633_v20 = vpop.permute.xlu0 %3632  ;;  %v8982_v0 = vadd.f32 %v16050_v36, %v8812_v47  ;;  %v2755_v58 = vor.u32 %v2754_v43, %v2750_v46  ;;  %v3522_v47 = vsel %vm11416_vm15, %v3520_v18, %v3521_v55  ;;  %v3222_v36 = vld [vmem:[#allocation2 + $0x164] sm:$0x1]  ;;  %v2778_v55 = vrot.slane %v2776_v9, 4 }
 0x4a1   :  { %v11055_v7 = vld [vmem:[#allocation3 + $0x1a0] sm:$0xf0]  ;;  %v2769_v13 = vor.u32 %v2768_v4, %v2765_v60  ;;  %v9288_v46 = vmul.f32 %v14875_v39, %v9149_v49  ;;  %v3867_v49 = vld [vmem:[#allocation2 + $0x15c] sm:$0xf] }
 0x4a2   :  { %v9151_v51 = vadd.f32 %v16052_v35, %v8982_v0  ;;  %v2756_v17 = vrot.slane %v2755_v58, 4  ;;  %v16056_v60 = vld [vmem:[#allocation24_spill] sm:$0xff]  ;;  %v2787_v58 = vshrl.u32 %v2099_v1, 16  ;;  %v14930_v35 = vld [vmem:[%s15946_s9] ss:$0 sm:$0xff] }
 0x4a4   :  { %3658 = vrot.lane.b32.xlu2 %v3512_v24, %s11159_s1  ;;  %v2770_v24 = vrot.slane %v2769_v13, 4  ;;  %v2782_v13 = vshll.u32 %v2098_v40, 16 }
 0x4a5   :  { %2984 = vrot.lane.b32.xlu1 %v2737_v8, %s11161_s26  ;;  %2986 = vrot.lane.b32.xlu0 %v2751_v3, %s11161_s26  ;;  %v9289_v8 = vmul.f32 %v14875_v39, %v9151_v51  ;;  %v1938_v3 = vld [vmem:[#allocation2 + $0x148] sm:$0xf] }
 0x4a6   :  { %v14851_v19 = vpop.permute.xlu2 %4021  ;;  %2002 = vst.msk [vmem:[#allocation3 + $0x264] sm:$0xf] %vm742_vm6, %v1938_v3 }
 0x4a7   :  { %v2957_v33 = vpop.permute.xlu1 %2956  ;;  %v14846_v61 = vpop.f32.mrf.mxu1  ;;  %v10647_v48 = vld [vmem:[#allocation3 + $0x198] sm:$0xf] }
 0x4a8   :  { %3112 = vst.msk [vmem:[#allocation3 + $0x1bc] sm:$0xf] %vm3074_vm2, %v2957_v33  ;;  %v10648_v63 = vor.u32 %v11055_v7, %v10647_v48  ;;  %v2959_v34 = vpop.permute.xlu0 %2958  ;;  %v14887_v7 = vrot.slane %v2772_v38, 5 }
 0x4a9   :  { %3788 = vst.msk [vmem:[#allocation3 + $0x1bc] sm:$0xf] %vm3750_vm4, %v3633_v20  ;;  %v2760_v20 = vrot.slane %v2758_v10, 5  ;;  %v2790_v10 = vshll.u32 %v2099_v1, 16  ;;  %v1940_v1 = vld [vmem:[#allocation2 + $0x154] sm:$0xf] }
 0x4aa   :  { %4173 = vst.msk [vmem:[#allocation3 + $0x1bc] sm:$0xf] %vm4135_vm8, %v14811_v50  ;;  %8854 = vmatmul.bf16.gmra.mxu1 %v10648_v63  ;;  %v3217_v50 = vld [vmem:[#allocation2 + $0x150] sm:$0xe]  ;;  %v8985_v63 = vadd.f32 %v16054_v11, %v14846_v61  ;;  %v2775_v43 = vsel %vm11407_vm14, %v2770_v24, %v14887_v7  ;;  %v3525_v61 = vrot.slane %v14879_v6, 5 }
 0x4ab   :  { %3113 = vst.msk [vmem:[#allocation3 + $0x1c8] sm:$0xf] %vm3074_vm2, %v2959_v34  ;;  %v10371_v53 = vrot.slane %v3217_v50, 9  ;;  %v2761_v33 = vsel %vm11407_vm14, %v2756_v17, %v2760_v20  ;;  %v9356_v34 = vadd.f32 %v14898_v15, %v9288_v46  ;;  %v2792_v30 = vrot.slane %v2790_v10, 5  ;;  %v16057_v20 = vld [vmem:[#allocation9_spill] sm:$0xff] }
 0x4ac   :  { %3789 = vst.msk [vmem:[#allocation3 + $0x1c8] sm:$0xf] %vm3750_vm4, %v3635_v2  ;;  %4045 = vrot.lane.b32.xlu2 %v3866_v28, %s11160_s25  ;;  %v3527_v51 = vrot.slane %v3525_v61, 4  ;;  %v2100_v24 = vld [vmem:[#allocation2 + $0x16c] sm:$0xf] }
 0x4ad   :  { %4043 = vrot.lane.b32.xlu1 %v3865_v25, %s11160_s25  ;;  %3664 = vrot.lane.b32.xlu0 %v3522_v47, %s11159_s1  ;;  %v3519_v48 = vsel %vm11416_vm15, %v10371_v53, %v3518_v62  ;;  %v9357_v62 = vadd.f32 %v14898_v15, %v9289_v8  ;;  %v9154_v25 = vadd.f32 %v16055_v14, %v8985_v63  ;;  %v9420_v47 = vmax.f32 %v9356_v34, 0.0  ;;  %v3220_v8 = vld [vmem:[#allocation2 + $0x15c] sm:$0xe] }
 0x4ae   :  { %v3639_v16 = vpop.permute.xlu2 %3638  ;;  %2004 = vst.msk [vmem:[#allocation3 + $0x27c] sm:$0xf] %vm742_vm6, %v1940_v1 }
 0x4af   :  { %v4016_v31 = vpop.permute.xlu1 %4015  ;;  %v8817_v2 = vpop.f32.mrf.mxu1  ;;  %v9421_v50 = vmax.f32 %v9357_v62, 0.0  ;;  %v9290_v17 = vmul.f32 %v14875_v39, %v9154_v25  ;;  %v10372_v62 = vrot.slane %v3220_v8, 9  ;;  %v14992_v8 = vld [vmem:[%s15940_s0 + $0x8] sm:$0xff]  }
 0x4b0   :  { %4172 = vst.msk [vmem:[#allocation3 + $0x1b0] sm:$0xf] %vm4135_vm8, %v4016_v31  ;;  %10944 = vmatmul.msk.bf16.gmra.mxu0 %vm276_vm0, %v9475_v23  ;;  %v3637_v41 = vpop.permute.xlu0 %3636  ;;  %v8987_v4 = vadd.f32 %v16056_v60, %v8817_v2  ;;  %v3528_v23 = vrot.slane %v3222_v36, 5  ;;  %v3868_v31 = vld [vmem:[#allocation2 + $0x160] sm:$0xf]  ;;  %v2779_v2 = vor.u32 %v2778_v55, %v14887_v7  ;;  %v2784_v7 = vrot.slane %v2782_v13, 5 }
 0x4b1   :  { %v11058_v27 = vld [vmem:[#allocation3 + $0x1b8] sm:$0xf0]  ;;  %v9476_v29 = vpack.c.bf16 %v9421_v50, %v9420_v47  ;;  %v14950_v40 = vadd.f32 %v14898_v15, %v9290_v17  ;;  %v2800_v36 = vshrl.u32 %v2100_v24, 16  ;;  %v1939_v55 = vld [vmem:[#allocation2 + $0x150] sm:$0xf]  ;;  %v3526_v60 = vsel %vm11416_vm15, %v10372_v62, %v3525_v61 }
 0x4b2   :  { %v9156_v53 = vadd.f32 %v16057_v20, %v8987_v4  ;;  %v2780_v11 = vrot.slane %v2779_v2, 4  ;;  %2003 = vst.msk [vmem:[#allocation3 + $0x270] sm:$0xf] %vm742_vm6, %v1939_v55  ;;  %v9918_v50 = vunpack.c.h.bf16 %v14925_v21  ;;  %v2101_v17 = vld [vmem:[#allocation2 + $0x170] sm:$0x1]  ;;  %v16060_v55 = vld [vmem:[#allocation11_spill] sm:$0xff] }
 0x4b3   :  { %v2102_v20 = vld [vmem:[#allocation2 + $0x174] sm:$0xf]  ;;  %v2806_v62 = vshll.u32 %v2101_v17, 16 }
 0x4b4   :  { %3662 = vrot.lane.b32.xlu2 %v3519_v48, %s11159_s1  ;;  %v9291_v34 = vmul.f32 %v14875_v39, %v9156_v53  ;;  %v2785_v25 = vsel %vm11407_vm14, %v2780_v11, %v2784_v7  ;;  %v3869_v7 = vld [vmem:[#allocation2 + $0x168] sm:$0xf] }
 0x4b5   :  { %2988 = vrot.lane.b32.xlu1 %v2761_v33, %s11161_s26  ;;  %2990 = vrot.lane.b32.xlu0 %v2775_v43, %s11161_s26  ;;  %v2796_v43 = vshll.u32 %v2100_v24, 16 }
 0x4b6   :  { %v14910_v18 = vpop.permute.xlu2 %4025 }
 0x4b7   :  { %v2961_v54 = vpop.permute.xlu1 %2960  ;;  %v14906_v42 = vpop.f32.mrf.mxu1  ;;  %v10659_v44 = vld [vmem:[#allocation3 + $0x1b0] sm:$0xf]  ;;  %v14961_v4 = vrot.slane %v2796_v43, 5 }
 0x4b8   :  { %3114 = vst.msk [vmem:[#allocation3 + $0x1d4] sm:$0xf] %vm3074_vm2, %v2961_v54  ;;  %v10660_v0 = vor.u32 %v11058_v27, %v10659_v44  ;;  %v2963_v28 = vpop.permute.xlu0 %2962 }
 0x4b9   :  { %3790 = vst.msk [vmem:[#allocation3 + $0x1d4] sm:$0xf] %vm3750_vm4, %v3637_v41  ;;  %v9917_v41 = vunpack.c.l.bf16 %v14925_v21 }
 0x4ba   :  { %4175 = vst.msk [vmem:[#allocation3 + $0x1d4] sm:$0xf] %vm4135_vm8, %v14851_v19  ;;  %8859 = vmatmul.bf16.gmra.mxu1 %v10660_v0  ;;  %v2789_v19 = vrot.slane %v2787_v58, 4  ;;  %v14953_v0 = vld [vmem:[#allocation2 + $0x16c] sm:$0xf]  ;;  %v9359_v58 = vadd.f32 %v14898_v15, %v9291_v34 }
 0x4bb   :  { %3115 = vst.msk [vmem:[#allocation3 + $0x1e0] sm:$0xf] %vm3074_vm2, %v2963_v28  ;;  %v9422_v28 = vmax.f32 %v14950_v40, 0.0  ;;  %v3532_v21 = vrot.slane %v14953_v0, 5 }
 0x4bc   :  { %3791 = vst.msk [vmem:[#allocation3 + $0x1e0] sm:$0xf] %vm3750_vm4, %v3639_v16  ;;  %4049 = vrot.lane.b32.xlu2 %v3868_v31, %s11160_s25  ;;  %v3529_v16 = vsel %vm11416_vm15, %v3527_v51, %v3528_v23  ;;  %v2793_v3 = vor.u32 %v2792_v30, %v2789_v19  ;;  %v2802_v51 = vrot.slane %v2800_v36, 4  ;;  %v3225_v30 = vld [vmem:[#allocation2 + $0x170] sm:$0x1]  ;;  %v9423_v53 = vmax.f32 %v9359_v58, 0.0 }
 0x4bd   :  { %v9621_v38 = vpop.f32.mrf.mxu0  ;;  %4047 = vrot.lane.b32.xlu1 %v3867_v49, %s11160_s25  ;;  %3668 = vrot.lane.b32.xlu0 %v3529_v16, %s11159_s1  ;;  %v16059_v16 = vld [vmem:[#allocation28_spill] sm:$0xff]  ;;  %v2103_v36 = vld [vmem:[#allocation2 + $0x178] sm:$0xf] }
 0x4be   :  { %v9785_v46 = vmul.f32 %v14918_v12, %v9621_v38  ;;  %v3643_v63 = vpop.permute.xlu2 %3642  ;;  %v2794_v27 = vrot.slane %v2793_v3, 4  ;;  %v16058_v38 = vld [vmem:[#allocation26_spill] sm:$0xff]  ;;  %v2803_v11 = vor.u32 %v2802_v51, %v14961_v4 }
 0x4bf   :  { %v4020_v33 = vpop.permute.xlu1 %4019  ;;  %v8822_v48 = vpop.f32.mrf.mxu1 }
 0x4c0   :  { %v9853_v9 = vadd.f32 %v14930_v35, %v9785_v46  ;;  %4174 = vst.msk [vmem:[#allocation3 + $0x1c8] sm:$0xf] %vm4135_vm8, %v4020_v33  ;;  %10945 = vmatmul.msk.bf16.gmra.mxu0 %vm276_vm0, %v9476_v29  ;;  %v3641_v54 = vpop.permute.xlu0 %3640  ;;  %v2799_v61 = vsel %vm11407_vm14, %v2794_v27, %v14961_v4  ;;  %v2811_v46 = vshrl.u32 %v2102_v20, 16  ;;  %v2814_v29 = vshll.u32 %v2102_v20, 16  ;;  %v3223_v27 = vld [vmem:[#allocation2 + $0x168] sm:$0xe] }
 0x4c1   :  { %v11061_v19 = vld [vmem:[#allocation3 + $0x1d0] sm:$0xf0]  ;;  %v8992_v3 = vadd.f32 %v16059_v16, %v8822_v48  ;;  %v3870_v48 = vld [vmem:[#allocation2 + $0x16c] sm:$0xf]  ;;  %v10373_v51 = vrot.slane %v3223_v27, 9 }
 0x4c2   :  { %v9981_v44 = vadd.f32 %v9917_v41, %v9853_v9  ;;  %v8990_v41 = vadd.f32 %v16058_v38, %v14906_v42  ;;  %v3534_v42 = vrot.slane %v3532_v21, 4  ;;  %v3535_v9 = vrot.slane %v3225_v30, 5  ;;  %v15022_v20 = vld [vmem:[#allocation2 + $0x178] sm:$0xf]  ;;  %v1942_v38 = vld [vmem:[#allocation2 + $0x160] sm:$0xf] }
 0x4c3   :  { %v2813_v43 = vrot.slane %v2811_v46, 4  ;;  %v2816_v40 = vrot.slane %v2814_v29, 5  ;;  %v9161_v1 = vadd.f32 %v16060_v55, %v8992_v3  ;;  %v2824_v29 = vshrl.u32 %v2103_v36, 16  ;;  %2006 = vst.msk [vmem:[#allocation3 + $0x294] sm:$0xf] %vm742_vm6, %v1942_v38  ;;  %v16062_v27 = vld [vmem:[#allocation31_spill] sm:$0xff] }
 0x4c4   :  { %v10045_v14 = vmax.f32 %v9981_v44, 0.0  ;;  %3666 = vrot.lane.b32.xlu2 %v3526_v60, %s11159_s1  ;;  %v9477_v44 = vpack.c.bf16 %v9423_v53, %v9422_v28  ;;  %v16061_v60 = vld [vmem:[#allocation10_spill] sm:$0xff]  ;;  %v1941_v53 = vld [vmem:[#allocation2 + $0x15c] sm:$0xf]  ;;  %v9920_v3 = vunpack.c.h.bf16 %v14992_v8 }
 0x4c5   :  { %v9623_v10 = vpop.f32.mrf.mxu0  ;;  %2992 = vrot.lane.b32.xlu1 %v2785_v25, %s11161_s26  ;;  %2994 = vrot.lane.b32.xlu0 %v2799_v61, %s11161_s26  ;;  %v2817_v25 = vor.u32 %v2816_v40, %v2813_v43  ;;  %v9159_v4 = vadd.f32 %v16061_v60, %v8990_v41  ;;  %2005 = vst.msk [vmem:[#allocation3 + $0x288] sm:$0xf] %vm742_vm6, %v1941_v53  ;;  %v3228_v43 = vld [vmem:[#allocation2 + $0x17c] sm:$0x1]  ;;  %v15060_v60 = vld [vmem:[%s15940_s0 + $0x10] sm:$0xff]  }
 0x4c6   :  { %10109 = vst.msk [vmem:[%s15947_s10] sm:$0xff] %vm276_vm0, %v10045_v14  ;;  %v9786_v6 = vmul.f32 %v14918_v12, %v9623_v10  ;;  %v14984_v2 = vpop.permute.xlu2 %4029  ;;  %v3536_v14 = vsel %vm11416_vm15, %v3534_v42, %v3535_v9  ;;  %v2804_v10 = vrot.slane %v2803_v11, 4  ;;  %v9921_v53 = vunpack.c.l.bf16 %v15060_v60  ;;  %v2106_v38 = vld [vmem:[#allocation2 + $0x184] sm:$0xf] }
 0x4c7   :  { %v2965_v23 = vpop.permute.xlu1 %2964  ;;  %v14979_v47 = vpop.f32.mrf.mxu1  ;;  %v10671_v13 = vld [vmem:[#allocation3 + $0x1c8] sm:$0xf] }
 0x4c8   :  { %v9854_v49 = vadd.f32 %v14930_v35, %v9786_v6  ;;  %3116 = vst.msk [vmem:[#allocation3 + $0x1ec] sm:$0xf] %vm3074_vm2, %v2965_v23  ;;  %v10672_v31 = vor.u32 %v11061_v19, %v10671_v13  ;;  %v2967_v24 = vpop.permute.xlu0 %2966  ;;  %v2820_v23 = vshll.u32 %v2103_v36, 16  ;;  %v9293_v19 = vmul.f32 %v14875_v39, %v9161_v1 }
 0x4c9   :  { %3792 = vst.msk [vmem:[#allocation3 + $0x1ec] sm:$0xf] %vm3750_vm4, %v3641_v54 }
 0x4ca   :  { %v9982_v33 = vadd.f32 %v9918_v50, %v9854_v49  ;;  %4177 = vst.msk [vmem:[#allocation3 + $0x1ec] sm:$0xf] %vm4135_vm8, %v14910_v18  ;;  %8864 = vmatmul.bf16.gmra.mxu1 %v10672_v31  ;;  %v9919_v18 = vunpack.c.l.bf16 %v14992_v8  ;;  %v2808_v50 = vrot.slane %v2806_v62, 5  ;;  %v2818_v49 = vrot.slane %v2817_v25, 4  ;;  %v2104_v8 = vld [vmem:[#allocation2 + $0x17c] sm:$0x1] }
 0x4cb   :  { %3117 = vst.msk [vmem:[#allocation3 + $0x1f8] sm:$0xf] %vm3074_vm2, %v2967_v24  ;;  %v9292_v31 = vmul.f32 %v14875_v39, %v9159_v4  ;;  %v3533_v24 = vsel %vm11416_vm15, %v10373_v51, %v3532_v21  ;;  %v15028_v46 = vrot.slane %v2820_v23, 5  ;;  %v3871_v4 = vld [vmem:[#allocation2 + $0x174] sm:$0xf] }
 0x4cc   :  { %v10046_v34 = vmax.f32 %v9982_v33, 0.0  ;;  %3793 = vst.msk [vmem:[#allocation3 + $0x1f8] sm:$0xf] %vm3750_vm4, %v3643_v63  ;;  %4053 = vrot.lane.b32.xlu2 %v3870_v48, %s11160_s25  ;;  %v2809_v17 = vsel %vm11407_vm14, %v2804_v10, %v2808_v50  ;;  %v9361_v33 = vadd.f32 %v14898_v15, %v9293_v19  ;;  %v16063_v10 = vld [vmem:[#allocation29_spill] sm:$0xff] }
 0x4cd   :  { %v9626_v54 = vpop.f32.mrf.mxu0  ;;  %4051 = vrot.lane.b32.xlu1 %v3869_v7, %s11160_s25  ;;  %3672 = vrot.lane.b32.xlu0 %v3536_v14, %s11159_s1  ;;  %v2823_v21 = vsel %vm11407_vm14, %v2818_v49, %v15028_v46  ;;  %v3539_v7 = vrot.slane %v15022_v20, 5  ;;  %v9360_v40 = vadd.f32 %v14898_v15, %v9292_v31  ;;  %v8995_v50 = vadd.f32 %v16063_v10, %v14979_v47  ;;  %v3872_v19 = vld [vmem:[#allocation2 + $0x178] sm:$0xf]  ;;  %v3226_v47 = vld [vmem:[#allocation2 + $0x174] sm:$0xe] }
 0x4ce   :  { %10110 = vst.msk [vmem:[%s15947_s10 + $0x8] sm:$0xff] %vm276_vm0, %v10046_v34  ;;  %v9787_v63 = vmul.f32 %v14918_v12, %v9626_v54  ;;  %v3647_v61 = vpop.permute.xlu2 %3646  ;;  %v9425_v14 = vmax.f32 %v9361_v33, 0.0  ;;  %v16064_v49 = vld [vmem:[#allocation13_spill] sm:$0xff] }
 0x4cf   :  { %v4024_v28 = vpop.permute.xlu1 %4023  ;;  %v8827_v58 = vpop.f32.mrf.mxu1 }
 0x4d0   :  { %v9855_v6 = vadd.f32 %v14930_v35, %v9787_v63  ;;  %4176 = vst.msk [vmem:[#allocation3 + $0x1e0] sm:$0xf] %vm4135_vm8, %v4024_v28  ;;  %10946 = vmatmul.msk.bf16.gmra.mxu0 %vm276_vm0, %v9477_v44  ;;  %v3645_v13 = vpop.permute.xlu0 %3644  ;;  %v2105_v44 = vld [vmem:[#allocation2 + $0x180] sm:$0xf]  ;;  %v8997_v36 = vadd.f32 %v16062_v27, %v8827_v58  ;;  %v3541_v28 = vrot.slane %v3539_v7, 4  ;;  %v3542_v58 = vrot.slane %v3228_v43, 5 }
 0x4d1   :  { %v11064_v62 = vld [vmem:[#allocation3 + $0x1e8] sm:$0xf0]  ;;  %v2835_v1 = vshrl.u32 %v2105_v44, 16  ;;  %v2838_v63 = vshll.u32 %v2105_v44, 16  ;;  %v15087_v27 = vld [vmem:[#allocation2 + $0x184] sm:$0xf] }
 0x4d2   :  { %v9983_v30 = vadd.f32 %v9919_v18, %v9855_v6  ;;  %v2826_v18 = vrot.slane %v2824_v29, 4  ;;  %v2830_v6 = vshll.u32 %v2104_v8, 16  ;;  %v9166_v31 = vadd.f32 %v16064_v49, %v8997_v36  ;;  %v16065_v29 = vld [vmem:[#allocation12_spill] sm:$0xff]  ;;  %v1943_v36 = vld [vmem:[#allocation2 + $0x168] sm:$0xf] }
 0x4d3   :  { %v2837_v51 = vrot.slane %v2835_v1, 4  ;;  %v2840_v23 = vrot.slane %v2838_v63, 5  ;;  %2007 = vst.msk [vmem:[#allocation3 + $0x2a0] sm:$0xf] %vm742_vm6, %v1943_v36  ;;  %v3229_v36 = vld [vmem:[#allocation2 + $0x180] sm:$0xe] }
 0x4d4   :  { %v10047_v41 = vmax.f32 %v9983_v30, 0.0  ;;  %3670 = vrot.lane.b32.xlu2 %v3533_v24, %s11159_s1  ;;  %v2827_v30 = vor.u32 %v2826_v18, %v15028_v46  ;;  %v3543_v24 = vsel %vm11416_vm15, %v3541_v28, %v3542_v58  ;;  %v9295_v43 = vmul.f32 %v14875_v39, %v9166_v31  ;;  %v2107_v31 = vld [vmem:[#allocation2 + $0x188] sm:$0x1] }
 0x4d5   :  { %v9628_v16 = vpop.f32.mrf.mxu0  ;;  %2996 = vrot.lane.b32.xlu1 %v2809_v17, %s11161_s26  ;;  %2998 = vrot.lane.b32.xlu0 %v2823_v21, %s11161_s26  ;;  %v2841_v46 = vor.u32 %v2840_v23, %v2837_v51  ;;  %v2848_v18 = vshrl.u32 %v2106_v38, 16  ;;  %v9922_v58 = vunpack.c.h.bf16 %v15060_v60  ;;  %v3546_v60 = vrot.slane %v15087_v27, 5 }
 0x4d6   :  { %10111 = vst.msk [vmem:[%s15947_s10 + $0x10] sm:$0xff] %vm276_vm0, %v10047_v41  ;;  %v9788_v0 = vmul.f32 %v14918_v12, %v9628_v16  ;;  %v15051_v54 = vpop.permute.xlu2 %4033  ;;  %v9164_v16 = vadd.f32 %v16065_v29, %v8995_v50  ;;  %v2828_v8 = vrot.slane %v2827_v30, 4  ;;  %v16067_v29 = vld [vmem:[#allocation33_spill] sm:$0xff] }
 0x4d7   :  { %v2969_v42 = vpop.permute.xlu1 %2968  ;;  %v15045_v9 = vpop.f32.mrf.mxu1  ;;  %v10683_v11 = vld [vmem:[#allocation3 + $0x1e0] sm:$0xf]  ;;  %v2850_v10 = vrot.slane %v2848_v18, 4 }
 0x4d8   :  { %v9856_v34 = vadd.f32 %v14930_v35, %v9788_v0  ;;  %3118 = vst.msk [vmem:[#allocation3 + $0x204] sm:$0xf] %vm3074_vm2, %v2969_v42  ;;  %v10684_v48 = vor.u32 %v11064_v62, %v10683_v11  ;;  %v2971_v55 = vpop.permute.xlu0 %2970  ;;  %v2832_v0 = vrot.slane %v2830_v6, 5  ;;  %v10374_v11 = vrot.slane %v3226_v47, 9  ;;  %v16066_v47 = vld [vmem:[#allocation35_spill] sm:$0xff] }
 0x4d9   :  { %3794 = vst.msk [vmem:[#allocation3 + $0x204] sm:$0xf] %vm3750_vm4, %v3645_v13  ;;  %v2844_v62 = vshll.u32 %v2106_v38, 16  ;;  %v9294_v44 = vmul.f32 %v14875_v39, %v9164_v16  ;;  %v9000_v16 = vadd.f32 %v16067_v29, %v15045_v9  ;;  %v3874_v9 = vld [vmem:[#allocation2 + $0x184] sm:$0xf] }
 0x4da   :  { %v9984_v25 = vadd.f32 %v9920_v3, %v9856_v34  ;;  %4179 = vst.msk [vmem:[#allocation3 + $0x204] sm:$0xf] %vm4135_vm8, %v14984_v2  ;;  %8869 = vmatmul.bf16.gmra.mxu1 %v10684_v48  ;;  %v9424_v2 = vmax.f32 %v9360_v40, 0.0  ;;  %v2842_v48 = vrot.slane %v2841_v46, 4  ;;  %v2833_v63 = vsel %vm11407_vm14, %v2828_v8, %v2832_v0  ;;  %v3873_v0 = vld [vmem:[#allocation2 + $0x180] sm:$0xf] }
 0x4db   :  { %3119 = vst.msk [vmem:[#allocation3 + $0x210] sm:$0xf] %vm3074_vm2, %v2971_v55  ;;  %v1944_v55 = vld [vmem:[#allocation2 + $0x16c] sm:$0xf] }
 0x4dc   :  { %v10048_v13 = vmax.f32 %v9984_v25, 0.0  ;;  %3795 = vst.msk [vmem:[#allocation3 + $0x210] sm:$0xf] %vm3750_vm4, %v3647_v61  ;;  %4057 = vrot.lane.b32.xlu2 %v3872_v19, %s11160_s25  ;;  %v9478_v41 = vpack.c.bf16 %v9425_v14, %v9424_v2  ;;  %v3540_v14 = vsel %vm11416_vm15, %v10374_v11, %v3539_v7  ;;  %v15095_v25 = vrot.slane %v2844_v62, 5  ;;  %v3231_v2 = vld [vmem:[#allocation2 + $0x188] sm:$0x1] }
 0x4dd   :  { %v9631_v17 = vpop.f32.mrf.mxu0  ;;  %4055 = vrot.lane.b32.xlu1 %v3871_v4, %s11160_s25  ;;  %3676 = vrot.lane.b32.xlu0 %v3543_v24, %s11159_s1  ;;  %v9363_v4 = vadd.f32 %v14898_v15, %v9295_v43  ;;  %2008 = vst.msk [vmem:[#allocation3 + $0x2ac] sm:$0xf] %vm742_vm6, %v1944_v55  ;;  %v2854_v11 = vshll.u32 %v2107_v31, 16  ;;  %v2109_v55 = vld [vmem:[#allocation2 + $0x190] sm:$0xf] }
 0x4de   :  { %10112 = vst.msk [vmem:[%s15947_s10 + $0x18] sm:$0xff] %vm276_vm0, %v10048_v13  ;;  %v9789_v61 = vmul.f32 %v14918_v12, %v9631_v17  ;;  %v3651_v42 = vpop.permute.xlu2 %3650  ;;  %v2847_v7 = vsel %vm11407_vm14, %v2842_v48, %v15095_v25  ;;  %v9362_v13 = vadd.f32 %v14898_v15, %v9294_v44  ;;  %v2108_v17 = vld [vmem:[#allocation2 + $0x18c] sm:$0xf]  ;;  %v2851_v8 = vor.u32 %v2850_v10, %v15095_v25  ;;  %v16068_v48 = vld [vmem:[#allocation16_spill] sm:$0xff]  ;;  %v16069_v25 = vld [vmem:[#allocation14_spill] sm:$0xff] }
 0x4df   :  { %v4028_v3 = vpop.permute.xlu1 %4027  ;;  %v8832_v33 = vpop.f32.mrf.mxu1  ;;  %v2859_v24 = vshrl.u32 %v2108_v17, 16  ;;  %v2862_v46 = vshll.u32 %v2108_v17, 16  ;;  %v2872_v29 = vshrl.u32 %v2109_v55, 16 }
 0x4e0   :  { %v9857_v21 = vadd.f32 %v14930_v35, %v9789_v61  ;;  %4178 = vst.msk [vmem:[#allocation3 + $0x1f8] sm:$0xf] %vm4135_vm8, %v4028_v3  ;;  %10947 = vmatmul.msk.bf16.gmra.mxu0 %vm276_vm0, %v9478_v41  ;;  %v3649_v40 = vpop.permute.xlu0 %3648  ;;  %v9002_v38 = vadd.f32 %v16066_v47, %v8832_v33  ;;  %v15125_v61 = vld [vmem:[%s15940_s0 + $0x18] sm:$0xff]   ;;  %v3548_v33 = vrot.slane %v3546_v60, 4  ;;  %v1945_v47 = vld [vmem:[#allocation2 + $0x174] sm:$0xf] }
 0x4e1   :  { %v11067_v23 = vld [vmem:[#allocation3 + $0x200] sm:$0xf0]  ;;  %v2861_v62 = vrot.slane %v2859_v24, 4  ;;  %v2864_v43 = vrot.slane %v2862_v46, 5  ;;  %v9923_v44 = vunpack.c.l.bf16 %v15125_v61  ;;  %2009 = vst.msk [vmem:[#allocation3 + $0x2b8] sm:$0xf] %vm742_vm6, %v1945_v47 }
 0x4e2   :  { %v9985_v34 = vadd.f32 %v9921_v53, %v9857_v21  ;;  %v9427_v53 = vmax.f32 %v9363_v4, 0.0  ;;  %v3549_v21 = vrot.slane %v3231_v2, 5  ;;  %v9169_v4 = vadd.f32 %v16069_v25, %v9000_v16 }
 0x4e4   :  { %v10049_v1 = vmax.f32 %v9985_v34, 0.0  ;;  %3674 = vrot.lane.b32.xlu2 %v3540_v14, %s11159_s1  ;;  %v2865_v14 = vor.u32 %v2864_v43, %v2861_v62  ;;  %v9296_v31 = vmul.f32 %v14875_v39, %v9169_v4  ;;  %v16071_v4 = vld [vmem:[#allocation37_spill] sm:$0xff] }
 0x4e5   :  { %v9633_v28 = vpop.f32.mrf.mxu0  ;;  %3000 = vrot.lane.b32.xlu1 %v2833_v63, %s11161_s26  ;;  %3002 = vrot.lane.b32.xlu0 %v2847_v7, %s11161_s26  ;;  %v3550_v63 = vsel %vm11416_vm15, %v3548_v33, %v3549_v21  ;;  %v2856_v7 = vrot.slane %v2854_v11, 5 }
 0x4e6   :  { %10113 = vst.msk [vmem:[%s15947_s10 + $0x20] sm:$0xff] %vm276_vm0, %v10049_v1  ;;  %v9790_v20 = vmul.f32 %v14918_v12, %v9633_v28  ;;  %v15118_v49 = vpop.permute.xlu2 %4037  ;;  %v9364_v21 = vadd.f32 %v14898_v15, %v9296_v31  ;;  %v16073_v31 = vld [vmem:[#allocation18_spill] sm:$0xff] }
 0x4e7   :  { %v2973_v50 = vpop.permute.xlu1 %2972  ;;  %v15112_v6 = vpop.f32.mrf.mxu1  ;;  %v10695_v51 = vld [vmem:[#allocation3 + $0x1f8] sm:$0xf] }
 0x4e8   :  { %v9858_v19 = vadd.f32 %v14930_v35, %v9790_v20  ;;  %3120 = vst.msk [vmem:[#allocation3 + $0x21c] sm:$0xf] %vm3074_vm2, %v2973_v50  ;;  %v10696_v30 = vor.u32 %v11067_v23, %v10695_v51  ;;  %v2975_v41 = vpop.permute.xlu0 %2974  ;;  %v2852_v20 = vrot.slane %v2851_v8, 4  ;;  %v10375_v51 = vrot.slane %v3229_v36, 9  ;;  %v16070_v36 = vld [vmem:[#allocation38_spill] sm:$0xff] }
 0x4e9   :  { %3796 = vst.msk [vmem:[#allocation3 + $0x21c] sm:$0xf] %vm3750_vm4, %v3649_v40  ;;  %v9426_v40 = vmax.f32 %v9362_v13, 0.0  ;;  %v2868_v23 = vshll.u32 %v2109_v55, 16  ;;  %v9428_v25 = vmax.f32 %v9364_v21, 0.0 }
 0x4ea   :  { %v9986_v3 = vadd.f32 %v9922_v58, %v9858_v19  ;;  %4181 = vst.msk [vmem:[#allocation3 + $0x21c] sm:$0xf] %vm4135_vm8, %v15051_v54  ;;  %8874 = vmatmul.bf16.gmra.mxu1 %v10696_v30  ;;  %v9171_v54 = vadd.f32 %v16068_v48, %v9002_v38  ;;  %v2866_v30 = vrot.slane %v2865_v14, 4  ;;  %v2857_v17 = vsel %vm11407_vm14, %v2852_v20, %v2856_v7  ;;  %v1946_v38 = vld [vmem:[#allocation2 + $0x178] sm:$0xf] }
 0x4eb   :  { %3121 = vst.msk [vmem:[#allocation3 + $0x228] sm:$0xf] %vm3074_vm2, %v2975_v41  ;;  %v3547_v24 = vsel %vm11416_vm15, %v10375_v51, %v3546_v60  ;;  %v2870_v46 = vrot.slane %v2868_v23, 5  ;;  %v9924_v60 = vunpack.c.h.bf16 %v15125_v61  ;;  %v2874_v48 = vrot.slane %v2872_v29, 4  ;;  %v3875_v20 = vld [vmem:[#allocation2 + $0x18c] sm:$0xf] }
 0x4ec   :  { %v10050_v34 = vmax.f32 %v9986_v3, 0.0  ;;  %3797 = vst.msk [vmem:[#allocation3 + $0x228] sm:$0xf] %vm3750_vm4, %v3651_v42  ;;  %4061 = vrot.lane.b32.xlu2 %v3874_v9, %s11160_s25  ;;  %v9479_v42 = vpack.c.bf16 %v9427_v53, %v9426_v40  ;;  %v9297_v2 = vmul.f32 %v14875_v39, %v9171_v54  ;;  %v15156_v53 = vld [vmem:[#allocation2 + $0x190] sm:$0xf] }
 0x4ed   :  { %v9636_v18 = vpop.f32.mrf.mxu0  ;;  %4059 = vrot.lane.b32.xlu1 %v3873_v0, %s11160_s25  ;;  %3680 = vrot.lane.b32.xlu0 %v3550_v63, %s11159_s1  ;;  %2010 = vst.msk [vmem:[#allocation3 + $0x2c4] sm:$0xf] %vm742_vm6, %v1946_v38  ;;  %v2871_v0 = vsel %vm11407_vm14, %v2866_v30, %v2870_v46  ;;  %v3553_v33 = vrot.slane %v15156_v53, 5  ;;  %v3234_v40 = vld [vmem:[#allocation2 + $0x194] sm:$0x1]  ;;  %v2875_v7 = vor.u32 %v2874_v48, %v2870_v46 }
 0x4ee   :  { %10114 = vst.msk [vmem:[%s15947_s10 + $0x28] sm:$0xff] %vm276_vm0, %v10050_v34  ;;  %v9791_v1 = vmul.f32 %v14918_v12, %v9636_v18  ;;  %v3655_v50 = vpop.permute.xlu2 %3654  ;;  %v9365_v16 = vadd.f32 %v14898_v15, %v9297_v2  ;;  %v3556_v14 = vrot.slane %v3234_v40, 5  ;;  %v3232_v2 = vld [vmem:[#allocation2 + $0x18c] sm:$0xe]  ;;  %v1948_v21 = vld [vmem:[#allocation2 + $0x184] sm:$0xf] }
 0x4ef   :  { %v4032_v28 = vpop.permute.xlu1 %4031  ;;  %v8837_v58 = vpop.f32.mrf.mxu1  ;;  %v3555_v63 = vrot.slane %v3553_v33, 4  ;;  %2012 = vst.msk [vmem:[#allocation3 + $0x2dc] sm:$0xf] %vm742_vm6, %v1948_v21 }
 0x4f0   :  { %v9859_v10 = vadd.f32 %v14930_v35, %v9791_v1  ;;  %4180 = vst.msk [vmem:[#allocation3 + $0x210] sm:$0xf] %vm4135_vm8, %v4032_v28  ;;  %10948 = vmatmul.msk.bf16.gmra.mxu0 %vm276_vm0, %v9479_v42  ;;  %v3653_v13 = vpop.permute.xlu0 %3652  ;;  %v9429_v54 = vmax.f32 %v9365_v16, 0.0  ;;  %v9007_v55 = vadd.f32 %v16070_v36, %v8837_v58  ;;  %v15191_v42 = vld [vmem:[%s15940_s0 + $0x20] sm:$0xff]   ;;  %v9005_v28 = vadd.f32 %v16071_v4, %v15112_v6 }
 0x4f1   :  { %v11070_v43 = vld [vmem:[#allocation3 + $0x218] sm:$0xf0]  ;;  %v9925_v23 = vunpack.c.l.bf16 %v15191_v42  ;;  %v3557_v30 = vsel %vm11416_vm15, %v3555_v63, %v3556_v14  ;;  %v10376_v16 = vrot.slane %v3232_v2, 9  ;;  %v9926_v53 = vunpack.c.h.bf16 %v15191_v42 }
 0x4f2   :  { %v9987_v19 = vadd.f32 %v9923_v44, %v9859_v10  ;;  %v2110_v44 = vld [vmem:[#allocation2 + $0x194] sm:$0x1] }
 0x4f3   :  { %v2878_v10 = vshll.u32 %v2110_v44, 16  ;;  %v3554_v40 = vsel %vm11416_vm15, %v10376_v16, %v3553_v33 }
 0x4f4   :  { %v10051_v41 = vmax.f32 %v9987_v19, 0.0  ;;  %3678 = vrot.lane.b32.xlu2 %v3547_v24, %s11159_s1  ;;  %v2876_v24 = vrot.slane %v2875_v7, 4 }
 0x4f5   :  { %v9638_v3 = vpop.f32.mrf.mxu0  ;;  %3004 = vrot.lane.b32.xlu1 %v2857_v17, %s11161_s26  ;;  %3006 = vrot.lane.b32.xlu0 %v2871_v0, %s11161_s26  ;;  %v9174_v17 = vadd.f32 %v16073_v31, %v9005_v28  ;;  %v2880_v46 = vrot.slane %v2878_v10, 5  ;;  %v1947_v0 = vld [vmem:[#allocation2 + $0x180] sm:$0xf]  ;;  %v46_v28 = vld [vmem:[%s15940_s0 + $0x28] sm:$0xff]  }
 0x4f6   :  { %10115 = vst.msk [vmem:[%s15947_s10 + $0x30] sm:$0xff] %vm276_vm0, %v10051_v41  ;;  %v9792_v27 = vmul.f32 %v14918_v12, %v9638_v3  ;;  %v15182_v9 = vpop.permute.xlu2 %4041  ;;  %v9928_v21 = vunpack.c.h.bf16 %v46_v28 }
 0x4f7   :  { %v2977_v8 = vpop.permute.xlu1 %2976  ;;  %v15177_v11 = vpop.f32.mrf.mxu1  ;;  %v10707_v62 = vld [vmem:[#allocation3 + $0x210] sm:$0xf]  ;;  %2011 = vst.msk [vmem:[#allocation3 + $0x2d0] sm:$0xf] %vm742_vm6, %v1947_v0 }
 0x4f8   :  { %v9860_v34 = vadd.f32 %v14930_v35, %v9792_v27  ;;  %3122 = vst.msk [vmem:[#allocation3 + $0x234] sm:$0xf] %vm3074_vm2, %v2977_v8  ;;  %v10708_v61 = vor.u32 %v11070_v43, %v10707_v62  ;;  %v2979_v18 = vpop.permute.xlu0 %2978  ;;  %v9298_v8 = vmul.f32 %v14875_v39, %v9174_v17  ;;  %v2881_v43 = vsel %vm11407_vm14, %v2876_v24, %v2880_v46  ;;  %v1949_v46 = vld [vmem:[#allocation2 + $0x18c] sm:$0xf] }
 0x4f9   :  { %3798 = vst.msk [vmem:[#allocation3 + $0x234] sm:$0xf] %vm3750_vm4, %v3653_v13  ;;  %v16072_v13 = vld [vmem:[#allocation21_spill] sm:$0xff] }
 0x4fa   :  { %v9988_v1 = vadd.f32 %v9924_v60, %v9860_v34  ;;  %4183 = vst.msk [vmem:[#allocation3 + $0x234] sm:$0xf] %vm4135_vm8, %v15118_v49  ;;  %8879 = vmatmul.bf16.gmra.mxu1 %v10708_v61  ;;  %v3876_v49 = vld [vmem:[#allocation2 + $0x190] sm:$0xf]  ;;  %v9176_v19 = vadd.f32 %v16072_v13, %v9007_v55  ;;  %v9366_v44 = vadd.f32 %v14898_v15, %v9298_v8 }
 0x4fb   :  { %3123 = vst.msk [vmem:[#allocation3 + $0x240] sm:$0xf] %vm3074_vm2, %v2979_v18 }
 0x4fc   :  { %v10052_v58 = vmax.f32 %v9988_v1, 0.0  ;;  %3799 = vst.msk [vmem:[#allocation3 + $0x240] sm:$0xf] %vm3750_vm4, %v3655_v50  ;;  %4065 = vrot.lane.b32.xlu2 %v3876_v49, %s11160_s25  ;;  %v9480_v50 = vpack.c.bf16 %v9429_v54, %v9428_v25  ;;  %v9299_v27 = vmul.f32 %v14875_v39, %v9176_v19  ;;  %v16074_v25 = vld [vmem:[#allocation42_spill] sm:$0xff]  ;;  %v16075_v49 = vld [vmem:[#allocation40_spill] sm:$0xff]  ;;  %v9927_v19 = vunpack.c.l.bf16 %v46_v28 }
 0x4fd   :  { %v9641_v51 = vpop.f32.mrf.mxu0  ;;  %4063 = vrot.lane.b32.xlu1 %v3875_v20, %s11160_s25  ;;  %3684 = vrot.lane.b32.xlu0 %v3557_v30, %s11159_s1  ;;  %v3877_v20 = vld [vmem:[#allocation2 + $0x198] sm:$0xf]  ;;  %v9010_v7 = vadd.f32 %v16075_v49, %v15177_v11  ;;  %v16077_v30 = vld [vmem:[#allocation23_spill] sm:$0xff]  ;;  %2013 = vst.msk [vmem:[#allocation3 + $0x2e8] sm:$0xf] %vm742_vm6, %v1949_v46 }
 0x4fe   :  { %10116 = vst.msk [vmem:[%s15947_s10 + $0x38] sm:$0xff] %vm276_vm0, %v10052_v58  ;;  %v9793_v6 = vmul.f32 %v14918_v12, %v9641_v51  ;;  %v3659_v29 = vpop.permute.xlu2 %3658  ;;  %v9367_v61 = vadd.f32 %v14898_v15, %v9299_v27  ;;  %v9430_v58 = vmax.f32 %v9366_v44, 0.0  ;;  %v3878_v51 = vld [vmem:[#allocation2 + $0x19c] sm:$0xf]  ;;  %v16079_v49 = vld [vmem:[#allocation27_spill] sm:$0xff] }
 0x4ff   :  { %v4036_v47 = vpop.permute.xlu1 %4035  ;;  %v8842_v38 = vpop.f32.mrf.mxu1  ;;  %v9179_v31 = vadd.f32 %v16077_v30, %v9010_v7 }
 0x500   :  { %v9861_v41 = vadd.f32 %v14930_v35, %v9793_v6  ;;  %4182 = vst.msk [vmem:[#allocation3 + $0x228] sm:$0xf] %vm4135_vm8, %v4036_v47  ;;  %10949 = vmatmul.msk.bf16.gmra.mxu0 %vm276_vm0, %v9480_v50  ;;  %v3657_v3 = vpop.permute.xlu0 %3656  ;;  %v9431_v14 = vmax.f32 %v9367_v61, 0.0  ;;  %v9012_v4 = vadd.f32 %v16074_v25, %v8842_v38 }
 0x501   :  { %v11073_v18 = vld [vmem:[#allocation3 + $0x230] sm:$0xf0]  ;;  %v9300_v16 = vmul.f32 %v14875_v39, %v9179_v31 }
 0x502   :  { %v9989_v60 = vadd.f32 %v9925_v23, %v9861_v41  ;;  %v9481_v11 = vpack.c.bf16 %v9431_v14, %v9430_v58 }
 0x504   :  { %v10053_v62 = vmax.f32 %v9989_v60, 0.0  ;;  %3682 = vrot.lane.b32.xlu2 %v3554_v40, %s11159_s1  ;;  %v15274_v40 = vpop.f32.mrf.mxu3 }
 0x505   :  { %v9643_v34 = vpop.f32.mrf.mxu0  ;;  %3008 = vrot.lane.b32.xlu1 %v2881_v43, %s11161_s26 }
 0x506   :  { %10117 = vst.msk [vmem:[%s15947_s10 + $0x40] sm:$0xff] %vm276_vm0, %v10053_v62  ;;  %v9794_v22 = vmul.f32 %v14918_v12, %v9643_v34  ;;  %v4046_v1 = vpop.permute.xlu2 %4045  ;;  %v9368_v34 = vadd.f32 %v14898_v15, %v9300_v16 }
 0x507   :  { %v2981_v33 = vpop.permute.xlu1 %2980  ;;  %v15234_v48 = vpop.f32.mrf.mxu1  ;;  %v10719_v54 = vld [vmem:[#allocation3 + $0x228] sm:$0xf] }
 0x508   :  { %v9862_v36 = vadd.f32 %v14930_v35, %v9794_v22  ;;  %3124 = vst.msk [vmem:[#allocation3 + $0x24c] sm:$0xf] %vm3074_vm2, %v2981_v33  ;;  %v10720_v55 = vor.u32 %v11073_v18, %v10719_v54  ;;  %v2983_v63 = vpop.permute.xlu0 %2982 }
 0x509   :  { %3800 = vst.msk [vmem:[#allocation3 + $0x24c] sm:$0xf] %vm3750_vm4, %v3657_v3 }
 0x50a   :  { %v9990_v42 = vadd.f32 %v9926_v53, %v9862_v36  ;;  %4185 = vst.msk [vmem:[#allocation3 + $0x24c] sm:$0xf] %vm4135_vm8, %v15182_v9  ;;  %8884 = vmatmul.bf16.gmra.mxu1 %v10720_v55  ;;  %v16076_v9 = vld [vmem:[#allocation25_spill] sm:$0xff]  ;;  %v48_v36 = vld [vmem:[%s15940_s0 + $0x30] sm:$0xff]   ;;  %v9432_v55 = vmax.f32 %v9368_v34, 0.0 }
 0x50b   :  { %3125 = vst.msk [vmem:[#allocation3 + $0x258] sm:$0xf] %vm3074_vm2, %v2983_v63  ;;  %v9181_v2 = vadd.f32 %v16076_v9, %v9012_v4  ;;  %v9015_v63 = vadd.f32 %v13828_v57, %v15234_v48  ;;  %v16078_v4 = vld [vmem:[#allocation30_spill] sm:$0xff]  ;;  %v9930_v30 = vunpack.c.h.bf16 %v48_v36 }
 0x50c   :  { %v10054_v10 = vmax.f32 %v9990_v42, 0.0  ;;  %3801 = vst.msk [vmem:[#allocation3 + $0x258] sm:$0xf] %vm3750_vm4, %v3659_v29  ;;  %4069 = vrot.lane.b32.xlu2 %v3878_v51, %s11160_s25  ;;  %v1950_v29 = vld [vmem:[#allocation2 + $0x190] sm:$0xf]  ;;  %v9929_v42 = vunpack.c.l.bf16 %v48_v36  ;;  %v15299_v51 = vpop.f32.mrf.mxu3 }
 0x50d   :  { %v9646_v23 = vpop.f32.mrf.mxu0  ;;  %4067 = vrot.lane.b32.xlu1 %v3877_v20, %s11160_s25  ;;  %v9301_v41 = vmul.f32 %v14875_v39, %v9181_v2  ;;  %2014 = vst.msk [vmem:[#allocation3 + $0x2f4] sm:$0xf] %vm742_vm6, %v1950_v29  ;;  %v9184_v7 = vadd.f32 %v16079_v49, %v9015_v63  ;;  %v15344_v34 = vld [vmem:[%s15945_s8] ss:$0 sm:$0xff] }
 0x50e   :  { %10118 = vst.msk [vmem:[%s15947_s10 + $0x48] sm:$0xff] %vm276_vm0, %v10054_v10  ;;  %v9795_v13 = vmul.f32 %v14918_v12, %v9646_v23  ;;  %v3663_v47 = vpop.permute.xlu2 %3662  ;;  %v15304_v23 = vld [vmem:[%s15943_s5] ss:$0 sm:$0xff] }
 0x50f   :  { %v4040_v6 = vpop.permute.xlu1 %4039  ;;  %v8847_v50 = vpop.f32.mrf.mxu1  ;;  %v9369_v60 = vadd.f32 %v14898_v15, %v9301_v41  ;;  %v15319_v41 = vld [vmem:[%s15944_s6] ss:$0 sm:$0xff] }
 0x510   :  { %v9863_v17 = vadd.f32 %v14930_v35, %v9795_v13  ;;  %4184 = vst.msk [vmem:[#allocation3 + $0x240] sm:$0xf] %vm4135_vm8, %v4040_v6  ;;  %10950 = vmatmul.msk.bf16.gmra.mxu0 %vm276_vm0, %v9481_v11  ;;  %v3661_v38 = vpop.permute.xlu0 %3660  ;;  %v9017_v18 = vadd.f32 %v13862_v45, %v8847_v50  ;;  %v9302_v13 = vmul.f32 %v15304_v23, %v9184_v7 }
 0x511   :  { %v11076_v43 = vld [vmem:[#allocation3 + $0x248] sm:$0xf0]  ;;  %v9433_v54 = vmax.f32 %v9369_v60, 0.0 }
 0x512   :  { %v9991_v24 = vadd.f32 %v9927_v19, %v9863_v17  ;;  %v9186_v45 = vadd.f32 %v16078_v4, %v9017_v18  ;;  %v50_v60 = vld [vmem:[%s15940_s0 + $0x38] sm:$0xff]   ;;  %v15351_v18 = vld [vmem:[%s15946_s9] ss:$0 sm:$0xff] }
 0x513   :  { %v9482_v28 = vpack.c.bf16 %v9433_v54, %v9432_v55 }
 0x514   :  { %v10055_v3 = vmax.f32 %v9991_v24, 0.0  ;;  %v9303_v9 = vmul.f32 %v15304_v23, %v9186_v45 }
 0x515   :  { %v9648_v27 = vpop.f32.mrf.mxu0 }
 0x516   :  { %10119 = vst.msk [vmem:[%s15947_s10 + $0x50] sm:$0xff] %vm276_vm0, %v10055_v3  ;;  %v9796_v0 = vmul.f32 %v14918_v12, %v9648_v27  ;;  %v4050_v53 = vpop.permute.xlu2 %4049  ;;  %v9371_v6 = vadd.f32 %v14898_v15, %v9303_v9  ;;  %v9370_v15 = vadd.f32 %v15319_v41, %v9302_v13 }
 0x517   :  { %v2985_v8 = vpop.permute.xlu1 %2984  ;;  %v15272_v62 = vpop.f32.mrf.mxu1  ;;  %v10731_v39 = vld [vmem:[#allocation3 + $0x240] sm:$0xf] }
 0x518   :  { %v9864_v61 = vadd.f32 %v14930_v35, %v9796_v0  ;;  %3126 = vst.msk [vmem:[#allocation3 + $0x264] sm:$0xf] %vm3074_vm2, %v2985_v8  ;;  %v10732_v22 = vor.u32 %v11076_v43, %v10731_v39  ;;  %v2987_v33 = vpop.permute.xlu0 %2986  ;;  %v9435_v16 = vmax.f32 %v9371_v6, 0.0  ;;  %v9434_v0 = vmax.f32 %v9370_v15, 0.0  ;;  %v16080_v39 = vld [vmem:[#allocation34_spill] sm:$0xff]  ;;  %v16082_v15 = vld [vmem:[#allocation39_spill] sm:$0xff] }
 0x519   :  { %3802 = vst.msk [vmem:[#allocation3 + $0x264] sm:$0xf] %vm3750_vm4, %v3661_v38 }
 0x51a   :  { %v9992_v44 = vadd.f32 %v9928_v21, %v9864_v61  ;;  %4187 = vst.msk [vmem:[#allocation3 + $0x264] sm:$0xf] %vm4135_vm8, %v4046_v1  ;;  %8889 = vmatmul.bf16.gmra.mxu1 %v10732_v22  ;;  %v9020_v21 = vadd.f32 %v13880_v59, %v15272_v62  ;;  %v9931_v22 = vunpack.c.l.bf16 %v50_v60  ;;  %v9483_v59 = vpack.c.bf16 %v9435_v16, %v9434_v0 }
 0x51b   :  { %3127 = vst.msk [vmem:[#allocation3 + $0x270] sm:$0xf] %vm3074_vm2, %v2987_v33  ;;  %v16081_v33 = vld [vmem:[#allocation32_spill] sm:$0xff] }
 0x51c   :  { %v10056_v14 = vmax.f32 %v9992_v44, 0.0  ;;  %3803 = vst.msk [vmem:[#allocation3 + $0x270] sm:$0xf] %vm3750_vm4, %v3663_v47  ;;  %v9189_v54 = vadd.f32 %v16081_v33, %v9020_v21 }
 0x51d   :  { %v9651_v25 = vpop.f32.mrf.mxu0 }
 0x51e   :  { %10120 = vst.msk [vmem:[%s15947_s10 + $0x58] sm:$0xff] %vm276_vm0, %v10056_v14  ;;  %v9797_v1 = vmul.f32 %v14918_v12, %v9651_v25  ;;  %v3667_v48 = vpop.permute.xlu2 %3666  ;;  %v9304_v25 = vmul.f32 %v15304_v23, %v9189_v54 }
 0x51f   :  { %v4044_v20 = vpop.permute.xlu1 %4043  ;;  %v8852_v58 = vpop.f32.mrf.mxu1 }
 0x520   :  { %v9865_v57 = vadd.f32 %v14930_v35, %v9797_v1  ;;  %4186 = vst.msk [vmem:[#allocation3 + $0x258] sm:$0xf] %vm4135_vm8, %v4044_v20  ;;  %10951 = vmatmul.msk.bf16.gmra.mxu0 %vm276_vm0, %v9482_v28  ;;  %v3665_v10 = vpop.permute.xlu0 %3664  ;;  %v9022_v3 = vadd.f32 %v13910_v5, %v8852_v58  ;;  %v9932_v20 = vunpack.c.h.bf16 %v50_v60 }
 0x521   :  { %v11079_v38 = vld [vmem:[#allocation3 + $0x260] sm:$0xf0] }
 0x522   :  { %v9993_v2 = vadd.f32 %v9929_v42, %v9865_v57  ;;  %v9191_v43 = vadd.f32 %v16080_v39, %v9022_v3 }
 0x524   :  { %v10057_v19 = vmax.f32 %v9993_v2, 0.0  ;;  %v9305_v63 = vmul.f32 %v15304_v23, %v9191_v43 }
 0x525   :  { %v9653_v11 = vpop.f32.mrf.mxu0 }
 0x526   :  { %10121 = vst.msk [vmem:[%s15947_s10 + $0x60] sm:$0xff] %vm276_vm0, %v10057_v19  ;;  %v9798_v50 = vmul.f32 %v14918_v12, %v9653_v11  ;;  %v4054_v29 = vpop.permute.xlu2 %4053  ;;  %v9373_v42 = vadd.f32 %v15319_v41, %v9305_v63 }
 0x527   :  { %v2989_v31 = vpop.permute.xlu1 %2988  ;;  %v15314_v17 = vpop.f32.mrf.mxu1  ;;  %v10743_v47 = vld [vmem:[#allocation3 + $0x258] sm:$0xf] }
 0x528   :  { %v9866_v24 = vadd.f32 %v14930_v35, %v9798_v50  ;;  %3128 = vst.msk [vmem:[#allocation3 + $0x27c] sm:$0xf] %vm3074_vm2, %v2989_v31  ;;  %v10744_v46 = vor.u32 %v11079_v38, %v10743_v47  ;;  %v2991_v12 = vpop.permute.xlu0 %2990  ;;  %v15331_v35 = vpop.f32.mrf.mxu3  ;;  %v9437_v19 = vmax.f32 %v9373_v42, 0.0  ;;  %v52_v50 = vld [vmem:[%s15940_s0 + $0x40] sm:$0xff]   ;;  %v9025_v31 = vadd.f32 %v13936_v56, %v15314_v17  ;;  %v16083_v56 = vld [vmem:[#allocation36_spill] sm:$0xff]  ;;  %v54_v42 = vld [vmem:[%s15940_s0 + $0x48] sm:$0xff]  }
 0x529   :  { %3804 = vst.msk [vmem:[#allocation3 + $0x27c] sm:$0xf] %vm3750_vm4, %v3665_v10 }
 0x52a   :  { %v9994_v27 = vadd.f32 %v9930_v30, %v9866_v24  ;;  %4189 = vst.msk [vmem:[#allocation3 + $0x27c] sm:$0xf] %vm4135_vm8, %v4050_v53  ;;  %8894 = vmatmul.bf16.gmra.mxu1 %v10744_v46  ;;  %v9933_v46 = vunpack.c.l.bf16 %v52_v50  ;;  %v9194_v17 = vadd.f32 %v16083_v56, %v9025_v31 }
 0x52b   :  { %3129 = vst.msk [vmem:[#allocation3 + $0x288] sm:$0xf] %vm3074_vm2, %v2991_v12 }
 0x52c   :  { %v10058_v8 = vmax.f32 %v9994_v27, 0.0  ;;  %3805 = vst.msk [vmem:[#allocation3 + $0x288] sm:$0xf] %vm3750_vm4, %v3667_v48  ;;  %v9372_v48 = vadd.f32 %v15319_v41, %v9304_v25 }
 0x52d   :  { %v9656_v5 = vpop.f32.mrf.mxu0 }
 0x52e   :  { %10122 = vst.msk [vmem:[%s15947_s10 + $0x68] sm:$0xff] %vm276_vm0, %v10058_v8  ;;  %v9799_v61 = vmul.f32 %v15344_v34, %v9656_v5  ;;  %v3671_v36 = vpop.permute.xlu2 %3670  ;;  %v9436_v30 = vmax.f32 %v9372_v48, 0.0  ;;  %v9306_v5 = vmul.f32 %v15304_v23, %v9194_v17 }
 0x52f   :  { %v4048_v62 = vpop.permute.xlu1 %4047  ;;  %v8857_v53 = vpop.f32.mrf.mxu1 }
 0x530   :  { %v9867_v44 = vadd.f32 %v15351_v18, %v9799_v61  ;;  %4188 = vst.msk [vmem:[#allocation3 + $0x270] sm:$0xf] %vm4135_vm8, %v4048_v62  ;;  %10952 = vmatmul.msk.bf16.gmra.mxu0 %vm276_vm0, %v9483_v59  ;;  %v3669_v55 = vpop.permute.xlu0 %3668  ;;  %v15358_v1 = vpop.f32.mrf.mxu3  ;;  %v9027_v11 = vadd.f32 %v13969_v26, %v8857_v53  ;;  %v9934_v59 = vunpack.c.h.bf16 %v52_v50 }
 0x531   :  { %v11082_v57 = vld [vmem:[#allocation3 + $0x278] sm:$0xf0] }
 0x532   :  { %v9995_v14 = vadd.f32 %v9931_v22, %v9867_v44  ;;  %v9196_v26 = vadd.f32 %v16082_v15, %v9027_v11  ;;  %v9374_v44 = vadd.f32 %v15319_v41, %v9306_v5 }
 0x534   :  { %v10059_v4 = vmax.f32 %v9995_v14, 0.0  ;;  %v9307_v0 = vmul.f32 %v15304_v23, %v9196_v26 }
 0x535   :  { %v9658_v45 = vpop.f32.mrf.mxu0 }
 0x536   :  { %10123 = vst.msk [vmem:[%s15947_s10 + $0x70] sm:$0xff] %vm276_vm0, %v10059_v4  ;;  %v9800_v28 = vmul.f32 %v15344_v34, %v9658_v45  ;;  %v4058_v2 = vpop.permute.xlu2 %4057  ;;  %v9375_v61 = vadd.f32 %v15319_v41, %v9307_v0 }
 0x537   :  { %v2993_v58 = vpop.permute.xlu1 %2992  ;;  %v15366_v49 = vpop.f32.mrf.mxu1  ;;  %v10755_v7 = vld [vmem:[#allocation3 + $0x270] sm:$0xf] }
 0x538   :  { %v9868_v10 = vadd.f32 %v15351_v18, %v9800_v28  ;;  %3130 = vst.msk [vmem:[#allocation3 + $0x294] sm:$0xf] %vm3074_vm2, %v2993_v58  ;;  %v10756_v9 = vor.u32 %v11082_v57, %v10755_v7  ;;  %v2995_v13 = vpop.permute.xlu0 %2994  ;;  %v15387_v3 = vpop.f32.mrf.mxu3  ;;  %v9439_v25 = vmax.f32 %v9375_v61, 0.0  ;;  %v9438_v28 = vmax.f32 %v9374_v44, 0.0 }
 0x539   :  { %3806 = vst.msk [vmem:[#allocation3 + $0x294] sm:$0xf] %vm3750_vm4, %v3669_v55 }
 0x53a   :  { %v9996_v6 = vadd.f32 %v9932_v20, %v9868_v10  ;;  %4191 = vst.msk [vmem:[#allocation3 + $0x294] sm:$0xf] %vm4135_vm8, %v4054_v29  ;;  %8899 = vmatmul.bf16.gmra.mxu1 %v10756_v9  ;;  %v9484_v29 = vpack.c.bf16 %v9437_v19, %v9436_v30  ;;  %v16084_v20 = vld [vmem:[#allocation44_spill] sm:$0xff] }
 0x53b   :  { %3131 = vst.msk [vmem:[#allocation3 + $0x2a0] sm:$0xf] %vm3074_vm2, %v2995_v13  ;;  %v9030_v58 = vadd.f32 %v16084_v20, %v15366_v49  ;;  %v9485_v13 = vpack.c.bf16 %v9439_v25, %v9438_v28 }
 0x53c   :  { %v10060_v47 = vmax.f32 %v9996_v6, 0.0  ;;  %3807 = vst.msk [vmem:[#allocation3 + $0x2a0] sm:$0xf] %vm3750_vm4, %v3671_v36  ;;  %v16086_v6 = vld [vmem:[#allocation41_spill] sm:$0xff] }
 0x53d   :  { %v9661_v38 = vpop.f32.mrf.mxu0  ;;  %v9199_v49 = vadd.f32 %v16086_v6, %v9030_v58 }
 0x53e   :  { %10124 = vst.msk [vmem:[%s15947_s10 + $0x78] sm:$0xff] %vm276_vm0, %v10060_v47  ;;  %v9801_v24 = vmul.f32 %v15344_v34, %v9661_v38  ;;  %v3675_v8 = vpop.permute.xlu2 %3674 }
 0x53f   :  { %v4052_v12 = vpop.permute.xlu1 %4051  ;;  %v8862_v16 = vpop.f32.mrf.mxu1  ;;  %v9308_v15 = vmul.f32 %v15304_v23, %v9199_v49 }
 0x540   :  { %v9869_v27 = vadd.f32 %v15351_v18, %v9801_v24  ;;  %4190 = vst.msk [vmem:[#allocation3 + $0x288] sm:$0xf] %vm4135_vm8, %v4052_v12  ;;  %10953 = vmatmul.msk.bf16.gmra.mxu0 %vm276_vm0, %v9484_v29  ;;  %v3673_v60 = vpop.permute.xlu0 %3672  ;;  %v15407_v14 = vpop.f32.mrf.mxu3  ;;  %v9032_v4 = vadd.f32 %v14026_v37, %v8862_v16  ;;  %v16085_v37 = vld [vmem:[#allocation43_spill] sm:$0xff]  ;;  %v9936_v12 = vunpack.c.h.bf16 %v54_v42 }
 0x541   :  { %v11085_v54 = vld [vmem:[#allocation3 + $0x290] sm:$0xf0]  ;;  %v9376_v0 = vadd.f32 %v15319_v41, %v9308_v15 }
 0x542   :  { %v9997_v21 = vadd.f32 %v9933_v46, %v9869_v27  ;;  %v9201_v10 = vadd.f32 %v16085_v37, %v9032_v4 }
 0x544   :  { %v10061_v39 = vmax.f32 %v9997_v21, 0.0  ;;  %v9309_v31 = vmul.f32 %v15304_v23, %v9201_v10 }
 0x545   :  { %v9663_v43 = vpop.f32.mrf.mxu0 }
 0x546   :  { %10125 = vst.msk [vmem:[%s15947_s10 + $0x80] sm:$0xff] %vm276_vm0, %v10061_v39  ;;  %v9802_v22 = vmul.f32 %v15344_v34, %v9663_v43  ;;  %v4062_v57 = vpop.permute.xlu2 %4061  ;;  %v9377_v46 = vadd.f32 %v15319_v41, %v9309_v31  ;;  %v16087_v43 = vld [vmem:[#allocation46_spill] sm:$0xff] }
 0x547   :  { %v2997_v62 = vpop.permute.xlu1 %2996  ;;  %v15401_v53 = vpop.f32.mrf.mxu1  ;;  %v10767_v33 = vld [vmem:[#allocation3 + $0x288] sm:$0xf] }
 0x548   :  { %v9870_v36 = vadd.f32 %v15351_v18, %v9802_v22  ;;  %3132 = vst.msk [vmem:[#allocation3 + $0x2ac] sm:$0xf] %vm3074_vm2, %v2997_v62  ;;  %v10768_v55 = vor.u32 %v11085_v54, %v10767_v33  ;;  %v2999_v63 = vpop.permute.xlu0 %2998  ;;  %v15429_v38 = vpop.f32.mrf.mxu3  ;;  %v9441_v39 = vmax.f32 %v9377_v46, 0.0  ;;  %v9440_v62 = vmax.f32 %v9376_v0, 0.0  ;;  %v16088_v33 = vld [vmem:[#allocation45_spill] sm:$0xff] }
 0x549   :  { %3808 = vst.msk [vmem:[#allocation3 + $0x2ac] sm:$0xf] %vm3750_vm4, %v3673_v60  ;;  %v9035_v54 = vadd.f32 %v16088_v33, %v15401_v53 }
 0x54a   :  { %v9998_v45 = vadd.f32 %v9934_v59, %v9870_v36  ;;  %4193 = vst.msk [vmem:[#allocation3 + $0x2ac] sm:$0xf] %vm4135_vm8, %v4058_v2  ;;  %8904 = vmatmul.bf16.gmra.mxu1 %v10768_v55  ;;  %v9935_v2 = vunpack.c.l.bf16 %v54_v42  ;;  %v56_v59 = vld [vmem:[%s15940_s0 + $0x50] sm:$0xff]  }
 0x54b   :  { %3133 = vst.msk [vmem:[#allocation3 + $0x2b8] sm:$0xf] %vm3074_vm2, %v2999_v63  ;;  %v9937_v4 = vunpack.c.l.bf16 %v56_v59  ;;  %v9204_v53 = vadd.f32 %v15274_v40, %v9035_v54 }
 0x54c   :  { %v10062_v7 = vmax.f32 %v9998_v45, 0.0  ;;  %3809 = vst.msk [vmem:[#allocation3 + $0x2b8] sm:$0xf] %vm3750_vm4, %v3675_v8  ;;  %v9486_v45 = vpack.c.bf16 %v9441_v39, %v9440_v62  ;;  %v16089_v39 = vld [vmem:[#allocation47_spill] sm:$0xff] }
 0x54d   :  { %v9666_v48 = vpop.f32.mrf.mxu0 }
 0x54e   :  { %10126 = vst.msk [vmem:[%s15947_s10 + $0x88] sm:$0xff] %vm276_vm0, %v10062_v7  ;;  %v9803_v9 = vmul.f32 %v15344_v34, %v9666_v48  ;;  %v3679_v16 = vpop.permute.xlu2 %3678  ;;  %v9310_v48 = vmul.f32 %v15304_v23, %v9204_v53 }
 0x54f   :  { %v4056_v19 = vpop.permute.xlu1 %4055  ;;  %v8867_v11 = vpop.f32.mrf.mxu1 }
 0x550   :  { %v9871_v50 = vadd.f32 %v15351_v18, %v9803_v9  ;;  %4192 = vst.msk [vmem:[#allocation3 + $0x2a0] sm:$0xf] %vm4135_vm8, %v4056_v19  ;;  %10954 = vmatmul.msk.bf16.gmra.mxu0 %vm276_vm0, %v9485_v13  ;;  %v3677_v30 = vpop.permute.xlu0 %3676  ;;  %v9037_v61 = vadd.f32 %v16087_v43, %v8867_v11  ;;  %v15453_v55 = vpop.f32.mrf.mxu3  ;;  %v9938_v13 = vunpack.c.h.bf16 %v56_v59  ;;  %v7462_v19 = vld [vmem:[#allocation2 + $0x1a4] sm:$0xe]  ;;  %v7463_v11 = vld [vmem:[#allocation2 + $0x1a8] sm:$0xf]  ;;  %v9378_v15 = vadd.f32 %v15319_v41, %v9310_v48 }
 0x551   :  { %v11088_v60 = vld [vmem:[#allocation3 + $0x2a8] sm:$0xf0]  ;;  %v10440_v31 = vrot.slane %v7462_v19, 9 }
 0x552   :  { %v9999_v47 = vadd.f32 %v9935_v2, %v9871_v50  ;;  %v9206_v63 = vadd.f32 %v15299_v51, %v9037_v61 }
 0x554   :  { %v10063_v26 = vmax.f32 %v9999_v47, 0.0  ;;  %v9311_v7 = vmul.f32 %v15304_v23, %v9206_v63  ;;  %v7780_v47 = vrot.slane %v7463_v11, 5  ;;  %v16090_v11 = vld [vmem:[#allocation49_spill] sm:$0xff] }
 0x555   :  { %v9668_v24 = vpop.f32.mrf.mxu0 }
 0x556   :  { %10127 = vst.msk [vmem:[%s15947_s10 + $0x90] sm:$0xff] %vm276_vm0, %v10063_v26  ;;  %v9804_v29 = vmul.f32 %v15344_v34, %v9668_v24  ;;  %v4066_v51 = vpop.permute.xlu2 %4065  ;;  %v9379_v2 = vadd.f32 %v15319_v41, %v9311_v7  ;;  %v7781_v0 = vsel %vm11416_vm15, %v10440_v31, %v7780_v47 }
 0x557   :  { %v3001_v56 = vpop.permute.xlu1 %3000  ;;  %v15438_v17 = vpop.f32.mrf.mxu1  ;;  %v10779_v27 = vld [vmem:[#allocation3 + $0x2a0] sm:$0xf]  ;;  %7911 = vst.msk [vmem:[#allocation3 + $0x2f0] sm:$0xf] %vm742_vm6, %v7781_v0 }
 0x558   :  { %v9872_v21 = vadd.f32 %v15351_v18, %v9804_v29  ;;  %3134 = vst.msk [vmem:[#allocation3 + $0x2c4] sm:$0xf] %vm3074_vm2, %v3001_v56  ;;  %v10780_v8 = vor.u32 %v11088_v60, %v10779_v27  ;;  %v3003_v5 = vpop.permute.xlu0 %3002  ;;  %v15478_v46 = vpop.f32.mrf.mxu3  ;;  %v9443_v56 = vmax.f32 %v9379_v2, 0.0  ;;  %v9040_v43 = vadd.f32 %v16089_v39, %v15438_v17 }
 0x559   :  { %3810 = vst.msk [vmem:[#allocation3 + $0x2c4] sm:$0xf] %vm3750_vm4, %v3677_v30  ;;  %v7464_v30 = vld [vmem:[#allocation2 + $0x1ac] sm:$0x1] }
 0x55a   :  { %v10000_v22 = vadd.f32 %v9936_v12, %v9872_v21  ;;  %4195 = vst.msk [vmem:[#allocation3 + $0x2c4] sm:$0xf] %vm4135_vm8, %v4062_v57  ;;  %8909 = vmatmul.bf16.gmra.mxu1 %v10780_v8  ;;  %v7782_v12 = vrot.slane %v7780_v47, 4  ;;  %v58_v8 = vld [vmem:[%s15940_s0 + $0x58] sm:$0xff]   ;;  %v9209_v32 = vadd.f32 %v15331_v35, %v9040_v43  ;;  %v16091_v47 = vld [vmem:[#allocation48_spill] sm:$0xff] }
 0x55b   :  { %3135 = vst.msk [vmem:[#allocation3 + $0x2d0] sm:$0xf] %vm3074_vm2, %v3003_v5  ;;  %v9442_v5 = vmax.f32 %v9378_v15, 0.0  ;;  %v9939_v33 = vunpack.c.l.bf16 %v58_v8 }
 0x55c   :  { %v10064_v44 = vmax.f32 %v10000_v22, 0.0  ;;  %3811 = vst.msk [vmem:[#allocation3 + $0x2d0] sm:$0xf] %vm3750_vm4, %v3679_v16  ;;  %v7783_v16 = vrot.slane %v7464_v30, 5  ;;  %v60_v30 = vld [vmem:[%s15940_s0 + $0x60] sm:$0xff]  }
 0x55d   :  { %v9671_v36 = vpop.f32.mrf.mxu0  ;;  %v9487_v17 = vpack.c.bf16 %v9443_v56, %v9442_v5  ;;  %v9941_v56 = vunpack.c.l.bf16 %v60_v30 }
 0x55e   :  { %10128 = vst.msk [vmem:[%s15947_s10 + $0x98] sm:$0xff] %vm276_vm0, %v10064_v44  ;;  %v9805_v25 = vmul.f32 %v15344_v34, %v9671_v36  ;;  %v3683_v21 = vpop.permute.xlu2 %3682 }
 0x55f   :  { %v4060_v42 = vpop.permute.xlu1 %4059  ;;  %v8872_v28 = vpop.f32.mrf.mxu1 }
 0x560   :  { %v9873_v20 = vadd.f32 %v15351_v18, %v9805_v25  ;;  %4194 = vst.msk [vmem:[#allocation3 + $0x2b8] sm:$0xf] %vm4135_vm8, %v4060_v42  ;;  %10955 = vmatmul.msk.bf16.gmra.mxu0 %vm276_vm0, %v9486_v45  ;;  %v3681_v58 = vpop.permute.xlu0 %3680  ;;  %v9042_v27 = vadd.f32 %v14117_v52, %v8872_v28  ;;  %v7784_v52 = vsel %vm11416_vm15, %v7782_v12, %v7783_v16  ;;  %v15507_v25 = vpop.f32.mrf.mxu3  ;;  %v10823_v42 = vld [vmem:[#allocation3 + $0x2f0] sm:$0xf] }
 0x561   :  { %v11091_v9 = vld [vmem:[#allocation3 + $0x2c0] sm:$0xf0]  ;;  %7912 = vst.msk [vmem:[#allocation3 + $0x2fc] sm:$0xf] %vm742_vm6, %v7784_v52  ;;  %v9942_v52 = vunpack.c.h.bf16 %v60_v30 }
 0x562   :  { %v10001_v57 = vadd.f32 %v9937_v4, %v9873_v20  ;;  %v9211_v59 = vadd.f32 %v15358_v1, %v9042_v27  ;;  %v9312_v4 = vmul.f32 %v15304_v23, %v9209_v32  ;;  %v9940_v20 = vunpack.c.h.bf16 %v58_v8 }
 0x564   :  { %v10065_v37 = vmax.f32 %v10001_v57, 0.0  ;;  %v9313_v1 = vmul.f32 %v15304_v23, %v9211_v59 }
 0x565   :  { %v9673_v10 = vpop.f32.mrf.mxu0 }
 0x566   :  { %10129 = vst.msk [vmem:[%s15947_s10 + $0xa0] sm:$0xff] %vm276_vm0, %v10065_v37  ;;  %v9806_v40 = vmul.f32 %v15344_v34, %v9673_v10  ;;  %v9381_v53 = vadd.f32 %v15319_v41, %v9313_v1 }
 0x567   :  { %v3005_v6 = vpop.permute.xlu1 %3004  ;;  %v15473_v49 = vpop.f32.mrf.mxu1  ;;  %v10791_v50 = vld [vmem:[#allocation3 + $0x2b8] sm:$0xf] }
 0x568   :  { %v9874_v26 = vadd.f32 %v15351_v18, %v9806_v40  ;;  %3136 = vst.msk [vmem:[#allocation3 + $0x2dc] sm:$0xf] %vm3074_vm2, %v3005_v6  ;;  %v10792_v24 = vor.u32 %v11091_v9, %v10791_v50  ;;  %v3007_v29 = vpop.permute.xlu0 %3006  ;;  %v9380_v9 = vadd.f32 %v15319_v41, %v9312_v4  ;;  %v9445_v19 = vmax.f32 %v9381_v53, 0.0  ;;  %v62_v4 = vld [vmem:[%s15940_s0 + $0x68] sm:$0xff]  }
 0x569   :  { %3812 = vst.msk [vmem:[#allocation3 + $0x2dc] sm:$0xf] %vm3750_vm4, %v3681_v58  ;;  %v11098_v58 = vld [vmem:[#allocation3 + $0x2f8] sm:$0xf0]  ;;  %v9045_v15 = vadd.f32 %v16091_v47, %v15473_v49  ;;  %v16094_v47 = vld [vmem:[#allocation53_spill] sm:$0xff] }
 0x56a   :  { %v10002_v60 = vadd.f32 %v9938_v13, %v9874_v26  ;;  %4197 = vst.msk [vmem:[#allocation3 + $0x2dc] sm:$0xf] %vm4135_vm8, %v4066_v51  ;;  %8914 = vmatmul.bf16.gmra.mxu1 %v10792_v24  ;;  %v10824_v10 = vor.u32 %v11098_v58, %v10823_v42  ;;  %v4070_v13 = vpop.permute.xlu2 %4069  ;;  %v9444_v31 = vmax.f32 %v9380_v9, 0.0  ;;  %v15528_v24 = vpop.f32.mrf.mxu3  ;;  %v16093_v42 = vld [vmem:[#allocation50_spill] sm:$0xff]  ;;  %v9943_v58 = vunpack.c.l.bf16 %v62_v4 }
 0x56b   :  { %3137 = vst.msk [vmem:[#allocation3 + $0x2e8] sm:$0xf] %vm3074_vm2, %v3007_v29 }
 0x56c   :  { %v10066_v61 = vmax.f32 %v10002_v60, 0.0  ;;  %3813 = vst.msk [vmem:[#allocation3 + $0x2e8] sm:$0xf] %vm3750_vm4, %v3683_v21  ;;  %10928 = vmatmul.msk.bf16.gmra.mxu3 %vm276_vm0, %v10824_v10  ;;  %v9488_v27 = vpack.c.bf16 %v9445_v19, %v9444_v31  ;;  %v9214_v21 = vadd.f32 %v15387_v3, %v9045_v15 }
 0x56d   :  { %v9676_v22 = vpop.f32.mrf.mxu0 }
 0x56e   :  { %10130 = vst.msk [vmem:[%s15947_s10 + $0xa8] sm:$0xff] %vm276_vm0, %v10066_v61  ;;  %v9807_v62 = vmul.f32 %v15344_v34, %v9676_v22  ;;  %v9314_v5 = vmul.f32 %v15304_v23, %v9214_v21 }
 0x56f   :  { %v4064_v54 = vpop.permute.xlu1 %4063  ;;  %v8877_v44 = vpop.f32.mrf.mxu1 }
 0x570   :  { %v9875_v36 = vadd.f32 %v15351_v18, %v9807_v62  ;;  %4196 = vst.msk [vmem:[#allocation3 + $0x2d0] sm:$0xf] %vm4135_vm8, %v4064_v54  ;;  %10956 = vmatmul.msk.bf16.gmra.mxu0 %vm276_vm0, %v9487_v17  ;;  %v3685_v51 = vpop.permute.xlu0 %3684  ;;  %v9047_v6 = vadd.f32 %v16090_v11, %v8877_v44  ;;  %v9382_v17 = vadd.f32 %v15319_v41, %v9314_v5  ;;  %v9944_v11 = vunpack.c.h.bf16 %v62_v4 }
 0x571   :  { %v11094_v37 = vld [vmem:[#allocation3 + $0x2d8] sm:$0xf0] }
 0x572   :  { %v10003_v63 = vadd.f32 %v9939_v33, %v9875_v36  ;;  %v9216_v12 = vadd.f32 %v15407_v14, %v9047_v6  ;;  %v15548_v22 = vpop.f32.mrf.mxu3  ;;  %v16092_v36 = vld [vmem:[#allocation51_spill] sm:$0xff] }
 0x574   :  { %v10067_v45 = vmax.f32 %v10003_v63, 0.0  ;;  %v9315_v14 = vmul.f32 %v15304_v23, %v9216_v12  ;;  %v64_v12 = vld [vmem:[%s15940_s0 + $0x70] sm:$0xff]  }
 0x575   :  { %v9678_v28 = vpop.f32.mrf.mxu0 }
 0x576   :  { %10131 = vst.msk [vmem:[%s15947_s10 + $0xb0] sm:$0xff] %vm276_vm0, %v10067_v45  ;;  %v9808_v35 = vmul.f32 %v15344_v34, %v9678_v28  ;;  %v9383_v61 = vadd.f32 %v15319_v41, %v9315_v14  ;;  %v9446_v45 = vmax.f32 %v9382_v17, 0.0  ;;  %v9945_v14 = vunpack.c.l.bf16 %v64_v12 }
 0x577   :  { %v3009_v7 = vpop.permute.xlu1 %3008  ;;  %v8880_v57 = vpop.f32.mrf.mxu1  ;;  %v10803_v48 = vld [vmem:[#allocation3 + $0x2d0] sm:$0xf]  ;;  %v9946_v17 = vunpack.c.h.bf16 %v64_v12 }
 0x578   :  { %v9876_v2 = vadd.f32 %v15351_v18, %v9808_v35  ;;  %3138 = vst.msk [vmem:[#allocation3 + $0x2f4] sm:$0xf] %vm3074_vm2, %v3009_v7  ;;  %v10804_v40 = vor.u32 %v11094_v37, %v10803_v48  ;;  %v9447_v32 = vmax.f32 %v9383_v61, 0.0  ;;  %v9050_v28 = vadd.f32 %v16093_v42, %v8880_v57 }
 0x579   :  { %3814 = vst.msk [vmem:[#allocation3 + $0x2f4] sm:$0xf] %vm3750_vm4, %v3685_v51 }
 0x57a   :  { %v10004_v50 = vadd.f32 %v9940_v20, %v9876_v2  ;;  %4199 = vst.msk [vmem:[#allocation3 + $0x2f4] sm:$0xf] %vm4135_vm8, %v4070_v13  ;;  %8919 = vmatmul.bf16.gmra.mxu1 %v10804_v40  ;;  %v9489_v7 = vpack.c.bf16 %v9447_v32, %v9446_v45  ;;  %v9219_v37 = vadd.f32 %v15429_v38, %v9050_v28  ;;  %v15566_v57 = vpop.f32.mrf.mxu3  ;;  %v66_v45 = vld [vmem:[%s15940_s0 + $0x78] sm:$0xff]   ;;  %v16097_v28 = vld [vmem:[#allocation54_spill] sm:$0xff] }
 0x57c   :  { %v10068_v26 = vmax.f32 %v10004_v50, 0.0  ;;  %v9316_v2 = vmul.f32 %v15304_v23, %v9219_v37 }
 0x57d   :  { %v9681_v29 = vpop.f32.mrf.mxu0 }
 0x57e   :  { %10132 = vst.msk [vmem:[%s15947_s10 + $0xb8] sm:$0xff] %vm276_vm0, %v10068_v26  ;;  %v9809_v16 = vmul.f32 %v15344_v34, %v9681_v29  ;;  %v9384_v50 = vadd.f32 %v15319_v41, %v9316_v2 }
 0x57f   :  { %v4068_v60 = vpop.permute.xlu1 %4067  ;;  %v8882_v0 = vpop.f32.mrf.mxu1 }
 0x580   :  { %v9877_v49 = vadd.f32 %v15351_v18, %v9809_v16  ;;  %4198 = vst.msk [vmem:[#allocation3 + $0x2e8] sm:$0xf] %vm4135_vm8, %v4068_v60  ;;  %10957 = vmatmul.msk.bf16.gmra.mxu0 %vm276_vm0, %v9488_v27  ;;  %v9052_v1 = vadd.f32 %v16092_v36, %v8882_v0  ;;  %v9448_v16 = vmax.f32 %v9384_v50, 0.0 }
 0x581   :  { %v11097_v33 = vld [vmem:[#allocation3 + $0x2f0] sm:$0xf0] }
 0x582   :  { %v10005_v8 = vadd.f32 %v9941_v56, %v9877_v49  ;;  %v9221_v20 = vadd.f32 %v15453_v55, %v9052_v1  ;;  %v15579_v29 = vpop.f32.mrf.mxu3  ;;  %v16095_v56 = vld [vmem:[#allocation52_spill] sm:$0xff]  ;;  %v16096_v1 = vld [vmem:[#allocation55_spill] sm:$0xff] }
 0x584   :  { %v10069_v39 = vmax.f32 %v10005_v8, 0.0  ;;  %v9317_v55 = vmul.f32 %v15304_v23, %v9221_v20 }
 0x585   :  { %v9683_v43 = vpop.f32.mrf.mxu0 }
 0x586   :  { %10133 = vst.msk [vmem:[%s15947_s10 + $0xc0] sm:$0xff] %vm276_vm0, %v10069_v39  ;;  %v9810_v3 = vmul.f32 %v15344_v34, %v9683_v43  ;;  %v9385_v19 = vadd.f32 %v15319_v41, %v9317_v55 }
 0x587   :  { %v8885_v59 = vpop.f32.mrf.mxu1  ;;  %v10815_v62 = vld [vmem:[#allocation3 + $0x2e8] sm:$0xf] }
 0x588   :  { %v9878_v54 = vadd.f32 %v15351_v18, %v9810_v3  ;;  %v10816_v44 = vor.u32 %v11097_v33, %v10815_v62  ;;  %v9449_v31 = vmax.f32 %v9385_v19, 0.0  ;;  %v9055_v27 = vadd.f32 %v16095_v56, %v8885_v59 }
 0x58a   :  { %v10006_v63 = vadd.f32 %v9942_v52, %v9878_v54  ;;  %8924 = vmatmul.bf16.gmra.mxu1 %v10816_v44  ;;  %v9490_v8 = vpack.c.bf16 %v9449_v31, %v9448_v16  ;;  %v9224_v39 = vadd.f32 %v15478_v46, %v9055_v27  ;;  %v15596_v59 = vpop.f32.mrf.mxu3  ;;  %v68_v16 = vld [vmem:[%s15940_s0 + $0x80] sm:$0xff]   ;;  %v16099_v27 = vld [vmem:[#allocation56_spill] sm:$0xff] }
 0x58c   :  { %v10070_v53 = vmax.f32 %v10006_v63, 0.0 }
 0x58d   :  { %v9686_v35 = vpop.f32.mrf.mxu0 }
 0x58e   :  { %10134 = vst.msk [vmem:[%s15947_s10 + $0xc8] sm:$0xff] %vm276_vm0, %v10070_v53  ;;  %v9811_v51 = vmul.f32 %v15344_v34, %v9686_v35 }
 0x58f   :  { %v8887_v48 = vpop.f32.mrf.mxu1 }
 0x590   :  { %v9879_v10 = vadd.f32 %v15351_v18, %v9811_v51  ;;  %10958 = vmatmul.msk.bf16.gmra.mxu0 %vm276_vm0, %v9489_v7  ;;  %v9057_v15 = vadd.f32 %v16094_v47, %v8887_v48  ;;  %v9947_v7 = vunpack.c.l.bf16 %v66_v45 }
 0x592   :  { %v10007_v9 = vadd.f32 %v9943_v58, %v9879_v10  ;;  %v9226_v21 = vadd.f32 %v15507_v25, %v9057_v15  ;;  %v9318_v25 = vmul.f32 %v15304_v23, %v9224_v39  ;;  %v9240_v37 = vpop.f32.mrf.mxu3  ;;  %v16098_v15 = vld [vmem:[#allocation57_spill] sm:$0xff] }
 0x594   :  { %v10071_v40 = vmax.f32 %v10007_v9, 0.0  ;;  %v9319_v61 = vmul.f32 %v15304_v23, %v9226_v21  ;;  %v9386_v44 = vadd.f32 %v15319_v41, %v9318_v25 }
 0x595   :  { %v9688_v13 = vpop.f32.mrf.mxu0 }
 0x596   :  { %10135 = vst.msk [vmem:[%s15947_s10 + $0xd0] sm:$0xff] %vm276_vm0, %v10071_v40  ;;  %v9812_v38 = vmul.f32 %v15344_v34, %v9688_v13  ;;  %v9387_v33 = vadd.f32 %v15319_v41, %v9319_v61  ;;  %v9450_v42 = vmax.f32 %v9386_v44, 0.0 }
 0x597   :  { %v8890_v6 = vpop.f32.mrf.mxu1 }
 0x598   :  { %v9880_v30 = vadd.f32 %v15351_v18, %v9812_v38  ;;  %v9451_v36 = vmax.f32 %v9387_v33, 0.0  ;;  %v9060_v53 = vadd.f32 %v16097_v28, %v8890_v6  ;;  %v16101_v28 = vld [vmem:[#allocation58_spill] sm:$0xff] }
 0x59a   :  { %v10008_v26 = vadd.f32 %v9944_v11, %v9880_v30  ;;  %v9491_v48 = vpack.c.bf16 %v9451_v36, %v9450_v42  ;;  %v9229_v55 = vadd.f32 %v15528_v24, %v9060_v53  ;;  %v9948_v11 = vunpack.c.h.bf16 %v66_v45  ;;  %v15630_v31 = vpop.f32.mrf.mxu3  ;;  %v70_v45 = vld [vmem:[%s15940_s0 + $0x88] sm:$0xff]  }
 0x59c   :  { %v10072_v60 = vmax.f32 %v10008_v26, 0.0  ;;  %v9320_v40 = vmul.f32 %v15304_v23, %v9229_v55 }
 0x59d   :  { %v9691_v0 = vpop.f32.mrf.mxu0 }
 0x59e   :  { %10136 = vst.msk [vmem:[%s15947_s10 + $0xd8] sm:$0xff] %vm276_vm0, %v10072_v60  ;;  %v9813_v49 = vmul.f32 %v15344_v34, %v9691_v0  ;;  %v9388_v50 = vadd.f32 %v15319_v41, %v9320_v40 }
 0x59f   :  { %v8892_v5 = vpop.f32.mrf.mxu1 }
 0x5a0   :  { %v9881_v43 = vadd.f32 %v15351_v18, %v9813_v49  ;;  %10959 = vmatmul.msk.bf16.gmra.mxu0 %vm276_vm0, %v9490_v8  ;;  %v9062_v63 = vadd.f32 %v16096_v1, %v8892_v5  ;;  %v9452_v56 = vmax.f32 %v9388_v50, 0.0  ;;  %v9949_v8 = vunpack.c.l.bf16 %v68_v16  ;;  %v16100_v1 = vld [vmem:[#allocation59_spill] sm:$0xff] }
 0x5a2   :  { %v10009_v3 = vadd.f32 %v9945_v14, %v9881_v43  ;;  %v9231_v51 = vadd.f32 %v15548_v22, %v9062_v63 }
 0x5a4   :  { %v10073_v52 = vmax.f32 %v10009_v3, 0.0  ;;  %v9321_v2 = vmul.f32 %v15304_v23, %v9231_v51 }
 0x5a5   :  { %v9693_v62 = vpop.f32.mrf.mxu0 }
 0x5a6   :  { %10137 = vst.msk [vmem:[%s15947_s10 + $0xe0] sm:$0xff] %vm276_vm0, %v10073_v52  ;;  %v9814_v46 = vmul.f32 %v15344_v34, %v9693_v62  ;;  %v9389_v38 = vadd.f32 %v15319_v41, %v9321_v2 }
 0x5a7   :  { %v8895_v54 = vpop.f32.mrf.mxu1 }
 0x5a8   :  { %v9882_v32 = vadd.f32 %v15351_v18, %v9814_v46  ;;  %v9453_v47 = vmax.f32 %v9389_v38, 0.0  ;;  %v9065_v60 = vadd.f32 %v16099_v27, %v8895_v54  ;;  %v16103_v27 = vld [vmem:[#allocation60_spill] sm:$0xff] }
 0x5aa   :  { %v10010_v4 = vadd.f32 %v9946_v17, %v9882_v32  ;;  %v9492_v5 = vpack.c.bf16 %v9453_v47, %v9452_v56  ;;  %v9234_v43 = vadd.f32 %v15566_v57, %v9065_v60  ;;  %v9950_v17 = vunpack.c.h.bf16 %v68_v16  ;;  %v72_v16 = vld [vmem:[%s15940_s0 + $0x90] sm:$0xff]  }
 0x5ac   :  { %v10074_v35 = vmax.f32 %v10010_v4, 0.0  ;;  %v9322_v52 = vmul.f32 %v15304_v23, %v9234_v43 }
 0x5ad   :  { %v9696_v20 = vpop.f32.mrf.mxu0 }
 0x5ae   :  { %10138 = vst.msk [vmem:[%s15947_s10 + $0xe8] sm:$0xff] %vm276_vm0, %v10074_v35  ;;  %v9815_v58 = vmul.f32 %v15344_v34, %v9696_v20  ;;  %v9390_v44 = vadd.f32 %v15319_v41, %v9322_v52 }
 0x5af   :  { %v8897_v10 = vpop.f32.mrf.mxu1 }
 0x5b0   :  { %v9883_v9 = vadd.f32 %v15351_v18, %v9815_v58  ;;  %10960 = vmatmul.msk.bf16.gmra.mxu0 %vm276_vm0, %v9491_v48  ;;  %v9067_v26 = vadd.f32 %v16098_v15, %v8897_v10  ;;  %v9454_v42 = vmax.f32 %v9390_v44, 0.0  ;;  %v9951_v48 = vunpack.c.l.bf16 %v70_v45  ;;  %v16102_v15 = vld [vmem:[#allocation61_spill] sm:$0xff] }
 0x5b2   :  { %v10011_v22 = vadd.f32 %v9947_v7, %v9883_v9  ;;  %v9236_v49 = vadd.f32 %v15579_v29, %v9067_v26  ;;  %v9245_v29 = vpop.f32.mrf.mxu3 }
 0x5b4   :  { %v10075_v13 = vmax.f32 %v10011_v22, 0.0  ;;  %v9323_v3 = vmul.f32 %v15304_v23, %v9236_v49 }
 0x5b5   :  { %v9698_v19 = vpop.f32.mrf.mxu0 }
 0x5b6   :  { %10139 = vst.msk [vmem:[%s15947_s10 + $0xf0] sm:$0xff] %vm276_vm0, %v10075_v13  ;;  %v9816_v24 = vmul.f32 %v15344_v34, %v9698_v19  ;;  %v9391_v46 = vadd.f32 %v15319_v41, %v9323_v3 }
 0x5b7   :  { %v8900_v6 = vpop.f32.mrf.mxu1 }
 0x5b8   :  { %v9884_v30 = vadd.f32 %v15351_v18, %v9816_v24  ;;  %v9455_v36 = vmax.f32 %v9391_v46, 0.0  ;;  %v9070_v53 = vadd.f32 %v16101_v28, %v8900_v6  ;;  %v9952_v24 = vunpack.c.h.bf16 %v70_v45  ;;  %v74_v45 = vld [vmem:[%s15940_s0 + $0x98] sm:$0xff]   ;;  %v16105_v28 = vld [vmem:[#allocation62_spill] sm:$0xff] }
 0x5ba   :  { %v10012_v12 = vadd.f32 %v9948_v11, %v9884_v30  ;;  %v15661_v20 = vpop.f32.mrf.mxu3  ;;  %v9493_v10 = vpack.c.bf16 %v9455_v36, %v9454_v42  ;;  %v9239_v9 = vadd.f32 %v15596_v59, %v9070_v53  ;;  %v16104_v36 = vld [vmem:[#allocation63_spill] sm:$0xff] }
 0x5bc   :  { %v10076_v0 = vmax.f32 %v10012_v12, 0.0 }
 0x5bd   :  { %v9701_v21 = vpop.f32.mrf.mxu0 }
 0x5be   :  { %10140 = vst.msk [vmem:[%s15947_s10 + $0xf8] sm:$0xff] %vm276_vm0, %v10076_v0  ;;  %v9817_v14 = vmul.f32 %v15344_v34, %v9701_v21 }
 0x5bf   :  { %v8902_v39 = vpop.f32.mrf.mxu1 }
 0x5c0   :  { %v9885_v61 = vadd.f32 %v15351_v18, %v9817_v14  ;;  %10961 = vmatmul.msk.bf16.gmra.mxu0 %vm276_vm0, %v9492_v5  ;;  %v9072_v63 = vadd.f32 %v16100_v1, %v8902_v39 }
 0x5c2   :  { %v10013_v25 = vadd.f32 %v9949_v8, %v9885_v61  ;;  %v9241_v58 = vadd.f32 %v9240_v37, %v9072_v63  ;;  %v9324_v37 = vmul.f32 %v15304_v23, %v9239_v9  ;;  %v9250_v11 = vpop.f32.mrf.mxu3  ;;  %v9953_v8 = vunpack.c.l.bf16 %v72_v16 }
 0x5c4   :  { %v10077_v62 = vmax.f32 %v10013_v25, 0.0  ;;  %v9325_v22 = vmul.f32 %v15304_v23, %v9241_v58  ;;  %v9392_v50 = vadd.f32 %v15319_v41, %v9324_v37 }
 0x5c5   :  { %v9703_v33 = vpop.f32.mrf.mxu0 }
 0x5c6   :  { %10141 = vst.msk [vmem:[%s15947_s10 + $0x100] sm:$0xff] %vm276_vm0, %v10077_v62  ;;  %v9818_v57 = vmul.f32 %v15344_v34, %v9703_v33  ;;  %v9393_v38 = vadd.f32 %v15319_v41, %v9325_v22  ;;  %v9456_v56 = vmax.f32 %v9392_v50, 0.0 }
 0x5c7   :  { %v8905_v54 = vpop.f32.mrf.mxu1 }
 0x5c8   :  { %v9886_v32 = vadd.f32 %v15351_v18, %v9818_v57  ;;  %v9457_v47 = vmax.f32 %v9393_v38, 0.0  ;;  %v9075_v60 = vadd.f32 %v16103_v27, %v8905_v54  ;;  %v9954_v57 = vunpack.c.h.bf16 %v72_v16  ;;  %v16107_v16 = vld [vmem:[#allocation64_spill] sm:$0xff] }
 0x5ca   :  { %v10014_v4 = vadd.f32 %v9950_v17, %v9886_v32  ;;  %v9494_v5 = vpack.c.bf16 %v9457_v47, %v9456_v56  ;;  %v9244_v43 = vadd.f32 %v15630_v31, %v9075_v60  ;;  %v9253_v3 = vpop.f32.mrf.mxu3 }
 0x5cc   :  { %v10078_v35 = vmax.f32 %v10014_v4, 0.0  ;;  %v9326_v52 = vmul.f32 %v15304_v23, %v9244_v43  ;;  %v11155_v43 = vld [vmem:[%s15943_s5] ss:$0 sm:$0xff] }
 0x5cd   :  { %v9706_v51 = vpop.f32.mrf.mxu0 }
 0x5ce   :  { %10142 = vst.msk [vmem:[%s15947_s10 + $0x108] sm:$0xff] %vm276_vm0, %v10078_v35  ;;  %v9819_v7 = vmul.f32 %v15344_v34, %v9706_v51  ;;  %v9394_v54 = vadd.f32 %v15319_v41, %v9326_v52 }
 0x5cf   :  { %v8907_v55 = vpop.f32.mrf.mxu1 }
 0x5d0   :  { %v9887_v2 = vadd.f32 %v15351_v18, %v9819_v7  ;;  %10962 = vmatmul.msk.bf16.gmra.mxu0 %vm276_vm0, %v9493_v10  ;;  %v9077_v26 = vadd.f32 %v16102_v15, %v8907_v55  ;;  %v9458_v42 = vmax.f32 %v9394_v54, 0.0 }
 0x5d2   :  { %v10015_v40 = vadd.f32 %v9951_v48, %v9887_v2  ;;  %v9246_v49 = vadd.f32 %v9245_v29, %v9077_v26  ;;  %v9255_v4 = vpop.f32.mrf.mxu3  ;;  %v9955_v48 = vunpack.c.l.bf16 %v74_v45  ;;  %v76_v26 = vld [vmem:[%s15940_s0 + $0xa0] sm:$0xff]  }
 0x5d4   :  { %v10079_v13 = vmax.f32 %v10015_v40, 0.0  ;;  %v9327_v25 = vmul.f32 %v15304_v23, %v9246_v49 }
 0x5d5   :  { %v9708_v19 = vpop.f32.mrf.mxu0 }
 0x5d6   :  { %10143 = vst.msk [vmem:[%s15947_s10 + $0x110] sm:$0xff] %vm276_vm0, %v10079_v13  ;;  %v9820_v59 = vmul.f32 %v15344_v34, %v9708_v19  ;;  %v9395_v46 = vadd.f32 %v15319_v41, %v9327_v25 }
 0x5d7   :  { %v8910_v6 = vpop.f32.mrf.mxu1 }
 0x5d8   :  { %v9888_v30 = vadd.f32 %v15351_v18, %v9820_v59  ;;  %v9459_v32 = vmax.f32 %v9395_v46, 0.0  ;;  %v9080_v53 = vadd.f32 %v16105_v28, %v8910_v6 }
 0x5da   :  { %v10016_v12 = vadd.f32 %v9952_v24, %v9888_v30  ;;  %v9495_v10 = vpack.c.bf16 %v9459_v32, %v9458_v42  ;;  %v9249_v9 = vadd.f32 %v15661_v20, %v9080_v53  ;;  %v9258_v19 = vpop.f32.mrf.mxu3  ;;  %v9956_v24 = vunpack.c.h.bf16 %v74_v45  ;;  %v16108_v32 = vld [vmem:[#allocation68_spill] sm:$0xff]  ;;  %v78_v42 = vld [vmem:[%s15940_s0 + $0xa8] sm:$0xff]   ;;  %v16110_v53 = vld [vmem:[#allocation66_spill] sm:$0xff] }
 0x5dc   :  { %v10080_v0 = vmax.f32 %v10016_v12, 0.0  ;;  %v9328_v37 = vmul.f32 %v15304_v23, %v9249_v9 }
 0x5dd   :  { %v9711_v21 = vpop.f32.mrf.mxu0 }
 0x5de   :  { %10144 = vst.msk [vmem:[%s15947_s10 + $0x118] sm:$0xff] %vm276_vm0, %v10080_v0  ;;  %v9821_v14 = vmul.f32 %v15344_v34, %v9711_v21  ;;  %v9396_v6 = vadd.f32 %v15319_v41, %v9328_v37  ;;  %v9957_v21 = vunpack.c.l.bf16 %v76_v26 }
 0x5df   :  { %v8912_v39 = vpop.f32.mrf.mxu1 }
 0x5e0   :  { %v9889_v61 = vadd.f32 %v15351_v18, %v9821_v14  ;;  %10963 = vmatmul.msk.bf16.gmra.mxu0 %vm276_vm0, %v9494_v5  ;;  %v9082_v1 = vadd.f32 %v16104_v36, %v8912_v39  ;;  %v9460_v12 = vmax.f32 %v9396_v6, 0.0 }
 0x5e2   :  { %v10017_v29 = vadd.f32 %v9953_v8, %v9889_v61  ;;  %v9251_v58 = vadd.f32 %v9250_v11, %v9082_v1  ;;  %v9260_v14 = vpop.f32.mrf.mxu3 }
 0x5e4   :  { %v10081_v62 = vmax.f32 %v10017_v29, 0.0  ;;  %v9329_v22 = vmul.f32 %v15304_v23, %v9251_v58  ;;  %v16106_v23 = vld [vmem:[#allocation65_spill] sm:$0xff] }
 0x5e5   :  { %v9713_v33 = vpop.f32.mrf.mxu0 }
 0x5e6   :  { %10145 = vst.msk [vmem:[%s15947_s10 + $0x120] sm:$0xff] %vm276_vm0, %v10081_v62  ;;  %v9822_v31 = vmul.f32 %v15344_v34, %v9713_v33  ;;  %v9397_v59 = vadd.f32 %v15319_v41, %v9329_v22  ;;  %v11156_v33 = vld [vmem:[%s15944_s6] ss:$0 sm:$0xff] }
 0x5e7   :  { %v8915_v17 = vpop.f32.mrf.mxu1 }
 0x5e8   :  { %v9890_v44 = vadd.f32 %v15351_v18, %v9822_v31  ;;  %v9461_v30 = vmax.f32 %v9397_v59, 0.0  ;;  %v9085_v56 = vadd.f32 %v16107_v16, %v8915_v17  ;;  %v9958_v31 = vunpack.c.h.bf16 %v76_v26 }
 0x5ea   :  { %v10018_v63 = vadd.f32 %v9954_v57, %v9890_v44  ;;  %v9496_v49 = vpack.c.bf16 %v9461_v30, %v9460_v12  ;;  %v9254_v5 = vadd.f32 %v9253_v3, %v9085_v56  ;;  %v9960_v12 = vunpack.c.h.bf16 %v78_v42 }
 0x5ec   :  { %v10082_v35 = vmax.f32 %v10018_v63, 0.0  ;;  %v9330_v29 = vmul.f32 %v11155_v43, %v9254_v5  ;;  %v16109_v63 = vld [vmem:[#allocation67_spill] sm:$0xff] }
 0x5ed   :  { %v9716_v51 = vpop.f32.mrf.mxu0 }
 0x5ee   :  { %10146 = vst.msk [vmem:[%s15947_s10 + $0x128] sm:$0xff] %vm276_vm0, %v10082_v35  ;;  %v9823_v7 = vmul.f32 %v15344_v34, %v9716_v51  ;;  %v9398_v54 = vadd.f32 %v11156_v33, %v9330_v29 }
 0x5ef   :  { %v8917_v55 = vpop.f32.mrf.mxu1  ;;  %v9263_v57 = vpop.f32.mrf.mxu3 }
 0x5f0   :  { %v9891_v2 = vadd.f32 %v15351_v18, %v9823_v7  ;;  %10964 = vmatmul.msk.bf16.gmra.mxu0 %vm276_vm0, %v9495_v10  ;;  %v9087_v47 = vadd.f32 %v16106_v23, %v8917_v55  ;;  %v9462_v28 = vmax.f32 %v9398_v54, 0.0  ;;  %v9959_v10 = vunpack.c.l.bf16 %v78_v42 }
 0x5f2   :  { %v10019_v40 = vadd.f32 %v9955_v48, %v9891_v2  ;;  %v9256_v0 = vadd.f32 %v9255_v4, %v9087_v47 }
 0x5f4   :  { %v10083_v13 = vmax.f32 %v10019_v40, 0.0  ;;  %v9331_v61 = vmul.f32 %v11155_v43, %v9256_v0  ;;  %v15770_v40 = vld [vmem:[%s15946_s9] ss:$0 sm:$0xff] }
 0x5f5   :  { %v9718_v38 = vpop.f32.mrf.mxu0 }
 0x5f6   :  { %10147 = vst.msk [vmem:[%s15947_s10 + $0x130] sm:$0xff] %vm276_vm0, %v10083_v13  ;;  %v9824_v20 = vmul.f32 %v15344_v34, %v9718_v38  ;;  %v9399_v46 = vadd.f32 %v11156_v33, %v9331_v61  ;;  %v16111_v13 = vld [vmem:[#allocation69_spill] sm:$0xff] }
 0x5f7   :  { %v8920_v11 = vpop.f32.mrf.mxu1  ;;  %v9265_v59 = vpop.f32.mrf.mxu3 }
 0x5f8   :  { %v9892_v50 = vadd.f32 %v15351_v18, %v9824_v20  ;;  %v9463_v1 = vmax.f32 %v9399_v46, 0.0  ;;  %v9090_v35 = vadd.f32 %v16110_v53, %v8920_v11 }
 0x5fa   :  { %v10020_v15 = vadd.f32 %v9956_v24, %v9892_v50  ;;  %v9497_v55 = vpack.c.bf16 %v9463_v1, %v9462_v28  ;;  %v9259_v2 = vadd.f32 %v9258_v19, %v9090_v35  ;;  %v84_v35 = vld [vmem:[%s15940_s0 + $0xc0] sm:$0xff]  }
 0x5fc   :  { %v10084_v27 = vmax.f32 %v10020_v15, 0.0  ;;  %v9332_v6 = vmul.f32 %v11155_v43, %v9259_v2 }
 0x5fd   :  { %v9721_v60 = vpop.f32.mrf.mxu0 }
 0x5fe   :  { %10148 = vst.msk [vmem:[%s15947_s10 + $0x138] sm:$0xff] %vm276_vm0, %v10084_v27  ;;  %v9825_v41 = vmul.f32 %v15344_v34, %v9721_v60  ;;  %v9400_v16 = vadd.f32 %v11156_v33, %v9332_v6 }
 0x5ff   :  { %v8922_v8 = vpop.f32.mrf.mxu1 }
 0x600   :  { %v9893_v39 = vadd.f32 %v15351_v18, %v9825_v41  ;;  %10965 = vmatmul.msk.bf16.gmra.mxu0 %vm276_vm0, %v9496_v49  ;;  %v9092_v4 = vadd.f32 %v16109_v63, %v8922_v8  ;;  %v80_v49 = vld [vmem:[%s15940_s0 + $0xb0] sm:$0xff]  }
 0x601   :  { %v9962_v46 = vunpack.c.h.bf16 %v80_v49 }
 0x602   :  { %v10021_v25 = vadd.f32 %v9957_v21, %v9893_v39  ;;  %v9261_v7 = vadd.f32 %v9260_v14, %v9092_v4  ;;  %v9464_v14 = vmax.f32 %v9400_v16, 0.0 }
 0x604   :  { %v10085_v52 = vmax.f32 %v10021_v25, 0.0  ;;  %v9333_v20 = vmul.f32 %v11155_v43, %v9261_v7  ;;  %v9965_v7 = vunpack.c.l.bf16 %v84_v35 }
 0x605   :  { %v9723_v62 = vpop.f32.mrf.mxu0 }
 0x606   :  { %10149 = vst.msk [vmem:[%s15947_s10 + $0x140] sm:$0xff] %vm276_vm0, %v10085_v52  ;;  %v9826_v3 = vmul.f32 %v15344_v34, %v9723_v62  ;;  %v9401_v47 = vadd.f32 %v11156_v33, %v9333_v20 }
 0x607   :  { %v8925_v17 = vpop.f32.mrf.mxu1 }
 0x608   :  { %v9894_v44 = vadd.f32 %v15351_v18, %v9826_v3  ;;  %v9095_v36 = vadd.f32 %v16108_v32, %v8925_v17  ;;  %v15764_v18 = vld [vmem:[%s15945_s8] ss:$0 sm:$0xff]  ;;  %v9465_v0 = vmax.f32 %v9401_v47, 0.0 }
 0x60a   :  { %v10022_v45 = vadd.f32 %v9958_v31, %v9894_v44  ;;  %v9264_v51 = vadd.f32 %v9263_v57, %v9095_v36  ;;  %v9498_v61 = vpack.c.bf16 %v9465_v0, %v9464_v14  ;;  %v82_v57 = vld [vmem:[%s15940_s0 + $0xb8] sm:$0xff]  }
 0x60b   :  { %v9963_v32 = vunpack.c.l.bf16 %v82_v57  ;;  %v9964_v42 = vunpack.c.h.bf16 %v82_v57 }
 0x60c   :  { %v10086_v34 = vmax.f32 %v10022_v45, 0.0  ;;  %v9334_v22 = vmul.f32 %v11155_v43, %v9264_v51 }
 0x60d   :  { %v9726_v58 = vpop.f32.mrf.mxu0 }
 0x60e   :  { %10150 = vst.msk [vmem:[%s15947_s10 + $0x148] sm:$0xff] %vm276_vm0, %v10086_v34  ;;  %v9827_v48 = vmul.f32 %v15764_v18, %v9726_v58  ;;  %v9402_v50 = vadd.f32 %v11156_v33, %v9334_v22  ;;  %v9966_v22 = vunpack.c.h.bf16 %v84_v35 }
 0x60f   :  { %v8927_v9 = vpop.f32.mrf.mxu1 }
 0x610   :  { %v9895_v37 = vadd.f32 %v15770_v40, %v9827_v48  ;;  %v9097_v38 = vadd.f32 %v16111_v13, %v8927_v9  ;;  %10966 = vmatmul.msk.bf16.gmra.mxu0 %vm276_vm0, %v9497_v55  ;;  %v9466_v56 = vmax.f32 %v9402_v50, 0.0 }
 0x612   :  { %v10023_v24 = vadd.f32 %v9959_v10, %v9895_v37  ;;  %v9266_v11 = vadd.f32 %v9265_v59, %v9097_v38  ;;  %v86_v38 = vld [vmem:[%s15940_s0 + $0xc8] sm:$0xff]  }
 0x613   :  { %v9968_v47 = vunpack.c.h.bf16 %v86_v38 }
 0x614   :  { %v10087_v30 = vmax.f32 %v10023_v24, 0.0  ;;  %v9335_v19 = vmul.f32 %v11155_v43, %v9266_v11  ;;  %v9961_v43 = vunpack.c.l.bf16 %v80_v49  ;;  %v9967_v11 = vunpack.c.l.bf16 %v86_v38 }
 0x615   :  { %v9728_v23 = vpop.f32.mrf.mxu0 }
 0x616   :  { %10151 = vst.msk [vmem:[%s15947_s10 + $0x150] sm:$0xff] %vm276_vm0, %v10087_v30  ;;  %v9403_v15 = vadd.f32 %v11156_v33, %v9335_v19  ;;  %v9828_v26 = vmul.f32 %v15764_v18, %v9728_v23 }
 0x618   :  { %v9467_v27 = vmax.f32 %v9403_v15, 0.0  ;;  %v9896_v60 = vadd.f32 %v15770_v40, %v9828_v26 }
 0x61a   :  { %v9499_v41 = vpack.c.bf16 %v9467_v27, %v9466_v56  ;;  %v10024_v21 = vadd.f32 %v9960_v12, %v9896_v60  ;;  %v88_v12 = vld [vmem:[%s15940_s0 + $0xd0] sm:$0xff]  }
 0x61b   :  { %v9969_v60 = vunpack.c.l.bf16 %v88_v12 }
 0x61c   :  { %v10088_v8 = vmax.f32 %v10024_v21, 0.0  ;;  %10968 = vmatmul.msk.bf16.vlgmr.msrb.gmra.mxu2 %vm276_vm0, %v9499_v41 }
 0x61d   :  { %v9731_v5 = vpop.f32.mrf.mxu0 }
 0x61e   :  { %10152 = vst.msk [vmem:[%s15947_s10 + $0x158] sm:$0xff] %vm276_vm0, %v10088_v8  ;;  %v9829_v39 = vmul.f32 %v15764_v18, %v9731_v5  ;;  %v9970_v8 = vunpack.c.h.bf16 %v88_v12 }
 0x620   :  { %v9897_v25 = vadd.f32 %v15770_v40, %v9829_v39  ;;  %10967 = vmatmul.msk.bf16.gmra.mxu0 %vm276_vm0, %v9498_v61 }
 0x622   :  { %v10025_v29 = vadd.f32 %v9961_v43, %v9897_v25  ;;  %v90_v43 = vld [vmem:[%s15940_s0 + $0xd8] sm:$0xff]  }
 0x623   :  { %v9972_v57 = vunpack.c.h.bf16 %v90_v43 }
 0x624   :  { %v10089_v52 = vmax.f32 %v10025_v29, 0.0 }
 0x625   :  { %v9733_v62 = vpop.f32.mrf.mxu0 }
 0x626   :  { %10153 = vst.msk [vmem:[%s15947_s10 + $0x160] sm:$0xff] %vm276_vm0, %v10089_v52  ;;  %v9830_v33 = vmul.f32 %v15764_v18, %v9733_v62  ;;  %v9971_v52 = vunpack.c.l.bf16 %v90_v43 }
 0x628   :  { %v9898_v3 = vadd.f32 %v15770_v40, %v9830_v33 }
 0x62a   :  { %v10026_v31 = vadd.f32 %v9962_v46, %v9898_v3 }
 0x62c   :  { %v10090_v17 = vmax.f32 %v10026_v31, 0.0 }
 0x62d   :  { %v9736_v54 = vpop.f32.mrf.mxu0 }
 0x62e   :  { %10154 = vst.msk [vmem:[%s15947_s10 + $0x168] sm:$0xff] %vm276_vm0, %v10090_v17  ;;  %v9831_v44 = vmul.f32 %v15764_v18, %v9736_v54 }
 0x630   :  { %v9899_v36 = vadd.f32 %v15770_v40, %v9831_v44  ;;  %v92_v44 = vld [vmem:[%s15940_s0 + $0xe0] sm:$0xff]  }
 0x631   :  { %v9974_v35 = vunpack.c.h.bf16 %v92_v44 }
 0x632   :  { %v10027_v1 = vadd.f32 %v9963_v32, %v9899_v36 }
 0x634   :  { %v10091_v63 = vmax.f32 %v10027_v1, 0.0 }
 0x635   :  { %v9738_v4 = vpop.f32.mrf.mxu0 }
 0x636   :  { %10155 = vst.msk [vmem:[%s15947_s10 + $0x170] sm:$0xff] %vm276_vm0, %v10091_v63  ;;  %v9832_v45 = vmul.f32 %v15764_v18, %v9738_v4  ;;  %v9973_v63 = vunpack.c.l.bf16 %v92_v44 }
 0x638   :  { %v9900_v28 = vadd.f32 %v15770_v40, %v9832_v45 }
 0x63a   :  { %v10028_v53 = vadd.f32 %v9964_v42, %v9900_v28 }
 0x63c   :  { %v10092_v34 = vmax.f32 %v10028_v53, 0.0 }
 0x63d   :  { %v9741_v51 = vpop.f32.mrf.mxu0 }
 0x63e   :  { %10156 = vst.msk [vmem:[%s15947_s10 + $0x178] sm:$0xff] %vm276_vm0, %v10092_v34  ;;  %v9833_v58 = vmul.f32 %v15764_v18, %v9741_v51 }
 0x640   :  { %v9901_v48 = vadd.f32 %v15770_v40, %v9833_v58  ;;  %v94_v58 = vld [vmem:[%s15940_s0 + $0xe8] sm:$0xff]  }
 0x641   :  { %v9976_v38 = vunpack.c.h.bf16 %v94_v58 }
 0x642   :  { %v10029_v10 = vadd.f32 %v9965_v7, %v9901_v48 }
 0x644   :  { %v10093_v55 = vmax.f32 %v10029_v10, 0.0 }
 0x645   :  { %v9743_v9 = vpop.f32.mrf.mxu0 }
 0x646   :  { %10157 = vst.msk [vmem:[%s15947_s10 + $0x180] sm:$0xff] %vm276_vm0, %v10093_v55  ;;  %v9834_v2 = vmul.f32 %v15764_v18, %v9743_v9  ;;  %v9975_v55 = vunpack.c.l.bf16 %v94_v58 }
 0x648   :  { %v9902_v37 = vadd.f32 %v15770_v40, %v9834_v2 }
 0x64a   :  { %v10030_v13 = vadd.f32 %v9966_v22, %v9902_v37 }
 0x64c   :  { %v10094_v59 = vmax.f32 %v10030_v13, 0.0 }
 0x64d   :  { %v9746_v20 = vpop.f32.mrf.mxu0 }
 0x64e   :  { %10158 = vst.msk [vmem:[%s15947_s10 + $0x188] sm:$0xff] %vm276_vm0, %v10094_v59  ;;  %v9835_v24 = vmul.f32 %v15764_v18, %v9746_v20 }
 0x650   :  { %v9903_v6 = vadd.f32 %v15770_v40, %v9835_v24  ;;  %v96_v24 = vld [vmem:[%s15940_s0 + $0xf0] sm:$0xff]  }
 0x652   :  { %v10031_v50 = vadd.f32 %v9967_v11, %v9903_v6 }
 0x654   :  { %v10095_v30 = vmax.f32 %v10031_v50, 0.0  ;;  %v98_v50 = vld [vmem:[%s15940_s0 + $0xf8] sm:$0xff]  }
 0x655   :  { %v9748_v19 = vpop.f32.mrf.mxu0 }
 0x656   :  { %10159 = vst.msk [vmem:[%s15947_s10 + $0x190] sm:$0xff] %vm276_vm0, %v10095_v30  ;;  %v9836_v23 = vmul.f32 %v15764_v18, %v9748_v19  ;;  %v9977_v19 = vunpack.c.l.bf16 %v96_v24 }
 0x658   :  { %v9904_v15 = vadd.f32 %v15770_v40, %v9836_v23 }
 0x65a   :  { %v10032_v26 = vadd.f32 %v9968_v47, %v9904_v15 }
 0x65c   :  { %v10096_v16 = vmax.f32 %v10032_v26, 0.0  ;;  %v9979_v26 = vunpack.c.l.bf16 %v98_v50 }
 0x65d   :  { %v9751_v56 = vpop.f32.mrf.mxu0 }
 0x65e   :  { %10160 = vst.msk [vmem:[%s15947_s10 + $0x198] sm:$0xff] %vm276_vm0, %v10096_v16  ;;  %v9837_v27 = vmul.f32 %v15764_v18, %v9751_v56 }
 0x660   :  { %v9905_v0 = vadd.f32 %v15770_v40, %v9837_v27 }
 0x662   :  { %v10033_v41 = vadd.f32 %v9969_v60, %v9905_v0 }
 0x664   :  { %v10097_v21 = vmax.f32 %v10033_v41, 0.0 }
 0x665   :  { %v9753_v49 = vpop.f32.mrf.mxu0 }
 0x666   :  { %10161 = vst.msk [vmem:[%s15947_s10 + $0x1a0] sm:$0xff] %vm276_vm0, %v10097_v21  ;;  %v9838_v14 = vmul.f32 %v15764_v18, %v9753_v49  ;;  %v9978_v21 = vunpack.c.h.bf16 %v96_v24 }
 0x668   :  { %v9906_v5 = vadd.f32 %v15770_v40, %v9838_v14 }
 0x66a   :  { %v10034_v39 = vadd.f32 %v9970_v8, %v9906_v5  ;;  %v9980_v5 = vunpack.c.h.bf16 %v98_v50 }
 0x66c   :  { %v10098_v61 = vmax.f32 %v10034_v39, 0.0 }
 0x66d   :  { %v9756_v25 = vpop.f32.mrf.mxu0 }
 0x66e   :  { %10162 = vst.msk [vmem:[%s15947_s10 + $0x1a8] sm:$0xff] %vm276_vm0, %v10098_v61  ;;  %v9839_v29 = vmul.f32 %v15764_v18, %v9756_v25 }
 0x670   :  { %v9907_v62 = vadd.f32 %v15770_v40, %v9839_v29 }
 0x672   :  { %v10035_v33 = vadd.f32 %v9971_v52, %v9907_v62 }
 0x674   :  { %v10099_v46 = vmax.f32 %v10035_v33, 0.0 }
 0x675   :  { %v9758_v3 = vpop.f32.mrf.mxu0 }
 0x676   :  { %10163 = vst.msk [vmem:[%s15947_s10 + $0x1b0] sm:$0xff] %vm276_vm0, %v10099_v46  ;;  %v9840_v31 = vmul.f32 %v15764_v18, %v9758_v3 }
 0x678   :  { %v9908_v17 = vadd.f32 %v15770_v40, %v9840_v31 }
 0x67a   :  { %v10036_v54 = vadd.f32 %v9972_v57, %v9908_v17 }
 0x67c   :  { %v10100_v32 = vmax.f32 %v10036_v54, 0.0 }
 0x67d   :  { %v9761_v36 = vpop.f32.mrf.mxu0 }
 0x67e   :  { %10164 = vst.msk [vmem:[%s15947_s10 + $0x1b8] sm:$0xff] %vm276_vm0, %v10100_v32  ;;  %v9841_v1 = vmul.f32 %v15764_v18, %v9761_v36 }
 0x680   :  { %v9909_v4 = vadd.f32 %v15770_v40, %v9841_v1 }
 0x682   :  { %v10037_v45 = vadd.f32 %v9973_v63, %v9909_v4 }
 0x684   :  { %v10101_v42 = vmax.f32 %v10037_v45, 0.0 }
 0x685   :  { %v9763_v28 = vpop.f32.mrf.mxu0 }
 0x686   :  { %10165 = vst.msk [vmem:[%s15947_s10 + $0x1c0] sm:$0xff] %vm276_vm0, %v10101_v42  ;;  %v9842_v53 = vmul.f32 %v15764_v18, %v9763_v28 }
 0x688   :  { %v9910_v34 = vadd.f32 %v15770_v40, %v9842_v53 }
 0x68a   :  { %v10038_v51 = vadd.f32 %v9974_v35, %v9910_v34 }
 0x68c   :  { %v10102_v7 = vmax.f32 %v10038_v51, 0.0 }
 0x68d   :  { %v9766_v48 = vpop.f32.mrf.mxu0 }
 0x68e   :  { %10166 = vst.msk [vmem:[%s15947_s10 + $0x1c8] sm:$0xff] %vm276_vm0, %v10102_v7  ;;  %v9843_v10 = vmul.f32 %v15764_v18, %v9766_v48 }
 0x690   :  { %v9911_v9 = vadd.f32 %v15770_v40, %v9843_v10 }
 0x692   :  { %v10039_v2 = vadd.f32 %v9975_v55, %v9911_v9 }
 0x694   :  { %v10103_v22 = vmax.f32 %v10039_v2, 0.0 }
 0x695   :  { %v9768_v37 = vpop.f32.mrf.mxu0 }
 0x696   :  { %10167 = vst.msk [vmem:[%s15947_s10 + $0x1d0] sm:$0xff] %vm276_vm0, %v10103_v22  ;;  %v9844_v13 = vmul.f32 %v15764_v18, %v9768_v37 }
 0x698   :  { %v9912_v59 = vadd.f32 %v15770_v40, %v9844_v13 }
 0x69a   :  { %v10040_v20 = vadd.f32 %v9976_v38, %v9912_v59 }
 0x69c   :  { %v10104_v11 = vmax.f32 %v10040_v20, 0.0 }
 0x69d   :  { %v9771_v6 = vpop.f32.mrf.mxu0 }
 0x69e   :  { %10168 = vst.msk [vmem:[%s15947_s10 + $0x1d8] sm:$0xff] %vm276_vm0, %v10104_v11  ;;  %v9845_v30 = vmul.f32 %v15764_v18, %v9771_v6 }
 0x69f   :  { %v9776_v23 = vpop.f32.mrf.mxu2 }
 0x6a0   :  { %v9913_v47 = vadd.f32 %v15770_v40, %v9845_v30  ;;  %v9847_v15 = vmul.f32 %v15764_v18, %v9776_v23 }
 0x6a2   :  { %v10041_v12 = vadd.f32 %v9977_v19, %v9913_v47  ;;  %v9915_v16 = vadd.f32 %v15770_v40, %v9847_v15 }
 0x6a4   :  { %v10105_v56 = vmax.f32 %v10041_v12, 0.0  ;;  %v10043_v27 = vadd.f32 %v9979_v26, %v9915_v16 }
 0x6a5   :  { %v9773_v60 = vpop.f32.mrf.mxu0 }
 0x6a6   :  { %10169 = vst.msk [vmem:[%s15947_s10 + $0x1e0] sm:$0xff] %vm276_vm0, %v10105_v56  ;;  %v10107_v0 = vmax.f32 %v10043_v27, 0.0  ;;  %v9846_v41 = vmul.f32 %v15764_v18, %v9773_v60 }
 0x6a7   :  { %v9778_v49 = vpop.f32.mrf.mxu2 }
 0x6a8   :  { %10171 = vst.msk [vmem:[%s15947_s10 + $0x1f0] sm:$0xff] %vm276_vm0, %v10107_v0  ;;  %v9914_v14 = vadd.f32 %v15770_v40, %v9846_v41  ;;  %v9848_v8 = vmul.f32 %v15764_v18, %v9778_v49 }
 0x6aa   :  { %v10042_v39 = vadd.f32 %v9978_v21, %v9914_v14  ;;  %v9916_v43 = vadd.f32 %v15770_v40, %v9848_v8 }
 0x6ac   :  { %v10106_v61 = vmax.f32 %v10042_v39, 0.0  ;;  %v10044_v25 = vadd.f32 %v9980_v5, %v9916_v43 }
 0x6ae   :  { %10170 = vst.msk [vmem:[%s15947_s10 + $0x1e8] sm:$0xff] %vm276_vm0, %v10106_v61  ;;  %v10108_v29 = vmax.f32 %v10044_v25, 0.0 }
 0x6b0   :  { %10172 = vst.msk [vmem:[%s15947_s10 + $0x1f8] sm:$0xff] %vm276_vm0, %v10108_v29 }

</bundles_post_ra>
